<compile_context>
chip_gen: v7x
topology: tpu7x:2x2x1
jax: 0.10.0
libtpu: 0.0.40
codegen_flags: <defaults>
</compile_context>

<pallas_src>
import collections
import functools

import jax
import jax.numpy as jnp
import numpy as np
from jax import lax
from jax.experimental import pallas as pl
from jax.experimental.pallas import tpu as pltpu

LEAKY_SLOPE = 0.2
BN_EPS = 1e-5
# Per-step VMEM for the largest layer is ~20 MB including double buffers, so a fixed
# 48 MiB scoped limit fits every generation (v7x has only 64 MiB physical per TensorCore).
VMEM_LIMIT = 48 * 1024 * 1024

LayerCfg = collections.namedtuple("LayerCfg", ["stride", "bn", "act"])


def _leaky(y):
    return jnp.where(y >= 0, y, LEAKY_SLOPE * y)


def _resident_spec(block_shape, index_map):
    """BlockSpec for operands whose block index is constant over the grid (weights, bias,
    BN params): single-buffer them to save VMEM (matters most on v7x's 64 MiB VMEM).
    Falls back to a plain BlockSpec if this jax version has no pipeline_mode."""
    if hasattr(pl, "Buffered"):
        try:
            return pl.BlockSpec(block_shape, index_map, pipeline_mode=pl.Buffered(1))
        except TypeError:
            pass
    return pl.BlockSpec(block_shape, index_map)


# ----------------------------------------------------------------------------
# Kernel 1: direct 3x3 conv (9 taps folded into the MXU reduction) + bias
#           [+ LeakyReLU] [+ per-channel BN partial statistics]
# ----------------------------------------------------------------------------
def conv3x3_kernel(x_ref, w_ref, b_ref, o_ref, *stat_refs,
                   taps, Ho, Wo, Hpp, apply_leaky, compute_stats):
    Cin = w_ref.shape[1]
    Cout = w_ref.shape[2]
    xv = x_ref[...]                      # (1, P*Hpp, Wpp, Cin) bf16: one image's phases
    wv = w_ref[...]                      # (9, Cin, Cout) bf16

    acc = jnp.zeros((Ho * Wo, Cout), jnp.float32)
    for t, (p, oy, ox) in enumerate(taps):            # 9 static taps -> 9 MXU dots
        lhs = xv[0, p * Hpp + oy:p * Hpp + oy + Ho, ox:ox + Wo, :]
        acc = acc + jnp.dot(lhs.reshape(Ho * Wo, Cin), wv[t],
                            preferred_element_type=jnp.float32)

    if compute_stats:
        # Dense (8, Cout) partial sums of the pre-bias accumulator (well conditioned);
        # the wrapper adds the bias back when finalizing mean / var.
        sum_ref, sq_ref = stat_refs
        accr = acc.reshape(Ho * Wo // 8, 8, Cout)
        sum_ref[...] = jnp.sum(accr, axis=0)
        sq_ref[...] = jnp.sum(accr * accr, axis=0)

    y = acc + b_ref[...]
    if apply_leaky:
        y = _leaky(y)
    o_ref[...] = y.reshape(1, Ho, Wo, Cout).astype(o_ref.dtype)


def pallas_conv3x3(stacked, taps, w9, b, Ho, Wo, Hpp, *, apply_leaky, compute_stats):
    """stacked: (N, P*Hpp, Wpp, Cin) bf16 phase tensor; w9: (9, Cin, Cout) bf16.

    One grid step per image; returns bf16 (N, Ho, Wo, Cout) and, if requested, f32
    per-channel partial sums / sums-of-squares of the pre-bias conv output."""
    N, PH, Wpp, Cin = stacked.shape
    Cout = w9.shape[-1]
    b2 = b.reshape(1, Cout).astype(jnp.float32)

    out_shape = [jax.ShapeDtypeStruct((N, Ho, Wo, Cout), jnp.bfloat16)]
    out_specs = [pl.BlockSpec((1, Ho, Wo, Cout), lambda n: (n, 0, 0, 0))]
    if compute_stats:
        out_shape += [jax.ShapeDtypeStruct((N * 8, Cout), jnp.float32)] * 2
        out_specs += [pl.BlockSpec((8, Cout), lambda n: (n, 0))] * 2

    cost = pl.CostEstimate(
        flops=2 * N * Ho * Wo * 9 * Cin * Cout,
        transcendentals=0,
        bytes_accessed=(stacked.size * 2 + w9.size * 2 + b2.size * 4
                        + N * Ho * Wo * Cout * 2
                        + (2 * N * 8 * Cout * 4 if compute_stats else 0)))

    results = pl.pallas_call(
        functools.partial(conv3x3_kernel, taps=taps, Ho=Ho, Wo=Wo, Hpp=Hpp,
                          apply_leaky=apply_leaky, compute_stats=compute_stats),
        out_shape=tuple(out_shape),
        grid_spec=pltpu.PrefetchScalarGridSpec(
            num_scalar_prefetch=0,
            grid=(N,),
            in_specs=[
                pl.BlockSpec((1, PH, Wpp, Cin), lambda n: (n, 0, 0, 0)),
                _resident_spec((9, Cin, Cout), lambda n: (0, 0, 0)),
                _resident_spec((1, Cout), lambda n: (0, 0)),
            ],
            out_specs=out_specs,
        ),
        compiler_params=pltpu.CompilerParams(
            dimension_semantics=("parallel",),      # shards images across v7x's 2 TCs
            vmem_limit_bytes=VMEM_LIMIT),
        cost_estimate=cost,
    )(stacked, w9, b2)

    if compute_stats:
        y, sums, sqs = results
        return y, jnp.sum(sums, axis=0), jnp.sum(sqs, axis=0)
    return results[0] if isinstance(results, (tuple, list)) else results


# ----------------------------------------------------------------------------
# Kernel 2: fused BatchNorm affine + LeakyReLU(0.2), lane-dense bf16 streaming
# ----------------------------------------------------------------------------
def scale_shift_act_kernel(x_ref, scale_ref, shift_ref, o_ref):
    y = x_ref[...].astype(jnp.float32) * scale_ref[...] + shift_ref[...]
    o_ref[...] = _leaky(y).astype(o_ref.dtype)


def pallas_scale_shift_act(y, scale, shift):
    """LeakyReLU(y * scale + shift): y (M, C) bf16, scale/shift (C,) f32 -> (M, C) bf16."""
    M, C = y.shape
    fold = 1
    if C < 128 and 128 % C == 0 and M % (128 // C) == 0:
        fold = 128 // C                  # lane-dense: fold row pairs so last dim >= 128
    Mf, Cf = M // fold, C * fold
    tm = next((t for t in (1024, 512, 256, 128, 64, 32, 16, 8)
               if t <= Mf and Mf % t == 0), None)
    if tm is None:
        # TODO(synk): ragged M -- keep in XLA rather than pad/copy the whole tensor.
        return _leaky(y.astype(jnp.float32) * scale + shift).astype(jnp.bfloat16)

    yv = y.reshape(Mf, Cf)
    sc = jnp.tile(scale.astype(jnp.float32), fold).reshape(1, Cf)
    sh = jnp.tile(shift.astype(jnp.float32), fold).reshape(1, Cf)

    out = pl.pallas_call(
        scale_shift_act_kernel,
        out_shape=jax.ShapeDtypeStruct((Mf, Cf), jnp.bfloat16),
        grid_spec=pltpu.PrefetchScalarGridSpec(
            num_scalar_prefetch=0,
            grid=(Mf // tm,),
            in_specs=[
                pl.BlockSpec((tm, Cf), lambda i: (i, 0)),
                _resident_spec((1, Cf), lambda i: (0, 0)),
                _resident_spec((1, Cf), lambda i: (0, 0)),
            ],
            out_specs=pl.BlockSpec((tm, Cf), lambda i: (i, 0)),
        ),
        compiler_params=pltpu.CompilerParams(
            dimension_semantics=("parallel",),
            vmem_limit_bytes=VMEM_LIMIT),
        cost_estimate=pl.CostEstimate(flops=3 * Mf * Cf, transcendentals=0,
                                      bytes_accessed=4 * Mf * Cf + 8 * Cf),
    )(yv, sc, sh)
    return out.reshape(M, C)


# ----------------------------------------------------------------------------
# Plain-JAX glue: halo pad + stride-2 phase decomposition (no 9x im2col blow-up)
# ----------------------------------------------------------------------------
def build_phases(x, stride):
    """Pad (+1 halo) and phase-split an NHWC bf16 activation for a 3x3/stride-s conv.

    Returns (stacked, taps, Hpp): stacked is (N, P*Hpp, Wpp, C) with the s*s spatial
    phases stacked along H; taps[t] = (phase, row_off, col_off) static offsets of the
    t-th (dy, dx) tap inside its phase."""
    N, H, W, C = x.shape
    xp = jnp.pad(x, ((0, 0), (1, 1), (1, 1), (0, 0)))
    if stride == 1:
        taps = tuple((0, dy, dx) for dy in range(3) for dx in range(3))
        return xp, taps, H + 2
    assert stride == 2 and H % 2 == 0 and W % 2 == 0
    Hpp = H // 2 + 1
    phases = [xp[:, r::2, c::2, :] for r in range(2) for c in range(2)]
    stacked = jnp.concatenate(phases, axis=1)        # (N, 4*Hpp, Wpp, C)
    taps = tuple(((dy % 2) * 2 + (dx % 2), dy // 2, dx // 2)
                 for dy in range(3) for dx in range(3))
    return stacked, taps, Hpp


# ----------------------------------------------------------------------------
# One layer: conv3x3 (+ bias) [-> train-mode BatchNorm] [-> LeakyReLU(0.2)]
# ----------------------------------------------------------------------------
def conv_layer(x, p, cfg, use_pallas):
    x = x.astype(jnp.bfloat16)
    N, H, W, Cin = x.shape
    Cout = p["w"].shape[-1]
    stride = cfg.stride
    Ho = (H - 1) // stride + 1
    Wo = (W - 1) // stride + 1
    M = N * Ho * Wo
    has_bn = cfg.bn
    fuse_act = cfg.act and not has_bn
    b = p["b"].astype(jnp.float32)

    # Degenerate layers (tiny M, the Cout=1 head, the Cin=3 first conv, odd spatial dims)
    # run in plain XLA: a pallas_call there is all launch overhead / wasted MXU lanes.
    layer_pallas = (use_pallas and M >= 128 and Cout >= 64 and Cin >= 16
                    and stride in (1, 2)
                    and (stride == 1 or (H % 2 == 0 and W % 2 == 0))
                    and (not has_bn or (Ho * Wo) % 8 == 0))

    if layer_pallas:
        stacked, taps, Hpp = build_phases(x, stride)
        w9 = p["w"].reshape(9, Cin, Cout).astype(jnp.bfloat16)
        if has_bn:
            y, s, sq = pallas_conv3x3(stacked, taps, w9, b, Ho, Wo, Hpp,
                                      apply_leaky=False, compute_stats=True)
            mean = b + s / M                                   # stats were pre-bias
            var = jnp.maximum(sq / M - (s / M) ** 2, 0.0)      # biased variance, clamped
            scale = p["gamma"] * jax.lax.rsqrt(var + BN_EPS)
            shift = p["beta"] - mean * scale
            y = pallas_scale_shift_act(y.reshape(M, Cout), scale, shift)
            return y.reshape(N, Ho, Wo, Cout)
        y = pallas_conv3x3(stacked, taps, w9, b, Ho, Wo, Hpp,
                           apply_leaky=fuse_act, compute_stats=False)
        return y

    # ---- plain-XLA path (degenerate layers, and the pure-JAX reference) ----
    y = lax.conv_general_dilated(
        x, p["w"].astype(jnp.bfloat16), window_strides=(stride, stride),
        padding=((1, 1), (1, 1)), dimension_numbers=("NHWC", "HWIO", "NHWC"),
        preferred_element_type=jnp.float32) + b
    if fuse_act:
        y = _leaky(y)
    if has_bn:
        yf = y.reshape(M, Cout)
        mean = jnp.mean(yf, axis=0)
        var = jnp.maximum(jnp.mean(yf * yf, axis=0) - mean * mean, 0.0)
        scale = p["gamma"] * jax.lax.rsqrt(var + BN_EPS)
        shift = p["beta"] - mean * scale
        yb = yf.astype(jnp.bfloat16)                 # mirror the Pallas bf16 handoff
        y = _leaky(yb.astype(jnp.float32) * scale + shift).reshape(N, Ho, Wo, Cout)
    if cfg.act or has_bn:
        y = y.astype(jnp.bfloat16)
    return y


def discriminator_forward(params, img_nchw, configs, use_pallas=True):
    # PyTorch gives NCHW; compute in NHWC with bf16 activations end-to-end.
    x = jnp.transpose(img_nchw, (0, 2, 3, 1)).astype(jnp.bfloat16)
    for p, cfg in zip(params, configs):
        x = conv_layer(x, p, cfg, use_pallas)
    return jnp.transpose(x, (0, 3, 1, 2)).astype(jnp.float32)   # (N, 1, H/16, W/16)


# ----------------------------------------------------------------------------
# Deterministic parameter construction (same layer list as the nn.Sequential).
# Static per-layer config (stride/bn/act) is kept separate from array params so it
# never becomes a jit tracer.
# ----------------------------------------------------------------------------
def init_params(key, in_channels):
    layer_defs = []
    cin = in_channels
    for i, cout in enumerate([64, 128, 256, 512]):
        layer_defs.append(dict(cin=cin, cout=cout, stride=1, bn=(i != 0), act=True))
        layer_defs.append(dict(cin=cout, cout=cout, stride=2, bn=True, act=True))
        cin = cout
    layer_defs.append(dict(cin=cin, cout=1, stride=1, bn=False, act=False))

    params, configs = [], []
    for d in layer_defs:
        key, kw, kb, kg, kbeta = jax.random.split(key, 5)
        fan_in = 9 * d["cin"]
        w = jax.random.normal(kw, (3, 3, d["cin"], d["cout"]), jnp.float32) / np.sqrt(fan_in)
        b = 0.05 * jax.random.normal(kb, (d["cout"],), jnp.float32)
        gamma = beta = None
        if d["bn"]:
            gamma = 1.0 + 0.1 * jax.random.normal(kg, (d["cout"],), jnp.float32)
            beta = 0.1 * jax.random.normal(kbeta, (d["cout"],), jnp.float32)
        params.append(dict(w=w, b=b, gamma=gamma, beta=beta))
        configs.append(LayerCfg(stride=d["stride"], bn=d["bn"], act=d["act"]))
    return params, tuple(configs)


# ----------------------------------------------------------------------------
if __name__ == "__main__":
    key = jax.random.PRNGKey(0)
    k_param, k_img = jax.random.split(key)

    N, C, H, W = 2, 3, 32, 32                          # H, W divisible by 2**4
    params, configs = init_params(k_param, C)
    img = jax.random.normal(k_img, (N, C, H, W), jnp.float32)   # NCHW, like PyTorch

    fwd_pallas = jax.jit(functools.partial(
        discriminator_forward, configs=configs, use_pallas=True))
    out = jax.block_until_ready(fwd_pallas(params, img))
    assert out.shape == (N, 1, H // 16, W // 16), out.shape

    # Pure-JAX reference of the same math (bf16 activations, f32 accumulation,
    # train-mode BN, LeakyReLU).
    fwd_ref = jax.jit(functools.partial(
        discriminator_forward, configs=configs, use_pallas=False))
    ref = jax.block_until_ready(fwd_ref(params, img))
    np.testing.assert_allclose(np.asarray(out), np.asarray(ref), rtol=3e-2, atol=3e-2)

    print("KERNEL_OK")
</pallas_src>

<mosaic_0001>
module attributes {stable_mosaic.version = 11 : i64} {
  func.func @conv3x3_kernel(%arg0: i32, %arg1: memref<1x68x17x64xbf16, #tpu.memory_space<vmem>>, %arg2: memref<9x64x64xbf16, #tpu.memory_space<vmem>>, %arg3: memref<1x64xf32, #tpu.memory_space<vmem>>, %arg4: memref<1x16x16x64xbf16, #tpu.memory_space<vmem>>, %arg5: memref<8x64xf32, #tpu.memory_space<vmem>>, %arg6: memref<8x64xf32, #tpu.memory_space<vmem>>) attributes {dimension_semantics = [#tpu.dimension_semantics<parallel>], iteration_bounds = array<i64: 2>, scalar_prefetch = 0 : i64, scratch_operands = 0 : i64, tpu.core_type = #tpu.core_type<tc>, window_params = [{transform_indices = @transform_0, window_bounds = array<i64: 1, 68, 17, 64>}, {pipeline_mode = #tpu.pipeline_mode<synchronous>, transform_indices = @transform_1, window_bounds = array<i64: 9, 64, 64>}, {pipeline_mode = #tpu.pipeline_mode<synchronous>, transform_indices = @transform_2, window_bounds = array<i64: 1, 64>}, {transform_indices = @transform_3, window_bounds = array<i64: 1, 16, 16, 64>}, {transform_indices = @transform_4, window_bounds = array<i64: 8, 64>}, {transform_indices = @transform_5, window_bounds = array<i64: 8, 64>}]} {
    %c0 = arith.constant 0 : index
    %c0_0 = arith.constant 0 : index
    %c0_1 = arith.constant 0 : index
    %c0_2 = arith.constant 0 : index
    %0 = vector.load %arg1[%c0, %c0_0, %c0_1, %c0_2] : memref<1x68x17x64xbf16, #tpu.memory_space<vmem>>, vector<1x68x17x64xbf16>
    %c0_3 = arith.constant 0 : index
    %c0_4 = arith.constant 0 : index
    %c0_5 = arith.constant 0 : index
    %1 = vector.load %arg2[%c0_3, %c0_4, %c0_5] : memref<9x64x64xbf16, #tpu.memory_space<vmem>>, vector<9x64x64xbf16>
    %cst = arith.constant 0.000000e+00 : f32
    %2 = vector.broadcast %cst : f32 to vector<256x64xf32>
    %3 = vector.extract_strided_slice %0 {offsets = [0, 0, 0, 0], sizes = [1, 16, 16, 64], strides = [1, 1, 1, 1]} : vector<1x68x17x64xbf16> to vector<1x16x16x64xbf16>
    %4 = vector.shape_cast %3 : vector<1x16x16x64xbf16> to vector<16x16x64xbf16>
    %5 = vector.shape_cast %4 : vector<16x16x64xbf16> to vector<256x64xbf16>
    %6 = vector.extract_strided_slice %1 {offsets = [0, 0, 0], sizes = [1, 64, 64], strides = [1, 1, 1]} : vector<9x64x64xbf16> to vector<1x64x64xbf16>
    %7 = vector.shape_cast %6 : vector<1x64x64xbf16> to vector<64x64xbf16>
    %cst_6 = arith.constant dense<0.000000e+00> : vector<256x64xf32>
    %8 = tpu.matmul %5, %7, %cst_6 {dimension_numbers = #tpu.dot_dimension_numbers<[1], [0], [0], [1], [0, 0, 1, 1], [], []>} : vector<256x64xbf16>, vector<64x64xbf16>, vector<256x64xf32> -> vector<256x64xf32>
    %9 = arith.addf %2, %8 : vector<256x64xf32>
    %10 = vector.extract_strided_slice %0 {offsets = [0, 17, 0, 0], sizes = [1, 16, 16, 64], strides = [1, 1, 1, 1]} : vector<1x68x17x64xbf16> to vector<1x16x16x64xbf16>
    %11 = vector.shape_cast %10 : vector<1x16x16x64xbf16> to vector<16x16x64xbf16>
    %12 = vector.shape_cast %11 : vector<16x16x64xbf16> to vector<256x64xbf16>
    %13 = vector.extract_strided_slice %1 {offsets = [1, 0, 0], sizes = [1, 64, 64], strides = [1, 1, 1]} : vector<9x64x64xbf16> to vector<1x64x64xbf16>
    %14 = vector.shape_cast %13 : vector<1x64x64xbf16> to vector<64x64xbf16>
    %cst_7 = arith.constant dense<0.000000e+00> : vector<256x64xf32>
    %15 = tpu.matmul %12, %14, %cst_7 {dimension_numbers = #tpu.dot_dimension_numbers<[1], [0], [0], [1], [0, 0, 1, 1], [], []>} : vector<256x64xbf16>, vector<64x64xbf16>, vector<256x64xf32> -> vector<256x64xf32>
    %16 = arith.addf %9, %15 : vector<256x64xf32>
    %17 = vector.extract_strided_slice %0 {offsets = [0, 0, 1, 0], sizes = [1, 16, 16, 64], strides = [1, 1, 1, 1]} : vector<1x68x17x64xbf16> to vector<1x16x16x64xbf16>
    %18 = vector.shape_cast %17 : vector<1x16x16x64xbf16> to vector<16x16x64xbf16>
    %19 = vector.shape_cast %18 : vector<16x16x64xbf16> to vector<256x64xbf16>
    %20 = vector.extract_strided_slice %1 {offsets = [2, 0, 0], sizes = [1, 64, 64], strides = [1, 1, 1]} : vector<9x64x64xbf16> to vector<1x64x64xbf16>
    %21 = vector.shape_cast %20 : vector<1x64x64xbf16> to vector<64x64xbf16>
    %cst_8 = arith.constant dense<0.000000e+00> : vector<256x64xf32>
    %22 = tpu.matmul %19, %21, %cst_8 {dimension_numbers = #tpu.dot_dimension_numbers<[1], [0], [0], [1], [0, 0, 1, 1], [], []>} : vector<256x64xbf16>, vector<64x64xbf16>, vector<256x64xf32> -> vector<256x64xf32>
    %23 = arith.addf %16, %22 : vector<256x64xf32>
    %24 = vector.extract_strided_slice %0 {offsets = [0, 34, 0, 0], sizes = [1, 16, 16, 64], strides = [1, 1, 1, 1]} : vector<1x68x17x64xbf16> to vector<1x16x16x64xbf16>
    %25 = vector.shape_cast %24 : vector<1x16x16x64xbf16> to vector<16x16x64xbf16>
    %26 = vector.shape_cast %25 : vector<16x16x64xbf16> to vector<256x64xbf16>
    %27 = vector.extract_strided_slice %1 {offsets = [3, 0, 0], sizes = [1, 64, 64], strides = [1, 1, 1]} : vector<9x64x64xbf16> to vector<1x64x64xbf16>
    %28 = vector.shape_cast %27 : vector<1x64x64xbf16> to vector<64x64xbf16>
    %cst_9 = arith.constant dense<0.000000e+00> : vector<256x64xf32>
    %29 = tpu.matmul %26, %28, %cst_9 {dimension_numbers = #tpu.dot_dimension_numbers<[1], [0], [0], [1], [0, 0, 1, 1], [], []>} : vector<256x64xbf16>, vector<64x64xbf16>, vector<256x64xf32> -> vector<256x64xf32>
    %30 = arith.addf %23, %29 : vector<256x64xf32>
    %31 = vector.extract_strided_slice %0 {offsets = [0, 51, 0, 0], sizes = [1, 16, 16, 64], strides = [1, 1, 1, 1]} : vector<1x68x17x64xbf16> to vector<1x16x16x64xbf16>
    %32 = vector.shape_cast %31 : vector<1x16x16x64xbf16> to vector<16x16x64xbf16>
    %33 = vector.shape_cast %32 : vector<16x16x64xbf16> to vector<256x64xbf16>
    %34 = vector.extract_strided_slice %1 {offsets = [4, 0, 0], sizes = [1, 64, 64], strides = [1, 1, 1]} : vector<9x64x64xbf16> to vector<1x64x64xbf16>
    %35 = vector.shape_cast %34 : vector<1x64x64xbf16> to vector<64x64xbf16>
    %cst_10 = arith.constant dense<0.000000e+00> : vector<256x64xf32>
    %36 = tpu.matmul %33, %35, %cst_10 {dimension_numbers = #tpu.dot_dimension_numbers<[1], [0], [0], [1], [0, 0, 1, 1], [], []>} : vector<256x64xbf16>, vector<64x64xbf16>, vector<256x64xf32> -> vector<256x64xf32>
    %37 = arith.addf %30, %36 : vector<256x64xf32>
    %38 = vector.extract_strided_slice %0 {offsets = [0, 34, 1, 0], sizes = [1, 16, 16, 64], strides = [1, 1, 1, 1]} : vector<1x68x17x64xbf16> to vector<1x16x16x64xbf16>
    %39 = vector.shape_cast %38 : vector<1x16x16x64xbf16> to vector<16x16x64xbf16>
    %40 = vector.shape_cast %39 : vector<16x16x64xbf16> to vector<256x64xbf16>
    %41 = vector.extract_strided_slice %1 {offsets = [5, 0, 0], sizes = [1, 64, 64], strides = [1, 1, 1]} : vector<9x64x64xbf16> to vector<1x64x64xbf16>
    %42 = vector.shape_cast %41 : vector<1x64x64xbf16> to vector<64x64xbf16>
    %cst_11 = arith.constant dense<0.000000e+00> : vector<256x64xf32>
    %43 = tpu.matmul %40, %42, %cst_11 {dimension_numbers = #tpu.dot_dimension_numbers<[1], [0], [0], [1], [0, 0, 1, 1], [], []>} : vector<256x64xbf16>, vector<64x64xbf16>, vector<256x64xf32> -> vector<256x64xf32>
    %44 = arith.addf %37, %43 : vector<256x64xf32>
    %45 = vector.extract_strided_slice %0 {offsets = [0, 1, 0, 0], sizes = [1, 16, 16, 64], strides = [1, 1, 1, 1]} : vector<1x68x17x64xbf16> to vector<1x16x16x64xbf16>
    %46 = vector.shape_cast %45 : vector<1x16x16x64xbf16> to vector<16x16x64xbf16>
    %47 = vector.shape_cast %46 : vector<16x16x64xbf16> to vector<256x64xbf16>
    %48 = vector.extract_strided_slice %1 {offsets = [6, 0, 0], sizes = [1, 64, 64], strides = [1, 1, 1]} : vector<9x64x64xbf16> to vector<1x64x64xbf16>
    %49 = vector.shape_cast %48 : vector<1x64x64xbf16> to vector<64x64xbf16>
    %cst_12 = arith.constant dense<0.000000e+00> : vector<256x64xf32>
    %50 = tpu.matmul %47, %49, %cst_12 {dimension_numbers = #tpu.dot_dimension_numbers<[1], [0], [0], [1], [0, 0, 1, 1], [], []>} : vector<256x64xbf16>, vector<64x64xbf16>, vector<256x64xf32> -> vector<256x64xf32>
    %51 = arith.addf %44, %50 : vector<256x64xf32>
    %52 = vector.extract_strided_slice %0 {offsets = [0, 18, 0, 0], sizes = [1, 16, 16, 64], strides = [1, 1, 1, 1]} : vector<1x68x17x64xbf16> to vector<1x16x16x64xbf16>
    %53 = vector.shape_cast %52 : vector<1x16x16x64xbf16> to vector<16x16x64xbf16>
    %54 = vector.shape_cast %53 : vector<16x16x64xbf16> to vector<256x64xbf16>
    %55 = vector.extract_strided_slice %1 {offsets = [7, 0, 0], sizes = [1, 64, 64], strides = [1, 1, 1]} : vector<9x64x64xbf16> to vector<1x64x64xbf16>
    %56 = vector.shape_cast %55 : vector<1x64x64xbf16> to vector<64x64xbf16>
    %cst_13 = arith.constant dense<0.000000e+00> : vector<256x64xf32>
    %57 = tpu.matmul %54, %56, %cst_13 {dimension_numbers = #tpu.dot_dimension_numbers<[1], [0], [0], [1], [0, 0, 1, 1], [], []>} : vector<256x64xbf16>, vector<64x64xbf16>, vector<256x64xf32> -> vector<256x64xf32>
    %58 = arith.addf %51, %57 : vector<256x64xf32>
    %59 = vector.extract_strided_slice %0 {offsets = [0, 1, 1, 0], sizes = [1, 16, 16, 64], strides = [1, 1, 1, 1]} : vector<1x68x17x64xbf16> to vector<1x16x16x64xbf16>
    %60 = vector.shape_cast %59 : vector<1x16x16x64xbf16> to vector<16x16x64xbf16>
    %61 = vector.shape_cast %60 : vector<16x16x64xbf16> to vector<256x64xbf16>
    %62 = vector.extract_strided_slice %1 {offsets = [8, 0, 0], sizes = [1, 64, 64], strides = [1, 1, 1]} : vector<9x64x64xbf16> to vector<1x64x64xbf16>
    %63 = vector.shape_cast %62 : vector<1x64x64xbf16> to vector<64x64xbf16>
    %cst_14 = arith.constant dense<0.000000e+00> : vector<256x64xf32>
    %64 = tpu.matmul %61, %63, %cst_14 {dimension_numbers = #tpu.dot_dimension_numbers<[1], [0], [0], [1], [0, 0, 1, 1], [], []>} : vector<256x64xbf16>, vector<64x64xbf16>, vector<256x64xf32> -> vector<256x64xf32>
    %65 = arith.addf %58, %64 : vector<256x64xf32>
    %66 = vector.shape_cast %65 : vector<256x64xf32> to vector<32x8x64xf32>
    %cst_15 = arith.constant dense<0.000000e+00> : vector<8x64xf32>
    %67 = vector.multi_reduction <add>, %66, %cst_15 [0] : vector<32x8x64xf32> to vector<8x64xf32>
    %c0_16 = arith.constant 0 : index
    %c0_17 = arith.constant 0 : index
    %68 = vector.load %arg5[%c0_16, %c0_17] : memref<8x64xf32, #tpu.memory_space<vmem>>, vector<8x64xf32>
    tpu.vector_store %arg5[%c0_16, %c0_17], %67 {strides = array<i32>} : memref<8x64xf32, #tpu.memory_space<vmem>>, vector<8x64xf32>,
    %69 = arith.mulf %66, %66 : vector<32x8x64xf32>
    %cst_18 = arith.constant dense<0.000000e+00> : vector<8x64xf32>
    %70 = vector.multi_reduction <add>, %69, %cst_18 [0] : vector<32x8x64xf32> to vector<8x64xf32>
    %c0_19 = arith.constant 0 : index
    %c0_20 = arith.constant 0 : index
    %71 = vector.load %arg6[%c0_19, %c0_20] : memref<8x64xf32, #tpu.memory_space<vmem>>, vector<8x64xf32>
    tpu.vector_store %arg6[%c0_19, %c0_20], %70 {strides = array<i32>} : memref<8x64xf32, #tpu.memory_space<vmem>>, vector<8x64xf32>,
    %c0_21 = arith.constant 0 : index
    %c0_22 = arith.constant 0 : index
    %72 = vector.load %arg3[%c0_21, %c0_22] : memref<1x64xf32, #tpu.memory_space<vmem>>, vector<1x64xf32>
    %73 = vector.broadcast %72 : vector<1x64xf32> to vector<256x64xf32>
    %74 = arith.addf %65, %73 : vector<256x64xf32>
    %75 = vector.shape_cast %74 : vector<256x64xf32> to vector<1x16x16x64xf32>
    %76 = arith.truncf %75 : vector<1x16x16x64xf32> to vector<1x16x16x64xbf16>
    %c0_23 = arith.constant 0 : index
    %c0_24 = arith.constant 0 : index
    %c0_25 = arith.constant 0 : index
    %c0_26 = arith.constant 0 : index
    %77 = vector.load %arg4[%c0_23, %c0_24, %c0_25, %c0_26] : memref<1x16x16x64xbf16, #tpu.memory_space<vmem>>, vector<1x16x16x64xbf16>
    tpu.vector_store %arg4[%c0_23, %c0_24, %c0_25, %c0_26], %76 {strides = array<i32>} : memref<1x16x16x64xbf16, #tpu.memory_space<vmem>>, vector<1x16x16x64xbf16>,
    return
  }
  func.func @transform_0(%arg0: i32) -> (i32, i32, i32, i32) {
    %c0_i32 = arith.constant 0 : i32
    %c0_i32_0 = arith.constant 0 : i32
    %c0_i32_1 = arith.constant 0 : i32
    %c0_i32_2 = arith.constant 0 : i32
    return %arg0, %c0_i32, %c0_i32_0, %c0_i32_1 : i32, i32, i32, i32
  }
  func.func @transform_1(%arg0: i32) -> (i32, i32, i32) {
    %c0_i32 = arith.constant 0 : i32
    %c0_i32_0 = arith.constant 0 : i32
    %c0_i32_1 = arith.constant 0 : i32
    %c0_i32_2 = arith.constant 0 : i32
    return %c0_i32, %c0_i32_0, %c0_i32_1 : i32, i32, i32
  }
  func.func @transform_2(%arg0: i32) -> (i32, i32) {
    %c0_i32 = arith.constant 0 : i32
    %c0_i32_0 = arith.constant 0 : i32
    %c0_i32_1 = arith.constant 0 : i32
    return %c0_i32, %c0_i32_0 : i32, i32
  }
  func.func @transform_3(%arg0: i32) -> (i32, i32, i32, i32) {
    %c0_i32 = arith.constant 0 : i32
    %c0_i32_0 = arith.constant 0 : i32
    %c0_i32_1 = arith.constant 0 : i32
    %c0_i32_2 = arith.constant 0 : i32
    return %arg0, %c0_i32, %c0_i32_0, %c0_i32_1 : i32, i32, i32, i32
  }
  func.func @transform_4(%arg0: i32) -> (i32, i32) {
    %c0_i32 = arith.constant 0 : i32
    %c0_i32_0 = arith.constant 0 : i32
    return %arg0, %c0_i32 : i32, i32
  }
  func.func @transform_5(%arg0: i32) -> (i32, i32) {
    %c0_i32 = arith.constant 0 : i32
    %c0_i32_0 = arith.constant 0 : i32
    return %arg0, %c0_i32 : i32, i32
  }
}

module attributes {stable_mosaic.version = 11 : i64} {
  func.func @scale_shift_act_kernel(%arg0: i32, %arg1: memref<256x128xbf16, #tpu.memory_space<vmem>>, %arg2: memref<1x128xf32, #tpu.memory_space<vmem>>, %arg3: memref<1x128xf32, #tpu.memory_space<vmem>>, %arg4: memref<256x128xbf16, #tpu.memory_space<vmem>>) attributes {dimension_semantics = [#tpu.dimension_semantics<parallel>], iteration_bounds = array<i64: 1>, scalar_prefetch = 0 : i64, scratch_operands = 0 : i64, tpu.core_type = #tpu.core_type<tc>, window_params = [{transform_indices = @transform_0, window_bounds = array<i64: 256, 128>}, {pipeline_mode = #tpu.pipeline_mode<synchronous>, transform_indices = @transform_1, window_bounds = array<i64: 1, 128>}, {pipeline_mode = #tpu.pipeline_mode<synchronous>, transform_indices = @transform_2, window_bounds = array<i64: 1, 128>}, {transform_indices = @transform_3, window_bounds = array<i64: 256, 128>}]} {
    %c0 = arith.constant 0 : index
    %c0_0 = arith.constant 0 : index
    %0 = vector.load %arg1[%c0, %c0_0] : memref<256x128xbf16, #tpu.memory_space<vmem>>, vector<256x128xbf16>
    %1 = arith.extf %0 : vector<256x128xbf16> to vector<256x128xf32>
    %c0_1 = arith.constant 0 : index
    %c0_2 = arith.constant 0 : index
    %2 = vector.load %arg2[%c0_1, %c0_2] : memref<1x128xf32, #tpu.memory_space<vmem>>, vector<1x128xf32>
    %3 = vector.broadcast %2 : vector<1x128xf32> to vector<256x128xf32>
    %4 = arith.mulf %1, %3 : vector<256x128xf32>
    %c0_3 = arith.constant 0 : index
    %c0_4 = arith.constant 0 : index
    %5 = vector.load %arg3[%c0_3, %c0_4] : memref<1x128xf32, #tpu.memory_space<vmem>>, vector<1x128xf32>
    %6 = vector.broadcast %5 : vector<1x128xf32> to vector<256x128xf32>
    %7 = arith.addf %4, %6 : vector<256x128xf32>
    %cst = arith.constant 0.000000e+00 : f32
    %8 = vector.broadcast %cst : f32 to vector<256x128xf32>
    %9 = arith.cmpf oge, %7, %8 : vector<256x128xf32>
    %cst_5 = arith.constant 2.000000e-01 : f32
    %10 = vector.broadcast %cst_5 : f32 to vector<256x128xf32>
    %11 = arith.mulf %10, %7 : vector<256x128xf32>
    %12 = arith.select %9, %7, %11 : vector<256x128xi1>, vector<256x128xf32>
    %13 = arith.truncf %12 : vector<256x128xf32> to vector<256x128xbf16>
    %c0_6 = arith.constant 0 : index
    %c0_7 = arith.constant 0 : index
    %14 = vector.load %arg4[%c0_6, %c0_7] : memref<256x128xbf16, #tpu.memory_space<vmem>>, vector<256x128xbf16>
    tpu.vector_store %arg4[%c0_6, %c0_7], %13 {strides = array<i32>} : memref<256x128xbf16, #tpu.memory_space<vmem>>, vector<256x128xbf16>,
    return
  }
  func.func @transform_0(%arg0: i32) -> (i32, i32) {
    %c0_i32 = arith.constant 0 : i32
    %c0_i32_0 = arith.constant 0 : i32
    return %arg0, %c0_i32 : i32, i32
  }
  func.func @transform_1(%arg0: i32) -> (i32, i32) {
    %c0_i32 = arith.constant 0 : i32
    %c0_i32_0 = arith.constant 0 : i32
    %c0_i32_1 = arith.constant 0 : i32
    return %c0_i32, %c0_i32_0 : i32, i32
  }
  func.func @transform_2(%arg0: i32) -> (i32, i32) {
    %c0_i32 = arith.constant 0 : i32
    %c0_i32_0 = arith.constant 0 : i32
    %c0_i32_1 = arith.constant 0 : i32
    return %c0_i32, %c0_i32_0 : i32, i32
  }
  func.func @transform_3(%arg0: i32) -> (i32, i32) {
    %c0_i32 = arith.constant 0 : i32
    %c0_i32_0 = arith.constant 0 : i32
    return %arg0, %c0_i32 : i32, i32
  }
}

module attributes {stable_mosaic.version = 11 : i64} {
  func.func @conv3x3_kernel(%arg0: i32, %arg1: memref<1x18x18x64xbf16, #tpu.memory_space<vmem>>, %arg2: memref<9x64x128xbf16, #tpu.memory_space<vmem>>, %arg3: memref<1x128xf32, #tpu.memory_space<vmem>>, %arg4: memref<1x16x16x128xbf16, #tpu.memory_space<vmem>>, %arg5: memref<8x128xf32, #tpu.memory_space<vmem>>, %arg6: memref<8x128xf32, #tpu.memory_space<vmem>>) attributes {dimension_semantics = [#tpu.dimension_semantics<parallel>], iteration_bounds = array<i64: 2>, scalar_prefetch = 0 : i64, scratch_operands = 0 : i64, tpu.core_type = #tpu.core_type<tc>, window_params = [{transform_indices = @transform_0, window_bounds = array<i64: 1, 18, 18, 64>}, {pipeline_mode = #tpu.pipeline_mode<synchronous>, transform_indices = @transform_1, window_bounds = array<i64: 9, 64, 128>}, {pipeline_mode = #tpu.pipeline_mode<synchronous>, transform_indices = @transform_2, window_bounds = array<i64: 1, 128>}, {transform_indices = @transform_3, window_bounds = array<i64: 1, 16, 16, 128>}, {transform_indices = @transform_4, window_bounds = array<i64: 8, 128>}, {transform_indices = @transform_5, window_bounds = array<i64: 8, 128>}]} {
    %c0 = arith.constant 0 : index
    %c0_0 = arith.constant 0 : index
    %c0_1 = arith.constant 0 : index
    %c0_2 = arith.constant 0 : index
    %0 = vector.load %arg1[%c0, %c0_0, %c0_1, %c0_2] : memref<1x18x18x64xbf16, #tpu.memory_space<vmem>>, vector<1x18x18x64xbf16>
    %c0_3 = arith.constant 0 : index
    %c0_4 = arith.constant 0 : index
    %c0_5 = arith.constant 0 : index
    %1 = vector.load %arg2[%c0_3, %c0_4, %c0_5] : memref<9x64x128xbf16, #tpu.memory_space<vmem>>, vector<9x64x128xbf16>
    %cst = arith.constant 0.000000e+00 : f32
    %2 = vector.broadcast %cst : f32 to vector<256x128xf32>
    %3 = vector.extract_strided_slice %0 {offsets = [0, 0, 0, 0], sizes = [1, 16, 16, 64], strides = [1, 1, 1, 1]} : vector<1x18x18x64xbf16> to vector<1x16x16x64xbf16>
    %4 = vector.shape_cast %3 : vector<1x16x16x64xbf16> to vector<16x16x64xbf16>
    %5 = vector.shape_cast %4 : vector<16x16x64xbf16> to vector<256x64xbf16>
    %6 = vector.extract_strided_slice %1 {offsets = [0, 0, 0], sizes = [1, 64, 128], strides = [1, 1, 1]} : vector<9x64x128xbf16> to vector<1x64x128xbf16>
    %7 = vector.shape_cast %6 : vector<1x64x128xbf16> to vector<64x128xbf16>
    %cst_6 = arith.constant dense<0.000000e+00> : vector<256x128xf32>
    %8 = tpu.matmul %5, %7, %cst_6 {dimension_numbers = #tpu.dot_dimension_numbers<[1], [0], [0], [1], [0, 0, 1, 1], [], []>} : vector<256x64xbf16>, vector<64x128xbf16>, vector<256x128xf32> -> vector<256x128xf32>
    %9 = arith.addf %2, %8 : vector<256x128xf32>
    %10 = vector.extract_strided_slice %0 {offsets = [0, 0, 1, 0], sizes = [1, 16, 16, 64], strides = [1, 1, 1, 1]} : vector<1x18x18x64xbf16> to vector<1x16x16x64xbf16>
    %11 = vector.shape_cast %10 : vector<1x16x16x64xbf16> to vector<16x16x64xbf16>
    %12 = vector.shape_cast %11 : vector<16x16x64xbf16> to vector<256x64xbf16>
    %13 = vector.extract_strided_slice %1 {offsets = [1, 0, 0], sizes = [1, 64, 128], strides = [1, 1, 1]} : vector<9x64x128xbf16> to vector<1x64x128xbf16>
    %14 = vector.shape_cast %13 : vector<1x64x128xbf16> to vector<64x128xbf16>
    %cst_7 = arith.constant dense<0.000000e+00> : vector<256x128xf32>
    %15 = tpu.matmul %12, %14, %cst_7 {dimension_numbers = #tpu.dot_dimension_numbers<[1], [0], [0], [1], [0, 0, 1, 1], [], []>} : vector<256x64xbf16>, vector<64x128xbf16>, vector<256x128xf32> -> vector<256x128xf32>
    %16 = arith.addf %9, %15 : vector<256x128xf32>
    %17 = vector.extract_strided_slice %0 {offsets = [0, 0, 2, 0], sizes = [1, 16, 16, 64], strides = [1, 1, 1, 1]} : vector<1x18x18x64xbf16> to vector<1x16x16x64xbf16>
    %18 = vector.shape_cast %17 : vector<1x16x16x64xbf16> to vector<16x16x64xbf16>
    %19 = vector.shape_cast %18 : vector<16x16x64xbf16> to vector<256x64xbf16>
    %20 = vector.extract_strided_slice %1 {offsets = [2, 0, 0], sizes = [1, 64, 128], strides = [1, 1, 1]} : vector<9x64x128xbf16> to vector<1x64x128xbf16>
    %21 = vector.shape_cast %20 : vector<1x64x128xbf16> to vector<64x128xbf16>
    %cst_8 = arith.constant dense<0.000000e+00> : vector<256x128xf32>
    %22 = tpu.matmul %19, %21, %cst_8 {dimension_numbers = #tpu.dot_dimension_numbers<[1], [0], [0], [1], [0, 0, 1, 1], [], []>} : vector<256x64xbf16>, vector<64x128xbf16>, vector<256x128xf32> -> vector<256x128xf32>
    %23 = arith.addf %16, %22 : vector<256x128xf32>
    %24 = vector.extract_strided_slice %0 {offsets = [0, 1, 0, 0], sizes = [1, 16, 16, 64], strides = [1, 1, 1, 1]} : vector<1x18x18x64xbf16> to vector<1x16x16x64xbf16>
    %25 = vector.shape_cast %24 : vector<1x16x16x64xbf16> to vector<16x16x64xbf16>
    %26 = vector.shape_cast %25 : vector<16x16x64xbf16> to vector<256x64xbf16>
    %27 = vector.extract_strided_slice %1 {offsets = [3, 0, 0], sizes = [1, 64, 128], strides = [1, 1, 1]} : vector<9x64x128xbf16> to vector<1x64x128xbf16>
    %28 = vector.shape_cast %27 : vector<1x64x128xbf16> to vector<64x128xbf16>
    %cst_9 = arith.constant dense<0.000000e+00> : vector<256x128xf32>
    %29 = tpu.matmul %26, %28, %cst_9 {dimension_numbers = #tpu.dot_dimension_numbers<[1], [0], [0], [1], [0, 0, 1, 1], [], []>} : vector<256x64xbf16>, vector<64x128xbf16>, vector<256x128xf32> -> vector<256x128xf32>
    %30 = arith.addf %23, %29 : vector<256x128xf32>
    %31 = vector.extract_strided_slice %0 {offsets = [0, 1, 1, 0], sizes = [1, 16, 16, 64], strides = [1, 1, 1, 1]} : vector<1x18x18x64xbf16> to vector<1x16x16x64xbf16>
    %32 = vector.shape_cast %31 : vector<1x16x16x64xbf16> to vector<16x16x64xbf16>
    %33 = vector.shape_cast %32 : vector<16x16x64xbf16> to vector<256x64xbf16>
    %34 = vector.extract_strided_slice %1 {offsets = [4, 0, 0], sizes = [1, 64, 128], strides = [1, 1, 1]} : vector<9x64x128xbf16> to vector<1x64x128xbf16>
    %35 = vector.shape_cast %34 : vector<1x64x128xbf16> to vector<64x128xbf16>
    %cst_10 = arith.constant dense<0.000000e+00> : vector<256x128xf32>
    %36 = tpu.matmul %33, %35, %cst_10 {dimension_numbers = #tpu.dot_dimension_numbers<[1], [0], [0], [1], [0, 0, 1, 1], [], []>} : vector<256x64xbf16>, vector<64x128xbf16>, vector<256x128xf32> -> vector<256x128xf32>
    %37 = arith.addf %30, %36 : vector<256x128xf32>
    %38 = vector.extract_strided_slice %0 {offsets = [0, 1, 2, 0], sizes = [1, 16, 16, 64], strides = [1, 1, 1, 1]} : vector<1x18x18x64xbf16> to vector<1x16x16x64xbf16>
    %39 = vector.shape_cast %38 : vector<1x16x16x64xbf16> to vector<16x16x64xbf16>
    %40 = vector.shape_cast %39 : vector<16x16x64xbf16> to vector<256x64xbf16>
    %41 = vector.extract_strided_slice %1 {offsets = [5, 0, 0], sizes = [1, 64, 128], strides = [1, 1, 1]} : vector<9x64x128xbf16> to vector<1x64x128xbf16>
    %42 = vector.shape_cast %41 : vector<1x64x128xbf16> to vector<64x128xbf16>
    %cst_11 = arith.constant dense<0.000000e+00> : vector<256x128xf32>
    %43 = tpu.matmul %40, %42, %cst_11 {dimension_numbers = #tpu.dot_dimension_numbers<[1], [0], [0], [1], [0, 0, 1, 1], [], []>} : vector<256x64xbf16>, vector<64x128xbf16>, vector<256x128xf32> -> vector<256x128xf32>
    %44 = arith.addf %37, %43 : vector<256x128xf32>
    %45 = vector.extract_strided_slice %0 {offsets = [0, 2, 0, 0], sizes = [1, 16, 16, 64], strides = [1, 1, 1, 1]} : vector<1x18x18x64xbf16> to vector<1x16x16x64xbf16>
    %46 = vector.shape_cast %45 : vector<1x16x16x64xbf16> to vector<16x16x64xbf16>
    %47 = vector.shape_cast %46 : vector<16x16x64xbf16> to vector<256x64xbf16>
    %48 = vector.extract_strided_slice %1 {offsets = [6, 0, 0], sizes = [1, 64, 128], strides = [1, 1, 1]} : vector<9x64x128xbf16> to vector<1x64x128xbf16>
    %49 = vector.shape_cast %48 : vector<1x64x128xbf16> to vector<64x128xbf16>
    %cst_12 = arith.constant dense<0.000000e+00> : vector<256x128xf32>
    %50 = tpu.matmul %47, %49, %cst_12 {dimension_numbers = #tpu.dot_dimension_numbers<[1], [0], [0], [1], [0, 0, 1, 1], [], []>} : vector<256x64xbf16>, vector<64x128xbf16>, vector<256x128xf32> -> vector<256x128xf32>
    %51 = arith.addf %44, %50 : vector<256x128xf32>
    %52 = vector.extract_strided_slice %0 {offsets = [0, 2, 1, 0], sizes = [1, 16, 16, 64], strides = [1, 1, 1, 1]} : vector<1x18x18x64xbf16> to vector<1x16x16x64xbf16>
    %53 = vector.shape_cast %52 : vector<1x16x16x64xbf16> to vector<16x16x64xbf16>
    %54 = vector.shape_cast %53 : vector<16x16x64xbf16> to vector<256x64xbf16>
    %55 = vector.extract_strided_slice %1 {offsets = [7, 0, 0], sizes = [1, 64, 128], strides = [1, 1, 1]} : vector<9x64x128xbf16> to vector<1x64x128xbf16>
    %56 = vector.shape_cast %55 : vector<1x64x128xbf16> to vector<64x128xbf16>
    %cst_13 = arith.constant dense<0.000000e+00> : vector<256x128xf32>
    %57 = tpu.matmul %54, %56, %cst_13 {dimension_numbers = #tpu.dot_dimension_numbers<[1], [0], [0], [1], [0, 0, 1, 1], [], []>} : vector<256x64xbf16>, vector<64x128xbf16>, vector<256x128xf32> -> vector<256x128xf32>
    %58 = arith.addf %51, %57 : vector<256x128xf32>
    %59 = vector.extract_strided_slice %0 {offsets = [0, 2, 2, 0], sizes = [1, 16, 16, 64], strides = [1, 1, 1, 1]} : vector<1x18x18x64xbf16> to vector<1x16x16x64xbf16>
    %60 = vector.shape_cast %59 : vector<1x16x16x64xbf16> to vector<16x16x64xbf16>
    %61 = vector.shape_cast %60 : vector<16x16x64xbf16> to vector<256x64xbf16>
    %62 = vector.extract_strided_slice %1 {offsets = [8, 0, 0], sizes = [1, 64, 128], strides = [1, 1, 1]} : vector<9x64x128xbf16> to vector<1x64x128xbf16>
    %63 = vector.shape_cast %62 : vector<1x64x128xbf16> to vector<64x128xbf16>
    %cst_14 = arith.constant dense<0.000000e+00> : vector<256x128xf32>
    %64 = tpu.matmul %61, %63, %cst_14 {dimension_numbers = #tpu.dot_dimension_numbers<[1], [0], [0], [1], [0, 0, 1, 1], [], []>} : vector<256x64xbf16>, vector<64x128xbf16>, vector<256x128xf32> -> vector<256x128xf32>
    %65 = arith.addf %58, %64 : vector<256x128xf32>
    %66 = vector.shape_cast %65 : vector<256x128xf32> to vector<32x8x128xf32>
    %cst_15 = arith.constant dense<0.000000e+00> : vector<8x128xf32>
    %67 = vector.multi_reduction <add>, %66, %cst_15 [0] : vector<32x8x128xf32> to vector<8x128xf32>
    %c0_16 = arith.constant 0 : index
    %c0_17 = arith.constant 0 : index
    %68 = vector.load %arg5[%c0_16, %c0_17] : memref<8x128xf32, #tpu.memory_space<vmem>>, vector<8x128xf32>
    tpu.vector_store %arg5[%c0_16, %c0_17], %67 {strides = array<i32>} : memref<8x128xf32, #tpu.memory_space<vmem>>, vector<8x128xf32>,
    %69 = arith.mulf %66, %66 : vector<32x8x128xf32>
    %cst_18 = arith.constant dense<0.000000e+00> : vector<8x128xf32>
    %70 = vector.multi_reduction <add>, %69, %cst_18 [0] : vector<32x8x128xf32> to vector<8x128xf32>
    %c0_19 = arith.constant 0 : index
    %c0_20 = arith.constant 0 : index
    %71 = vector.load %arg6[%c0_19, %c0_20] : memref<8x128xf32, #tpu.memory_space<vmem>>, vector<8x128xf32>
    tpu.vector_store %arg6[%c0_19, %c0_20], %70 {strides = array<i32>} : memref<8x128xf32, #tpu.memory_space<vmem>>, vector<8x128xf32>,
    %c0_21 = arith.constant 0 : index
    %c0_22 = arith.constant 0 : index
    %72 = vector.load %arg3[%c0_21, %c0_22] : memref<1x128xf32, #tpu.memory_space<vmem>>, vector<1x128xf32>
    %73 = vector.broadcast %72 : vector<1x128xf32> to vector<256x128xf32>
    %74 = arith.addf %65, %73 : vector<256x128xf32>
    %75 = vector.shape_cast %74 : vector<256x128xf32> to vector<1x16x16x128xf32>
    %76 = arith.truncf %75 : vector<1x16x16x128xf32> to vector<1x16x16x128xbf16>
    %c0_23 = arith.constant 0 : index
    %c0_24 = arith.constant 0 : index
    %c0_25 = arith.constant 0 : index
    %c0_26 = arith.constant 0 : index
    %77 = vector.load %arg4[%c0_23, %c0_24, %c0_25, %c0_26] : memref<1x16x16x128xbf16, #tpu.memory_space<vmem>>, vector<1x16x16x128xbf16>
    tpu.vector_store %arg4[%c0_23, %c0_24, %c0_25, %c0_26], %76 {strides = array<i32>} : memref<1x16x16x128xbf16, #tpu.memory_space<vmem>>, vector<1x16x16x128xbf16>,
    return
  }
  func.func @transform_0(%arg0: i32) -> (i32, i32, i32, i32) {
    %c0_i32 = arith.constant 0 : i32
    %c0_i32_0 = arith.constant 0 : i32
    %c0_i32_1 = arith.constant 0 : i32
    %c0_i32_2 = arith.constant 0 : i32
    return %arg0, %c0_i32, %c0_i32_0, %c0_i32_1 : i32, i32, i32, i32
  }
  func.func @transform_1(%arg0: i32) -> (i32, i32, i32) {
    %c0_i32 = arith.constant 0 : i32
    %c0_i32_0 = arith.constant 0 : i32
    %c0_i32_1 = arith.constant 0 : i32
    %c0_i32_2 = arith.constant 0 : i32
    return %c0_i32, %c0_i32_0, %c0_i32_1 : i32, i32, i32
  }
  func.func @transform_2(%arg0: i32) -> (i32, i32) {
    %c0_i32 = arith.constant 0 : i32
    %c0_i32_0 = arith.constant 0 : i32
    %c0_i32_1 = arith.constant 0 : i32
    return %c0_i32, %c0_i32_0 : i32, i32
  }
  func.func @transform_3(%arg0: i32) -> (i32, i32, i32, i32) {
    %c0_i32 = arith.constant 0 : i32
    %c0_i32_0 = arith.constant 0 : i32
    %c0_i32_1 = arith.constant 0 : i32
    %c0_i32_2 = arith.constant 0 : i32
    return %arg0, %c0_i32, %c0_i32_0, %c0_i32_1 : i32, i32, i32, i32
  }
  func.func @transform_4(%arg0: i32) -> (i32, i32) {
    %c0_i32 = arith.constant 0 : i32
    %c0_i32_0 = arith.constant 0 : i32
    return %arg0, %c0_i32 : i32, i32
  }
  func.func @transform_5(%arg0: i32) -> (i32, i32) {
    %c0_i32 = arith.constant 0 : i32
    %c0_i32_0 = arith.constant 0 : i32
    return %arg0, %c0_i32 : i32, i32
  }
}

module attributes {stable_mosaic.version = 11 : i64} {
  func.func @scale_shift_act_kernel(%arg0: i32, %arg1: memref<512x128xbf16, #tpu.memory_space<vmem>>, %arg2: memref<1x128xf32, #tpu.memory_space<vmem>>, %arg3: memref<1x128xf32, #tpu.memory_space<vmem>>, %arg4: memref<512x128xbf16, #tpu.memory_space<vmem>>) attributes {dimension_semantics = [#tpu.dimension_semantics<parallel>], iteration_bounds = array<i64: 1>, scalar_prefetch = 0 : i64, scratch_operands = 0 : i64, tpu.core_type = #tpu.core_type<tc>, window_params = [{transform_indices = @transform_0, window_bounds = array<i64: 512, 128>}, {pipeline_mode = #tpu.pipeline_mode<synchronous>, transform_indices = @transform_1, window_bounds = array<i64: 1, 128>}, {pipeline_mode = #tpu.pipeline_mode<synchronous>, transform_indices = @transform_2, window_bounds = array<i64: 1, 128>}, {transform_indices = @transform_3, window_bounds = array<i64: 512, 128>}]} {
    %c0 = arith.constant 0 : index
    %c0_0 = arith.constant 0 : index
    %0 = vector.load %arg1[%c0, %c0_0] : memref<512x128xbf16, #tpu.memory_space<vmem>>, vector<512x128xbf16>
    %1 = arith.extf %0 : vector<512x128xbf16> to vector<512x128xf32>
    %c0_1 = arith.constant 0 : index
    %c0_2 = arith.constant 0 : index
    %2 = vector.load %arg2[%c0_1, %c0_2] : memref<1x128xf32, #tpu.memory_space<vmem>>, vector<1x128xf32>
    %3 = vector.broadcast %2 : vector<1x128xf32> to vector<512x128xf32>
    %4 = arith.mulf %1, %3 : vector<512x128xf32>
    %c0_3 = arith.constant 0 : index
    %c0_4 = arith.constant 0 : index
    %5 = vector.load %arg3[%c0_3, %c0_4] : memref<1x128xf32, #tpu.memory_space<vmem>>, vector<1x128xf32>
    %6 = vector.broadcast %5 : vector<1x128xf32> to vector<512x128xf32>
    %7 = arith.addf %4, %6 : vector<512x128xf32>
    %cst = arith.constant 0.000000e+00 : f32
    %8 = vector.broadcast %cst : f32 to vector<512x128xf32>
    %9 = arith.cmpf oge, %7, %8 : vector<512x128xf32>
    %cst_5 = arith.constant 2.000000e-01 : f32
    %10 = vector.broadcast %cst_5 : f32 to vector<512x128xf32>
    %11 = arith.mulf %10, %7 : vector<512x128xf32>
    %12 = arith.select %9, %7, %11 : vector<512x128xi1>, vector<512x128xf32>
    %13 = arith.truncf %12 : vector<512x128xf32> to vector<512x128xbf16>
    %c0_6 = arith.constant 0 : index
    %c0_7 = arith.constant 0 : index
    %14 = vector.load %arg4[%c0_6, %c0_7] : memref<512x128xbf16, #tpu.memory_space<vmem>>, vector<512x128xbf16>
    tpu.vector_store %arg4[%c0_6, %c0_7], %13 {strides = array<i32>} : memref<512x128xbf16, #tpu.memory_space<vmem>>, vector<512x128xbf16>,
    return
  }
  func.func @transform_0(%arg0: i32) -> (i32, i32) {
    %c0_i32 = arith.constant 0 : i32
    %c0_i32_0 = arith.constant 0 : i32
    return %arg0, %c0_i32 : i32, i32
  }
  func.func @transform_1(%arg0: i32) -> (i32, i32) {
    %c0_i32 = arith.constant 0 : i32
    %c0_i32_0 = arith.constant 0 : i32
    %c0_i32_1 = arith.constant 0 : i32
    return %c0_i32, %c0_i32_0 : i32, i32
  }
  func.func @transform_2(%arg0: i32) -> (i32, i32) {
    %c0_i32 = arith.constant 0 : i32
    %c0_i32_0 = arith.constant 0 : i32
    %c0_i32_1 = arith.constant 0 : i32
    return %c0_i32, %c0_i32_0 : i32, i32
  }
  func.func @transform_3(%arg0: i32) -> (i32, i32) {
    %c0_i32 = arith.constant 0 : i32
    %c0_i32_0 = arith.constant 0 : i32
    return %arg0, %c0_i32 : i32, i32
  }
}

module attributes {stable_mosaic.version = 11 : i64} {
  func.func @conv3x3_kernel(%arg0: i32, %arg1: memref<1x36x9x128xbf16, #tpu.memory_space<vmem>>, %arg2: memref<9x128x128xbf16, #tpu.memory_space<vmem>>, %arg3: memref<1x128xf32, #tpu.memory_space<vmem>>, %arg4: memref<1x8x8x128xbf16, #tpu.memory_space<vmem>>, %arg5: memref<8x128xf32, #tpu.memory_space<vmem>>, %arg6: memref<8x128xf32, #tpu.memory_space<vmem>>) attributes {dimension_semantics = [#tpu.dimension_semantics<parallel>], iteration_bounds = array<i64: 2>, scalar_prefetch = 0 : i64, scratch_operands = 0 : i64, tpu.core_type = #tpu.core_type<tc>, window_params = [{transform_indices = @transform_0, window_bounds = array<i64: 1, 36, 9, 128>}, {pipeline_mode = #tpu.pipeline_mode<synchronous>, transform_indices = @transform_1, window_bounds = array<i64: 9, 128, 128>}, {pipeline_mode = #tpu.pipeline_mode<synchronous>, transform_indices = @transform_2, window_bounds = array<i64: 1, 128>}, {transform_indices = @transform_3, window_bounds = array<i64: 1, 8, 8, 128>}, {transform_indices = @transform_4, window_bounds = array<i64: 8, 128>}, {transform_indices = @transform_5, window_bounds = array<i64: 8, 128>}]} {
    %c0 = arith.constant 0 : index
    %c0_0 = arith.constant 0 : index
    %c0_1 = arith.constant 0 : index
    %c0_2 = arith.constant 0 : index
    %0 = vector.load %arg1[%c0, %c0_0, %c0_1, %c0_2] : memref<1x36x9x128xbf16, #tpu.memory_space<vmem>>, vector<1x36x9x128xbf16>
    %c0_3 = arith.constant 0 : index
    %c0_4 = arith.constant 0 : index
    %c0_5 = arith.constant 0 : index
    %1 = vector.load %arg2[%c0_3, %c0_4, %c0_5] : memref<9x128x128xbf16, #tpu.memory_space<vmem>>, vector<9x128x128xbf16>
    %cst = arith.constant 0.000000e+00 : f32
    %2 = vector.broadcast %cst : f32 to vector<64x128xf32>
    %3 = vector.extract_strided_slice %0 {offsets = [0, 0, 0, 0], sizes = [1, 8, 8, 128], strides = [1, 1, 1, 1]} : vector<1x36x9x128xbf16> to vector<1x8x8x128xbf16>
    %4 = vector.shape_cast %3 : vector<1x8x8x128xbf16> to vector<8x8x128xbf16>
    %5 = vector.shape_cast %4 : vector<8x8x128xbf16> to vector<64x128xbf16>
    %6 = vector.extract_strided_slice %1 {offsets = [0, 0, 0], sizes = [1, 128, 128], strides = [1, 1, 1]} : vector<9x128x128xbf16> to vector<1x128x128xbf16>
    %7 = vector.shape_cast %6 : vector<1x128x128xbf16> to vector<128x128xbf16>
    %cst_6 = arith.constant dense<0.000000e+00> : vector<64x128xf32>
    %8 = tpu.matmul %5, %7, %cst_6 {dimension_numbers = #tpu.dot_dimension_numbers<[1], [0], [0], [1], [0, 0, 1, 1], [], []>} : vector<64x128xbf16>, vector<128x128xbf16>, vector<64x128xf32> -> vector<64x128xf32>
    %9 = arith.addf %2, %8 : vector<64x128xf32>
    %10 = vector.extract_strided_slice %0 {offsets = [0, 9, 0, 0], sizes = [1, 8, 8, 128], strides = [1, 1, 1, 1]} : vector<1x36x9x128xbf16> to vector<1x8x8x128xbf16>
    %11 = vector.shape_cast %10 : vector<1x8x8x128xbf16> to vector<8x8x128xbf16>
    %12 = vector.shape_cast %11 : vector<8x8x128xbf16> to vector<64x128xbf16>
    %13 = vector.extract_strided_slice %1 {offsets = [1, 0, 0], sizes = [1, 128, 128], strides = [1, 1, 1]} : vector<9x128x128xbf16> to vector<1x128x128xbf16>
    %14 = vector.shape_cast %13 : vector<1x128x128xbf16> to vector<128x128xbf16>
    %cst_7 = arith.constant dense<0.000000e+00> : vector<64x128xf32>
    %15 = tpu.matmul %12, %14, %cst_7 {dimension_numbers = #tpu.dot_dimension_numbers<[1], [0], [0], [1], [0, 0, 1, 1], [], []>} : vector<64x128xbf16>, vector<128x128xbf16>, vector<64x128xf32> -> vector<64x128xf32>
    %16 = arith.addf %9, %15 : vector<64x128xf32>
    %17 = vector.extract_strided_slice %0 {offsets = [0, 0, 1, 0], sizes = [1, 8, 8, 128], strides = [1, 1, 1, 1]} : vector<1x36x9x128xbf16> to vector<1x8x8x128xbf16>
    %18 = vector.shape_cast %17 : vector<1x8x8x128xbf16> to vector<8x8x128xbf16>
    %19 = vector.shape_cast %18 : vector<8x8x128xbf16> to vector<64x128xbf16>
    %20 = vector.extract_strided_slice %1 {offsets = [2, 0, 0], sizes = [1, 128, 128], strides = [1, 1, 1]} : vector<9x128x128xbf16> to vector<1x128x128xbf16>
    %21 = vector.shape_cast %20 : vector<1x128x128xbf16> to vector<128x128xbf16>
    %cst_8 = arith.constant dense<0.000000e+00> : vector<64x128xf32>
    %22 = tpu.matmul %19, %21, %cst_8 {dimension_numbers = #tpu.dot_dimension_numbers<[1], [0], [0], [1], [0, 0, 1, 1], [], []>} : vector<64x128xbf16>, vector<128x128xbf16>, vector<64x128xf32> -> vector<64x128xf32>
    %23 = arith.addf %16, %22 : vector<64x128xf32>
    %24 = vector.extract_strided_slice %0 {offsets = [0, 18, 0, 0], sizes = [1, 8, 8, 128], strides = [1, 1, 1, 1]} : vector<1x36x9x128xbf16> to vector<1x8x8x128xbf16>
    %25 = vector.shape_cast %24 : vector<1x8x8x128xbf16> to vector<8x8x128xbf16>
    %26 = vector.shape_cast %25 : vector<8x8x128xbf16> to vector<64x128xbf16>
    %27 = vector.extract_strided_slice %1 {offsets = [3, 0, 0], sizes = [1, 128, 128], strides = [1, 1, 1]} : vector<9x128x128xbf16> to vector<1x128x128xbf16>
    %28 = vector.shape_cast %27 : vector<1x128x128xbf16> to vector<128x128xbf16>
    %cst_9 = arith.constant dense<0.000000e+00> : vector<64x128xf32>
    %29 = tpu.matmul %26, %28, %cst_9 {dimension_numbers = #tpu.dot_dimension_numbers<[1], [0], [0], [1], [0, 0, 1, 1], [], []>} : vector<64x128xbf16>, vector<128x128xbf16>, vector<64x128xf32> -> vector<64x128xf32>
    %30 = arith.addf %23, %29 : vector<64x128xf32>
    %31 = vector.extract_strided_slice %0 {offsets = [0, 27, 0, 0], sizes = [1, 8, 8, 128], strides = [1, 1, 1, 1]} : vector<1x36x9x128xbf16> to vector<1x8x8x128xbf16>
    %32 = vector.shape_cast %31 : vector<1x8x8x128xbf16> to vector<8x8x128xbf16>
    %33 = vector.shape_cast %32 : vector<8x8x128xbf16> to vector<64x128xbf16>
    %34 = vector.extract_strided_slice %1 {offsets = [4, 0, 0], sizes = [1, 128, 128], strides = [1, 1, 1]} : vector<9x128x128xbf16> to vector<1x128x128xbf16>
    %35 = vector.shape_cast %34 : vector<1x128x128xbf16> to vector<128x128xbf16>
    %cst_10 = arith.constant dense<0.000000e+00> : vector<64x128xf32>
    %36 = tpu.matmul %33, %35, %cst_10 {dimension_numbers = #tpu.dot_dimension_numbers<[1], [0], [0], [1], [0, 0, 1, 1], [], []>} : vector<64x128xbf16>, vector<128x128xbf16>, vector<64x128xf32> -> vector<64x128xf32>
    %37 = arith.addf %30, %36 : vector<64x128xf32>
    %38 = vector.extract_strided_slice %0 {offsets = [0, 18, 1, 0], sizes = [1, 8, 8, 128], strides = [1, 1, 1, 1]} : vector<1x36x9x128xbf16> to vector<1x8x8x128xbf16>
    %39 = vector.shape_cast %38 : vector<1x8x8x128xbf16> to vector<8x8x128xbf16>
    %40 = vector.shape_cast %39 : vector<8x8x128xbf16> to vector<64x128xbf16>
    %41 = vector.extract_strided_slice %1 {offsets = [5, 0, 0], sizes = [1, 128, 128], strides = [1, 1, 1]} : vector<9x128x128xbf16> to vector<1x128x128xbf16>
    %42 = vector.shape_cast %41 : vector<1x128x128xbf16> to vector<128x128xbf16>
    %cst_11 = arith.constant dense<0.000000e+00> : vector<64x128xf32>
    %43 = tpu.matmul %40, %42, %cst_11 {dimension_numbers = #tpu.dot_dimension_numbers<[1], [0], [0], [1], [0, 0, 1, 1], [], []>} : vector<64x128xbf16>, vector<128x128xbf16>, vector<64x128xf32> -> vector<64x128xf32>
    %44 = arith.addf %37, %43 : vector<64x128xf32>
    %45 = vector.extract_strided_slice %0 {offsets = [0, 1, 0, 0], sizes = [1, 8, 8, 128], strides = [1, 1, 1, 1]} : vector<1x36x9x128xbf16> to vector<1x8x8x128xbf16>
    %46 = vector.shape_cast %45 : vector<1x8x8x128xbf16> to vector<8x8x128xbf16>
    %47 = vector.shape_cast %46 : vector<8x8x128xbf16> to vector<64x128xbf16>
    %48 = vector.extract_strided_slice %1 {offsets = [6, 0, 0], sizes = [1, 128, 128], strides = [1, 1, 1]} : vector<9x128x128xbf16> to vector<1x128x128xbf16>
    %49 = vector.shape_cast %48 : vector<1x128x128xbf16> to vector<128x128xbf16>
    %cst_12 = arith.constant dense<0.000000e+00> : vector<64x128xf32>
    %50 = tpu.matmul %47, %49, %cst_12 {dimension_numbers = #tpu.dot_dimension_numbers<[1], [0], [0], [1], [0, 0, 1, 1], [], []>} : vector<64x128xbf16>, vector<128x128xbf16>, vector<64x128xf32> -> vector<64x128xf32>
    %51 = arith.addf %44, %50 : vector<64x128xf32>
    %52 = vector.extract_strided_slice %0 {offsets = [0, 10, 0, 0], sizes = [1, 8, 8, 128], strides = [1, 1, 1, 1]} : vector<1x36x9x128xbf16> to vector<1x8x8x128xbf16>
    %53 = vector.shape_cast %52 : vector<1x8x8x128xbf16> to vector<8x8x128xbf16>
    %54 = vector.shape_cast %53 : vector<8x8x128xbf16> to vector<64x128xbf16>
    %55 = vector.extract_strided_slice %1 {offsets = [7, 0, 0], sizes = [1, 128, 128], strides = [1, 1, 1]} : vector<9x128x128xbf16> to vector<1x128x128xbf16>
    %56 = vector.shape_cast %55 : vector<1x128x128xbf16> to vector<128x128xbf16>
    %cst_13 = arith.constant dense<0.000000e+00> : vector<64x128xf32>
    %57 = tpu.matmul %54, %56, %cst_13 {dimension_numbers = #tpu.dot_dimension_numbers<[1], [0], [0], [1], [0, 0, 1, 1], [], []>} : vector<64x128xbf16>, vector<128x128xbf16>, vector<64x128xf32> -> vector<64x128xf32>
    %58 = arith.addf %51, %57 : vector<64x128xf32>
    %59 = vector.extract_strided_slice %0 {offsets = [0, 1, 1, 0], sizes = [1, 8, 8, 128], strides = [1, 1, 1, 1]} : vector<1x36x9x128xbf16> to vector<1x8x8x128xbf16>
    %60 = vector.shape_cast %59 : vector<1x8x8x128xbf16> to vector<8x8x128xbf16>
    %61 = vector.shape_cast %60 : vector<8x8x128xbf16> to vector<64x128xbf16>
    %62 = vector.extract_strided_slice %1 {offsets = [8, 0, 0], sizes = [1, 128, 128], strides = [1, 1, 1]} : vector<9x128x128xbf16> to vector<1x128x128xbf16>
    %63 = vector.shape_cast %62 : vector<1x128x128xbf16> to vector<128x128xbf16>
    %cst_14 = arith.constant dense<0.000000e+00> : vector<64x128xf32>
    %64 = tpu.matmul %61, %63, %cst_14 {dimension_numbers = #tpu.dot_dimension_numbers<[1], [0], [0], [1], [0, 0, 1, 1], [], []>} : vector<64x128xbf16>, vector<128x128xbf16>, vector<64x128xf32> -> vector<64x128xf32>
    %65 = arith.addf %58, %64 : vector<64x128xf32>
    %66 = vector.shape_cast %65 : vector<64x128xf32> to vector<8x8x128xf32>
    %cst_15 = arith.constant dense<0.000000e+00> : vector<8x128xf32>
    %67 = vector.multi_reduction <add>, %66, %cst_15 [0] : vector<8x8x128xf32> to vector<8x128xf32>
    %c0_16 = arith.constant 0 : index
    %c0_17 = arith.constant 0 : index
    %68 = vector.load %arg5[%c0_16, %c0_17] : memref<8x128xf32, #tpu.memory_space<vmem>>, vector<8x128xf32>
    tpu.vector_store %arg5[%c0_16, %c0_17], %67 {strides = array<i32>} : memref<8x128xf32, #tpu.memory_space<vmem>>, vector<8x128xf32>,
    %69 = arith.mulf %66, %66 : vector<8x8x128xf32>
    %cst_18 = arith.constant dense<0.000000e+00> : vector<8x128xf32>
    %70 = vector.multi_reduction <add>, %69, %cst_18 [0] : vector<8x8x128xf32> to vector<8x128xf32>
    %c0_19 = arith.constant 0 : index
    %c0_20 = arith.constant 0 : index
    %71 = vector.load %arg6[%c0_19, %c0_20] : memref<8x128xf32, #tpu.memory_space<vmem>>, vector<8x128xf32>
    tpu.vector_store %arg6[%c0_19, %c0_20], %70 {strides = array<i32>} : memref<8x128xf32, #tpu.memory_space<vmem>>, vector<8x128xf32>,
    %c0_21 = arith.constant 0 : index
    %c0_22 = arith.constant 0 : index
    %72 = vector.load %arg3[%c0_21, %c0_22] : memref<1x128xf32, #tpu.memory_space<vmem>>, vector<1x128xf32>
    %73 = vector.broadcast %72 : vector<1x128xf32> to vector<64x128xf32>
    %74 = arith.addf %65, %73 : vector<64x128xf32>
    %75 = vector.shape_cast %74 : vector<64x128xf32> to vector<1x8x8x128xf32>
    %76 = arith.truncf %75 : vector<1x8x8x128xf32> to vector<1x8x8x128xbf16>
    %c0_23 = arith.constant 0 : index
    %c0_24 = arith.constant 0 : index
    %c0_25 = arith.constant 0 : index
    %c0_26 = arith.constant 0 : index
    %77 = vector.load %arg4[%c0_23, %c0_24, %c0_25, %c0_26] : memref<1x8x8x128xbf16, #tpu.memory_space<vmem>>, vector<1x8x8x128xbf16>
    tpu.vector_store %arg4[%c0_23, %c0_24, %c0_25, %c0_26], %76 {strides = array<i32>} : memref<1x8x8x128xbf16, #tpu.memory_space<vmem>>, vector<1x8x8x128xbf16>,
    return
  }
  func.func @transform_0(%arg0: i32) -> (i32, i32, i32, i32) {
    %c0_i32 = arith.constant 0 : i32
    %c0_i32_0 = arith.constant 0 : i32
    %c0_i32_1 = arith.constant 0 : i32
    %c0_i32_2 = arith.constant 0 : i32
    return %arg0, %c0_i32, %c0_i32_0, %c0_i32_1 : i32, i32, i32, i32
  }
  func.func @transform_1(%arg0: i32) -> (i32, i32, i32) {
    %c0_i32 = arith.constant 0 : i32
    %c0_i32_0 = arith.constant 0 : i32
    %c0_i32_1 = arith.constant 0 : i32
    %c0_i32_2 = arith.constant 0 : i32
    return %c0_i32, %c0_i32_0, %c0_i32_1 : i32, i32, i32
  }
  func.func @transform_2(%arg0: i32) -> (i32, i32) {
    %c0_i32 = arith.constant 0 : i32
    %c0_i32_0 = arith.constant 0 : i32
    %c0_i32_1 = arith.constant 0 : i32
    return %c0_i32, %c0_i32_0 : i32, i32
  }
  func.func @transform_3(%arg0: i32) -> (i32, i32, i32, i32) {
    %c0_i32 = arith.constant 0 : i32
    %c0_i32_0 = arith.constant 0 : i32
    %c0_i32_1 = arith.constant 0 : i32
    %c0_i32_2 = arith.constant 0 : i32
    return %arg0, %c0_i32, %c0_i32_0, %c0_i32_1 : i32, i32, i32, i32
  }
  func.func @transform_4(%arg0: i32) -> (i32, i32) {
    %c0_i32 = arith.constant 0 : i32
    %c0_i32_0 = arith.constant 0 : i32
    return %arg0, %c0_i32 : i32, i32
  }
  func.func @transform_5(%arg0: i32) -> (i32, i32) {
    %c0_i32 = arith.constant 0 : i32
    %c0_i32_0 = arith.constant 0 : i32
    return %arg0, %c0_i32 : i32, i32
  }
}

module attributes {stable_mosaic.version = 11 : i64} {
  func.func @scale_shift_act_kernel(%arg0: i32, %arg1: memref<128x128xbf16, #tpu.memory_space<vmem>>, %arg2: memref<1x128xf32, #tpu.memory_space<vmem>>, %arg3: memref<1x128xf32, #tpu.memory_space<vmem>>, %arg4: memref<128x128xbf16, #tpu.memory_space<vmem>>) attributes {dimension_semantics = [#tpu.dimension_semantics<parallel>], iteration_bounds = array<i64: 1>, scalar_prefetch = 0 : i64, scratch_operands = 0 : i64, tpu.core_type = #tpu.core_type<tc>, window_params = [{transform_indices = @transform_0, window_bounds = array<i64: 128, 128>}, {pipeline_mode = #tpu.pipeline_mode<synchronous>, transform_indices = @transform_1, window_bounds = array<i64: 1, 128>}, {pipeline_mode = #tpu.pipeline_mode<synchronous>, transform_indices = @transform_2, window_bounds = array<i64: 1, 128>}, {transform_indices = @transform_3, window_bounds = array<i64: 128, 128>}]} {
    %c0 = arith.constant 0 : index
    %c0_0 = arith.constant 0 : index
    %0 = vector.load %arg1[%c0, %c0_0] : memref<128x128xbf16, #tpu.memory_space<vmem>>, vector<128x128xbf16>
    %1 = arith.extf %0 : vector<128x128xbf16> to vector<128x128xf32>
    %c0_1 = arith.constant 0 : index
    %c0_2 = arith.constant 0 : index
    %2 = vector.load %arg2[%c0_1, %c0_2] : memref<1x128xf32, #tpu.memory_space<vmem>>, vector<1x128xf32>
    %3 = vector.broadcast %2 : vector<1x128xf32> to vector<128x128xf32>
    %4 = arith.mulf %1, %3 : vector<128x128xf32>
    %c0_3 = arith.constant 0 : index
    %c0_4 = arith.constant 0 : index
    %5 = vector.load %arg3[%c0_3, %c0_4] : memref<1x128xf32, #tpu.memory_space<vmem>>, vector<1x128xf32>
    %6 = vector.broadcast %5 : vector<1x128xf32> to vector<128x128xf32>
    %7 = arith.addf %4, %6 : vector<128x128xf32>
    %cst = arith.constant 0.000000e+00 : f32
    %8 = vector.broadcast %cst : f32 to vector<128x128xf32>
    %9 = arith.cmpf oge, %7, %8 : vector<128x128xf32>
    %cst_5 = arith.constant 2.000000e-01 : f32
    %10 = vector.broadcast %cst_5 : f32 to vector<128x128xf32>
    %11 = arith.mulf %10, %7 : vector<128x128xf32>
    %12 = arith.select %9, %7, %11 : vector<128x128xi1>, vector<128x128xf32>
    %13 = arith.truncf %12 : vector<128x128xf32> to vector<128x128xbf16>
    %c0_6 = arith.constant 0 : index
    %c0_7 = arith.constant 0 : index
    %14 = vector.load %arg4[%c0_6, %c0_7] : memref<128x128xbf16, #tpu.memory_space<vmem>>, vector<128x128xbf16>
    tpu.vector_store %arg4[%c0_6, %c0_7], %13 {strides = array<i32>} : memref<128x128xbf16, #tpu.memory_space<vmem>>, vector<128x128xbf16>,
    return
  }
  func.func @transform_0(%arg0: i32) -> (i32, i32) {
    %c0_i32 = arith.constant 0 : i32
    %c0_i32_0 = arith.constant 0 : i32
    return %arg0, %c0_i32 : i32, i32
  }
  func.func @transform_1(%arg0: i32) -> (i32, i32) {
    %c0_i32 = arith.constant 0 : i32
    %c0_i32_0 = arith.constant 0 : i32
    %c0_i32_1 = arith.constant 0 : i32
    return %c0_i32, %c0_i32_0 : i32, i32
  }
  func.func @transform_2(%arg0: i32) -> (i32, i32) {
    %c0_i32 = arith.constant 0 : i32
    %c0_i32_0 = arith.constant 0 : i32
    %c0_i32_1 = arith.constant 0 : i32
    return %c0_i32, %c0_i32_0 : i32, i32
  }
  func.func @transform_3(%arg0: i32) -> (i32, i32) {
    %c0_i32 = arith.constant 0 : i32
    %c0_i32_0 = arith.constant 0 : i32
    return %arg0, %c0_i32 : i32, i32
  }
}

module attributes {stable_mosaic.version = 11 : i64} {
  func.func @conv3x3_kernel(%arg0: i32, %arg1: memref<1x10x10x128xbf16, #tpu.memory_space<vmem>>, %arg2: memref<9x128x256xbf16, #tpu.memory_space<vmem>>, %arg3: memref<1x256xf32, #tpu.memory_space<vmem>>, %arg4: memref<1x8x8x256xbf16, #tpu.memory_space<vmem>>, %arg5: memref<8x256xf32, #tpu.memory_space<vmem>>, %arg6: memref<8x256xf32, #tpu.memory_space<vmem>>) attributes {dimension_semantics = [#tpu.dimension_semantics<parallel>], iteration_bounds = array<i64: 2>, scalar_prefetch = 0 : i64, scratch_operands = 0 : i64, tpu.core_type = #tpu.core_type<tc>, window_params = [{transform_indices = @transform_0, window_bounds = array<i64: 1, 10, 10, 128>}, {pipeline_mode = #tpu.pipeline_mode<synchronous>, transform_indices = @transform_1, window_bounds = array<i64: 9, 128, 256>}, {pipeline_mode = #tpu.pipeline_mode<synchronous>, transform_indices = @transform_2, window_bounds = array<i64: 1, 256>}, {transform_indices = @transform_3, window_bounds = array<i64: 1, 8, 8, 256>}, {transform_indices = @transform_4, window_bounds = array<i64: 8, 256>}, {transform_indices = @transform_5, window_bounds = array<i64: 8, 256>}]} {
    %c0 = arith.constant 0 : index
    %c0_0 = arith.constant 0 : index
    %c0_1 = arith.constant 0 : index
    %c0_2 = arith.constant 0 : index
    %0 = vector.load %arg1[%c0, %c0_0, %c0_1, %c0_2] : memref<1x10x10x128xbf16, #tpu.memory_space<vmem>>, vector<1x10x10x128xbf16>
    %c0_3 = arith.constant 0 : index
    %c0_4 = arith.constant 0 : index
    %c0_5 = arith.constant 0 : index
    %1 = vector.load %arg2[%c0_3, %c0_4, %c0_5] : memref<9x128x256xbf16, #tpu.memory_space<vmem>>, vector<9x128x256xbf16>
    %cst = arith.constant 0.000000e+00 : f32
    %2 = vector.broadcast %cst : f32 to vector<64x256xf32>
    %3 = vector.extract_strided_slice %0 {offsets = [0, 0, 0, 0], sizes = [1, 8, 8, 128], strides = [1, 1, 1, 1]} : vector<1x10x10x128xbf16> to vector<1x8x8x128xbf16>
    %4 = vector.shape_cast %3 : vector<1x8x8x128xbf16> to vector<8x8x128xbf16>
    %5 = vector.shape_cast %4 : vector<8x8x128xbf16> to vector<64x128xbf16>
    %6 = vector.extract_strided_slice %1 {offsets = [0, 0, 0], sizes = [1, 128, 256], strides = [1, 1, 1]} : vector<9x128x256xbf16> to vector<1x128x256xbf16>
    %7 = vector.shape_cast %6 : vector<1x128x256xbf16> to vector<128x256xbf16>
    %cst_6 = arith.constant dense<0.000000e+00> : vector<64x256xf32>
    %8 = tpu.matmul %5, %7, %cst_6 {dimension_numbers = #tpu.dot_dimension_numbers<[1], [0], [0], [1], [0, 0, 1, 1], [], []>} : vector<64x128xbf16>, vector<128x256xbf16>, vector<64x256xf32> -> vector<64x256xf32>
    %9 = arith.addf %2, %8 : vector<64x256xf32>
    %10 = vector.extract_strided_slice %0 {offsets = [0, 0, 1, 0], sizes = [1, 8, 8, 128], strides = [1, 1, 1, 1]} : vector<1x10x10x128xbf16> to vector<1x8x8x128xbf16>
    %11 = vector.shape_cast %10 : vector<1x8x8x128xbf16> to vector<8x8x128xbf16>
    %12 = vector.shape_cast %11 : vector<8x8x128xbf16> to vector<64x128xbf16>
    %13 = vector.extract_strided_slice %1 {offsets = [1, 0, 0], sizes = [1, 128, 256], strides = [1, 1, 1]} : vector<9x128x256xbf16> to vector<1x128x256xbf16>
    %14 = vector.shape_cast %13 : vector<1x128x256xbf16> to vector<128x256xbf16>
    %cst_7 = arith.constant dense<0.000000e+00> : vector<64x256xf32>
    %15 = tpu.matmul %12, %14, %cst_7 {dimension_numbers = #tpu.dot_dimension_numbers<[1], [0], [0], [1], [0, 0, 1, 1], [], []>} : vector<64x128xbf16>, vector<128x256xbf16>, vector<64x256xf32> -> vector<64x256xf32>
    %16 = arith.addf %9, %15 : vector<64x256xf32>
    %17 = vector.extract_strided_slice %0 {offsets = [0, 0, 2, 0], sizes = [1, 8, 8, 128], strides = [1, 1, 1, 1]} : vector<1x10x10x128xbf16> to vector<1x8x8x128xbf16>
    %18 = vector.shape_cast %17 : vector<1x8x8x128xbf16> to vector<8x8x128xbf16>
    %19 = vector.shape_cast %18 : vector<8x8x128xbf16> to vector<64x128xbf16>
    %20 = vector.extract_strided_slice %1 {offsets = [2, 0, 0], sizes = [1, 128, 256], strides = [1, 1, 1]} : vector<9x128x256xbf16> to vector<1x128x256xbf16>
    %21 = vector.shape_cast %20 : vector<1x128x256xbf16> to vector<128x256xbf16>
    %cst_8 = arith.constant dense<0.000000e+00> : vector<64x256xf32>
    %22 = tpu.matmul %19, %21, %cst_8 {dimension_numbers = #tpu.dot_dimension_numbers<[1], [0], [0], [1], [0, 0, 1, 1], [], []>} : vector<64x128xbf16>, vector<128x256xbf16>, vector<64x256xf32> -> vector<64x256xf32>
    %23 = arith.addf %16, %22 : vector<64x256xf32>
    %24 = vector.extract_strided_slice %0 {offsets = [0, 1, 0, 0], sizes = [1, 8, 8, 128], strides = [1, 1, 1, 1]} : vector<1x10x10x128xbf16> to vector<1x8x8x128xbf16>
    %25 = vector.shape_cast %24 : vector<1x8x8x128xbf16> to vector<8x8x128xbf16>
    %26 = vector.shape_cast %25 : vector<8x8x128xbf16> to vector<64x128xbf16>
    %27 = vector.extract_strided_slice %1 {offsets = [3, 0, 0], sizes = [1, 128, 256], strides = [1, 1, 1]} : vector<9x128x256xbf16> to vector<1x128x256xbf16>
    %28 = vector.shape_cast %27 : vector<1x128x256xbf16> to vector<128x256xbf16>
    %cst_9 = arith.constant dense<0.000000e+00> : vector<64x256xf32>
    %29 = tpu.matmul %26, %28, %cst_9 {dimension_numbers = #tpu.dot_dimension_numbers<[1], [0], [0], [1], [0, 0, 1, 1], [], []>} : vector<64x128xbf16>, vector<128x256xbf16>, vector<64x256xf32> -> vector<64x256xf32>
    %30 = arith.addf %23, %29 : vector<64x256xf32>
    %31 = vector.extract_strided_slice %0 {offsets = [0, 1, 1, 0], sizes = [1, 8, 8, 128], strides = [1, 1, 1, 1]} : vector<1x10x10x128xbf16> to vector<1x8x8x128xbf16>
    %32 = vector.shape_cast %31 : vector<1x8x8x128xbf16> to vector<8x8x128xbf16>
    %33 = vector.shape_cast %32 : vector<8x8x128xbf16> to vector<64x128xbf16>
    %34 = vector.extract_strided_slice %1 {offsets = [4, 0, 0], sizes = [1, 128, 256], strides = [1, 1, 1]} : vector<9x128x256xbf16> to vector<1x128x256xbf16>
    %35 = vector.shape_cast %34 : vector<1x128x256xbf16> to vector<128x256xbf16>
    %cst_10 = arith.constant dense<0.000000e+00> : vector<64x256xf32>
    %36 = tpu.matmul %33, %35, %cst_10 {dimension_numbers = #tpu.dot_dimension_numbers<[1], [0], [0], [1], [0, 0, 1, 1], [], []>} : vector<64x128xbf16>, vector<128x256xbf16>, vector<64x256xf32> -> vector<64x256xf32>
    %37 = arith.addf %30, %36 : vector<64x256xf32>
    %38 = vector.extract_strided_slice %0 {offsets = [0, 1, 2, 0], sizes = [1, 8, 8, 128], strides = [1, 1, 1, 1]} : vector<1x10x10x128xbf16> to vector<1x8x8x128xbf16>
    %39 = vector.shape_cast %38 : vector<1x8x8x128xbf16> to vector<8x8x128xbf16>
    %40 = vector.shape_cast %39 : vector<8x8x128xbf16> to vector<64x128xbf16>
    %41 = vector.extract_strided_slice %1 {offsets = [5, 0, 0], sizes = [1, 128, 256], strides = [1, 1, 1]} : vector<9x128x256xbf16> to vector<1x128x256xbf16>
    %42 = vector.shape_cast %41 : vector<1x128x256xbf16> to vector<128x256xbf16>
    %cst_11 = arith.constant dense<0.000000e+00> : vector<64x256xf32>
    %43 = tpu.matmul %40, %42, %cst_11 {dimension_numbers = #tpu.dot_dimension_numbers<[1], [0], [0], [1], [0, 0, 1, 1], [], []>} : vector<64x128xbf16>, vector<128x256xbf16>, vector<64x256xf32> -> vector<64x256xf32>
    %44 = arith.addf %37, %43 : vector<64x256xf32>
    %45 = vector.extract_strided_slice %0 {offsets = [0, 2, 0, 0], sizes = [1, 8, 8, 128], strides = [1, 1, 1, 1]} : vector<1x10x10x128xbf16> to vector<1x8x8x128xbf16>
    %46 = vector.shape_cast %45 : vector<1x8x8x128xbf16> to vector<8x8x128xbf16>
    %47 = vector.shape_cast %46 : vector<8x8x128xbf16> to vector<64x128xbf16>
    %48 = vector.extract_strided_slice %1 {offsets = [6, 0, 0], sizes = [1, 128, 256], strides = [1, 1, 1]} : vector<9x128x256xbf16> to vector<1x128x256xbf16>
    %49 = vector.shape_cast %48 : vector<1x128x256xbf16> to vector<128x256xbf16>
    %cst_12 = arith.constant dense<0.000000e+00> : vector<64x256xf32>
    %50 = tpu.matmul %47, %49, %cst_12 {dimension_numbers = #tpu.dot_dimension_numbers<[1], [0], [0], [1], [0, 0, 1, 1], [], []>} : vector<64x128xbf16>, vector<128x256xbf16>, vector<64x256xf32> -> vector<64x256xf32>
    %51 = arith.addf %44, %50 : vector<64x256xf32>
    %52 = vector.extract_strided_slice %0 {offsets = [0, 2, 1, 0], sizes = [1, 8, 8, 128], strides = [1, 1, 1, 1]} : vector<1x10x10x128xbf16> to vector<1x8x8x128xbf16>
    %53 = vector.shape_cast %52 : vector<1x8x8x128xbf16> to vector<8x8x128xbf16>
    %54 = vector.shape_cast %53 : vector<8x8x128xbf16> to vector<64x128xbf16>
    %55 = vector.extract_strided_slice %1 {offsets = [7, 0, 0], sizes = [1, 128, 256], strides = [1, 1, 1]} : vector<9x128x256xbf16> to vector<1x128x256xbf16>
    %56 = vector.shape_cast %55 : vector<1x128x256xbf16> to vector<128x256xbf16>
    %cst_13 = arith.constant dense<0.000000e+00> : vector<64x256xf32>
    %57 = tpu.matmul %54, %56, %cst_13 {dimension_numbers = #tpu.dot_dimension_numbers<[1], [0], [0], [1], [0, 0, 1, 1], [], []>} : vector<64x128xbf16>, vector<128x256xbf16>, vector<64x256xf32> -> vector<64x256xf32>
    %58 = arith.addf %51, %57 : vector<64x256xf32>
    %59 = vector.extract_strided_slice %0 {offsets = [0, 2, 2, 0], sizes = [1, 8, 8, 128], strides = [1, 1, 1, 1]} : vector<1x10x10x128xbf16> to vector<1x8x8x128xbf16>
    %60 = vector.shape_cast %59 : vector<1x8x8x128xbf16> to vector<8x8x128xbf16>
    %61 = vector.shape_cast %60 : vector<8x8x128xbf16> to vector<64x128xbf16>
    %62 = vector.extract_strided_slice %1 {offsets = [8, 0, 0], sizes = [1, 128, 256], strides = [1, 1, 1]} : vector<9x128x256xbf16> to vector<1x128x256xbf16>
    %63 = vector.shape_cast %62 : vector<1x128x256xbf16> to vector<128x256xbf16>
    %cst_14 = arith.constant dense<0.000000e+00> : vector<64x256xf32>
    %64 = tpu.matmul %61, %63, %cst_14 {dimension_numbers = #tpu.dot_dimension_numbers<[1], [0], [0], [1], [0, 0, 1, 1], [], []>} : vector<64x128xbf16>, vector<128x256xbf16>, vector<64x256xf32> -> vector<64x256xf32>
    %65 = arith.addf %58, %64 : vector<64x256xf32>
    %66 = vector.shape_cast %65 : vector<64x256xf32> to vector<8x8x256xf32>
    %cst_15 = arith.constant dense<0.000000e+00> : vector<8x256xf32>
    %67 = vector.multi_reduction <add>, %66, %cst_15 [0] : vector<8x8x256xf32> to vector<8x256xf32>
    %c0_16 = arith.constant 0 : index
    %c0_17 = arith.constant 0 : index
    %68 = vector.load %arg5[%c0_16, %c0_17] : memref<8x256xf32, #tpu.memory_space<vmem>>, vector<8x256xf32>
    tpu.vector_store %arg5[%c0_16, %c0_17], %67 {strides = array<i32>} : memref<8x256xf32, #tpu.memory_space<vmem>>, vector<8x256xf32>,
    %69 = arith.mulf %66, %66 : vector<8x8x256xf32>
    %cst_18 = arith.constant dense<0.000000e+00> : vector<8x256xf32>
    %70 = vector.multi_reduction <add>, %69, %cst_18 [0] : vector<8x8x256xf32> to vector<8x256xf32>
    %c0_19 = arith.constant 0 : index
    %c0_20 = arith.constant 0 : index
    %71 = vector.load %arg6[%c0_19, %c0_20] : memref<8x256xf32, #tpu.memory_space<vmem>>, vector<8x256xf32>
    tpu.vector_store %arg6[%c0_19, %c0_20], %70 {strides = array<i32>} : memref<8x256xf32, #tpu.memory_space<vmem>>, vector<8x256xf32>,
    %c0_21 = arith.constant 0 : index
    %c0_22 = arith.constant 0 : index
    %72 = vector.load %arg3[%c0_21, %c0_22] : memref<1x256xf32, #tpu.memory_space<vmem>>, vector<1x256xf32>
    %73 = vector.broadcast %72 : vector<1x256xf32> to vector<64x256xf32>
    %74 = arith.addf %65, %73 : vector<64x256xf32>
    %75 = vector.shape_cast %74 : vector<64x256xf32> to vector<1x8x8x256xf32>
    %76 = arith.truncf %75 : vector<1x8x8x256xf32> to vector<1x8x8x256xbf16>
    %c0_23 = arith.constant 0 : index
    %c0_24 = arith.constant 0 : index
    %c0_25 = arith.constant 0 : index
    %c0_26 = arith.constant 0 : index
    %77 = vector.load %arg4[%c0_23, %c0_24, %c0_25, %c0_26] : memref<1x8x8x256xbf16, #tpu.memory_space<vmem>>, vector<1x8x8x256xbf16>
    tpu.vector_store %arg4[%c0_23, %c0_24, %c0_25, %c0_26], %76 {strides = array<i32>} : memref<1x8x8x256xbf16, #tpu.memory_space<vmem>>, vector<1x8x8x256xbf16>,
    return
  }
  func.func @transform_0(%arg0: i32) -> (i32, i32, i32, i32) {
    %c0_i32 = arith.constant 0 : i32
    %c0_i32_0 = arith.constant 0 : i32
    %c0_i32_1 = arith.constant 0 : i32
    %c0_i32_2 = arith.constant 0 : i32
    return %arg0, %c0_i32, %c0_i32_0, %c0_i32_1 : i32, i32, i32, i32
  }
  func.func @transform_1(%arg0: i32) -> (i32, i32, i32) {
    %c0_i32 = arith.constant 0 : i32
    %c0_i32_0 = arith.constant 0 : i32
    %c0_i32_1 = arith.constant 0 : i32
    %c0_i32_2 = arith.constant 0 : i32
    return %c0_i32, %c0_i32_0, %c0_i32_1 : i32, i32, i32
  }
  func.func @transform_2(%arg0: i32) -> (i32, i32) {
    %c0_i32 = arith.constant 0 : i32
    %c0_i32_0 = arith.constant 0 : i32
    %c0_i32_1 = arith.constant 0 : i32
    return %c0_i32, %c0_i32_0 : i32, i32
  }
  func.func @transform_3(%arg0: i32) -> (i32, i32, i32, i32) {
    %c0_i32 = arith.constant 0 : i32
    %c0_i32_0 = arith.constant 0 : i32
    %c0_i32_1 = arith.constant 0 : i32
    %c0_i32_2 = arith.constant 0 : i32
    return %arg0, %c0_i32, %c0_i32_0, %c0_i32_1 : i32, i32, i32, i32
  }
  func.func @transform_4(%arg0: i32) -> (i32, i32) {
    %c0_i32 = arith.constant 0 : i32
    %c0_i32_0 = arith.constant 0 : i32
    return %arg0, %c0_i32 : i32, i32
  }
  func.func @transform_5(%arg0: i32) -> (i32, i32) {
    %c0_i32 = arith.constant 0 : i32
    %c0_i32_0 = arith.constant 0 : i32
    return %arg0, %c0_i32 : i32, i32
  }
}

module attributes {stable_mosaic.version = 11 : i64} {
  func.func @scale_shift_act_kernel(%arg0: i32, %arg1: memref<128x256xbf16, #tpu.memory_space<vmem>>, %arg2: memref<1x256xf32, #tpu.memory_space<vmem>>, %arg3: memref<1x256xf32, #tpu.memory_space<vmem>>, %arg4: memref<128x256xbf16, #tpu.memory_space<vmem>>) attributes {dimension_semantics = [#tpu.dimension_semantics<parallel>], iteration_bounds = array<i64: 1>, scalar_prefetch = 0 : i64, scratch_operands = 0 : i64, tpu.core_type = #tpu.core_type<tc>, window_params = [{transform_indices = @transform_0, window_bounds = array<i64: 128, 256>}, {pipeline_mode = #tpu.pipeline_mode<synchronous>, transform_indices = @transform_1, window_bounds = array<i64: 1, 256>}, {pipeline_mode = #tpu.pipeline_mode<synchronous>, transform_indices = @transform_2, window_bounds = array<i64: 1, 256>}, {transform_indices = @transform_3, window_bounds = array<i64: 128, 256>}]} {
    %c0 = arith.constant 0 : index
    %c0_0 = arith.constant 0 : index
    %0 = vector.load %arg1[%c0, %c0_0] : memref<128x256xbf16, #tpu.memory_space<vmem>>, vector<128x256xbf16>
    %1 = arith.extf %0 : vector<128x256xbf16> to vector<128x256xf32>
    %c0_1 = arith.constant 0 : index
    %c0_2 = arith.constant 0 : index
    %2 = vector.load %arg2[%c0_1, %c0_2] : memref<1x256xf32, #tpu.memory_space<vmem>>, vector<1x256xf32>
    %3 = vector.broadcast %2 : vector<1x256xf32> to vector<128x256xf32>
    %4 = arith.mulf %1, %3 : vector<128x256xf32>
    %c0_3 = arith.constant 0 : index
    %c0_4 = arith.constant 0 : index
    %5 = vector.load %arg3[%c0_3, %c0_4] : memref<1x256xf32, #tpu.memory_space<vmem>>, vector<1x256xf32>
    %6 = vector.broadcast %5 : vector<1x256xf32> to vector<128x256xf32>
    %7 = arith.addf %4, %6 : vector<128x256xf32>
    %cst = arith.constant 0.000000e+00 : f32
    %8 = vector.broadcast %cst : f32 to vector<128x256xf32>
    %9 = arith.cmpf oge, %7, %8 : vector<128x256xf32>
    %cst_5 = arith.constant 2.000000e-01 : f32
    %10 = vector.broadcast %cst_5 : f32 to vector<128x256xf32>
    %11 = arith.mulf %10, %7 : vector<128x256xf32>
    %12 = arith.select %9, %7, %11 : vector<128x256xi1>, vector<128x256xf32>
    %13 = arith.truncf %12 : vector<128x256xf32> to vector<128x256xbf16>
    %c0_6 = arith.constant 0 : index
    %c0_7 = arith.constant 0 : index
    %14 = vector.load %arg4[%c0_6, %c0_7] : memref<128x256xbf16, #tpu.memory_space<vmem>>, vector<128x256xbf16>
    tpu.vector_store %arg4[%c0_6, %c0_7], %13 {strides = array<i32>} : memref<128x256xbf16, #tpu.memory_space<vmem>>, vector<128x256xbf16>,
    return
  }
  func.func @transform_0(%arg0: i32) -> (i32, i32) {
    %c0_i32 = arith.constant 0 : i32
    %c0_i32_0 = arith.constant 0 : i32
    return %arg0, %c0_i32 : i32, i32
  }
  func.func @transform_1(%arg0: i32) -> (i32, i32) {
    %c0_i32 = arith.constant 0 : i32
    %c0_i32_0 = arith.constant 0 : i32
    %c0_i32_1 = arith.constant 0 : i32
    return %c0_i32, %c0_i32_0 : i32, i32
  }
  func.func @transform_2(%arg0: i32) -> (i32, i32) {
    %c0_i32 = arith.constant 0 : i32
    %c0_i32_0 = arith.constant 0 : i32
    %c0_i32_1 = arith.constant 0 : i32
    return %c0_i32, %c0_i32_0 : i32, i32
  }
  func.func @transform_3(%arg0: i32) -> (i32, i32) {
    %c0_i32 = arith.constant 0 : i32
    %c0_i32_0 = arith.constant 0 : i32
    return %arg0, %c0_i32 : i32, i32
  }
}

</mosaic_0001>

<bundles_post_ra>
// kernel: tile.19
= control target key start
LH: loop header
LB: loop body
LE: loop exit
PB: predicated region body
PF: predicated region fallthrough
CT: control target
= control target key end

     0   :  { %s22_s0 = inlined_call_operand.vmem [shape: f32[64], index: 0, kind: input, shape index: {}]   ;;  %s23_s1 = inlined_call_operand.vmem [shape: f32[2,64], index: 1, kind: output, shape index: {}]  }
   0x1   :  { %v4_v0 = vld [vmem:[%s22_s0] ss:$0 sm:$0xff] }
   0x2   :  { %5 = vst [vmem:[%s23_s1] sm:$0x3] %v4_v0 }

// kernel: tile.20
= control target key start
LH: loop header
LB: loop body
LE: loop exit
PB: predicated region body
PF: predicated region fallthrough
CT: control target
= control target key end

     0   :  { %vm7_vm0 = vcmask 523264   ;;  %vm13_vm1 = vcmask 1048064   ;;  %s39_s0 = inlined_call_operand.vmem [shape: f32[2,64], index: 0, kind: input, shape index: {}]   ;;  %s40_s1 = inlined_call_operand.vmem [shape: f32[1,128], index: 1, kind: output, shape index: {}]  }
   0x1   :  { %v4_v0 = vld [vmem:[%s39_s0] sm:$0x3]  ;;  %s22_s0 = smov 64  }
   0x2   :  { %5 = vst [vmem:[#allocation1] sm:$0x3] %v4_v0 }
   0x9   :  { %v10_v1 = vld [vmem:[#allocation1 + $0x1] sm:$0x1]   ;;  %v6_v2 = vld [vmem:[#allocation1] sm:$0x1]  }
   0xa   :  { %11 = vrot.lane.b32.xlu0 %v10_v1, %s22_s0  ;;  %8 = vst.msk [vmem:[#allocation0] sm:$0x1] %vm7_vm0, %v6_v2  }
  0x7c   :  { %v12_v3 = vpop.permute.xlu0 %11  }
  0x7d   :  { %14 = vst.msk [vmem:[#allocation0] sm:$0x1] %vm13_vm1, %v12_v3  }
  0x84   :  { %v18_v4 = vld [vmem:[#allocation0] sm:$0x1] }
  0x85   :  { %20 = vst [vmem:[%s40_s1] sm:$0x1] %v18_v4 }

// kernel: discriminator_forward.8
= control target key start
LH: loop header
LB: loop body
LE: loop exit
PB: predicated region body
PF: predicated region fallthrough
CT: control target
= control target key end

     0   :  { %s5733_s18 = smov 0   ;;  %s7100_s0 = inlined_call_operand.vmem [shape: bf16[2,68,17,64], index: 0, kind: input, shape index: {}]   ;;  %s7101_s1 = inlined_call_operand.vmem [shape: bf16[9,64,64], index: 1, kind: input, shape index: {}]   ;;  %s7102_s2 = inlined_call_operand.vmem [shape: f32[1,64], index: 2, kind: input, shape index: {}]   ;;  %s7103_s3 = inlined_call_operand.vmem [shape: bf16[2,16,16,64], index: 3, kind: output, shape index: {0}]   ;;  %s7104_s4 = inlined_call_operand.vmem [shape: f32[16,64], index: 4, kind: output, shape index: {1}]   ;;  %s7105_s5 = inlined_call_operand.vmem [shape: f32[16,64], index: 5, kind: output, shape index: {2}]  }
   0x1 LB: > { %s4372_s19 = sadd.s32 4294967295, %s5701_s18   ;;  %p4376_p0 = scmp.ge.s32.totalorder %s5701_s18, 1  ;;  %s5701_s18 = sphi %s5733_s18, %s16_s18  }
   0x2   : > { %p192_p1 = scmp.lt.s32.totalorder %s5701_s18, 3 }
   0x4   : > { %p193_p2 = pnand %p4376_p0, %p192_p1 }
   0x6   : > { %196 = sbr.rel (%p193_p2) target bundleno = 544 (0x220), region = 32 }
   0xd   : > { %v5542_v0 = vld [vmem:[%s7101_s1 + $0x20] sm:$0xff]   ;;  %p228_p3 = scmp.lt.s32.totalorder %s4372_s19, 1  ;;  %v5544_v2 = vld [vmem:[%s7101_s1 + $0x28] sm:$0xff]   ;;  %v5546_v4 = vld [vmem:[%s7101_s1 + $0x30] sm:$0xff]   ;;  %vm588_vm0 = vcmask 523264   ;;  %vm4222_vm4 = vcmask 519168  }
   0xe   : > { %v5543_v1 = vld [vmem:[%s7101_s1 + $0x80] sm:$0xff]   ;;  %4909 = vmatprep.subr.bf16.mxu1 %v5542_v0  ;;  %v5545_v3 = vld [vmem:[%s7101_s1 + $0x88] sm:$0xff]   ;;  %v5547_v5 = vld [vmem:[%s7101_s1 + $0x90] sm:$0xff]   ;;  %vm1111_vm1 = vsmask.f32 3328 }
   0xf   : > { %s7154_s19 = smov (!%p228_p3, %s4372_s19), 1  ;;  %5069 = vmatprep.subr.bf16.mxu0 %v5543_v1  ;;  %4910 = vmatpush3.bf16.msra.mxu1 %v5542_v0  ;;  %v5548_v6 = vld [vmem:[%s7101_s1 + $0x38] sm:$0xff]   ;;  %v5553_v10 = vld [vmem:[%s7101_s1] sm:$0xff]   ;;  %v5560_v16 = vld [vmem:[%s7101_s1 + $0xa8] sm:$0xff]   ;;  %vm1112_vm2 = vsmask.f32 7440 }
  0x10   : > { %5070 = vmatpush3.bf16.msra.mxu0 %v5543_v1  ;;  %4911 = vmatprep.subr.bf16.mxu1 %v5544_v2  ;;  %s5533_s30 = smul.u32 816, %s7154_s19  ;;  %v5549_v7 = vld [vmem:[%s7101_s1 + $0x98] sm:$0xff]   ;;  %v5555_v11 = vld [vmem:[%s7101_s1 + $0xa0] sm:$0xff]   ;;  %v5564_v20 = vld [vmem:[%s7101_s1 + $0x8] sm:$0xff]   ;;  %s4696_s14 = sshll.u32 %s7154_s19, 7 }
  0x11   : > { %5071 = vmatprep.subr.bf16.mxu0 %v5545_v3  ;;  %v5566_v22 = vld [vmem:[%s7101_s1 + $0xb0] sm:$0xff]   ;;  %v5571_v26 = vld [vmem:[%s7101_s1 + $0xb8] sm:$0xff]   ;;  %vm5832_vm3 = vmor %vm1111_vm1, %vm1112_vm2  ;;  %s6869_s17 = scalar_lea.vmem %s7103_s3, %s4696_s14  ;;  %s4380_s20 = sshll.u32 %s7154_s19, 3 }
  0x12   : > { %s5768_s12 = scalar_lea.vmem %s7100_s0, %s5533_s30  ;;  %v5574_v41 = vld [vmem:[%s7101_s1 + $0x10] sm:$0xff]   ;;  %v5839_v53 = vld [vmem:[%s7101_s1 + $0xc0] sm:$0xff]   ;;  %s241_s23 = scalar_lea.vmem %s7104_s4, %s4380_s20 }
  0x13   : > { %4912 = vmatpush3.bf16.msra.mxu1 %v5544_v2  ;;  %v5550_v8 = vld [vmem:[%s5768_s12 + $0xcc] sm:$0xff]   ;;  %v5551_v9 = vld [vmem:[%s5768_s12 + $0x264] sm:$0xff]   ;;  %v5552_v12 = vld [vmem:[%s5768_s12 + $0xd8] sm:$0xff]   ;;  %s245_s25 = scalar_lea.vmem %s7105_s5, %s4380_s20 }
  0x14   : > { %5072 = vmatpush3.bf16.msra.mxu0 %v5545_v3  ;;  %4913 = vmatprep.subr.bf16.mxu1 %v5546_v4  ;;  %v5554_v13 = vld [vmem:[%s5768_s12 + $0x270] sm:$0xff]   ;;  %v5556_v14 = vld [vmem:[%s5768_s12 + $0xe4] sm:$0xff]   ;;  %v5557_v15 = vld [vmem:[%s5768_s12 + $0x27c] sm:$0xff]  }
  0x15   : > { %5073 = vmatprep.subr.bf16.mxu0 %v5547_v5  ;;  %4917 = vmatprep.mubr.msk.bf16.mxu1 %vm588_vm0, %v5550_v8  ;;  %v5558_v17 = vld [vmem:[%s5768_s12 + $0xf0] sm:$0xff]   ;;  %v5559_v18 = vld [vmem:[%s5768_s12 + $0x288] sm:$0xff]   ;;  %v5561_v19 = vld [vmem:[%s5768_s12 + $0xfc] sm:$0xff]  }
  0x16   : > { %5077 = vmatprep.mubr.msk.bf16.mxu0 %vm588_vm0, %v5551_v9  ;;  %v5562_v21 = vld [vmem:[%s5768_s12 + $0x294] sm:$0xff]   ;;  %v5563_v23 = vld [vmem:[%s5768_s12 + $0x108] sm:$0xff]   ;;  %v5565_v24 = vld [vmem:[%s5768_s12 + $0x2a0] sm:$0xff]  }
  0x17   : > { %4914 = vmatpush3.bf16.msra.mxu1 %v5546_v4  ;;  %v5567_v25 = vld [vmem:[%s5768_s12 + $0x114] sm:$0xff]   ;;  %v5568_v27 = vld [vmem:[%s5768_s12 + $0x2ac] sm:$0xff]   ;;  %v333_v29 = vld [vmem:[%s5768_s12 + $0x19c] sm:$0xf] }
  0x18   : > { %5074 = vmatpush3.bf16.msra.mxu0 %v5547_v5  ;;  %4915 = vmatprep.subr.bf16.mxu1 %v5548_v6  ;;  %v332_v28 = vld [vmem:[%s5768_s12 + $0x198] sm:$0xf]  ;;  %v334_v30 = vld [vmem:[%s5768_s12 + $0x1a0] sm:$0x1]  ;;  %v2511_v33 = vshll.u32 %v333_v29, 16  ;;  %v2515_v34 = vshrl.u32 %v333_v29, 16 }
  0x19   : > { %5075 = vmatprep.subr.bf16.mxu0 %v5549_v7  ;;  %v2502_v31 = vshrl.u32 %v332_v28, 16  ;;  %v2505_v32 = vshll.u32 %v332_v28, 16  ;;  %v2521_v35 = vshll.u32 %v334_v30, 16  ;;  %v5569_v42 = vld [vmem:[%s5768_s12 + $0x120] sm:$0xff]   ;;  %v336_v45 = vld [vmem:[%s5768_s12 + $0x1a8] sm:$0xf] }
  0x1a   : > { %v2513_v38 = vrot.slane %v2511_v33, 5  ;;  %v2517_v39 = vrot.slane %v2515_v34, 4  ;;  %v335_v44 = vld [vmem:[%s5768_s12 + $0x1a4] sm:$0xf]  ;;  %v337_v46 = vld [vmem:[%s5768_s12 + $0x1ac] sm:$0x1] }
  0x1b   : > { %4916 = vmatpush3.bf16.msra.mxu1 %v5548_v6  ;;  %v2504_v36 = vrot.slane %v2502_v31, 4  ;;  %v2507_v37 = vrot.slane %v2505_v32, 5  ;;  %v2523_v40 = vrot.slane %v2521_v35, 5  ;;  %v5570_v47 = vld [vmem:[%s5768_s12 + $0x2b8] sm:$0xff]   ;;  %v2526_v50 = vshrl.u32 %v335_v44, 16  ;;  %v5572_v54 = vld [vmem:[%s5768_s12 + $0x12c] sm:$0xff]  }
  0x1c   : > { %5076 = vmatpush3.bf16.msra.mxu0 %v5549_v7  ;;  %4949 = vmatprep.subr.bf16.mxu1 %v5553_v10  ;;  %v2518_v49 = vor.u32 %v2517_v39, %v2513_v38  ;;  %v2529_v51 = vshll.u32 %v335_v44, 16  ;;  %v2535_v52 = vshll.u32 %v336_v45, 16  ;;  %v2539_v56 = vshrl.u32 %v336_v45, 16  ;;  %v338_v1 = vld [vmem:[%s5768_s12 + $0x1b0] sm:$0xf] }
  0x1d   : > { %5109 = vmatprep.subr.bf16.mxu0 %v5555_v11  ;;  %v2508_v43 = vor.u32 %v2507_v37, %v2504_v36  ;;  %v2545_v57 = vshll.u32 %v337_v46, 16  ;;  %v2528_v59 = vrot.slane %v2526_v50, 4  ;;  %v339_v4 = vld [vmem:[%s5768_s12 + $0x1b4] sm:$0xf]  ;;  %v340_v5 = vld [vmem:[%s5768_s12 + $0x1b8] sm:$0x1] }
  0x1e   : > { %4918 = vmatmul.mubr.msk.bf16.vlgmr.msra.gmra.mrb[0].mxu1 %vm588_vm0, %v5552_v12  ;;  %v2519_v58 = vrot.slane %v2518_v49, 4  ;;  %v2531_v60 = vrot.slane %v2529_v51, 5  ;;  %v2537_v61 = vrot.slane %v2535_v52, 5  ;;  %v2541_v63 = vrot.slane %v2539_v56, 4  ;;  %v344_v36 = vld [vmem:[%s5768_s12 + $0x1c8] sm:$0xf] }
  0x1f   : > { %5078 = vmatmul.mubr.msk.bf16.vlgmr.msra.gmra.mrb[0].mxu0 %vm588_vm0, %v5554_v13  ;;  %4950 = vmatpush3.bf16.msra.mxu1 %v5553_v10  ;;  %v2509_v55 = vrot.slane %v2508_v43, 4  ;;  %v2547_v0 = vrot.slane %v2545_v57, 5  ;;  %v2550_v6 = vshrl.u32 %v338_v1, 16  ;;  %v2553_v7 = vshll.u32 %v338_v1, 16  ;;  %v5580_v37 = vld [vmem:[%s7101_s1 + $0x18] sm:$0xff]   ;;  %v5581_v49 = vld [vmem:[%s7101_s1 + $0xc8] sm:$0xff]  }
  0x20   : > { %5110 = vmatpush3.bf16.msra.mxu0 %v5555_v11  ;;  %4921 = vmatprep.mubr.msk.bf16.mxu1 %vm588_vm0, %v5556_v14  ;;  %v2524_v2 = vsel %vm5832_vm3, %v2519_v58, %v2523_v40  ;;  %v2532_v3 = vor.u32 %v2531_v60, %v2528_v59  ;;  %v2542_v9 = vor.u32 %v2541_v63, %v2537_v61  ;;  %v2559_v10 = vshll.u32 %v339_v4, 16  ;;  %v346_v45 = vld [vmem:[%s5768_s12 + $0x1d0] sm:$0x1]  ;;  %v347_v63 = vld [vmem:[%s5768_s12 + $0x1d4] sm:$0xf] }
  0x21   : > { %5081 = vmatprep.mubr.msk.bf16.mxu0 %vm588_vm0, %v5557_v15  ;;  %5111 = vmatprep.subr.bf16.mxu0 %v5560_v16  ;;  %v2514_v62 = vsel %vm5832_vm3, %v2509_v55, %v2513_v38  ;;  %v2563_v11 = vshrl.u32 %v339_v4, 16  ;;  %v2552_v13 = vrot.slane %v2550_v6, 4  ;;  %v2555_v14 = vrot.slane %v2553_v7, 5 }
  0x22   : > { %4951 = vmatprep.subr.bf16.mxu1 %v5564_v20  ;;  %v4562_v8 = vcombine.low %v2514_v62, %v2524_v2  ;;  %v2533_v12 = vrot.slane %v2532_v3, 4  ;;  %v2569_v15 = vshll.u32 %v340_v5, 16  ;;  %v2598_v46 = vshrl.u32 %v344_v36, 16  ;;  %v348_v2 = vld [vmem:[%s5768_s12 + $0x1d8] sm:$0xf]  ;;  %v5577_v5 = vld [vmem:[%s5768_s12 + $0x150] sm:$0xff]  }
  0x23   : > { %4952 = vmatpush3.bf16.msra.mxu1 %v5564_v20  ;;  %v341_v20 = vld [vmem:[%s5768_s12 + $0x1bc] sm:$0xf]  ;;  %v2617_v62 = vshll.u32 %v346_v45, 16  ;;  %v2622_v4 = vshrl.u32 %v347_v63, 16 }
  0x24   : > { %5112 = vmatpush3.bf16.msra.mxu0 %v5560_v16  ;;  %4953 = vmatprep.subr.bf16.mxu1 %v5574_v41  ;;  %v5573_v16 = vld [vmem:[%s5768_s12 + $0x138] sm:$0xff]   ;;  %v2577_v30 = vshll.u32 %v341_v20, 16  ;;  %v2600_v57 = vrot.slane %v2598_v46, 4 }
  0x25   : > { %5113 = vmatprep.subr.bf16.mxu0 %v5566_v22  ;;  %v349_v3 = vld [vmem:[%s5768_s12 + $0x1dc] sm:$0x1]  ;;  %v2619_v7 = vrot.slane %v2617_v62, 5 }
  0x26   : > { %4922 = vmatmul.mubr.msk.bf16.gmra.mrb[4].mxu1 %vm588_vm0, %v5558_v17  ;;  %v2543_v17 = vrot.slane %v2542_v9, 4  ;;  %v2579_v39 = vrot.slane %v2577_v30, 5 }
  0x27   : > { %5082 = vmatmul.mubr.msk.bf16.gmra.mrb[4].mxu0 %vm588_vm0, %v5559_v18  ;;  %4925 = vmatprep.mubr.msk.bf16.mxu1 %vm588_vm0, %v5561_v19  ;;  %v2561_v18 = vrot.slane %v2559_v10, 5  ;;  %v2565_v19 = vrot.slane %v2563_v11, 4  ;;  %v5578_v10 = vld [vmem:[%s5768_s12 + $0x15c] sm:$0xff]  }
  0x28   : > { %5085 = vmatprep.mubr.msk.bf16.mxu0 %vm588_vm0, %v5562_v21  ;;  %5114 = vmatpush3.bf16.msra.mxu0 %v5566_v22  ;;  %v2538_v21 = vsel %vm5832_vm3, %v2533_v12, %v2537_v61  ;;  %v5576_v22 = vld [vmem:[%s5768_s12 + $0x144] sm:$0xff]   ;;  %v2548_v28 = vsel %vm5832_vm3, %v2543_v17, %v2547_v0  ;;  %v2624_v12 = vrot.slane %v2622_v4, 4  ;;  %v2635_v17 = vshrl.u32 %v348_v2, 16 }
  0x29   : > { %5115 = vmatprep.subr.bf16.mxu0 %v5571_v26  ;;  %4954 = vmatpush3.bf16.msra.mxu1 %v5574_v41  ;;  %v2566_v29 = vor.u32 %v2565_v19, %v2561_v18  ;;  %v4563_v32 = vcombine.low %v2538_v21, %v2548_v28  ;;  %v350_v21 = vld [vmem:[%s5768_s12 + $0x1e0] sm:$0xf] }
  0x2a   : > { %4955 = vmatprep.subr.bf16.mxu1 %v5580_v37  ;;  %v5899_v28 = vld [vmem:[%s7101_s1 + $0x40] sm:$0xff]   ;;  %v2649_v30 = vshll.u32 %v350_v21, 16 }
  0x2b   : > { %v2567_v38 = vrot.slane %v2566_v29, 4 }
  0x2c   : > { %5116 = vmatpush3.bf16.msra.mxu0 %v5571_v26  ;;  %v343_v26 = vld [vmem:[%s5768_s12 + $0x1c4] sm:$0x1] }
  0x2d   : > { %5149 = vmatprep.subr.bf16.mxu0 %v5839_v53  ;;  %v2593_v41 = vshll.u32 %v343_v26, 16  ;;  %4956 = vmatpush3.bf16.msra.mxu1 %v5580_v37  ;;  %v352_v26 = vld [vmem:[%s5768_s12 + $0x1e8] sm:$0x1]  ;;  %v353_v37 = vld [vmem:[%s5768_s12 + $0x1ec] sm:$0xf] }
  0x2e   : > { %4926 = vmatmul.mubr.msk.bf16.gmra.mrb[8].mxu1 %vm588_vm0, %v5563_v23  ;;  %v2556_v23 = vor.u32 %v2555_v14, %v2552_v13  ;;  %v2631_v13 = vshll.u32 %v348_v2, 16  ;;  %4989 = vmatprep.subr.bf16.mxu1 %v5899_v28 }
  0x2f   : > { %5086 = vmatmul.mubr.msk.bf16.gmra.mrb[8].mxu0 %vm588_vm0, %v5565_v24  ;;  %4929 = vmatprep.mubr.msk.bf16.mxu1 %vm588_vm0, %v5567_v25  ;;  %v2571_v24 = vrot.slane %v2569_v15, 5  ;;  %v342_v25 = vld [vmem:[%s5768_s12 + $0x1c0] sm:$0xf]  ;;  %v2595_v52 = vrot.slane %v2593_v41, 5 }
  0x30   : > { %5089 = vmatprep.mubr.msk.bf16.mxu0 %vm588_vm0, %v5568_v27  ;;  %v2574_v27 = vshrl.u32 %v341_v20, 16  ;;  %v2583_v31 = vshll.u32 %v342_v25, 16  ;;  %v2557_v33 = vrot.slane %v2556_v23, 4  ;;  %v2587_v35 = vshrl.u32 %v342_v25, 16 }
  0x31   : > { %v2572_v50 = vsel %vm5832_vm3, %v2567_v38, %v2571_v24  ;;  %v2633_v19 = vrot.slane %v2631_v13, 5  ;;  %v2641_v20 = vshll.u32 %v349_v3, 16  ;;  %v2637_v25 = vrot.slane %v2635_v17, 4 }
  0x32   : > { %v2576_v34 = vrot.slane %v2574_v27, 4  ;;  %v2585_v40 = vrot.slane %v2583_v31, 5  ;;  %v2562_v43 = vsel %vm5832_vm3, %v2557_v33, %v2561_v18  ;;  %v2589_v44 = vrot.slane %v2587_v35, 4 }
  0x33   : > { %v4564_v55 = vcombine.low %v2562_v43, %v2572_v50  ;;  %v2646_v27 = vshrl.u32 %v350_v21, 16  ;;  %v2643_v29 = vrot.slane %v2641_v20, 5  ;;  %v2638_v35 = vor.u32 %v2637_v25, %v2633_v19  ;;  %v5587_v43 = vld [vmem:[%s7101_s1 + $0xd0] sm:$0xff]  }
  0x34   : > { %v2580_v51 = vor.u32 %v2579_v39, %v2576_v34  ;;  %v2590_v56 = vor.u32 %v2589_v44, %v2585_v40  ;;  %v2651_v39 = vrot.slane %v2649_v30, 5  ;;  %v5579_v44 = vld [vmem:[%s5768_s12 + $0x168] sm:$0xff]   ;;  %v5582_v50 = vld [vmem:[%s5768_s12 + $0x174] sm:$0xff]  }
  0x35   : > { %v2639_v46 = vrot.slane %v2638_v35, 4  ;;  %v5955_v35 = vld [vmem:[%s5768_s12 + $0xc] sm:$0xf] }
  0x36   : > { %4930 = vmatmul.mubr.msk.bf16.gmra.mrb[12].mxu1 %vm588_vm0, %v5569_v42  ;;  %v345_v42 = vld [vmem:[%s5768_s12 + $0x1cc] sm:$0xf]  ;;  %v2581_v59 = vrot.slane %v2580_v51, 4  ;;  %v2591_v0 = vrot.slane %v2590_v56, 4 }
  0x37   : > { %5090 = vmatmul.mubr.msk.bf16.gmra.mrb[12].mxu0 %vm588_vm0, %v5570_v47  ;;  %4933 = vmatprep.mubr.msk.bf16.mxu1 %vm588_vm0, %v5572_v54  ;;  %v2601_v47 = vshll.u32 %v344_v36, 16  ;;  %v2607_v54 = vshll.u32 %v345_v42, 16  ;;  %v2611_v61 = vshrl.u32 %v345_v42, 16  ;;  %v2648_v36 = vrot.slane %v2646_v27, 4  ;;  %v354_v42 = vld [vmem:[%s5768_s12 + $0x1f0] sm:$0xf] }
  0x38   : > { %5117 = vmatprep.mubr.msk.bf16.mxu0 %vm588_vm0, %v4562_v8  ;;  %v2586_v6 = vsel %vm5832_vm3, %v2581_v59, %v2585_v40  ;;  %v2625_v8 = vshll.u32 %v347_v63, 16  ;;  %v2596_v9 = vsel %vm5832_vm3, %v2591_v0, %v2595_v52  ;;  %v2679_v56 = vshll.u32 %v354_v42, 16 }
  0x39   : > { %v2603_v58 = vrot.slane %v2601_v47, 5  ;;  %v2609_v60 = vrot.slane %v2607_v54, 5  ;;  %v4565_v14 = vcombine.low %v2586_v6, %v2596_v9  ;;  %v2665_v47 = vshll.u32 %v352_v26, 16  ;;  %v355_v54 = vld [vmem:[%s5768_s12 + $0x1f4] sm:$0x1]  ;;  %v5929_v6 = vld [vmem:[%s7101_s1 + $0xe0] sm:$0xff]  }
  0x3a   : > { %v2652_v51 = vor.u32 %v2651_v39, %v2648_v36  ;;  %v2681_v2 = vrot.slane %v2679_v56, 5  ;;  %v2689_v4 = vshll.u32 %v355_v54, 16  ;;  %v5938_v9 = vld [vmem:[%s5768_s12 + $0x4] sm:$0xf]  ;;  %v5958_v36 = vld [vmem:[%s5768_s12 + $0x10] sm:$0xf] }
  0x3b   : > { %v2604_v1 = vor.u32 %v2603_v58, %v2600_v57  ;;  %v2644_v57 = vsel %vm5832_vm3, %v2639_v46, %v2643_v29  ;;  %v2667_v58 = vrot.slane %v2665_v47, 5  ;;  %v5969_v46 = vld [vmem:[%s5768_s12 + $0x18] sm:$0xf]  ;;  %v5972_v47 = vld [vmem:[%s5768_s12 + $0x1c] sm:$0xf]  ;;  %v5592_v56 = vld [vmem:[%s7101_s1 + $0x48] sm:$0xff]  }
  0x3c   : > { %v2653_v63 = vrot.slane %v2652_v51, 4 }
  0x3d   : > { %v2605_v11 = vrot.slane %v2604_v1, 4 }
  0x3e   : > { %4934 = vmatmul.mubr.msk.bf16.gmra.mrb[16].mxu1 %vm588_vm0, %v5573_v16  ;;  %v2627_v16 = vrot.slane %v2625_v8, 5 }
  0x3f   : > { %5118 = vmatmul.mubr.msk.bf16.vlgmr.msra.gmra.mrb[0].mxu0 %vm588_vm0, %v4563_v32  ;;  %4937 = vmatprep.mubr.msk.bf16.mxu1 %vm588_vm0, %v5576_v22  ;;  %v2610_v18 = vsel %vm5832_vm3, %v2605_v11, %v2609_v60  ;;  %v351_v22 = vld [vmem:[%s5768_s12 + $0x1e4] sm:$0xf]  ;;  %v357_v11 = vld [vmem:[%s5768_s12 + $0x1fc] sm:$0xf] }
  0x40   : > { %5150 = vmatpush3.bf16.msra.mxu0 %v5839_v53  ;;  %5121 = vmatprep.mubr.msk.bf16.mxu0 %vm588_vm0, %v4564_v55  ;;  %v2613_v53 = vrot.slane %v2611_v61, 4  ;;  %v2628_v24 = vor.u32 %v2627_v16, %v2624_v12  ;;  %v2655_v31 = vshll.u32 %v351_v22, 16  ;;  %v2659_v32 = vshrl.u32 %v351_v22, 16  ;;  %v5593_v61 = vld [vmem:[%s7101_s1 + $0xd8] sm:$0xff]   ;;  %v5583_v16 = vld [vmem:[%s5768_s12 + $0x180] sm:$0xff]  }
  0x41   : > { %5151 = vmatprep.subr.bf16.mxu0 %v5581_v49  ;;  %v2673_v55 = vshll.u32 %v353_v37, 16  ;;  %v2707_v29 = vshrl.u32 %v357_v11, 16 }
  0x42   : > { %v2614_v15 = vor.u32 %v2613_v53, %v2609_v60  ;;  %v2629_v34 = vrot.slane %v2628_v24, 4  ;;  %v2657_v40 = vrot.slane %v2655_v31, 5  ;;  %v2661_v41 = vrot.slane %v2659_v32, 4  ;;  %v359_v24 = vld [vmem:[%s5768_s12 + $0x204] sm:$0xf] }
  0x43   : > { %v2683_v60 = vshrl.u32 %v354_v42, 16  ;;  %v2675_v1 = vrot.slane %v2673_v55, 5  ;;  %v361_v42 = vld [vmem:[%s5768_s12 + $0x20c] sm:$0x1] }
  0x44   : > { %5152 = vmatpush3.bf16.msra.mxu0 %v5581_v49  ;;  %v2615_v23 = vrot.slane %v2614_v15, 4  ;;  %v2634_v45 = vsel %vm5832_vm3, %v2629_v34, %v2633_v19  ;;  %v2670_v49 = vshrl.u32 %v353_v37, 16  ;;  %v2662_v52 = vor.u32 %v2661_v41, %v2657_v40  ;;  %v360_v37 = vld [vmem:[%s5768_s12 + $0x208] sm:$0xf] }
  0x45   : > { %5153 = vmatprep.subr.bf16.mxu0 %v5587_v43  ;;  %v4567_v62 = vcombine.low %v2634_v45, %v2644_v57  ;;  %v2685_v3 = vrot.slane %v2683_v60, 4  ;;  %v2658_v53 = vsel %vm5832_vm3, %v2653_v63, %v2657_v40  ;;  %v2709_v34 = vrot.slane %v2707_v29, 4 }
  0x46   : > { %4938 = vmatmul.mubr.msk.bf16.gmra.mrb[20].mxu1 %vm588_vm0, %v5577_v5  ;;  %v2620_v33 = vsel %vm5832_vm3, %v2615_v23, %v2619_v7  ;;  %v2672_v59 = vrot.slane %v2670_v49, 4  ;;  %v2663_v0 = vrot.slane %v2662_v52, 4  ;;  %v5924_v5 = vld [vmem:[%s5768_s12] sm:$0xf]  ;;  %v2703_v23 = vshll.u32 %v357_v11, 16 }
  0x47   : > { %5122 = vmatmul.mubr.msk.bf16.gmra.mrb[4].mxu0 %vm588_vm0, %v4565_v14  ;;  %4941 = vmatprep.mubr.msk.bf16.mxu1 %vm588_vm0, %v5578_v10  ;;  %v4566_v38 = vcombine.low %v2610_v18, %v2620_v33  ;;  %v356_v10 = vld [vmem:[%s5768_s12 + $0x1f8] sm:$0xf]  ;;  %v2686_v13 = vor.u32 %v2685_v3, %v2681_v2  ;;  %v2691_v14 = vrot.slane %v2689_v4, 5  ;;  %v358_v18 = vld [vmem:[%s5768_s12 + $0x200] sm:$0x1]  ;;  %v4418_v22 = vcombine.low %v5924_v5, %v5938_v9 }
  0x48   : > { %5154 = vmatpush3.bf16.msra.mxu0 %v5587_v43  ;;  %v2668_v7 = vsel %vm5832_vm3, %v2663_v0, %v2667_v58  ;;  %v2676_v8 = vor.u32 %v2675_v1, %v2672_v59  ;;  %v2694_v19 = vshrl.u32 %v356_v10, 16  ;;  %v2697_v20 = vshll.u32 %v356_v10, 16  ;;  %v364_v3 = vld [vmem:[%s5768_s12 + $0x218] sm:$0x1]  ;;  %v5991_v4 = vld [vmem:[%s5768_s12 + $0x24] sm:$0xf] }
  0x49   : > { %5125 = vmatprep.mubr.msk.bf16.mxu0 %vm588_vm0, %v4566_v38  ;;  %5155 = vmatprep.subr.bf16.mxu0 %v5593_v61  ;;  %v4568_v12 = vcombine.low %v2658_v53, %v2668_v7  ;;  %v2687_v17 = vrot.slane %v2686_v13, 4  ;;  %v2705_v31 = vrot.slane %v2703_v23, 5  ;;  %v2713_v32 = vshll.u32 %v358_v18, 16  ;;  %v5996_v11 = vld [vmem:[%s5768_s12 + $0x28] sm:$0xf] }
  0x4a   : > { %v2677_v15 = vrot.slane %v2676_v8, 4  ;;  %v2696_v26 = vrot.slane %v2694_v19, 4  ;;  %v2699_v27 = vrot.slane %v2697_v20, 5  ;;  %v2718_v38 = vshrl.u32 %v359_v24, 16  ;;  %v365_v23 = vld [vmem:[%s5768_s12 + $0x21c] sm:$0xf] }
  0x4b   : > { %v2692_v25 = vsel %vm5832_vm3, %v2687_v17, %v2691_v14  ;;  %v2710_v40 = vor.u32 %v2709_v34, %v2705_v31  ;;  %v2715_v41 = vrot.slane %v2713_v32, 5  ;;  %v5966_v43 = vcombine.low %v5955_v35, %v5958_v36  ;;  %v367_v32 = vld [vmem:[%s5768_s12 + $0x224] sm:$0x1] }
  0x4c   : > { %5156 = vmatpush3.bf16.msra.mxu0 %v5593_v61  ;;  %v2682_v21 = vsel %vm5832_vm3, %v2677_v15, %v2681_v2  ;;  %v2700_v33 = vor.u32 %v2699_v27, %v2696_v26  ;;  %v2721_v45 = vshll.u32 %v359_v24, 16  ;;  %v2727_v51 = vshll.u32 %v360_v37, 16  ;;  %v362_v61 = vld [vmem:[%s5768_s12 + $0x210] sm:$0xf]  ;;  %v366_v26 = vld [vmem:[%s5768_s12 + $0x220] sm:$0xf] }
  0x4d   : > { %5189 = vmatprep.subr.bf16.mxu0 %v5929_v6  ;;  %v4569_v30 = vcombine.low %v2682_v21, %v2692_v25  ;;  %v2731_v52 = vshrl.u32 %v360_v37, 16  ;;  %v2737_v55 = vshll.u32 %v361_v42, 16  ;;  %v5983_v60 = vcombine.low %v5969_v46, %v5972_v47  ;;  %v5598_v15 = vld [vmem:[%s7101_s1 + $0x50] sm:$0xff]   ;;  %v5604_v27 = vld [vmem:[%s7101_s1 + $0x58] sm:$0xff]  }
  0x4e   : > { %4942 = vmatmul.mubr.msk.bf16.gmra.mrb[24].mxu1 %vm588_vm0, %v5579_v44  ;;  %v2701_v39 = vrot.slane %v2700_v33, 4  ;;  %v2720_v44 = vrot.slane %v2718_v38, 4  ;;  %v2723_v54 = vrot.slane %v2721_v45, 5  ;;  %v2729_v58 = vrot.slane %v2727_v51, 5  ;;  %v6021_v37 = vld [vmem:[%s5768_s12 + $0x30] sm:$0xf] }
  0x4f   : > { %5126 = vmatmul.mubr.msk.bf16.gmra.mrb[8].mxu0 %vm588_vm0, %v4567_v62  ;;  %4945 = vmatprep.mubr.msk.bf16.mxu1 %vm588_vm0, %v5582_v50  ;;  %v2711_v50 = vrot.slane %v2710_v40, 4  ;;  %v2733_v59 = vrot.slane %v2731_v52, 4  ;;  %v363_v62 = vld [vmem:[%s5768_s12 + $0x214] sm:$0xf]  ;;  %v2739_v2 = vrot.slane %v2737_v55, 5  ;;  %v2742_v7 = vshrl.u32 %v362_v61, 16 }
  0x50   : > { %5129 = vmatprep.mubr.msk.bf16.mxu0 %vm588_vm0, %v4568_v12  ;;  %v2706_v49 = vsel %vm5832_vm3, %v2701_v39, %v2705_v31  ;;  %v2724_v0 = vor.u32 %v2723_v54, %v2720_v44  ;;  %v2745_v8 = vshll.u32 %v362_v61, 16  ;;  %v2751_v10 = vshll.u32 %v363_v62, 16  ;;  %v6024_v38 = vld [vmem:[%s5768_s12 + $0x34] sm:$0xf]  ;;  %v6037_v51 = vld [vmem:[%s7101_s1 + $0x60] sm:$0xff]  }
  0x51   : > { %v2716_v57 = vsel %vm5832_vm3, %v2711_v50, %v2715_v41  ;;  %v2734_v1 = vor.u32 %v2733_v59, %v2729_v58  ;;  %v1115_v12 = vshrl.u32 %v5924_v5, 16  ;;  %v2755_v14 = vshrl.u32 %v363_v62, 16  ;;  %v368_v50 = vld [vmem:[%s5768_s12 + $0x228] sm:$0xf] }
  0x52   : > { %v4570_v63 = vcombine.low %v2706_v49, %v2716_v57  ;;  %v2725_v53 = vrot.slane %v2724_v0, 4  ;;  %v2747_v17 = vrot.slane %v2745_v8, 5  ;;  %v2753_v18 = vrot.slane %v2751_v10, 5 }
  0x53   : > { %v2735_v13 = vrot.slane %v2734_v1, 4  ;;  %v2757_v20 = vrot.slane %v2755_v14, 4  ;;  %v2761_v21 = vshll.u32 %v364_v3, 16  ;;  %v1118_v29 = vshll.u32 %v5924_v5, 16  ;;  %v6061_v14 = vld [vmem:[%s5768_s12 + $0x40] sm:$0xf] }
  0x54   : > { %v2766_v34 = vshrl.u32 %v365_v23, 16  ;;  %v6026_v39 = vrot.slane %v1115_v12, 4  ;;  %v1124_v40 = vshll.u32 %v5938_v9, 16  ;;  %v2769_v5 = vshll.u32 %v365_v23, 16 }
  0x55   : > { %v2740_v19 = vsel %vm5832_vm3, %v2735_v13, %v2739_v2  ;;  %v2763_v31 = vrot.slane %v2761_v21, 5  ;;  %v2775_v45 = vshll.u32 %v366_v26, 16  ;;  %v2779_v49 = vshrl.u32 %v366_v26, 16  ;;  %v369_v2 = vld [vmem:[%s5768_s12 + $0x22c] sm:$0xf] }
  0x56   : > { %4946 = vmatmul.mubr.msk.bf16.gmra.mrb[28].mxu1 %vm588_vm0, %v5583_v16  ;;  %v2744_v16 = vrot.slane %v2742_v7, 4  ;;  %v2768_v44 = vrot.slane %v2766_v34, 4  ;;  %v2771_v54 = vrot.slane %v2769_v5, 5  ;;  %v2785_v55 = vshll.u32 %v367_v32, 16  ;;  %v370_v7 = vld [vmem:[%s5768_s12 + $0x230] sm:$0x1] }
  0x57   : > { %5130 = vmatmul.mubr.msk.bf16.gmra.mrb[12].mxu0 %vm588_vm0, %v4569_v30  ;;  %4957 = vmatprep.mubr.msk.bf16.mxu1 %vm588_vm0, %v4418_v22  ;;  %v6010_v22 = vcombine.low %v5991_v4, %v5996_v11  ;;  %v2758_v30 = vor.u32 %v2757_v20, %v2753_v18  ;;  %v1128_v57 = vshrl.u32 %v5938_v9, 16  ;;  %v2777_v59 = vrot.slane %v2775_v45, 5  ;;  %v6058_v13 = vld [vmem:[%s5768_s12 + $0x3c] sm:$0xf]  ;;  %v371_v26 = vld [vmem:[%s5768_s12 + $0x234] sm:$0xf] }
  0x58   : > { %5133 = vmatprep.mubr.msk.bf16.mxu0 %vm588_vm0, %v4570_v63  ;;  %v2748_v25 = vor.u32 %v2747_v17, %v2744_v16  ;;  %v2781_v61 = vrot.slane %v2779_v49, 4  ;;  %v6046_v62 = vrot.slane %v1118_v29, 5  ;;  %v6048_v63 = vrot.slane %v1124_v40, 5  ;;  %v372_v32 = vld [vmem:[%s5768_s12 + $0x238] sm:$0xf] }
  0x59   : > { %v2759_v41 = vrot.slane %v2758_v30, 4  ;;  %v1139_v0 = vshrl.u32 %v5955_v35, 16  ;;  %v2772_v1 = vor.u32 %v2771_v54, %v2768_v44  ;;  %v1142_v3 = vshll.u32 %v5955_v35, 16  ;;  %v6084_v40 = vld [vmem:[%s5768_s12 + $0x48] sm:$0xf] }
  0x5a   : > { %v2749_v33 = vrot.slane %v2748_v25, 4  ;;  %v2782_v9 = vor.u32 %v2781_v61, %v2777_v59  ;;  %v2790_v8 = vshrl.u32 %v368_v50, 16  ;;  %v2793_v12 = vshll.u32 %v368_v50, 16  ;;  %v6088_v45 = vld [vmem:[%s5768_s12 + $0x4c] sm:$0xf] }
  0x5b   : > { %v2764_v52 = vsel %vm5832_vm3, %v2759_v41, %v2763_v31  ;;  %v2773_v10 = vrot.slane %v2772_v1, 4  ;;  %v2799_v16 = vshll.u32 %v369_v2, 16  ;;  %v2809_v20 = vshll.u32 %v370_v7, 16 }
  0x5c   : > { %v2754_v42 = vsel %vm5832_vm3, %v2749_v33, %v2753_v18  ;;  %v2792_v35 = vrot.slane %v2790_v8, 4  ;;  %v2795_v18 = vrot.slane %v2793_v12, 5  ;;  %v1152_v21 = vshrl.u32 %v5958_v36, 16  ;;  %v375_v12 = vld [vmem:[%s5768_s12 + $0x244] sm:$0xf] }
  0x5d   : > { %v2778_v17 = vsel %vm5832_vm3, %v2773_v10, %v2777_v59  ;;  %v6072_v25 = vcombine.low %v6058_v13, %v6061_v14  ;;  %v6078_v33 = vrot.slane %v1139_v0, 4  ;;  %v2811_v34 = vrot.slane %v2809_v20, 5 }
  0x5e   : > { %4958 = vmatmul.mubr.msk.bf16.vlgmr.msra.gmra.mrb[0].mxu1 %vm588_vm0, %v5966_v43  ;;  %v2796_v30 = vor.u32 %v2795_v18, %v2792_v35  ;;  %v2817_v44 = vshll.u32 %v371_v26, 16  ;;  %v6090_v49 = vrot.slane %v1142_v3, 5  ;;  %v2823_v54 = vshll.u32 %v372_v32, 16  ;;  %v376_v35 = vld [vmem:[%s5768_s12 + $0x248] sm:$0x1] }
  0x5f   : > { %4990 = vmatpush3.bf16.msra.mxu1 %v5899_v28  ;;  %4961 = vmatprep.mubr.msk.bf16.mxu1 %vm588_vm0, %v5983_v60  ;;  %v2730_v28 = vsel %vm5832_vm3, %v2725_v53, %v2729_v58  ;;  %v4572_v58 = vcombine.low %v2754_v42, %v2764_v52  ;;  %v2787_v53 = vrot.slane %v2785_v55, 5  ;;  %v2814_v42 = vshrl.u32 %v371_v26, 16 }
  0x60   : > { %4991 = vmatprep.subr.bf16.mxu1 %v5592_v56  ;;  %v4571_v24 = vcombine.low %v2730_v28, %v2740_v19  ;;  %v2783_v28 = vrot.slane %v2782_v9, 4  ;;  %v2803_v19 = vshrl.u32 %v369_v2, 16  ;;  %v2797_v41 = vrot.slane %v2796_v30, 4 }
  0x61   : > { %v6094_v52 = vrot.slane %v1152_v21, 4  ;;  %v2819_v59 = vrot.slane %v2817_v44, 5  ;;  %v2825_v61 = vrot.slane %v2823_v54, 5  ;;  %v2827_v0 = vshrl.u32 %v372_v32, 16  ;;  %v6116_v21 = vld [vmem:[%s5768_s12 + $0x58] sm:$0xf] }
  0x62   : > { %5134 = vmatmul.mubr.msk.bf16.gmra.mrb[16].mxu0 %vm588_vm0, %v4571_v24  ;;  %v2788_v23 = vsel %vm5832_vm3, %v2783_v28, %v2787_v53  ;;  %v2801_v24 = vrot.slane %v2799_v16, 5  ;;  %v2805_v31 = vrot.slane %v2803_v19, 4  ;;  %v6100_v2 = vcombine.low %v6084_v40, %v6088_v45  ;;  %v374_v53 = vld [vmem:[%s5768_s12 + $0x240] sm:$0xf]  ;;  %v6112_v16 = vld [vmem:[%s5768_s12 + $0x54] sm:$0xf] }
  0x63   : > { %4992 = vmatpush3.bf16.msra.mxu1 %v5592_v56  ;;  %v6043_v56 = vcombine.low %v6021_v37, %v6024_v38  ;;  %5137 = vmatprep.mubr.msk.bf16.mxu0 %vm588_vm0, %v4572_v58  ;;  %v4573_v29 = vcombine.low %v2778_v17, %v2788_v23  ;;  %v2816_v58 = vrot.slane %v2814_v42, 4  ;;  %v1163_v7 = vshrl.u32 %v5969_v46, 16  ;;  %v377_v42 = vld [vmem:[%s5768_s12 + $0x24c] sm:$0xf] }
  0x64   : > { %4993 = vmatprep.subr.bf16.mxu1 %v5598_v15  ;;  %v2806_v5 = vor.u32 %v2805_v31, %v2801_v24  ;;  %v2802_v55 = vsel %vm5832_vm3, %v2797_v41, %v2801_v24  ;;  %v2829_v10 = vrot.slane %v2827_v0, 4  ;;  %v2838_v19 = vshrl.u32 %v374_v53, 16 }
  0x65   : > { %v2820_v9 = vor.u32 %v2819_v59, %v2816_v58  ;;  %v2841_v20 = vshll.u32 %v374_v53, 16  ;;  %v1172_v23 = vshll.u32 %v5972_v47, 16  ;;  %v2851_v26 = vshrl.u32 %v375_v12, 16  ;;  %v378_v58 = vld [vmem:[%s5768_s12 + $0x250] sm:$0xf] }
  0x66   : > { %4962 = vmatmul.mubr.msk.bf16.gmra.mrb[4].mxu1 %vm588_vm0, %v6010_v22  ;;  %v2830_v17 = vor.u32 %v2829_v10, %v2825_v61  ;;  %v2840_v30 = vrot.slane %v2838_v19, 4  ;;  %v2857_v32 = vshll.u32 %v376_v35, 16  ;;  %v6127_v44 = vrot.slane %v1163_v7, 4  ;;  %v379_v59 = vld [vmem:[%s5768_s12 + $0x254] sm:$0x1] }
  0x67   : > { %4994 = vmatpush3.bf16.msra.mxu1 %v5598_v15  ;;  %4965 = vmatprep.mubr.msk.bf16.mxu1 %vm588_vm0, %v6043_v56  ;;  %v1148_v15 = vshll.u32 %v5958_v36, 16  ;;  %v373_v36 = vld [vmem:[%s5768_s12 + $0x23c] sm:$0x1]  ;;  %v2821_v28 = vrot.slane %v2820_v9, 4  ;;  %v2843_v31 = vrot.slane %v2841_v20, 5  ;;  %v2853_v41 = vrot.slane %v2851_v26, 4 }
  0x68   : > { %4995 = vmatprep.subr.bf16.mxu1 %v5604_v27  ;;  %v2833_v1 = vshll.u32 %v373_v36, 16  ;;  %v2862_v53 = vshrl.u32 %v377_v42, 16  ;;  %v6143_v7 = vld [vmem:[%s5768_s12 + $0x64] sm:$0xf]  ;;  %v1187_v26 = vshrl.u32 %v5991_v4, 16 }
  0x69   : > { %v6092_v50 = vrot.slane %v1148_v15, 5  ;;  %v1166_v15 = vshll.u32 %v5969_v46, 16  ;;  %v2826_v24 = vsel %vm5832_vm3, %v2821_v28, %v2825_v61  ;;  %v2847_v46 = vshll.u32 %v375_v12, 16 }
  0x6a   : > { %5138 = vmatmul.mubr.msk.bf16.gmra.mrb[20].mxu0 %vm588_vm0, %v4573_v29  ;;  %v2835_v18 = vrot.slane %v2833_v1, 5  ;;  %v2831_v29 = vrot.slane %v2830_v17, 4  ;;  %v2859_v1 = vrot.slane %v2857_v32, 5  ;;  %v2865_v12 = vshll.u32 %v377_v42, 16 }
  0x6b   : > { %4996 = vmatpush3.bf16.msra.mxu1 %v5604_v27  ;;  %v6075_v27 = vrot.slane %v1128_v57, 4  ;;  %v2807_v57 = vrot.slane %v2806_v5, 4  ;;  %v2849_v36 = vrot.slane %v2847_v46, 5  ;;  %v6124_v5 = vcombine.low %v6112_v16, %v6116_v21  ;;  %v6156_v46 = vld [vmem:[%s5768_s12 + $0x70] sm:$0xf] }
  0x6c   : > { %5029 = vmatprep.subr.bf16.mxu1 %v6037_v51  ;;  %v6129_v54 = vrot.slane %v1166_v15, 5  ;;  %v2871_v15 = vshll.u32 %v378_v58, 16  ;;  %v2864_v35 = vrot.slane %v2862_v53, 4  ;;  %v2875_v17 = vshrl.u32 %v378_v58, 16 }
  0x6d   : > { %v2812_v3 = vsel %vm5832_vm3, %v2807_v57, %v2811_v34  ;;  %v1176_v34 = vshrl.u32 %v5972_v47, 16  ;;  %v2844_v57 = vor.u32 %v2843_v31, %v2840_v30  ;;  %v6135_v47 = vrot.slane %v1172_v23, 5 }
  0x6e   : > { %4966 = vmatmul.mubr.msk.bf16.gmra.mrb[8].mxu1 %vm588_vm0, %v6072_v25  ;;  %v4574_v8 = vcombine.low %v2802_v55, %v2812_v3  ;;  %v2836_v55 = vsel %vm5832_vm3, %v2831_v29, %v2835_v18  ;;  %v2854_v0 = vor.u32 %v2853_v41, %v2849_v36  ;;  %v6140_v3 = vld [vmem:[%s5768_s12 + $0x60] sm:$0xf]  ;;  %v6151_v18 = vld [vmem:[%s5768_s12 + $0x6c] sm:$0xf]  ;;  %v2867_v20 = vrot.slane %v2865_v12, 5 }
  0x6f   : > { %4969 = vmatprep.mubr.msk.bf16.mxu1 %vm588_vm0, %v6100_v2  ;;  %v4575_v61 = vcombine.low %v2826_v24, %v2836_v55  ;;  %v2845_v9 = vrot.slane %v2844_v57, 4  ;;  %v2873_v23 = vrot.slane %v2871_v15, 5  ;;  %v2881_v24 = vshll.u32 %v379_v59, 16  ;;  %v6178_v59 = vld [vmem:[%s5768_s12 + $0x7c] sm:$0xf] }
  0x70   : > { %5141 = vmatprep.mubr.msk.bf16.mxu0 %vm588_vm0, %v4574_v8  ;;  %v6145_v8 = vrot.slane %v1176_v34, 4  ;;  %v2855_v10 = vrot.slane %v2854_v0, 4  ;;  %v2877_v30 = vrot.slane %v2875_v17, 4  ;;  %v6161_v31 = vcombine.low %v6140_v3, %v6143_v7  ;;  %v6196_v15 = vld [vmem:[%s5768_s12 + $0x88] sm:$0xf] }
  0x71   : > { %v2850_v28 = vsel %vm5832_vm3, %v2845_v9, %v2849_v36  ;;  %v1190_v32 = vshll.u32 %v5991_v4, 16  ;;  %v1196_v34 = vshll.u32 %v5996_v11, 16  ;;  %v1200_v36 = vshrl.u32 %v5996_v11, 16  ;;  %v6175_v4 = vld [vmem:[%s5768_s12 + $0x78] sm:$0xf] }
  0x72   : > { %5142 = vmatmul.mubr.msk.bf16.gmra.mrb[24].mxu0 %vm588_vm0, %v4575_v61  ;;  %v2860_v19 = vsel %vm5832_vm3, %v2855_v10, %v2859_v1  ;;  %7125 = vst [vmem:[#allocation2_spill] sm:$0xff] %v6161_v31  ;;  %v2868_v41 = vor.u32 %v2867_v20, %v2864_v35  ;;  %v1211_v42 = vshrl.u32 %v6021_v37, 16  ;;  %v2878_v55 = vor.u32 %v2877_v30, %v2873_v23  ;;  %v6187_v10 = vld [vmem:[%s5768_s12 + $0x84] sm:$0xf] }
  0x73   : > { %v4576_v29 = vcombine.low %v2850_v28, %v2860_v19  ;;  %v2883_v57 = vrot.slane %v2881_v24, 5  ;;  %v6172_v58 = vcombine.low %v6151_v18, %v6156_v46  ;;  %v1214_v11 = vshll.u32 %v6021_v37, 16  ;;  %v6211_v24 = vld [vmem:[%s5768_s12 + $0x90] sm:$0xf] }
  0x74   : > { %v1220_v61 = vshll.u32 %v6024_v38, 16  ;;  %v1224_v0 = vshrl.u32 %v6024_v38, 16  ;;  %v2869_v1 = vrot.slane %v2868_v41, 4  ;;  %v1235_v9 = vshrl.u32 %v6058_v13, 16  ;;  %7128 = vst [vmem:[#allocation5_spill] sm:$0xff] %v6211_v24 }
  0x75   : > { %5145 = vmatprep.mubr.msk.bf16.mxu0 %vm588_vm0, %v4576_v29  ;;  %7126 = vst [vmem:[#allocation3_spill] sm:$0xff] %v6172_v58  ;;  %v2879_v53 = vrot.slane %v2878_v55, 4  ;;  %v6193_v37 = vcombine.low %v6175_v4, %v6178_v59  ;;  %v6198_v38 = vrot.slane %v1187_v26, 4  ;;  %v1238_v28 = vshll.u32 %v6058_v13, 16  ;;  %v6214_v29 = vld [vmem:[%s5768_s12 + $0x94] sm:$0xf] }
  0x76   : > { %4970 = vmatmul.mubr.msk.bf16.gmra.mrb[12].mxu1 %vm588_vm0, %v6124_v5  ;;  %v2874_v12 = vsel %vm5832_vm3, %v2869_v1, %v2873_v23  ;;  %v1244_v35 = vshll.u32 %v6061_v14, 16  ;;  %v6204_v19 = vrot.slane %v1190_v32, 5  ;;  %v6206_v20 = vrot.slane %v1196_v34, 5  ;;  %7129 = vst [vmem:[#allocation6_spill] sm:$0xff] %v6214_v29 }
  0x77   : > { %4973 = vmatprep.mubr.msk.bf16.mxu1 %vm588_vm0, %v6161_v31  ;;  %7127 = vst [vmem:[#allocation4_spill] sm:$0xff] %v6193_v37  ;;  %v2884_v17 = vsel %vm5832_vm3, %v2879_v53, %v2883_v57  ;;  %v6216_v26 = vrot.slane %v1200_v36, 4  ;;  %v6218_v13 = vrot.slane %v1211_v42, 4  ;;  %v6220_v30 = vrot.slane %v1214_v11, 5 }
  0x78   : > { %v4577_v23 = vcombine.low %v2874_v12, %v2884_v17  ;;  %v6224_v32 = vcombine.low %v6187_v10, %v6196_v15  ;;  %v6226_v34 = vrot.slane %v1220_v61, 5  ;;  %v6228_v41 = vrot.slane %v1224_v0, 4 }
  0x79   : > { %v6230_v55 = vrot.slane %v1235_v9, 4  ;;  %v1248_v57 = vshrl.u32 %v6061_v14, 16  ;;  %v6234_v36 = vrot.slane %v1238_v28, 5  ;;  %v6236_v42 = vrot.slane %v1244_v35, 5  ;;  %v6259_v28 = vld [vmem:[%s5768_s12 + $0xa0] sm:$0xf] }
  0x7a   : > { %7130 = vst [vmem:[#allocation7_spill] sm:$0xff] %v6224_v32  ;;  %5146 = vmatmul.mubr.msk.bf16.gmra.mrb[28].mxu0 %vm588_vm0, %v4577_v23  ;;  %v1259_v11 = vshrl.u32 %v6084_v40, 16  ;;  %v6243_v61 = vcombine.low %v6211_v24, %v6214_v29  ;;  %v1262_v14 = vshll.u32 %v6084_v40, 16  ;;  %v1268_v0 = vshll.u32 %v6088_v45, 16  ;;  %7132 = vst [vmem:[#allocation9_spill] sm:$0xff] %v6259_v28 }
  0x7b   : > { %5157 = vmatprep.mubr.msk.bf16.mxu0 %vm588_vm0, %v5966_v43  ;;  %v1272_v1 = vshrl.u32 %v6088_v45, 16  ;;  %v1283_v9 = vshrl.u32 %v6112_v16, 16  ;;  %v1286_v53 = vshll.u32 %v6112_v16, 16  ;;  %v1292_v12 = vshll.u32 %v6116_v21, 16  ;;  %v6254_v43 = vld [vmem:[%s5768_s12 + $0x9c] sm:$0xf] }
  0x7c   : > { %7131 = vst [vmem:[#allocation8_spill] sm:$0xff] %v6243_v61  ;;  %v6262_v40 = vld [vmem:[%s5768_s12 + $0xa8] sm:$0xf]  ;;  %v1296_v45 = vshrl.u32 %v6116_v21, 16  ;;  %v1307_v35 = vshrl.u32 %v6140_v3, 16  ;;  %v1310_v16 = vshll.u32 %v6140_v3, 16 }
  0x7d   : > { %7133 = vst [vmem:[#allocation10_spill] sm:$0xff] %v6262_v40  ;;  %v1316_v17 = vshll.u32 %v6143_v7, 16  ;;  %v6269_v23 = vld [vmem:[%s5768_s12 + $0xac] sm:$0xf]  ;;  %v1320_v29 = vshrl.u32 %v6143_v7, 16  ;;  %v6281_v24 = vrot.slane %v1268_v0, 5 }
  0x7e   : > { %4974 = vmatmul.mubr.msk.bf16.gmra.mrb[16].mxu1 %vm588_vm0, %v6172_v58  ;;  %7134 = vst [vmem:[#allocation11_spill] sm:$0xff] %v6269_v23  ;;  %v5605_v21 = vld [vmem:[%s7101_s1 + $0xe8] sm:$0xff]   ;;  %v6283_v3 = vrot.slane %v1272_v1, 4  ;;  %v1331_v58 = vshrl.u32 %v6151_v18, 16  ;;  %v6294_v7 = vrot.slane %v1292_v12, 5  ;;  %v6300_v0 = vcombine.low %v6262_v40, %v6269_v23 }
  0x7f   : > { %4977 = vmatprep.mubr.msk.bf16.mxu1 %vm588_vm0, %v6193_v37  ;;  %v6273_v37 = vrot.slane %v1259_v11, 4  ;;  %v6290_v11 = vrot.slane %v1283_v9, 4  ;;  %v249_v1 = vld [vmem:[%s5768_s12 + $0x8] sm:$0x1]  ;;  %v6303_v31 = vrot.slane %v1296_v45, 4  ;;  %v6307_v9 = vrot.slane %v1310_v16, 5 }
  0x80   : > { %v1334_v12 = vshll.u32 %v6151_v18, 16  ;;  %v1340_v23 = vshll.u32 %v6156_v46, 16  ;;  %v6319_v45 = vld [vmem:[%s5768_s12 + $0xb4] sm:$0xf]  ;;  %v1121_v16 = vor.u32 %v6046_v62, %v6026_v39  ;;  %v1131_v18 = vor.u32 %v6075_v27, %v6048_v63  ;;  %v255_v40 = vld [vmem:[%s5768_s12 + $0x20] sm:$0x1] }
  0x81   : > { %v1145_v62 = vor.u32 %v6090_v49, %v6078_v33  ;;  %v1169_v27 = vor.u32 %v6129_v54, %v6127_v44  ;;  %v1179_v33 = vor.u32 %v6145_v8, %v6135_v47  ;;  %v5611_v49 = vld [vmem:[%s7101_s1 + $0xf8] sm:$0xff]  }
  0x82   : > { %5158 = vmatmul.mubr.msk.bf16.vlgmr.msra.gmra.mrb[0].mxu0 %vm588_vm0, %v5983_v60  ;;  %v6314_v60 = vrot.slane %v1320_v29, 4  ;;  %v1134_v29 = vshll.u32 %v249_v1, 16  ;;  %v1122_v39 = vrot.slane %v1121_v16, 4 }
  0x83   : > { %5190 = vmatpush3.bf16.msra.mxu0 %v5929_v6  ;;  %5161 = vmatprep.mubr.msk.bf16.mxu0 %vm588_vm0, %v6010_v22  ;;  %v5609_v6 = vld [vmem:[%s7101_s1 + $0xf0] sm:$0xff]   ;;  %v6330_v22 = vrot.slane %v1331_v58, 4  ;;  %v1155_v58 = vor.u32 %v6094_v52, %v6092_v50  ;;  %v1146_v1 = vrot.slane %v1145_v62, 4  ;;  %v6382_v62 = vrot.slane %v1334_v12, 5 }
  0x84   : > { %7137 = vst [vmem:[#allocation14_spill] sm:$0xff] %v6314_v60  ;;  %5191 = vmatprep.subr.bf16.mxu0 %v5605_v21  ;;  %v1344_v60 = vshrl.u32 %v6156_v46, 16  ;;  %v1127_v46 = vsel %vm5832_vm3, %v1122_v39, %v6048_v63  ;;  %v258_v63 = vld [vmem:[%s5768_s12 + $0x2c] sm:$0x1]  ;;  %v261_v39 = vld [vmem:[%s5768_s12 + $0x38] sm:$0x1] }
  0x85   : > { %7138 = vst [vmem:[#allocation15_spill] sm:$0xff] %v6330_v22  ;;  %v1136_v22 = vrot.slane %v1134_v29, 5  ;;  %v1156_v16 = vrot.slane %v1155_v58, 4  ;;  %v1151_v8 = vsel %vm5832_vm3, %v1146_v1, %v6092_v50  ;;  %v1193_v29 = vor.u32 %v6204_v19, %v6198_v38 }
  0x86   : > { %4978 = vmatmul.mubr.msk.bf16.gmra.mrb[20].mxu1 %vm588_vm0, %v6224_v32  ;;  %v6271_v32 = vrot.slane %v1248_v57, 4  ;;  %v6288_v57 = vcombine.low %v6254_v43, %v6259_v28  ;;  %v6305_v28 = vrot.slane %v1307_v35, 4  ;;  %v6322_v35 = vld [vmem:[%s5768_s12 + $0xb8] sm:$0xf]  ;;  %v1203_v50 = vor.u32 %v6216_v26, %v6206_v20 }
  0x87   : > { %4981 = vmatprep.mubr.msk.bf16.mxu1 %vm588_vm0, %v6243_v61  ;;  %v6275_v61 = vrot.slane %v1262_v14, 5  ;;  %v6292_v14 = vrot.slane %v1286_v53, 5  ;;  %v6309_v53 = vrot.slane %v1316_v17, 5  ;;  %v252_v17 = vld [vmem:[%s5768_s12 + $0x14] sm:$0x1]  ;;  %5192 = vmatpush3.bf16.msra.mxu0 %v5605_v21  ;;  %v6356_v52 = vcombine.low %v6319_v45, %v6322_v35 }
  0x88   : > { %7135 = vst [vmem:[#allocation12_spill] sm:$0xff] %v6288_v57  ;;  %5193 = vmatprep.subr.bf16.mxu0 %v5609_v6  ;;  %v1182_v21 = vshll.u32 %v255_v40, 16  ;;  %v1180_v40 = vrot.slane %v1179_v33, 4  ;;  %v1194_v38 = vrot.slane %v1193_v29, 4  ;;  %v1206_v19 = vshll.u32 %v258_v63, 16 }
  0x89   : > { %7136 = vst [vmem:[#allocation13_spill] sm:$0xff] %v6309_v53  ;;  %v1158_v53 = vshll.u32 %v252_v17, 16  ;;  %v6384_v58 = vrot.slane %v1340_v23, 5  ;;  %v1217_v23 = vor.u32 %v6220_v30, %v6218_v13  ;;  %v1358_v33 = vshll.u32 %v6175_v4, 16  ;;  %v267_v63 = vld [vmem:[%s5768_s12 + $0x50] sm:$0x1] }
  0x8a   : > { %5162 = vmatmul.mubr.msk.bf16.gmra.mrb[4].mxu0 %vm588_vm0, %v6043_v56  ;;  %v1199_v26 = vsel %vm5832_vm3, %v1194_v38, %v6206_v20  ;;  %v1364_v20 = vshll.u32 %v6178_v59, 16  ;;  %v1388_v29 = vshll.u32 %v6196_v15, 16  ;;  %v7139_v38 = vld [vmem:[#allocation2_spill] sm:$0xff] }
  0x8b   : > { %v1160_v54 = vrot.slane %v1158_v53, 5  ;;  %5165 = vmatprep.mubr.msk.bf16.mxu0 %vm588_vm0, %v6072_v25  ;;  %5194 = vmatpush3.bf16.msra.mxu0 %v5609_v6  ;;  %v1184_v53 = vrot.slane %v1182_v21, 5  ;;  %v1355_v25 = vshrl.u32 %v6175_v4, 16  ;;  %v1204_v6 = vrot.slane %v1203_v50, 4 }
  0x8c   : > { %5195 = vmatprep.subr.bf16.mxu0 %v5611_v49 }
  0x8d   : > { %v1161_v56 = vsel %vm5832_vm3, %v1156_v16, %v1160_v54  ;;  %v1185_v1 = vsel %vm5832_vm3, %v1180_v40, %v1184_v53  ;;  %v1230_v16 = vshll.u32 %v261_v39, 16  ;;  %v6449_v40 = vrot.slane %v1358_v33, 5 }
  0x8e   : > { %4982 = vmatmul.mubr.msk.bf16.gmra.mrb[24].mxu1 %vm588_vm0, %v6288_v57  ;;  %v1132_v57 = vrot.slane %v1131_v18, 4  ;;  %v1170_v18 = vrot.slane %v1169_v27, 4  ;;  %v6389_v27 = vrot.slane %v1344_v60, 4  ;;  %v1227_v60 = vor.u32 %v6228_v41, %v6226_v34 }
  0x8f   : > { %4985 = vmatprep.mubr.msk.bf16.mxu1 %vm588_vm0, %v6300_v0  ;;  %5196 = vmatpush3.bf16.msra.mxu0 %v5611_v49  ;;  %v6415_v41 = vrot.slane %v1355_v25, 4  ;;  %v1218_v49 = vrot.slane %v1217_v23, 4  ;;  %v1232_v21 = vrot.slane %v1230_v16, 5  ;;  %v7141_v16 = vld [vmem:[#allocation5_spill] sm:$0xff] }
  0x90   : > { %v1137_v44 = vsel %vm5832_vm3, %v1132_v57, %v1136_v22  ;;  %v6371_v57 = vld [vmem:[%s7101_s1 + $0x100] sm:$0xff]   ;;  %v6379_v22 = vcombine.low %v1151_v8, %v1161_v56  ;;  %v1175_v12 = vsel %vm5832_vm3, %v1170_v18, %v6135_v47  ;;  %v1228_v54 = vrot.slane %v1227_v60, 4 }
  0x91   : > { %v4454_v17 = vcombine.low %v1127_v46, %v1137_v44  ;;  %v1208_v46 = vrot.slane %v1206_v19, 5  ;;  %5229 = vmatprep.subr.bf16.mxu0 %v6371_v57  ;;  %v264_v47 = vld [vmem:[%s5768_s12 + $0x44] sm:$0x1]  ;;  %v5610_v44 = vld [vmem:[%s7101_s1 + $0x68] sm:$0xff]   ;;  %v6419_v4 = vcombine.low %v1175_v12, %v1185_v1  ;;  %v1379_v8 = vshrl.u32 %v6187_v10, 16 }
  0x92   : > { %5166 = vmatmul.mubr.msk.bf16.gmra.mrb[8].mxu0 %vm588_vm0, %v6100_v2  ;;  %v1382_v18 = vshll.u32 %v6187_v10, 16  ;;  %v1241_v2 = vor.u32 %v6234_v36, %v6230_v55  ;;  %v1265_v10 = vor.u32 %v6275_v61, %v6273_v37  ;;  %v1223_v56 = vsel %vm5832_vm3, %v1218_v49, %v6226_v34  ;;  %v270_v1 = vld [vmem:[%s5768_s12 + $0x5c] sm:$0x1] }
  0x93   : > { %v1209_v13 = vsel %vm5832_vm3, %v1204_v6, %v1208_v46  ;;  %5169 = vmatprep.mubr.msk.bf16.mxu0 %vm588_vm0, %v6124_v5  ;;  %v1251_v5 = vor.u32 %v6271_v32, %v6236_v42  ;;  %v1233_v55 = vsel %vm5832_vm3, %v1228_v54, %v1232_v21  ;;  %v1278_v36 = vshll.u32 %v267_v63, 16  ;;  %v5613_v32 = vld [vmem:[%s7101_s1 + $0x70] sm:$0xff]   ;;  %v7140_v46 = vld [vmem:[#allocation3_spill] sm:$0xff] }
  0x94   : > { %v6409_v30 = vcombine.low %v1199_v26, %v1209_v13  ;;  %v1392_v37 = vshrl.u32 %v6196_v15, 16  ;;  %v6452_v61 = vrot.slane %v1364_v20, 5  ;;  %v6456_v53 = vrot.slane %v1379_v8, 4  ;;  %v5615_v15 = vld [vmem:[%s7101_s1 + $0x78] sm:$0xff]   ;;  %v7142_v13 = vld [vmem:[#allocation6_spill] sm:$0xff] }
  0x95   : > { %v1242_v50 = vrot.slane %v1241_v2, 4  ;;  %v1252_v19 = vrot.slane %v1251_v5, 4  ;;  %v1266_v25 = vrot.slane %v1265_v10, 4  ;;  %v6465_v6 = vrot.slane %v1382_v18, 5 }
  0x96   : > { %4986 = vmatmul.mubr.msk.bf16.gmra.mrb[28].mxu1 %vm588_vm0, %v6356_v52  ;;  %v6467_v26 = vrot.slane %v1388_v29, 5  ;;  %v1280_v12 = vrot.slane %v1278_v36, 5  ;;  %v6472_v60 = vrot.slane %v1392_v37, 4  ;;  %v1403_v33 = vshrl.u32 %v7141_v16, 16  ;;  %v7144_v29 = vld [vmem:[#allocation14_spill] sm:$0xff]  ;;  %v7146_v37 = vld [vmem:[#allocation4_spill] sm:$0xff] }
  0x97   : > { %4997 = vmatprep.mubr.msk.bf16.mxu1 %vm588_vm0, %v4454_v17  ;;  %v1368_v17 = vshrl.u32 %v6178_v59, 16  ;;  %v1254_v59 = vshll.u32 %v264_v47, 16  ;;  %v1406_v20 = vshll.u32 %v7141_v16, 16  ;;  %v1412_v47 = vshll.u32 %v7142_v13, 16 }
  0x98   : > { %v1416_v49 = vshrl.u32 %v7142_v13, 16  ;;  %v1427_v54 = vshrl.u32 %v6254_v43, 16  ;;  %v1247_v21 = vsel %vm5832_vm3, %v1242_v50, %v6236_v42  ;;  %v1289_v63 = vor.u32 %v6292_v14, %v6290_v11  ;;  %v7143_v14 = vld [vmem:[#allocation13_spill] sm:$0xff] }
  0x99   : > { %v6454_v34 = vrot.slane %v1368_v17, 4  ;;  %v1256_v39 = vrot.slane %v1254_v59, 5  ;;  %v1271_v8 = vsel %vm5832_vm3, %v1266_v25, %v6281_v24  ;;  %v1299_v18 = vor.u32 %v6303_v31, %v6294_v7 }
  0x9a   : > { %5170 = vmatmul.mubr.msk.bf16.gmra.mrb[12].mxu0 %vm588_vm0, %v7139_v38  ;;  %v1302_v2 = vshll.u32 %v270_v1, 16  ;;  %v1313_v11 = vor.u32 %v6307_v9, %v6305_v28  ;;  %v1323_v5 = vor.u32 %v7144_v29, %v7143_v14  ;;  %v6502_v10 = vrot.slane %v1403_v33, 4  ;;  %v6527_v1 = vld [vmem:[%s7101_s1 + $0x80] sm:$0xff]  }
  0x9b   : > { %5173 = vmatprep.mubr.msk.bf16.mxu0 %vm588_vm0, %v7140_v46  ;;  %v1257_v17 = vsel %vm5832_vm3, %v1252_v19, %v1256_v39  ;;  %v6509_v36 = vrot.slane %v1412_v47, 5  ;;  %v1290_v28 = vrot.slane %v1289_v63, 4  ;;  %v6513_v9 = vrot.slane %v1416_v49, 4  ;;  %v7147_v39 = vld [vmem:[#allocation7_spill] sm:$0xff]  ;;  %v279_v47 = vld [vmem:[%s5768_s12 + $0x80] sm:$0x1] }
  0x9c   : > { %v1304_v38 = vrot.slane %v1302_v2, 5  ;;  %v6519_v19 = vrot.slane %v1427_v54, 4  ;;  %v1314_v25 = vrot.slane %v1313_v11, 4  ;;  %v1324_v46 = vrot.slane %v1323_v5, 4  ;;  %v7149_v49 = vld [vmem:[#allocation11_spill] sm:$0xff] }
  0x9d   : > { %v1460_v54 = vshll.u32 %v7149_v49, 16  ;;  %v7150_v63 = vld [vmem:[#allocation15_spill] sm:$0xff]  ;;  %v1371_v11 = vor.u32 %v6454_v34, %v6452_v61  ;;  %v1374_v29 = vshll.u32 %v279_v47, 16  ;;  %v1395_v47 = vor.u32 %v6472_v60, %v6467_v26 }
  0x9e   : > { %4998 = vmatmul.mubr.msk.bf16.vlgmr.msra.gmra.mrb[0].mxu1 %vm588_vm0, %v6379_v22  ;;  %v1419_v60 = vor.u32 %v6513_v9, %v6509_v36  ;;  %v1478_v9 = vshll.u32 %v6319_v45, 16 }
  0x9f   : > { %5030 = vmatpush3.bf16.msra.mxu1 %v6037_v51  ;;  %5001 = vmatprep.mubr.msk.bf16.mxu1 %vm588_vm0, %v6419_v4  ;;  %v1275_v51 = vor.u32 %v6283_v3, %v6281_v24  ;;  %v6460_v3 = vcombine.low %v1223_v56, %v1233_v55  ;;  %v1430_v24 = vshll.u32 %v6254_v43, 16  ;;  %v7145_v56 = vld [vmem:[#allocation9_spill] sm:$0xff]  ;;  %v1300_v43 = vrot.slane %v1299_v18, 4 }
  0xa0   : > { %5031 = vmatprep.subr.bf16.mxu1 %v5610_v44  ;;  %v1436_v55 = vshll.u32 %v7145_v56, 16  ;;  %v1440_v31 = vshrl.u32 %v7145_v56, 16  ;;  %v1347_v18 = vor.u32 %v6389_v27, %v6384_v58  ;;  %v6566_v27 = vld [vmem:[%s5768_s12 + $0xc0] sm:$0xf] }
  0xa1   : > { %v1276_v23 = vrot.slane %v1275_v51, 4  ;;  %v6507_v51 = vrot.slane %v1406_v20, 5  ;;  %v6530_v16 = vrot.slane %v1430_v24, 5  ;;  %v7148_v20 = vld [vmem:[#allocation10_spill] sm:$0xff] }
  0xa2   : > { %5174 = vmatmul.mubr.msk.bf16.gmra.mrb[16].mxu0 %vm588_vm0, %v7146_v37  ;;  %v6532_v33 = vrot.slane %v1436_v55, 5  ;;  %v1451_v13 = vshrl.u32 %v7148_v20, 16  ;;  %v6569_v24 = vld [vmem:[%s5768_s12 + $0xc4] sm:$0xf]  ;;  %v282_v55 = vld [vmem:[%s5768_s12 + $0x8c] sm:$0x1] }
  0xa3   : > { %5032 = vmatpush3.bf16.msra.mxu1 %v5610_v44  ;;  %v273_v44 = vld [vmem:[%s5768_s12 + $0x68] sm:$0x1]  ;;  %v1281_v42 = vsel %vm5832_vm3, %v1276_v23, %v1280_v12  ;;  %5177 = vmatprep.mubr.msk.bf16.mxu0 %vm588_vm0, %v7147_v39  ;;  %v276_v12 = vld [vmem:[%s5768_s12 + $0x74] sm:$0x1]  ;;  %v3658_v34 = vshll.u32 %v6569_v24, 16  ;;  %v1348_v37 = vrot.slane %v1347_v18, 4 }
  0xa4   : > { %5033 = vmatprep.subr.bf16.mxu1 %v5613_v32  ;;  %v1326_v59 = vshll.u32 %v273_v44, 16  ;;  %v6517_v50 = vcombine.low %v1271_v8, %v1281_v42  ;;  %v1454_v44 = vshll.u32 %v7148_v20, 16  ;;  %v1305_v8 = vsel %vm5832_vm3, %v1300_v43, %v1304_v38  ;;  %v7152_v38 = vld [vmem:[#allocation12_spill] sm:$0xff] }
  0xa5   : > { %v1350_v2 = vshll.u32 %v276_v12, 16  ;;  %v1361_v42 = vor.u32 %v6449_v40, %v6415_v41  ;;  %v6562_v5 = vrot.slane %v1451_v13, 4  ;;  %v3649_v40 = vshrl.u32 %v6566_v27, 16  ;;  %v285_v12 = vld [vmem:[%s5768_s12 + $0x98] sm:$0x1] }
  0xa6   : > { %5002 = vmatmul.mubr.msk.bf16.gmra.mrb[4].mxu1 %vm588_vm0, %v6409_v30  ;;  %v1328_v23 = vrot.slane %v1326_v59, 5  ;;  %v1464_v59 = vshrl.u32 %v7149_v49, 16  ;;  %v3662_v39 = vshrl.u32 %v6569_v24, 16  ;;  %v1475_v20 = vshrl.u32 %v6319_v45, 16  ;;  %v288_v45 = vld [vmem:[%s5768_s12 + $0xa4] sm:$0x1] }
  0xa7   : > { %5005 = vmatprep.mubr.msk.bf16.mxu1 %vm588_vm0, %v6460_v3  ;;  %5034 = vmatpush3.bf16.msra.mxu1 %v5613_v32  ;;  %v6511_v32 = vcombine.low %v1247_v21, %v1257_v17  ;;  %v1295_v21 = vsel %vm5832_vm3, %v1290_v28, %v6294_v7  ;;  %v1337_v17 = vor.u32 %v6382_v62, %v7150_v63  ;;  %v1352_v43 = vrot.slane %v1350_v2, 5 }
  0xa8   : > { %5035 = vmatprep.subr.bf16.mxu1 %v5615_v15  ;;  %v1319_v7 = vsel %vm5832_vm3, %v1314_v25, %v7143_v14  ;;  %v1329_v62 = vsel %vm5832_vm3, %v1324_v46, %v1328_v23  ;;  %v6571_v41 = vcombine.low %v1295_v21, %v1305_v8  ;;  %v3652_v14 = vshll.u32 %v6566_v27, 16 }
  0xa9   : > { %v1338_v56 = vrot.slane %v1337_v17, 4  ;;  %v6579_v28 = vcombine.low %v1319_v7, %v1329_v62  ;;  %v1362_v25 = vrot.slane %v1361_v42, 4  ;;  %v1372_v46 = vrot.slane %v1371_v11, 4 }
  0xaa   : > { %v1376_v23 = vrot.slane %v1374_v29, 5  ;;  %v1385_v13 = vor.u32 %v6465_v6, %v6456_v53  ;;  %v1398_v49 = vshll.u32 %v282_v55, 16  ;;  %v6590_v21 = vrot.slane %v1454_v44, 5  ;;  %v297_v55 = vld [vmem:[%s5768_s12 + $0xc8] sm:$0x1] }
  0xab   : > { %5036 = vmatpush3.bf16.msra.mxu1 %v5615_v15  ;;  %v6534_v15 = vrot.slane %v1440_v31, 4  ;;  %v7151_v31 = vld [vmem:[#allocation8_spill] sm:$0xff]  ;;  %v3651_v63 = vrot.slane %v3649_v40, 4  ;;  %v3654_v17 = vrot.slane %v3652_v14, 5  ;;  %v1343_v8 = vsel %vm5832_vm3, %v1338_v56, %v6384_v58 }
  0xac   : > { %5269 = vmatprep.subr.bf16.mxu1 %v6527_v1  ;;  %5178 = vmatmul.mubr.msk.bf16.gmra.mrb[20].mxu0 %vm588_vm0, %v7151_v31  ;;  %v1353_v53 = vsel %vm5832_vm3, %v1348_v37, %v1352_v43  ;;  %v1409_v6 = vor.u32 %v6507_v51, %v6502_v10  ;;  %v1422_v44 = vshll.u32 %v285_v12, 16  ;;  %v3660_v18 = vrot.slane %v3658_v34, 5 }
  0xad   : > { %5181 = vmatprep.mubr.msk.bf16.mxu0 %vm588_vm0, %v7152_v38  ;;  %v3664_v2 = vrot.slane %v3662_v39, 4  ;;  %v1367_v58 = vsel %vm5832_vm3, %v1362_v25, %v6452_v61  ;;  %v1377_v42 = vsel %vm5832_vm3, %v1372_v46, %v1376_v23  ;;  %v6610_v7 = vrot.slane %v1460_v54, 5  ;;  %v291_v39 = vld [vmem:[%s5768_s12 + $0xb0] sm:$0x1] }
  0xae   : > { %5006 = vmatmul.mubr.msk.bf16.gmra.mrb[8].mxu1 %vm588_vm0, %v6511_v32  ;;  %v1386_v62 = vrot.slane %v1385_v13, 4  ;;  %v1396_v11 = vrot.slane %v1395_v47, 4  ;;  %v1400_v10 = vrot.slane %v1398_v49, 5  ;;  %v1466_v51 = vrot.slane %v1464_v59, 4 }
  0xaf   : > { %5009 = vmatprep.mubr.msk.bf16.mxu1 %vm588_vm0, %v6517_v50  ;;  %v1484_v29 = vshll.u32 %v6322_v35, 16  ;;  %v6614_v40 = vcombine.low %v1343_v8, %v1353_v53  ;;  %v6618_v61 = vcombine.low %v1367_v58, %v1377_v42  ;;  %v1410_v14 = vrot.slane %v1409_v6, 4 }
  0xb0   : > { %v1420_v54 = vrot.slane %v1419_v60, 4  ;;  %v1424_v56 = vrot.slane %v1422_v44, 5  ;;  %v1488_v31 = vshrl.u32 %v6322_v35, 16  ;;  %v3655_v59 = vor.u32 %v3654_v17, %v3651_v63  ;;  %v5645_v60 = vld [vmem:[%s5768_s12 + $0xd8] sm:$0xff]  }
  0xb1   : > { %v3665_v34 = vor.u32 %v3664_v2, %v3660_v18  ;;  %v3668_v37 = vshll.u32 %v297_v55, 16  ;;  %v4598_v43 = vcombine.low %v6566_v27, %v6569_v24  ;;  %v1401_v38 = vsel %vm5832_vm3, %v1396_v11, %v1400_v10  ;;  %v294_v2 = vld [vmem:[%s5768_s12 + $0xbc] sm:$0x1] }
  0xb2   : > { %v1433_v35 = vor.u32 %v6530_v16, %v6519_v19  ;;  %v3656_v25 = vrot.slane %v3655_v59, 4  ;;  %v1425_v19 = vsel %vm5832_vm3, %v1420_v54, %v1424_v56  ;;  %v1446_v16 = vshll.u32 %v288_v45, 16  ;;  %v5619_v45 = vld [vmem:[%s7101_s1 + $0x110] sm:$0xff]  }
  0xb3   : > { %v3666_v46 = vrot.slane %v3665_v34, 4  ;;  %v3670_v27 = vrot.slane %v3668_v37, 5  ;;  %v1457_v24 = vor.u32 %v6590_v21, %v6562_v5  ;;  %v1470_v23 = vshll.u32 %v291_v39, 16  ;;  %v5624_v34 = vld [vmem:[%s7101_s1 + $0x118] sm:$0xff]   ;;  %v5652_v39 = vld [vmem:[%s5768_s12 + $0x1a4] sm:$0xf] }
  0xb4   : > { %5182 = vmatmul.mubr.msk.bf16.gmra.mrb[24].mxu0 %vm588_vm0, %v6300_v0  ;;  %v1391_v0 = vsel %vm5832_vm3, %v1386_v62, %v6467_v26  ;;  %v1415_v26 = vsel %vm5832_vm3, %v1410_v14, %v6509_v36  ;;  %v3661_v12 = vsel %vm5832_vm3, %v3656_v25, %v3660_v18  ;;  %v1477_v47 = vrot.slane %v1475_v20, 4  ;;  %v5646_v14 = vld [vmem:[%s5768_s12 + $0xe4] sm:$0xff]  }
  0xb5   : > { %5185 = vmatprep.mubr.msk.bf16.mxu0 %vm588_vm0, %v6356_v52  ;;  %v1443_v52 = vor.u32 %v6534_v15, %v6532_v33  ;;  %v1467_v15 = vor.u32 %v1466_v51, %v6610_v7  ;;  %v3671_v13 = vsel %vm5832_vm3, %v3666_v46, %v3670_v27  ;;  %v1480_v49 = vrot.slane %v1478_v9, 5  ;;  %v5654_v46 = vld [vmem:[%s5768_s12 + $0x114] sm:$0xff]   ;;  %v5655_v27 = vld [vmem:[%s5768_s12 + $0x1b0] sm:$0xf] }
  0xb6   : > { %5010 = vmatmul.mubr.msk.bf16.gmra.mrb[12].mxu1 %vm588_vm0, %v6571_v41  ;;  %v6653_v36 = vcombine.low %v3661_v12, %v3671_v13  ;;  %v1486_v63 = vrot.slane %v1484_v29, 5  ;;  %v6655_v17 = vcombine.low %v1391_v0, %v1401_v38  ;;  %v1434_v8 = vrot.slane %v1433_v35, 4  ;;  %v5649_v0 = vld [vmem:[%s5768_s12 + $0x198] sm:$0xf]  ;;  %v5650_v38 = vld [vmem:[%s5768_s12 + $0x19c] sm:$0xf] }
  0xb7   : > { %5013 = vmatprep.mubr.msk.bf16.mxu1 %vm588_vm0, %v6579_v28  ;;  %v1490_v5 = vrot.slane %v1488_v31, 4  ;;  %v6658_v21 = vcombine.low %v1415_v26, %v1425_v19  ;;  %v1444_v53 = vrot.slane %v1443_v52, 4  ;;  %v1448_v6 = vrot.slane %v1446_v16, 5  ;;  %v5651_v35 = vld [vmem:[%s5768_s12 + $0x108] sm:$0xff]   ;;  %v5656_v26 = vld [vmem:[%s5768_s12 + $0x1b4] sm:$0xf] }
  0xb8   : > { %v1458_v20 = vrot.slane %v1457_v24, 4  ;;  %v1468_v44 = vrot.slane %v1467_v15, 4  ;;  %v1472_v18 = vrot.slane %v1470_v23, 5  ;;  %v1439_v58 = vsel %vm5832_vm3, %v1434_v8, %v6532_v33  ;;  %v5616_v33 = vld [vmem:[%s7101_s1 + $0x108] sm:$0xff]   ;;  %v5657_v16 = vld [vmem:[%s5768_s12 + $0x120] sm:$0xff]   ;;  %v5665_v8 = vld [vmem:[%s7101_s1 + $0x90] sm:$0xff]  }
  0xb9   : > { %v1449_v42 = vsel %vm5832_vm3, %v1444_v53, %v1448_v6  ;;  %v1481_v62 = vor.u32 %v1480_v49, %v1477_v47  ;;  %v1491_v11 = vor.u32 %v1490_v5, %v1486_v63  ;;  %v1494_v10 = vshll.u32 %v294_v2, 16  ;;  %v5653_v52 = vld [vmem:[%s5768_s12 + $0x1a8] sm:$0xf]  ;;  %v5659_v15 = vld [vmem:[%s5768_s12 + $0x1bc] sm:$0xf]  ;;  %v5661_v13 = vld [vmem:[%s5768_s12 + $0x12c] sm:$0xff]  }
  0xba   : > { %v1463_v51 = vsel %vm5832_vm3, %v1458_v20, %v6610_v7  ;;  %v1473_v9 = vsel %vm5832_vm3, %v1468_v44, %v1472_v18  ;;  %v6680_v29 = vcombine.low %v1439_v58, %v1449_v42  ;;  %v5647_v7 = vld [vmem:[%s5768_s12 + $0xf0] sm:$0xff]   ;;  %v4490_v48 = vcombine.low %v5649_v0, %v5650_v38  ;;  %v5658_v24 = vld [vmem:[%s7101_s1 + $0x88] sm:$0xff]   ;;  %v5660_v23 = vld [vmem:[%s5768_s12 + $0x1c0] sm:$0xf] }
  0xbb   : > { %v6684_v54 = vcombine.low %v1463_v51, %v1473_v9  ;;  %v1482_v56 = vrot.slane %v1481_v62, 4  ;;  %v1492_v55 = vrot.slane %v1491_v11, 4  ;;  %v1496_v31 = vrot.slane %v1494_v10, 5  ;;  %v5662_v47 = vld [vmem:[%s5768_s12 + $0x1c8] sm:$0xf]  ;;  %v5666_v5 = vld [vmem:[%s7101_s1 + $0x98] sm:$0xff]  }
  0xbc   : > { %5186 = vmatmul.mubr.msk.bf16.gmra.mrb[28].mxu0 %vm588_vm0, %v4598_v43  ;;  %v5648_v43 = vld [vmem:[%s5768_s12 + $0xfc] sm:$0xff]   ;;  %v4491_v25 = vcombine.low %v5652_v39, %v5653_v52  ;;  %v4492_v19 = vcombine.low %v5655_v27, %v5656_v26  ;;  %v4493_v12 = vcombine.low %v5659_v15, %v5660_v23  ;;  %v5663_v49 = vld [vmem:[%s5768_s12 + $0x1cc] sm:$0xf]  ;;  %v5667_v53 = vld [vmem:[%s5768_s12 + $0x1d4] sm:$0xf] }
  0xbd   : > { %5197 = vmatprep.mubr.msk.bf16.mxu0 %vm588_vm0, %v5645_v60  ;;  %v1487_v59 = vsel %vm5832_vm3, %v1482_v56, %v1486_v63  ;;  %v4494_v63 = vcombine.low %v5662_v47, %v5663_v49  ;;  %v5668_v6 = vld [vmem:[%s5768_s12 + $0x1d8] sm:$0xf]  ;;  %v5669_v20 = vld [vmem:[%s5768_s12 + $0x144] sm:$0xff]   ;;  %v5670_v44 = vld [vmem:[%s5768_s12 + $0x1e0] sm:$0xf] }
  0xbe   : > { %5014 = vmatmul.mubr.msk.bf16.gmra.mrb[16].mxu1 %vm588_vm0, %v6614_v40  ;;  %v4495_v60 = vcombine.low %v5667_v53, %v5668_v6  ;;  %v5671_v18 = vld [vmem:[%s5768_s12 + $0x1e4] sm:$0xf]  ;;  %v5672_v58 = vld [vmem:[%s5768_s12 + $0x150] sm:$0xff]   ;;  %v5673_v42 = vld [vmem:[%s5768_s12 + $0x1ec] sm:$0xf] }
  0xbf   : > { %5017 = vmatprep.mubr.msk.bf16.mxu1 %vm588_vm0, %v6618_v61  ;;  %v4496_v2 = vcombine.low %v5670_v44, %v5671_v18  ;;  %v5674_v62 = vld [vmem:[%s5768_s12 + $0x1f0] sm:$0xf]  ;;  %v5675_v10 = vld [vmem:[%s5768_s12 + $0x15c] sm:$0xff]   ;;  %v5676_v51 = vld [vmem:[%s5768_s12 + $0x1f8] sm:$0xf] }
  0xc0   : > { %v4497_v11 = vcombine.low %v5673_v42, %v5674_v62  ;;  %v5677_v9 = vld [vmem:[%s5768_s12 + $0x1fc] sm:$0xf]  ;;  %v5679_v56 = vld [vmem:[%s5768_s12 + $0x204] sm:$0xf]  ;;  %v5686_v38 = vld [vmem:[%s5768_s12 + $0x220] sm:$0xf] }
  0xc1   : > { %v5685_v0 = vld [vmem:[%s5768_s12 + $0x21c] sm:$0xf]  ;;  %v5688_v39 = vld [vmem:[%s5768_s12 + $0x22c] sm:$0xf]  ;;  %v5691_v26 = vld [vmem:[%s5768_s12 + $0x240] sm:$0xf] }
  0xc2   : > { %v5638_v23 = vld [vmem:[%s5768_s12 + $0x2dc] sm:$0xff]  }
  0xc3   : > { %v6862_v6 = vld [vmem:[%s7102_s2] ss:$0 sm:$0xff] }
  0xc4   : > { %5198 = vmatmul.mubr.msk.bf16.vlgmr.msra.gmra.mrb[0].mxu0 %vm588_vm0, %v5646_v14  ;;  %v5678_v14 = vld [vmem:[%s5768_s12 + $0x168] sm:$0xff]  }
  0xc5   : > { %5230 = vmatpush3.bf16.msra.mxu0 %v6371_v57  ;;  %5201 = vmatprep.mubr.msk.bf16.mxu0 %vm588_vm0, %v5647_v7  ;;  %v1497_v57 = vsel %vm5832_vm3, %v1492_v55, %v1496_v31  ;;  %v5680_v55 = vld [vmem:[%s5768_s12 + $0x208] sm:$0xf]  ;;  %v5681_v7 = vld [vmem:[%s5768_s12 + $0x174] sm:$0xff]  }
  0xc6   : > { %5018 = vmatmul.mubr.msk.bf16.gmra.mrb[20].mxu1 %vm588_vm0, %v6655_v17  ;;  %5231 = vmatprep.subr.bf16.mxu0 %v5616_v33  ;;  %v6703_v37 = vcombine.low %v1487_v59, %v1497_v57  ;;  %v4499_v31 = vcombine.low %v5679_v56, %v5680_v55  ;;  %v5683_v59 = vld [vmem:[%s5768_s12 + $0x214] sm:$0xf] }
  0xc7   : > { %5021 = vmatprep.mubr.msk.bf16.mxu1 %vm588_vm0, %v6658_v21 }
  0xc9   : > { %5232 = vmatpush3.bf16.msra.mxu0 %v5616_v33  ;;  %v4498_v33 = vcombine.low %v5676_v51, %v5677_v9 }
  0xca   : > { %5233 = vmatprep.subr.bf16.mxu0 %v5619_v45 }
  0xcc   : > { %5202 = vmatmul.mubr.msk.bf16.gmra.mrb[4].mxu0 %vm588_vm0, %v5648_v43  ;;  %v5627_v43 = vld [vmem:[%s5768_s12 + $0x18c] sm:$0xff]  }
  0xcd   : > { %5205 = vmatprep.mubr.msk.bf16.mxu0 %vm588_vm0, %v5651_v35  ;;  %5234 = vmatpush3.bf16.msra.mxu0 %v5619_v45  ;;  %v5682_v45 = vld [vmem:[%s5768_s12 + $0x210] sm:$0xf]  ;;  %v5687_v35 = vld [vmem:[%s5768_s12 + $0x228] sm:$0xf] }
  0xce   : > { %5022 = vmatmul.mubr.msk.bf16.gmra.mrb[24].mxu1 %vm588_vm0, %v6680_v29  ;;  %5235 = vmatprep.subr.bf16.mxu0 %v5624_v34  ;;  %v4500_v57 = vcombine.low %v5682_v45, %v5683_v59  ;;  %v4502_v52 = vcombine.low %v5687_v35, %v5688_v39 }
  0xcf   : > { %5025 = vmatprep.mubr.msk.bf16.mxu1 %vm588_vm0, %v6684_v54 }
  0xd1   : > { %5236 = vmatpush3.bf16.msra.mxu0 %v5624_v34  ;;  %v5684_v34 = vld [vmem:[%s5768_s12 + $0x180] sm:$0xff]  }
  0xd4   : > { %5206 = vmatmul.mubr.msk.bf16.gmra.mrb[8].mxu0 %vm588_vm0, %v5654_v46  ;;  %v5690_v46 = vld [vmem:[%s5768_s12 + $0x238] sm:$0xf] }
  0xd5   : > { %5209 = vmatprep.mubr.msk.bf16.mxu0 %vm588_vm0, %v5657_v16 }
  0xd6   : > { %5026 = vmatmul.mubr.msk.bf16.gmra.mrb[28].mxu1 %vm588_vm0, %v6703_v37 }
  0xd7   : > { %5037 = vmatprep.mubr.msk.bf16.mxu1 %vm588_vm0, %v4490_v48  ;;  %v4501_v48 = vcombine.low %v5685_v0, %v5686_v38 }
  0xdc   : > { %5210 = vmatmul.mubr.msk.bf16.gmra.mrb[12].mxu0 %vm588_vm0, %v5661_v13 }
  0xde   : > { %5038 = vmatmul.mubr.msk.bf16.vlgmr.msra.gmra.mrb[0].mxu1 %vm588_vm0, %v4491_v25  ;;  %v5689_v25 = vld [vmem:[%s5768_s12 + $0x234] sm:$0xf] }
  0xdf   : > { %5273 = vmatpush3.bf16.msra.mxu1 %v6527_v1  ;;  %5041 = vmatprep.mubr.msk.bf16.mxu1 %vm588_vm0, %v4492_v19  ;;  %v5664_v1 = vld [vmem:[%s5768_s12 + $0x138] sm:$0xff]   ;;  %v4503_v27 = vcombine.low %v5689_v25, %v5690_v46  ;;  %v5692_v19 = vld [vmem:[%s5768_s12 + $0x244] sm:$0xf] }
  0xe0   : > { %5270 = vmatprep.subr.bf16.mxu1 %v5658_v24  ;;  %5213 = vmatprep.mubr.msk.bf16.mxu0 %vm588_vm0, %v5664_v1  ;;  %v4504_v16 = vcombine.low %v5691_v26, %v5692_v19 }
  0xe3   : > { %5274 = vmatpush3.bf16.msra.mxu1 %v5658_v24  ;;  %v5694_v24 = vld [vmem:[%s5768_s12 + $0x250] sm:$0xf] }
  0xe4   : > { %5271 = vmatprep.subr.bf16.mxu1 %v5665_v8  ;;  %5214 = vmatmul.mubr.msk.bf16.gmra.mrb[16].mxu0 %vm588_vm0, %v5669_v20 }
  0xe5   : > { %5217 = vmatprep.mubr.msk.bf16.mxu0 %vm588_vm0, %v5672_v58 }
  0xe6   : > { %5042 = vmatmul.mubr.msk.bf16.gmra.mrb[4].mxu1 %vm588_vm0, %v4493_v12 }
  0xe7   : > { %5045 = vmatprep.mubr.msk.bf16.mxu1 %vm588_vm0, %v4494_v63  ;;  %5275 = vmatpush3.bf16.msra.mxu1 %v5665_v8 }
  0xe8   : > { %5272 = vmatprep.subr.bf16.mxu1 %v5666_v5 }
  0xeb   : > { %5276 = vmatpush3.bf16.msra.mxu1 %v5666_v5 }
  0xec   : > { %5218 = vmatmul.mubr.msk.bf16.gmra.mrb[20].mxu0 %vm588_vm0, %v5675_v10 }
  0xed   : > { %5221 = vmatprep.mubr.msk.bf16.mxu0 %vm588_vm0, %v5678_v14 }
  0xee   : > { %5046 = vmatmul.mubr.msk.bf16.gmra.mrb[8].mxu1 %vm588_vm0, %v4495_v60 }
  0xef   : > { %5049 = vmatprep.mubr.msk.bf16.mxu1 %vm588_vm0, %v4496_v2 }
  0xf4   : > { %5222 = vmatmul.mubr.msk.bf16.gmra.mrb[24].mxu0 %vm588_vm0, %v5681_v7 }
  0xf5   : > { %5225 = vmatprep.mubr.msk.bf16.mxu0 %vm588_vm0, %v5684_v34 }
  0xf6   : > { %5050 = vmatmul.mubr.msk.bf16.gmra.mrb[12].mxu1 %vm588_vm0, %v4497_v11 }
  0xf7   : > { %5053 = vmatprep.mubr.msk.bf16.mxu1 %vm588_vm0, %v4498_v33 }
  0xfc   : > { %5226 = vmatmul.mubr.msk.bf16.gmra.mrb[28].mxu0 %vm588_vm0, %v5627_v43 }
  0xfd   : > { %5237 = vmatprep.mubr.msk.bf16.mxu0 %vm588_vm0, %v6379_v22  ;;  %v5693_v22 = vld [vmem:[%s5768_s12 + $0x24c] sm:$0xf] }
  0xfe   : > { %5054 = vmatmul.mubr.msk.bf16.gmra.mrb[16].mxu1 %vm588_vm0, %v4499_v31  ;;  %v4505_v15 = vcombine.low %v5693_v22, %v5694_v24 }
  0xff   : > { %5057 = vmatprep.mubr.msk.bf16.mxu1 %vm588_vm0, %v4500_v57 }
 0x104   : > { %5238 = vmatmul.mubr.msk.bf16.vlgmr.msra.gmra.mrb[0].mxu0 %vm588_vm0, %v6419_v4  ;;  %v5636_v4 = vld [vmem:[%s5768_s12 + $0x2c4] sm:$0xff]  }
 0x105   : > { %5241 = vmatprep.mubr.msk.bf16.mxu0 %vm588_vm0, %v6409_v30  ;;  %v5637_v30 = vld [vmem:[%s5768_s12 + $0x2d0] sm:$0xff]  }
 0x106   : > { %5058 = vmatmul.mubr.msk.bf16.gmra.mrb[20].mxu1 %vm588_vm0, %v4501_v48 }
 0x107   : > { %5061 = vmatprep.mubr.msk.bf16.mxu1 %vm588_vm0, %v4502_v52 }
 0x10c   : > { %5242 = vmatmul.mubr.msk.bf16.gmra.mrb[4].mxu0 %vm588_vm0, %v6460_v3  ;;  %v5639_v3 = vld [vmem:[%s5768_s12 + $0x2e8] sm:$0xff]  }
 0x10d   : > { %5245 = vmatprep.mubr.msk.bf16.mxu0 %vm588_vm0, %v6511_v32  ;;  %v5640_v32 = vld [vmem:[%s5768_s12 + $0x2f4] sm:$0xff]  }
 0x10e   : > { %5062 = vmatmul.mubr.msk.bf16.gmra.mrb[24].mxu1 %vm588_vm0, %v4503_v27 }
 0x10f   : > { %5065 = vmatprep.mubr.msk.bf16.mxu1 %vm588_vm0, %v4504_v16 }
 0x114   : > { %5246 = vmatmul.mubr.msk.bf16.gmra.mrb[8].mxu0 %vm588_vm0, %v6517_v50  ;;  %v5641_v50 = vld [vmem:[%s5768_s12 + $0x300] sm:$0xff]  }
 0x115   : > { %5249 = vmatprep.mubr.msk.bf16.mxu0 %vm588_vm0, %v6571_v41  ;;  %v5642_v41 = vld [vmem:[%s5768_s12 + $0x30c] sm:$0xff]  }
 0x116   : > { %5066 = vmatmul.mubr.msk.bf16.gmra.mrb[28].mxu1 %vm588_vm0, %v4505_v15 }
 0x117   : > { %5093 = vmatprep.mubr.msk.bf16.mxu1 %vm588_vm0, %v5636_v4 }
 0x11c   : > { %5250 = vmatmul.mubr.msk.bf16.gmra.mrb[12].mxu0 %vm588_vm0, %v6579_v28  ;;  %v5643_v28 = vld [vmem:[%s5768_s12 + $0x318] sm:$0xff]  }
 0x11d   : > { %5253 = vmatprep.mubr.msk.bf16.mxu0 %vm588_vm0, %v6614_v40 }
 0x11e   : > { %5094 = vmatmul.mubr.msk.bf16.vlgmr.msra.gmra.mrb[16].mxu1 %vm588_vm0, %v5637_v30 }
 0x11f   : > { %5097 = vmatprep.mubr.msk.bf16.mxu1 %vm588_vm0, %v5638_v23 }
 0x124   : > { %5254 = vmatmul.mubr.msk.bf16.gmra.mrb[16].mxu0 %vm588_vm0, %v6618_v61 }
 0x125   : > { %5257 = vmatprep.mubr.msk.bf16.mxu0 %vm588_vm0, %v6655_v17 }
 0x126   : > { %5098 = vmatmul.mubr.msk.bf16.gmra.mrb[20].mxu1 %vm588_vm0, %v5639_v3 }
 0x127   : > { %5101 = vmatprep.mubr.msk.bf16.mxu1 %vm588_vm0, %v5640_v32 }
 0x12c   : > { %5258 = vmatmul.mubr.msk.bf16.gmra.mrb[20].mxu0 %vm588_vm0, %v6658_v21 }
 0x12d   : > { %5261 = vmatprep.mubr.msk.bf16.mxu0 %vm588_vm0, %v6680_v29 }
 0x12e   : > { %5102 = vmatmul.mubr.msk.bf16.gmra.mrb[24].mxu1 %vm588_vm0, %v5641_v50 }
 0x12f   : > { %5105 = vmatprep.mubr.msk.bf16.mxu1 %vm588_vm0, %v5642_v41 }
 0x134   : > { %5262 = vmatmul.mubr.msk.bf16.gmra.mrb[24].mxu0 %vm588_vm0, %v6684_v54 }
 0x135   : > { %5265 = vmatprep.mubr.msk.bf16.mxu0 %vm588_vm0, %v6703_v37 }
 0x136   : > { %5106 = vmatmul.mubr.msk.bf16.gmra.mrb[28].mxu1 %vm588_vm0, %v5643_v28 }
 0x13c   : > { %5266 = vmatmul.mubr.msk.bf16.gmra.mrb[28].mxu0 %vm588_vm0, %v6653_v36 }
 0x1b1   : > { %v5039_v40 = vpop.f32.mrb[0].mxu1 }
 0x1b2   : > { %v1997_v61 = vpop.f32.mrb[1].mxu1 }
 0x1b3   : > { %v5040_v17 = vpop.f32.mrb[2].mxu1 }
 0x1b4   : > { %v2000_v12 = vpop.f32.mrb[3].mxu1 }
 0x1b9   : > { %v5043_v21 = vpop.f32.mrb[4].mxu1 }
 0x1ba   : > { %v2013_v13 = vpop.f32.mrb[5].mxu1 }
 0x1bb   : > { %v6839_v47 = vpop.f32.mrb[6].mxu1 }
 0x1bc   : > { %v6841_v29 = vpop.f32.mrb[7].mxu1 }
 0x1c1   : > { %v6843_v49 = vpop.f32.mrb[8].mxu1 }
 0x1c2   : > { %v6845_v54 = vpop.f32.mrb[9].mxu1 }
 0x1c3   : > { %v6847_v63 = vpop.f32.mrb[10].mxu1 }
 0x1c4   : > { %v6849_v37 = vpop.f32.mrb[11].mxu1 }
 0x1c9   : > { %v6851_v36 = vpop.f32.mrb[12].mxu1 }
 0x1ca   : > { %v6853_v1 = vpop.f32.mrb[13].mxu1 }
 0x1cb   : > { %v6855_v8 = vpop.f32.mrb[14].mxu1 }
 0x1cc   : > { %v6857_v5 = vpop.f32.mrb[15].mxu1 }
 0x1d7   : > { %v5239_v53 = vpop.f32.mrb[0].mxu0 }
 0x1d8   : > { %v5277_v60 = vadd.f32 %v5239_v53, %v5039_v40  ;;  %v3736_v20 = vpop.f32.mrb[1].mxu0 }
 0x1d9   : > { %v5278_v44 = vadd.f32 %v3736_v20, %v1997_v61  ;;  %v5240_v18 = vpop.f32.mrb[2].mxu0 }
 0x1da   : > { %v4064_v2 = vadd.f32 %v5277_v60, %v6862_v6  ;;  %v5279_v58 = vadd.f32 %v5240_v18, %v5040_v17  ;;  %v3739_v42 = vpop.f32.mrb[3].mxu0  ;;  %v3961_v55 = vmul.f32 %v5277_v60, %v5277_v60  ;;  %v3898_v59 = vsel %vm588_vm0, %v5277_v60, 0.0 }
 0x1db   : > { %v3959_v62 = vmul.f32 %v5278_v44, %v5278_v44  ;;  %v4062_v11 = vadd.f32 %v5278_v44, %v6862_v6  ;;  %v5280_v10 = vadd.f32 %v3739_v42, %v2000_v12  ;;  %v3895_v9 = vsel %vm588_vm0, %v5278_v44, 0.0 }
 0x1dc   : > { %v4699_v51 = vpack.c.bf16 %v4064_v2, %v4064_v2  ;;  %v4065_v14 = vadd.f32 %v5279_v58, %v6862_v6  ;;  %v3962_v34 = vmul.f32 %v5279_v58, %v5279_v58  ;;  %v3900_v25 = vsel %vm588_vm0, %v5279_v58, 0.0 }
 0x1dd   : > { %v4697_v33 = vpack.c.bf16 %v4062_v11, %v4062_v11  ;;  %v3896_v56 = vsel %vm588_vm0, %v5280_v10, 0.0  ;;  %v3960_v7 = vmul.f32 %v5280_v10, %v5280_v10  ;;  %v4063_v45 = vadd.f32 %v5280_v10, %v6862_v6 }
 0x1de   : > { %4225 = vst.msk [vmem:[%s6869_s17 + $0x8] sm:$0xf] %vm4222_vm4, %v4699_v51  ;;  %v3897_v31 = vadd.f32 %v3896_v56, %v3895_v9  ;;  %v3991_v57 = vsel %vm588_vm0, %v3959_v62, 0.0  ;;  %v4700_v43 = vpack.c.bf16 %v4065_v14, %v4065_v14  ;;  %v3994_v19 = vsel %vm588_vm0, %v3961_v55, 0.0 }
 0x1df   : > { %4223 = vst.msk [vmem:[%s6869_s17] sm:$0xf] %vm4222_vm4, %v4697_v33  ;;  %v5243_v0 = vpop.f32.mrb[4].mxu0  ;;  %v3992_v48 = vsel %vm588_vm0, %v3960_v7, 0.0  ;;  %v4698_v35 = vpack.c.bf16 %v4063_v45, %v4063_v45  ;;  %v3996_v3 = vsel %vm588_vm0, %v3962_v34, 0.0 }
 0x1e0   : > { %v3899_v38 = vadd.f32 %v3898_v59, %v3897_v31  ;;  %v5281_v39 = vadd.f32 %v5243_v0, %v5043_v21  ;;  %v3752_v52 = vpop.f32.mrb[5].mxu0  ;;  %4226 = vst.msk [vmem:[%s6869_s17 + $0xc] sm:$0xf] %vm4222_vm4, %v4700_v43  ;;  %v3993_v46 = vadd.f32 %v3992_v48, %v3991_v57 }
 0x1e1   : > { %v5282_v27 = vadd.f32 %v3752_v52, %v2013_v13  ;;  %v5244_v26 = vpop.f32.mrb[6].mxu0  ;;  %4224 = vst.msk [vmem:[%s6869_s17 + $0x4] sm:$0xf] %vm4222_vm4, %v4698_v35 }
 0x1e2   : > { %v4068_v16 = vadd.f32 %v5281_v39, %v6862_v6  ;;  %v3901_v22 = vadd.f32 %v3900_v25, %v3899_v38  ;;  %v3755_v24 = vpop.f32.mrb[7].mxu0  ;;  %v3995_v15 = vadd.f32 %v3994_v19, %v3993_v46  ;;  %v5283_v41 = vadd.f32 %v5244_v26, %v6839_v47 }
 0x1e3   : > { %v3902_v4 = vsel %vm588_vm0, %v5282_v27, 0.0  ;;  %v3963_v30 = vmul.f32 %v5282_v27, %v5282_v27  ;;  %v4066_v23 = vadd.f32 %v5282_v27, %v6862_v6  ;;  %v5284_v17 = vadd.f32 %v3755_v24, %v6841_v29 }
 0x1e4   : > { %v4703_v32 = vpack.c.bf16 %v4068_v16, %v4068_v16  ;;  %v3903_v50 = vadd.f32 %v3902_v4, %v3901_v22  ;;  %v3997_v28 = vadd.f32 %v3996_v3, %v3995_v15  ;;  %v3965_v12 = vmul.f32 %v5281_v39, %v5281_v39 }
 0x1e5   : > { %v3998_v40 = vsel %vm588_vm0, %v3963_v30, 0.0  ;;  %v4701_v61 = vpack.c.bf16 %v4066_v23, %v4066_v23  ;;  %v4069_v21 = vadd.f32 %v5283_v41, %v6862_v6  ;;  %v3904_v53 = vsel %vm588_vm0, %v5284_v17, 0.0 }
 0x1e6   : > { %4229 = vst.msk [vmem:[%s6869_s17 + $0x18] sm:$0xf] %vm4222_vm4, %v4703_v32  ;;  %v3999_v13 = vadd.f32 %v3998_v40, %v3997_v28  ;;  %v3964_v60 = vmul.f32 %v5284_v17, %v5284_v17  ;;  %v4067_v47 = vadd.f32 %v5284_v17, %v6862_v6  ;;  %v3966_v44 = vmul.f32 %v5283_v41, %v5283_v41 }
 0x1e7   : > { %4227 = vst.msk [vmem:[%s6869_s17 + $0x10] sm:$0xf] %vm4222_vm4, %v4701_v61  ;;  %v5247_v20 = vpop.f32.mrb[8].mxu0  ;;  %v4704_v18 = vpack.c.bf16 %v4069_v21, %v4069_v21  ;;  %v3905_v2 = vadd.f32 %v3904_v53, %v3903_v50  ;;  %v3906_v42 = vsel %vm588_vm0, %v5281_v39, 0.0  ;;  %v4002_v9 = vsel %vm588_vm0, %v3965_v12, 0.0 }
 0x1e8   : > { %v5285_v29 = vadd.f32 %v5247_v20, %v6843_v49  ;;  %v3768_v58 = vpop.f32.mrb[9].mxu0  ;;  %v4000_v62 = vsel %vm588_vm0, %v3964_v60, 0.0  ;;  %v4702_v11 = vpack.c.bf16 %v4067_v47, %v4067_v47  ;;  %v3908_v33 = vsel %vm588_vm0, %v5283_v41, 0.0 }
 0x1e9   : > { %v5286_v10 = vadd.f32 %v3768_v58, %v6845_v54  ;;  %v5248_v51 = vpop.f32.mrb[10].mxu0  ;;  %4230 = vst.msk [vmem:[%s6869_s17 + $0x1c] sm:$0xf] %vm4222_vm4, %v4704_v18  ;;  %v3907_v14 = vadd.f32 %v3906_v42, %v3905_v2  ;;  %v4001_v56 = vadd.f32 %v4000_v62, %v3999_v13  ;;  %v4004_v57 = vsel %vm588_vm0, %v3966_v44, 0.0 }
 0x1ea   : > { %v3771_v55 = vpop.f32.mrb[11].mxu0  ;;  %4228 = vst.msk [vmem:[%s6869_s17 + $0x14] sm:$0xf] %vm4222_vm4, %v4702_v11  ;;  %v4072_v49 = vadd.f32 %v5285_v29, %v6862_v6  ;;  %v5287_v0 = vadd.f32 %v5248_v51, %v6847_v63  ;;  %v3914_v46 = vsel %vm588_vm0, %v5285_v29, 0.0  ;;  %v3969_v27 = vmul.f32 %v5285_v29, %v5285_v29 }
 0x1eb   : > { %v3910_v7 = vsel %vm588_vm0, %v5286_v10, 0.0  ;;  %v3967_v45 = vmul.f32 %v5286_v10, %v5286_v10  ;;  %v4070_v54 = vadd.f32 %v5286_v10, %v6862_v6  ;;  %v4003_v34 = vadd.f32 %v4002_v9, %v4001_v56 }
 0x1ec   : > { %v3909_v43 = vadd.f32 %v3908_v33, %v3907_v14  ;;  %v4707_v48 = vpack.c.bf16 %v4072_v49, %v4072_v49  ;;  %v5288_v52 = vadd.f32 %v3771_v55, %v6849_v37  ;;  %v4073_v63 = vadd.f32 %v5287_v0, %v6862_v6 }
 0x1ed   : > { %v4006_v35 = vsel %vm588_vm0, %v3967_v45, 0.0  ;;  %v4705_v39 = vpack.c.bf16 %v4070_v54, %v4070_v54  ;;  %v4005_v19 = vadd.f32 %v4004_v57, %v4003_v34  ;;  %v3970_v4 = vmul.f32 %v5287_v0, %v5287_v0 }
 0x1ee   : > { %v3911_v26 = vadd.f32 %v3910_v7, %v3909_v43  ;;  %4233 = vst.msk [vmem:[%s6869_s17 + $0x28] sm:$0xf] %vm4222_vm4, %v4707_v48  ;;  %v3912_v16 = vsel %vm588_vm0, %v5288_v52, 0.0  ;;  %v3968_v22 = vmul.f32 %v5288_v52, %v5288_v52  ;;  %v4071_v24 = vadd.f32 %v5288_v52, %v6862_v6 }
 0x1ef   : > { %4231 = vst.msk [vmem:[%s6869_s17 + $0x20] sm:$0xf] %vm4222_vm4, %v4705_v39  ;;  %v5251_v15 = vpop.f32.mrb[12].mxu0  ;;  %v4007_v37 = vadd.f32 %v4006_v35, %v4005_v19  ;;  %v4708_v32 = vpack.c.bf16 %v4073_v63, %v4073_v63  ;;  %v4010_v61 = vsel %vm588_vm0, %v3969_v27, 0.0  ;;  %v3916_v17 = vsel %vm588_vm0, %v5287_v0, 0.0 }
 0x1f0   : > { %v3913_v30 = vadd.f32 %v3912_v16, %v3911_v26  ;;  %v5289_v23 = vadd.f32 %v5251_v15, %v6851_v36  ;;  %v3784_v3 = vpop.f32.mrb[13].mxu0  ;;  %v4008_v50 = vsel %vm588_vm0, %v3968_v22, 0.0  ;;  %v4706_v41 = vpack.c.bf16 %v4071_v24, %v4071_v24 }
 0x1f1   : > { %v6911_v31 = vpop.f32.mrb[16].mxu1  ;;  %v5290_v28 = vadd.f32 %v3784_v3, %v6853_v1  ;;  %v5252_v40 = vpop.f32.mrb[14].mxu0  ;;  %v4009_v21 = vadd.f32 %v4008_v50, %v4007_v37  ;;  %4234 = vst.msk [vmem:[%s6869_s17 + $0x2c] sm:$0xf] %vm4222_vm4, %v4708_v32  ;;  %v4012_v44 = vsel %vm588_vm0, %v3970_v4, 0.0 }
 0x1f2   : > { %v6918_v59 = vpop.f32.mrb[17].mxu1  ;;  %v3915_v12 = vadd.f32 %v3914_v46, %v3913_v30  ;;  %v3787_v13 = vpop.f32.mrb[15].mxu0  ;;  %4232 = vst.msk [vmem:[%s6869_s17 + $0x24] sm:$0xf] %vm4222_vm4, %v4706_v41  ;;  %v4076_v36 = vadd.f32 %v5289_v23, %v6862_v6  ;;  %v5291_v29 = vadd.f32 %v5252_v40, %v6855_v8  ;;  %v3922_v9 = vsel %vm588_vm0, %v5289_v23, 0.0 }
 0x1f3   : > { %v6922_v38 = vpop.f32.mrb[18].mxu1  ;;  %v3918_v60 = vsel %vm588_vm0, %v5290_v28, 0.0  ;;  %v3971_v47 = vmul.f32 %v5290_v28, %v5290_v28  ;;  %v4074_v1 = vadd.f32 %v5290_v28, %v6862_v6  ;;  %v4011_v18 = vadd.f32 %v4010_v61, %v4009_v21 }
 0x1f4   : > { %v6926_v25 = vpop.f32.mrb[19].mxu1  ;;  %v3917_v2 = vadd.f32 %v3916_v17, %v3915_v12  ;;  %v4711_v42 = vpack.c.bf16 %v4076_v36, %v4076_v36  ;;  %v5292_v10 = vadd.f32 %v3787_v13, %v6857_v5  ;;  %v3973_v33 = vmul.f32 %v5289_v23, %v5289_v23 }
 0x1f5   : > { %v4014_v62 = vsel %vm588_vm0, %v3971_v47, 0.0  ;;  %v4709_v11 = vpack.c.bf16 %v4074_v1, %v4074_v1  ;;  %v4013_v56 = vadd.f32 %v4012_v44, %v4011_v18  ;;  %v4077_v8 = vadd.f32 %v5291_v29, %v6862_v6 }
 0x1f6   : > { %v3919_v14 = vadd.f32 %v3918_v60, %v3917_v2  ;;  %4237 = vst.msk [vmem:[%s6869_s17 + $0x38] sm:$0xf] %vm4222_vm4, %v4711_v42  ;;  %v3920_v55 = vsel %vm588_vm0, %v5292_v10, 0.0  ;;  %v3972_v49 = vmul.f32 %v5292_v10, %v5292_v10  ;;  %v4075_v7 = vadd.f32 %v5292_v10, %v6862_v6 }
 0x1f7   : > { %4235 = vst.msk [vmem:[%s6869_s17 + $0x30] sm:$0xf] %vm4222_vm4, %v4709_v11  ;;  %v5255_v45 = vpop.f32.mrb[16].mxu0  ;;  %v4015_v5 = vadd.f32 %v4014_v62, %v4013_v56  ;;  %v3974_v54 = vmul.f32 %v5291_v29, %v5291_v29  ;;  %v4712_v0 = vpack.c.bf16 %v4077_v8, %v4077_v8  ;;  %v4018_v46 = vsel %vm588_vm0, %v3973_v33, 0.0 }
 0x1f8   : > { %v3921_v57 = vadd.f32 %v3920_v55, %v3919_v14  ;;  %v5293_v34 = vadd.f32 %v5255_v45, %v6911_v31  ;;  %v3800_v43 = vpop.f32.mrb[17].mxu0  ;;  %v4016_v48 = vsel %vm588_vm0, %v3972_v49, 0.0  ;;  %v4710_v35 = vpack.c.bf16 %v4075_v7, %v4075_v7 }
 0x1f9   : > { %v6941_v53 = vpop.f32.mrb[20].mxu1  ;;  %v5294_v39 = vadd.f32 %v3800_v43, %v6918_v59  ;;  %v5256_v52 = vpop.f32.mrb[18].mxu0  ;;  %v3924_v27 = vsel %vm588_vm0, %v5291_v29, 0.0  ;;  %v4017_v19 = vadd.f32 %v4016_v48, %v4015_v5  ;;  %4238 = vst.msk [vmem:[%s6869_s17 + $0x3c] sm:$0xf] %vm4222_vm4, %v4712_v0  ;;  %v4020_v37 = vsel %vm588_vm0, %v3974_v54, 0.0 }
 0x1fa   : > { %v6950_v20 = vpop.f32.mrb[21].mxu1  ;;  %v3923_v26 = vadd.f32 %v3922_v9, %v3921_v57  ;;  %v3803_v63 = vpop.f32.mrb[19].mxu0  ;;  %4236 = vst.msk [vmem:[%s6869_s17 + $0x34] sm:$0xf] %vm4222_vm4, %v4710_v35  ;;  %v4080_v31 = vadd.f32 %v5293_v34, %v6862_v6  ;;  %v5295_v23 = vadd.f32 %v5256_v52, %v6922_v38  ;;  %v3930_v61 = vsel %vm588_vm0, %v5293_v34, 0.0 }
 0x1fb   : > { %v6954_v58 = vpop.f32.mrb[22].mxu1  ;;  %v3926_v22 = vsel %vm588_vm0, %v5294_v39, 0.0  ;;  %v3975_v24 = vmul.f32 %v5294_v39, %v5294_v39  ;;  %v4078_v59 = vadd.f32 %v5294_v39, %v6862_v6  ;;  %v4019_v4 = vadd.f32 %v4018_v46, %v4017_v19 }
 0x1fc   : > { %v6958_v51 = vpop.f32.mrb[23].mxu1  ;;  %v3925_v30 = vadd.f32 %v3924_v27, %v3923_v26  ;;  %v4715_v32 = vpack.c.bf16 %v4080_v31, %v4080_v31  ;;  %v5296_v28 = vadd.f32 %v3803_v63, %v6926_v25  ;;  %v3977_v17 = vmul.f32 %v5293_v34, %v5293_v34 }
 0x1fd   : > { %v4022_v50 = vsel %vm588_vm0, %v3975_v24, 0.0  ;;  %v4713_v41 = vpack.c.bf16 %v4078_v59, %v4078_v59  ;;  %v4021_v21 = vadd.f32 %v4020_v37, %v4019_v4  ;;  %v4081_v38 = vadd.f32 %v5295_v23, %v6862_v6 }
 0x1fe   : > { %v3927_v12 = vadd.f32 %v3926_v22, %v3925_v30  ;;  %4241 = vst.msk [vmem:[%s6869_s17 + $0x48] sm:$0xf] %vm4222_vm4, %v4715_v32  ;;  %v3928_v13 = vsel %vm588_vm0, %v5296_v28, 0.0  ;;  %v3976_v36 = vmul.f32 %v5296_v28, %v5296_v28  ;;  %v4079_v60 = vadd.f32 %v5296_v28, %v6862_v6 }
 0x1ff   : > { %4239 = vst.msk [vmem:[%s6869_s17 + $0x40] sm:$0xf] %vm4222_vm4, %v4713_v41  ;;  %v5259_v47 = vpop.f32.mrb[20].mxu0  ;;  %v4023_v25 = vadd.f32 %v4022_v50, %v4021_v21  ;;  %v3978_v1 = vmul.f32 %v5295_v23, %v5295_v23  ;;  %v4716_v29 = vpack.c.bf16 %v4081_v38, %v4081_v38  ;;  %v4026_v9 = vsel %vm588_vm0, %v3977_v17, 0.0 }
 0x200   : > { %v3929_v44 = vadd.f32 %v3928_v13, %v3927_v12  ;;  %v5297_v18 = vadd.f32 %v5259_v47, %v6941_v53  ;;  %v3816_v2 = vpop.f32.mrb[21].mxu0  ;;  %v4024_v42 = vsel %vm588_vm0, %v3976_v36, 0.0  ;;  %v4714_v62 = vpack.c.bf16 %v4079_v60, %v4079_v60 }
 0x201   : > { %v6973_v16 = vpop.f32.mrb[24].mxu1  ;;  %v5298_v11 = vadd.f32 %v3816_v2, %v6950_v20  ;;  %v5260_v10 = vpop.f32.mrb[22].mxu0  ;;  %v3932_v33 = vsel %vm588_vm0, %v5295_v23, 0.0  ;;  %v4025_v56 = vadd.f32 %v4024_v42, %v4023_v25  ;;  %4242 = vst.msk [vmem:[%s6869_s17 + $0x4c] sm:$0xf] %vm4222_vm4, %v4716_v29  ;;  %v4028_v5 = vsel %vm588_vm0, %v3978_v1, 0.0 }
 0x202   : > { %v6982_v15 = vpop.f32.mrb[25].mxu1  ;;  %v3931_v14 = vadd.f32 %v3930_v61, %v3929_v44  ;;  %v3819_v8 = vpop.f32.mrb[23].mxu0  ;;  %4240 = vst.msk [vmem:[%s6869_s17 + $0x44] sm:$0xf] %vm4222_vm4, %v4714_v62  ;;  %v4084_v53 = vadd.f32 %v5297_v18, %v6862_v6  ;;  %v5299_v34 = vadd.f32 %v5260_v10, %v6954_v58  ;;  %v3938_v46 = vsel %vm588_vm0, %v5297_v18, 0.0 }
 0x203   : > { %v6986_v3 = vpop.f32.mrb[26].mxu1  ;;  %v3934_v49 = vsel %vm588_vm0, %v5298_v11, 0.0  ;;  %v3979_v7 = vmul.f32 %v5298_v11, %v5298_v11  ;;  %v4082_v20 = vadd.f32 %v5298_v11, %v6862_v6  ;;  %v4027_v54 = vadd.f32 %v4026_v9, %v4025_v56 }
 0x204   : > { %v6990_v40 = vpop.f32.mrb[27].mxu1  ;;  %v3933_v57 = vadd.f32 %v3932_v33, %v3931_v14  ;;  %v4719_v0 = vpack.c.bf16 %v4084_v53, %v4084_v53  ;;  %v5300_v39 = vadd.f32 %v3819_v8, %v6958_v51  ;;  %v3981_v27 = vmul.f32 %v5297_v18, %v5297_v18 }
 0x205   : > { %v4030_v48 = vsel %vm588_vm0, %v3979_v7, 0.0  ;;  %v4717_v35 = vpack.c.bf16 %v4082_v20, %v4082_v20  ;;  %v4029_v19 = vadd.f32 %v4028_v5, %v4027_v54  ;;  %v4085_v58 = vadd.f32 %v5299_v34, %v6862_v6 }
 0x206   : > { %v3935_v26 = vadd.f32 %v3934_v49, %v3933_v57  ;;  %4245 = vst.msk [vmem:[%s6869_s17 + $0x58] sm:$0xf] %vm4222_vm4, %v4719_v0  ;;  %v3936_v63 = vsel %vm588_vm0, %v5300_v39, 0.0  ;;  %v3980_v31 = vmul.f32 %v5300_v39, %v5300_v39  ;;  %v4083_v22 = vadd.f32 %v5300_v39, %v6862_v6 }
 0x207   : > { %4243 = vst.msk [vmem:[%s6869_s17 + $0x50] sm:$0xf] %vm4222_vm4, %v4717_v35  ;;  %v5263_v24 = vpop.f32.mrb[24].mxu0  ;;  %v4031_v51 = vadd.f32 %v4030_v48, %v4029_v19  ;;  %v3982_v59 = vmul.f32 %v5299_v34, %v5299_v34  ;;  %v4720_v23 = vpack.c.bf16 %v4085_v58, %v4085_v58  ;;  %v4034_v61 = vsel %vm588_vm0, %v3981_v27, 0.0 }
 0x208   : > { %v3937_v37 = vadd.f32 %v3936_v63, %v3935_v26  ;;  %v5301_v4 = vadd.f32 %v5263_v24, %v6973_v16  ;;  %v3832_v30 = vpop.f32.mrb[25].mxu0  ;;  %v4032_v32 = vsel %vm588_vm0, %v3980_v31, 0.0  ;;  %v4718_v50 = vpack.c.bf16 %v4083_v22, %v4083_v22 }
 0x209   : > { %v7005_v55 = vpop.f32.mrb[28].mxu1  ;;  %v5302_v41 = vadd.f32 %v3832_v30, %v6982_v15  ;;  %v5264_v28 = vpop.f32.mrb[26].mxu0  ;;  %v3940_v17 = vsel %vm588_vm0, %v5299_v34, 0.0  ;;  %v4033_v21 = vadd.f32 %v4032_v32, %v4031_v51  ;;  %4246 = vst.msk [vmem:[%s6869_s17 + $0x5c] sm:$0xf] %vm4222_vm4, %v4720_v23  ;;  %v4036_v60 = vsel %vm588_vm0, %v3982_v59, 0.0 }
 0x20a   : > { %v7014_v45 = vpop.f32.mrb[29].mxu1  ;;  %v3939_v12 = vadd.f32 %v3938_v46, %v3937_v37  ;;  %v3835_v38 = vpop.f32.mrb[27].mxu0  ;;  %4244 = vst.msk [vmem:[%s6869_s17 + $0x54] sm:$0xf] %vm4222_vm4, %v4718_v50  ;;  %v4088_v16 = vadd.f32 %v5301_v4, %v6862_v6  ;;  %v5303_v1 = vadd.f32 %v5264_v28, %v6986_v3  ;;  %v3946_v42 = vsel %vm588_vm0, %v5301_v4, 0.0 }
 0x20b   : > { %v7018_v43 = vpop.f32.mrb[30].mxu1  ;;  %v3942_v13 = vsel %vm588_vm0, %v5302_v41, 0.0  ;;  %v3983_v36 = vmul.f32 %v5302_v41, %v5302_v41  ;;  %v4086_v15 = vadd.f32 %v5302_v41, %v6862_v6  ;;  %v4035_v47 = vadd.f32 %v4034_v61, %v4033_v21 }
 0x20c   : > { %v7022_v52 = vpop.f32.mrb[31].mxu1  ;;  %v3941_v25 = vadd.f32 %v3940_v17, %v3939_v12  ;;  %v4723_v44 = vpack.c.bf16 %v4088_v16, %v4088_v16  ;;  %v5304_v29 = vadd.f32 %v3835_v38, %v6990_v40  ;;  %v3985_v62 = vmul.f32 %v5301_v4, %v5301_v4 }
 0x20d   : > { %v4038_v18 = vsel %vm588_vm0, %v3983_v36, 0.0  ;;  %v4721_v2 = vpack.c.bf16 %v4086_v15, %v4086_v15  ;;  %v4037_v10 = vadd.f32 %v4036_v60, %v4035_v47  ;;  %v4089_v9 = vadd.f32 %v5303_v1, %v6862_v6 }
 0x20e   : > { %v3943_v11 = vadd.f32 %v3942_v13, %v3941_v25  ;;  %4249 = vst.msk [vmem:[%s6869_s17 + $0x68] sm:$0xf] %vm4222_vm4, %v4723_v44  ;;  %v3944_v33 = vsel %vm588_vm0, %v5304_v29, 0.0  ;;  %v3984_v3 = vmul.f32 %v5304_v29, %v5304_v29  ;;  %v4087_v14 = vadd.f32 %v5304_v29, %v6862_v6 }
 0x20f   : > { %4247 = vst.msk [vmem:[%s6869_s17 + $0x60] sm:$0xf] %vm4222_vm4, %v4721_v2  ;;  %v5267_v56 = vpop.f32.mrb[28].mxu0  ;;  %v4039_v8 = vadd.f32 %v4038_v18, %v4037_v10  ;;  %v3986_v40 = vmul.f32 %v5303_v1, %v5303_v1  ;;  %v4724_v20 = vpack.c.bf16 %v4089_v9, %v4089_v9  ;;  %v4042_v0 = vsel %vm588_vm0, %v3985_v62, 0.0 }
 0x210   : > { %v3945_v53 = vadd.f32 %v3944_v33, %v3943_v11  ;;  %v5305_v49 = vadd.f32 %v5267_v56, %v7005_v55  ;;  %v3848_v7 = vpop.f32.mrb[29].mxu0  ;;  %v4040_v5 = vsel %vm588_vm0, %v3984_v3, 0.0  ;;  %v4722_v54 = vpack.c.bf16 %v4087_v14, %v4087_v14 }
 0x211   : > { %v5306_v57 = vadd.f32 %v3848_v7, %v7014_v45  ;;  %v5268_v34 = vpop.f32.mrb[30].mxu0  ;;  %v3948_v48 = vsel %vm588_vm0, %v5303_v1, 0.0  ;;  %v4041_v39 = vadd.f32 %v4040_v5, %v4039_v8  ;;  %4250 = vst.msk [vmem:[%s6869_s17 + $0x6c] sm:$0xf] %vm4222_vm4, %v4724_v20  ;;  %v4044_v19 = vsel %vm588_vm0, %v3986_v40, 0.0 }
 0x212   : > { %v3947_v35 = vadd.f32 %v3946_v42, %v3945_v53  ;;  %v3851_v46 = vpop.f32.mrb[31].mxu0  ;;  %4248 = vst.msk [vmem:[%s6869_s17 + $0x64] sm:$0xf] %vm4222_vm4, %v4722_v54  ;;  %v4092_v55 = vadd.f32 %v5305_v49, %v6862_v6  ;;  %v5307_v31 = vadd.f32 %v5268_v34, %v7018_v43  ;;  %v3989_v37 = vmul.f32 %v5305_v49, %v5305_v49 }
 0x213   : > { %v3950_v27 = vsel %vm588_vm0, %v5306_v57, 0.0  ;;  %v3987_v26 = vmul.f32 %v5306_v57, %v5306_v57  ;;  %v4090_v45 = vadd.f32 %v5306_v57, %v6862_v6  ;;  %v4043_v58 = vadd.f32 %v4042_v0, %v4041_v39 }
 0x214   : > { %v3949_v63 = vadd.f32 %v3948_v48, %v3947_v35  ;;  %v4727_v22 = vpack.c.bf16 %v4092_v55, %v4092_v55  ;;  %v5308_v59 = vadd.f32 %v3851_v46, %v7022_v52  ;;  %v4093_v23 = vadd.f32 %v5307_v31, %v6862_v6 }
 0x215   : > { %v4046_v24 = vsel %vm588_vm0, %v3987_v26, 0.0  ;;  %v4725_v51 = vpack.c.bf16 %v4090_v45, %v4090_v45  ;;  %v4045_v30 = vadd.f32 %v4044_v19, %v4043_v58  ;;  %v3954_v41 = vsel %vm588_vm0, %v5305_v49, 0.0 }
 0x216   : > { %v3951_v4 = vadd.f32 %v3950_v27, %v3949_v63  ;;  %4253 = vst.msk [vmem:[%s6869_s17 + $0x78] sm:$0xf] %vm4222_vm4, %v4727_v22  ;;  %v3952_v32 = vsel %vm588_vm0, %v5308_v59, 0.0  ;;  %v3988_v43 = vmul.f32 %v5308_v59, %v5308_v59  ;;  %v4091_v50 = vadd.f32 %v5308_v59, %v6862_v6 }
 0x217   : > { %4251 = vst.msk [vmem:[%s6869_s17 + $0x70] sm:$0xf] %vm4222_vm4, %v4725_v51  ;;  %v4047_v28 = vadd.f32 %v4046_v24, %v4045_v30  ;;  %v3990_v61 = vmul.f32 %v5307_v31, %v5307_v31  ;;  %v4728_v17 = vpack.c.bf16 %v4093_v23, %v4093_v23  ;;  %v4050_v13 = vsel %vm588_vm0, %v3989_v37, 0.0 }
 0x218   : > { %v3953_v52 = vadd.f32 %v3952_v32, %v3951_v4  ;;  %v4048_v12 = vsel %vm588_vm0, %v3988_v43, 0.0  ;;  %v4726_v21 = vpack.c.bf16 %v4091_v50, %v4091_v50  ;;  %v3956_v36 = vsel %vm588_vm0, %v5307_v31, 0.0 }
 0x219   : > { %v4049_v16 = vadd.f32 %v4048_v12, %v4047_v28  ;;  %4254 = vst.msk [vmem:[%s6869_s17 + $0x7c] sm:$0xf] %vm4222_vm4, %v4728_v17  ;;  %v4052_v60 = vsel %vm588_vm0, %v3990_v61, 0.0 }
 0x21a   : > { %v3955_v38 = vadd.f32 %v3954_v41, %v3953_v52  ;;  %4252 = vst.msk [vmem:[%s6869_s17 + $0x74] sm:$0xf] %vm4222_vm4, %v4726_v21 }
 0x21b   : > { %v4051_v15 = vadd.f32 %v4050_v13, %v4049_v16 }
 0x21c   : > { %v3957_v6 = vadd.f32 %v3956_v36, %v3955_v38 }
 0x21d   : > { %v4053_v47 = vadd.f32 %v4052_v60, %v4051_v15 }
 0x21e   : > { %3958 = vst.msk [vmem:[%s241_s23] sm:$0xff] %vm588_vm0, %v3957_v6 }
 0x21f   : > { %4054 = vst.msk [vmem:[%s245_s25] sm:$0xff] %vm588_vm0, %v4053_v47 }
 0x220 PF: > { %s16_s18 = sadd.s32 1, %s5701_s18  }
 0x221   : > { %p13_p4 = scmp.ge.s32.totalorder %s16_s18, 4  }
 0x223   :  { %15 = sbr.rel (!%p13_p4) target bundleno = 1 (0x1), region = 86 }

// kernel: discriminator_forward.9
= control target key start
LH: loop header
LB: loop body
LE: loop exit
PB: predicated region body
PF: predicated region fallthrough
CT: control target
= control target key end

     0   :  { %s847_s0 = inlined_call_operand.vmem [shape: bf16[256,128], index: 0, kind: input, shape index: {}]   ;;  %s848_s1 = inlined_call_operand.vmem [shape: f32[1,128], index: 1, kind: input, shape index: {}]   ;;  %s849_s2 = inlined_call_operand.vmem [shape: f32[1,128], index: 2, kind: input, shape index: {}]   ;;  %s850_s3 = inlined_call_operand.vmem [shape: bf16[256,128], index: 3, kind: output, shape index: {}]  }
   0x1   :  { %v483_v0 = vld [vmem:[%s847_s0] sm:$0xff]   ;;  %v626_v4 = vld [vmem:[%s847_s0 + $0x8] sm:$0xff]   ;;  %v627_v5 = vld [vmem:[%s847_s0 + $0x10] sm:$0xff]  }
   0x2   :  { %v682_v1 = vld [vmem:[%s848_s1] ss:$0 sm:$0xff]  ;;  %v484_v2 = vunpack.c.l.bf16 %v483_v0  ;;  %v485_v3 = vunpack.c.h.bf16 %v483_v0  ;;  %v628_v6 = vld [vmem:[%s847_s0 + $0x18] sm:$0xff]   ;;  %v488_v8 = vunpack.c.l.bf16 %v626_v4  ;;  %v489_v9 = vunpack.c.h.bf16 %v626_v4  ;;  %v630_v35 = vld [vmem:[%s847_s0 + $0x28] sm:$0xff]  }
   0x3   :  { %v696_v7 = vld [vmem:[%s849_s2] ss:$0 sm:$0xff]  ;;  %v492_v10 = vunpack.c.l.bf16 %v627_v5  ;;  %v493_v11 = vunpack.c.h.bf16 %v627_v5  ;;  %v496_v14 = vunpack.c.l.bf16 %v628_v6  ;;  %v497_v15 = vunpack.c.h.bf16 %v628_v6  ;;  %v631_v48 = vld [vmem:[%s847_s0 + $0x30] sm:$0xff]   ;;  %v632_v4 = vld [vmem:[%s847_s0 + $0x38] sm:$0xff]  }
   0x4   :  { %v85_v12 = vmul.f32 %v484_v2, %v682_v1  ;;  %v86_v13 = vmul.f32 %v485_v3, %v682_v1  ;;  %v87_v16 = vmul.f32 %v488_v8, %v682_v1  ;;  %v88_v17 = vmul.f32 %v489_v9, %v682_v1  ;;  %v629_v34 = vld [vmem:[%s847_s0 + $0x20] sm:$0xff]  }
   0x5   :  { %v89_v18 = vmul.f32 %v492_v10, %v682_v1  ;;  %v90_v19 = vmul.f32 %v493_v11, %v682_v1  ;;  %v91_v22 = vmul.f32 %v496_v14, %v682_v1  ;;  %v92_v23 = vmul.f32 %v497_v15, %v682_v1  ;;  %v633_v15 = vld [vmem:[%s847_s0 + $0x40] sm:$0xff]  }
   0x6   :  { %v124_v20 = vadd.f32 %v696_v7, %v85_v12  ;;  %v125_v21 = vadd.f32 %v696_v7, %v86_v13  ;;  %v126_v24 = vadd.f32 %v696_v7, %v87_v16  ;;  %v127_v25 = vadd.f32 %v696_v7, %v88_v17 }
   0x7   :  { %v128_v26 = vadd.f32 %v696_v7, %v89_v18  ;;  %v129_v27 = vadd.f32 %v696_v7, %v90_v19  ;;  %v130_v42 = vadd.f32 %v696_v7, %v91_v22  ;;  %v131_v43 = vadd.f32 %v696_v7, %v92_v23 }
   0x8   :  { %vm156_vm0 = vcmp.ge.f32.partialorder %v124_v20, 0.0  ;;  %vm157_vm1 = vcmp.ge.f32.partialorder %v125_v21, 0.0  ;;  %v188_v28 = vmul.f32 0.2, %v124_v20  ;;  %v189_v29 = vmul.f32 0.2, %v125_v21 }
   0x9   :  { %vm158_vm2 = vcmp.ge.f32.partialorder %v126_v24, 0.0  ;;  %vm159_vm3 = vcmp.ge.f32.partialorder %v127_v25, 0.0  ;;  %v190_v30 = vmul.f32 0.2, %v126_v24  ;;  %v191_v31 = vmul.f32 0.2, %v127_v25 }
   0xa   :  { %v220_v32 = vsel %vm156_vm0, %v124_v20, %v188_v28  ;;  %v221_v33 = vsel %vm157_vm1, %v125_v21, %v189_v29  ;;  %vm160_vm4 = vcmp.ge.f32.partialorder %v128_v26, 0.0  ;;  %vm161_vm5 = vcmp.ge.f32.partialorder %v129_v27, 0.0 }
   0xb   :  { %v549_v36 = vpack.c.bf16 %v221_v33, %v220_v32  ;;  %v222_v37 = vsel %vm158_vm2, %v126_v24, %v190_v30  ;;  %v223_v38 = vsel %vm159_vm3, %v127_v25, %v191_v31  ;;  %v192_v39 = vmul.f32 0.2, %v128_v26 }
   0xc   :  { %v554_v40 = vpack.c.bf16 %v223_v38, %v222_v37  ;;  %v193_v41 = vmul.f32 0.2, %v129_v27  ;;  %v500_v45 = vunpack.c.l.bf16 %v629_v34  ;;  %v501_v46 = vunpack.c.h.bf16 %v629_v34 }
   0xd   :  { %550 = vst [vmem:[%s850_s3] sm:$0xff] %v549_v36   ;;  %v224_v44 = vsel %vm160_vm4, %v128_v26, %v192_v39  ;;  %v504_v47 = vunpack.c.l.bf16 %v630_v35  ;;  %vm162_vm6 = vcmp.ge.f32.partialorder %v130_v42, 0.0  ;;  %vm163_vm7 = vcmp.ge.f32.partialorder %v131_v43, 0.0  ;;  %v634_v26 = vld [vmem:[%s847_s0 + $0x48] sm:$0xff]  }
   0xe   :  { %641 = vst [vmem:[%s850_s3 + $0x8] sm:$0xff] %v554_v40   ;;  %v225_v49 = vsel %vm161_vm5, %v129_v27, %v193_v41  ;;  %v194_v50 = vmul.f32 0.2, %v130_v42  ;;  %v195_v52 = vmul.f32 0.2, %v131_v43  ;;  %v93_v53 = vmul.f32 %v500_v45, %v682_v1  ;;  %v635_v27 = vld [vmem:[%s847_s0 + $0x50] sm:$0xff]  }
   0xf   :  { %v559_v51 = vpack.c.bf16 %v225_v49, %v224_v44  ;;  %v94_v54 = vmul.f32 %v501_v46, %v682_v1  ;;  %v505_v56 = vunpack.c.h.bf16 %v630_v35  ;;  %v95_v57 = vmul.f32 %v504_v47, %v682_v1 }
  0x10   :  { %v226_v55 = vsel %vm162_vm6, %v130_v42, %v194_v50  ;;  %v508_v58 = vunpack.c.l.bf16 %v631_v48  ;;  %v227_v59 = vsel %vm163_vm7, %v131_v43, %v195_v52  ;;  %v132_v60 = vadd.f32 %v696_v7, %v93_v53 }
  0x11   :  { %642 = vst [vmem:[%s850_s3 + $0x10] sm:$0xff] %v559_v51   ;;  %v133_v61 = vadd.f32 %v696_v7, %v94_v54  ;;  %v509_v62 = vunpack.c.h.bf16 %v631_v48  ;;  %v564_v63 = vpack.c.bf16 %v227_v59, %v226_v55  ;;  %v96_v0 = vmul.f32 %v505_v56, %v682_v1  ;;  %v636_v55 = vld [vmem:[%s847_s0 + $0x58] sm:$0xff]  }
  0x12   :  { %v134_v2 = vadd.f32 %v696_v7, %v95_v57  ;;  %v97_v3 = vmul.f32 %v508_v58, %v682_v1  ;;  %vm164_vm8 = vcmp.ge.f32.partialorder %v132_v60, 0.0  ;;  %v196_v5 = vmul.f32 0.2, %v132_v60 }
  0x13   :  { %vm165_vm9 = vcmp.ge.f32.partialorder %v133_v61, 0.0  ;;  %v197_v6 = vmul.f32 0.2, %v133_v61  ;;  %643 = vst [vmem:[%s850_s3 + $0x18] sm:$0xff] %v564_v63   ;;  %v135_v8 = vadd.f32 %v696_v7, %v96_v0  ;;  %v98_v10 = vmul.f32 %v509_v62, %v682_v1 }
  0x14   :  { %vm166_vm10 = vcmp.ge.f32.partialorder %v134_v2, 0.0  ;;  %v198_v9 = vmul.f32 0.2, %v134_v2  ;;  %v228_v11 = vsel %vm164_vm8, %v132_v60, %v196_v5  ;;  %v136_v13 = vadd.f32 %v696_v7, %v97_v3  ;;  %v637_v60 = vld [vmem:[%s847_s0 + $0x60] sm:$0xff]  }
  0x15   :  { %v229_v12 = vsel %vm165_vm9, %v133_v61, %v197_v6  ;;  %v512_v14 = vunpack.c.l.bf16 %v632_v4  ;;  %vm167_vm11 = vcmp.ge.f32.partialorder %v135_v8, 0.0  ;;  %v199_v17 = vmul.f32 0.2, %v135_v8 }
  0x16   :  { %v569_v16 = vpack.c.bf16 %v229_v12, %v228_v11  ;;  %v230_v18 = vsel %vm166_vm10, %v134_v2, %v198_v9  ;;  %v137_v19 = vadd.f32 %v696_v7, %v98_v10  ;;  %vm168_vm12 = vcmp.ge.f32.partialorder %v136_v13, 0.0  ;;  %v638_v9 = vld [vmem:[%s847_s0 + $0x68] sm:$0xff]  }
  0x17   :  { %v200_v20 = vmul.f32 0.2, %v136_v13  ;;  %v513_v21 = vunpack.c.h.bf16 %v632_v4  ;;  %v231_v22 = vsel %vm167_vm11, %v135_v8, %v199_v17  ;;  %v99_v23 = vmul.f32 %v512_v14, %v682_v1 }
  0x18   :  { %644 = vst [vmem:[%s850_s3 + $0x20] sm:$0xff] %v569_v16   ;;  %v516_v24 = vunpack.c.l.bf16 %v633_v15  ;;  %v517_v25 = vunpack.c.h.bf16 %v633_v15  ;;  %v574_v28 = vpack.c.bf16 %v231_v22, %v230_v18  ;;  %vm169_vm13 = vcmp.ge.f32.partialorder %v137_v19, 0.0 }
  0x19   :  { %v201_v29 = vmul.f32 0.2, %v137_v19  ;;  %v232_v30 = vsel %vm168_vm12, %v136_v13, %v200_v20  ;;  %v100_v31 = vmul.f32 %v513_v21, %v682_v1  ;;  %v138_v32 = vadd.f32 %v696_v7, %v99_v23 }
  0x1a   :  { %v101_v33 = vmul.f32 %v516_v24, %v682_v1  ;;  %v102_v34 = vmul.f32 %v517_v25, %v682_v1  ;;  %645 = vst [vmem:[%s850_s3 + $0x28] sm:$0xff] %v574_v28   ;;  %v520_v36 = vunpack.c.l.bf16 %v634_v26  ;;  %v521_v37 = vunpack.c.h.bf16 %v634_v26  ;;  %v639_v28 = vld [vmem:[%s847_s0 + $0x70] sm:$0xff]  }
  0x1b   :  { %v233_v35 = vsel %vm169_vm13, %v137_v19, %v201_v29  ;;  %v524_v38 = vunpack.c.l.bf16 %v635_v27  ;;  %v139_v40 = vadd.f32 %v696_v7, %v100_v31  ;;  %vm170_vm14 = vcmp.ge.f32.partialorder %v138_v32, 0.0 }
  0x1c   :  { %v579_v39 = vpack.c.bf16 %v233_v35, %v232_v30  ;;  %v202_v41 = vmul.f32 0.2, %v138_v32  ;;  %v140_v42 = vadd.f32 %v696_v7, %v101_v33  ;;  %v141_v43 = vadd.f32 %v696_v7, %v102_v34 }
  0x1d   :  { %v103_v44 = vmul.f32 %v520_v36, %v682_v1  ;;  %v104_v45 = vmul.f32 %v521_v37, %v682_v1  ;;  %vm171_vm15 = vcmp.ge.f32.partialorder %v139_v40, 0.0  ;;  %v203_v46 = vmul.f32 0.2, %v139_v40  ;;  %v640_v37 = vld [vmem:[%s847_s0 + $0x78] sm:$0xff]  }
  0x1e   :  { %646 = vst [vmem:[%s850_s3 + $0x30] sm:$0xff] %v579_v39   ;;  %v234_v47 = vsel %vm170_vm14, %v138_v32, %v202_v41  ;;  %v525_v48 = vunpack.c.h.bf16 %v635_v27  ;;  %vm172_vm0 = vcmp.ge.f32.partialorder %v140_v42, 0.0  ;;  %vm173_vm1 = vcmp.ge.f32.partialorder %v141_v43, 0.0 }
  0x1f   :  { %v204_v49 = vmul.f32 0.2, %v140_v42  ;;  %v205_v50 = vmul.f32 0.2, %v141_v43  ;;  %v235_v51 = vsel %vm171_vm15, %v139_v40, %v203_v46  ;;  %v142_v52 = vadd.f32 %v696_v7, %v103_v44 }
  0x20   :  { %v143_v53 = vadd.f32 %v696_v7, %v104_v45  ;;  %v105_v54 = vmul.f32 %v524_v38, %v682_v1  ;;  %v584_v56 = vpack.c.bf16 %v235_v51, %v234_v47  ;;  %v106_v59 = vmul.f32 %v525_v48, %v682_v1 }
  0x21   :  { %v236_v57 = vsel %vm172_vm0, %v140_v42, %v204_v49  ;;  %v237_v58 = vsel %vm173_vm1, %v141_v43, %v205_v50  ;;  %vm174_vm2 = vcmp.ge.f32.partialorder %v142_v52, 0.0  ;;  %v206_v62 = vmul.f32 0.2, %v142_v52 }
  0x22   :  { %v589_v61 = vpack.c.bf16 %v237_v58, %v236_v57  ;;  %vm175_vm3 = vcmp.ge.f32.partialorder %v143_v53, 0.0  ;;  %647 = vst [vmem:[%s850_s3 + $0x38] sm:$0xff] %v584_v56   ;;  %v207_v63 = vmul.f32 0.2, %v143_v53  ;;  %v144_v0 = vadd.f32 %v696_v7, %v105_v54 }
  0x23   :  { %v145_v2 = vadd.f32 %v696_v7, %v106_v59  ;;  %v528_v3 = vunpack.c.l.bf16 %v636_v55  ;;  %v238_v4 = vsel %vm174_vm2, %v142_v52, %v206_v62  ;;  %v529_v5 = vunpack.c.h.bf16 %v636_v55 }
  0x24   :  { %648 = vst [vmem:[%s850_s3 + $0x40] sm:$0xff] %v589_v61   ;;  %v532_v6 = vunpack.c.l.bf16 %v637_v60  ;;  %v533_v8 = vunpack.c.h.bf16 %v637_v60  ;;  %v239_v10 = vsel %vm175_vm3, %v143_v53, %v207_v63  ;;  %vm176_vm4 = vcmp.ge.f32.partialorder %v144_v0, 0.0 }
  0x25   :  { %vm177_vm5 = vcmp.ge.f32.partialorder %v145_v2, 0.0  ;;  %v208_v11 = vmul.f32 0.2, %v144_v0  ;;  %v594_v12 = vpack.c.bf16 %v239_v10, %v238_v4  ;;  %v209_v13 = vmul.f32 0.2, %v145_v2 }
  0x26   :  { %v107_v14 = vmul.f32 %v528_v3, %v682_v1  ;;  %v108_v15 = vmul.f32 %v529_v5, %v682_v1  ;;  %v109_v17 = vmul.f32 %v532_v6, %v682_v1  ;;  %v110_v18 = vmul.f32 %v533_v8, %v682_v1 }
  0x27   :  { %v240_v16 = vsel %vm176_vm4, %v144_v0, %v208_v11  ;;  %v536_v19 = vunpack.c.l.bf16 %v638_v9  ;;  %649 = vst [vmem:[%s850_s3 + $0x48] sm:$0xff] %v594_v12   ;;  %v241_v20 = vsel %vm177_vm5, %v145_v2, %v209_v13  ;;  %v537_v23 = vunpack.c.h.bf16 %v638_v9 }
  0x28   :  { %v146_v21 = vadd.f32 %v696_v7, %v107_v14  ;;  %v147_v22 = vadd.f32 %v696_v7, %v108_v15  ;;  %v599_v24 = vpack.c.bf16 %v241_v20, %v240_v16  ;;  %v148_v25 = vadd.f32 %v696_v7, %v109_v17 }
  0x29   :  { %v149_v26 = vadd.f32 %v696_v7, %v110_v18  ;;  %v111_v27 = vmul.f32 %v536_v19, %v682_v1  ;;  %v112_v35 = vmul.f32 %v537_v23, %v682_v1  ;;  %v540_v41 = vunpack.c.l.bf16 %v639_v28 }
  0x2a   :  { %vm178_vm6 = vcmp.ge.f32.partialorder %v146_v21, 0.0  ;;  %vm179_vm7 = vcmp.ge.f32.partialorder %v147_v22, 0.0  ;;  %v210_v29 = vmul.f32 0.2, %v146_v21  ;;  %v211_v30 = vmul.f32 0.2, %v147_v22 }
  0x2b   :  { %650 = vst [vmem:[%s850_s3 + $0x50] sm:$0xff] %v599_v24   ;;  %vm180_vm8 = vcmp.ge.f32.partialorder %v148_v25, 0.0  ;;  %vm181_vm9 = vcmp.ge.f32.partialorder %v149_v26, 0.0  ;;  %v212_v31 = vmul.f32 0.2, %v148_v25  ;;  %v150_v36 = vadd.f32 %v696_v7, %v111_v27 }
  0x2c   :  { %v213_v32 = vmul.f32 0.2, %v149_v26  ;;  %v242_v33 = vsel %vm178_vm6, %v146_v21, %v210_v29  ;;  %v243_v34 = vsel %vm179_vm7, %v147_v22, %v211_v30  ;;  %v151_v43 = vadd.f32 %v696_v7, %v112_v35 }
  0x2d   :  { %v604_v38 = vpack.c.bf16 %v243_v34, %v242_v33  ;;  %v244_v39 = vsel %vm180_vm8, %v148_v25, %v212_v31  ;;  %vm182_vm10 = vcmp.ge.f32.partialorder %v150_v36, 0.0  ;;  %v214_v44 = vmul.f32 0.2, %v150_v36 }
  0x2e   :  { %v245_v40 = vsel %vm181_vm9, %v149_v26, %v213_v32  ;;  %v541_v45 = vunpack.c.h.bf16 %v639_v28  ;;  %v113_v46 = vmul.f32 %v540_v41, %v682_v1  ;;  %v544_v47 = vunpack.c.l.bf16 %v640_v37 }
  0x2f   :  { %v609_v42 = vpack.c.bf16 %v245_v40, %v244_v39  ;;  %651 = vst [vmem:[%s850_s3 + $0x58] sm:$0xff] %v604_v38   ;;  %v545_v48 = vunpack.c.h.bf16 %v640_v37  ;;  %vm183_vm11 = vcmp.ge.f32.partialorder %v151_v43, 0.0  ;;  %v215_v49 = vmul.f32 0.2, %v151_v43 }
  0x30   :  { %v246_v50 = vsel %vm182_vm10, %v150_v36, %v214_v44  ;;  %v114_v51 = vmul.f32 %v541_v45, %v682_v1  ;;  %v152_v52 = vadd.f32 %v696_v7, %v113_v46  ;;  %v115_v53 = vmul.f32 %v544_v47, %v682_v1 }
  0x31   :  { %652 = vst [vmem:[%s850_s3 + $0x60] sm:$0xff] %v609_v42   ;;  %v116_v54 = vmul.f32 %v545_v48, %v682_v1  ;;  %v247_v55 = vsel %vm183_vm11, %v151_v43, %v215_v49 }
  0x32   :  { %v614_v56 = vpack.c.bf16 %v247_v55, %v246_v50  ;;  %v153_v57 = vadd.f32 %v696_v7, %v114_v51  ;;  %vm184_vm12 = vcmp.ge.f32.partialorder %v152_v52, 0.0  ;;  %v216_v58 = vmul.f32 0.2, %v152_v52 }
  0x33   :  { %v154_v59 = vadd.f32 %v696_v7, %v115_v53  ;;  %v155_v60 = vadd.f32 %v696_v7, %v116_v54 }
  0x34   :  { %653 = vst [vmem:[%s850_s3 + $0x68] sm:$0xff] %v614_v56   ;;  %vm185_vm13 = vcmp.ge.f32.partialorder %v153_v57, 0.0  ;;  %v217_v61 = vmul.f32 0.2, %v153_v57  ;;  %v248_v62 = vsel %vm184_vm12, %v152_v52, %v216_v58 }
  0x35   :  { %vm186_vm14 = vcmp.ge.f32.partialorder %v154_v59, 0.0  ;;  %vm187_vm15 = vcmp.ge.f32.partialorder %v155_v60, 0.0  ;;  %v218_v1 = vmul.f32 0.2, %v154_v59  ;;  %v219_v63 = vmul.f32 0.2, %v155_v60 }
  0x36   :  { %v249_v0 = vsel %vm185_vm13, %v153_v57, %v217_v61 }
  0x37   :  { %v619_v2 = vpack.c.bf16 %v249_v0, %v248_v62  ;;  %v250_v3 = vsel %vm186_vm14, %v154_v59, %v218_v1  ;;  %v251_v4 = vsel %vm187_vm15, %v155_v60, %v219_v63 }
  0x38   :  { %v624_v5 = vpack.c.bf16 %v251_v4, %v250_v3 }
  0x39   :  { %654 = vst [vmem:[%s850_s3 + $0x70] sm:$0xff] %v619_v2  }
  0x3a   :  { %655 = vst [vmem:[%s850_s3 + $0x78] sm:$0xff] %v624_v5  }

// kernel: discriminator_forward.11
= control target key start
LH: loop header
LB: loop body
LE: loop exit
PB: predicated region body
PF: predicated region fallthrough
CT: control target
= control target key end

     0   :  { %s1631_s0 = inlined_call_operand.vmem [shape: bf16[512,128], index: 0, kind: input, shape index: {}]   ;;  %s1632_s1 = inlined_call_operand.vmem [shape: f32[1,128], index: 1, kind: input, shape index: {}]   ;;  %s1633_s2 = inlined_call_operand.vmem [shape: f32[1,128], index: 2, kind: input, shape index: {}]   ;;  %s1634_s3 = inlined_call_operand.vmem [shape: bf16[512,128], index: 3, kind: output, shape index: {}]  }
   0x1   :  { %v931_v0 = vld [vmem:[%s1631_s0] sm:$0xff]   ;;  %v1218_v4 = vld [vmem:[%s1631_s0 + $0x8] sm:$0xff]   ;;  %v1219_v5 = vld [vmem:[%s1631_s0 + $0x10] sm:$0xff]  }
   0x2   :  { %v1306_v1 = vld [vmem:[%s1632_s1] ss:$0 sm:$0xff]  ;;  %v932_v2 = vunpack.c.l.bf16 %v931_v0  ;;  %v933_v3 = vunpack.c.h.bf16 %v931_v0  ;;  %v1220_v6 = vld [vmem:[%s1631_s0 + $0x18] sm:$0xff]   ;;  %v936_v8 = vunpack.c.l.bf16 %v1218_v4  ;;  %v937_v9 = vunpack.c.h.bf16 %v1218_v4  ;;  %v1222_v35 = vld [vmem:[%s1631_s0 + $0x28] sm:$0xff]  }
   0x3   :  { %v1320_v7 = vld [vmem:[%s1633_s2] ss:$0 sm:$0xff]  ;;  %v940_v10 = vunpack.c.l.bf16 %v1219_v5  ;;  %v941_v11 = vunpack.c.h.bf16 %v1219_v5  ;;  %v944_v14 = vunpack.c.l.bf16 %v1220_v6  ;;  %v945_v15 = vunpack.c.h.bf16 %v1220_v6  ;;  %v1223_v48 = vld [vmem:[%s1631_s0 + $0x30] sm:$0xff]   ;;  %v1224_v4 = vld [vmem:[%s1631_s0 + $0x38] sm:$0xff]  }
   0x4   :  { %v149_v12 = vmul.f32 %v932_v2, %v1306_v1  ;;  %v150_v13 = vmul.f32 %v933_v3, %v1306_v1  ;;  %v151_v16 = vmul.f32 %v936_v8, %v1306_v1  ;;  %v152_v17 = vmul.f32 %v937_v9, %v1306_v1  ;;  %v1221_v34 = vld [vmem:[%s1631_s0 + $0x20] sm:$0xff]  }
   0x5   :  { %v153_v18 = vmul.f32 %v940_v10, %v1306_v1  ;;  %v154_v19 = vmul.f32 %v941_v11, %v1306_v1  ;;  %v155_v22 = vmul.f32 %v944_v14, %v1306_v1  ;;  %v156_v23 = vmul.f32 %v945_v15, %v1306_v1  ;;  %v1225_v15 = vld [vmem:[%s1631_s0 + $0x40] sm:$0xff]  }
   0x6   :  { %v220_v20 = vadd.f32 %v1320_v7, %v149_v12  ;;  %v221_v21 = vadd.f32 %v1320_v7, %v150_v13  ;;  %v222_v24 = vadd.f32 %v1320_v7, %v151_v16  ;;  %v223_v25 = vadd.f32 %v1320_v7, %v152_v17 }
   0x7   :  { %v224_v26 = vadd.f32 %v1320_v7, %v153_v18  ;;  %v225_v27 = vadd.f32 %v1320_v7, %v154_v19  ;;  %v226_v42 = vadd.f32 %v1320_v7, %v155_v22  ;;  %v227_v43 = vadd.f32 %v1320_v7, %v156_v23 }
   0x8   :  { %vm284_vm0 = vcmp.ge.f32.partialorder %v220_v20, 0.0  ;;  %vm285_vm1 = vcmp.ge.f32.partialorder %v221_v21, 0.0  ;;  %v348_v28 = vmul.f32 0.2, %v220_v20  ;;  %v349_v29 = vmul.f32 0.2, %v221_v21 }
   0x9   :  { %vm286_vm2 = vcmp.ge.f32.partialorder %v222_v24, 0.0  ;;  %vm287_vm3 = vcmp.ge.f32.partialorder %v223_v25, 0.0  ;;  %v350_v30 = vmul.f32 0.2, %v222_v24  ;;  %v351_v31 = vmul.f32 0.2, %v223_v25 }
   0xa   :  { %v412_v32 = vsel %vm284_vm0, %v220_v20, %v348_v28  ;;  %v413_v33 = vsel %vm285_vm1, %v221_v21, %v349_v29  ;;  %vm288_vm4 = vcmp.ge.f32.partialorder %v224_v26, 0.0  ;;  %vm289_vm5 = vcmp.ge.f32.partialorder %v225_v27, 0.0 }
   0xb   :  { %v1061_v36 = vpack.c.bf16 %v413_v33, %v412_v32  ;;  %v414_v37 = vsel %vm286_vm2, %v222_v24, %v350_v30  ;;  %v415_v38 = vsel %vm287_vm3, %v223_v25, %v351_v31  ;;  %v352_v39 = vmul.f32 0.2, %v224_v26 }
   0xc   :  { %v1066_v40 = vpack.c.bf16 %v415_v38, %v414_v37  ;;  %v353_v41 = vmul.f32 0.2, %v225_v27  ;;  %v948_v45 = vunpack.c.l.bf16 %v1221_v34  ;;  %v949_v46 = vunpack.c.h.bf16 %v1221_v34 }
   0xd   :  { %1062 = vst [vmem:[%s1634_s3] sm:$0xff] %v1061_v36   ;;  %v416_v44 = vsel %vm288_vm4, %v224_v26, %v352_v39  ;;  %v952_v47 = vunpack.c.l.bf16 %v1222_v35  ;;  %vm290_vm6 = vcmp.ge.f32.partialorder %v226_v42, 0.0  ;;  %vm291_vm7 = vcmp.ge.f32.partialorder %v227_v43, 0.0  ;;  %v1226_v26 = vld [vmem:[%s1631_s0 + $0x48] sm:$0xff]  }
   0xe   :  { %1249 = vst [vmem:[%s1634_s3 + $0x8] sm:$0xff] %v1066_v40   ;;  %v417_v49 = vsel %vm289_vm5, %v225_v27, %v353_v41  ;;  %v354_v50 = vmul.f32 0.2, %v226_v42  ;;  %v355_v52 = vmul.f32 0.2, %v227_v43  ;;  %v157_v53 = vmul.f32 %v948_v45, %v1306_v1  ;;  %v1227_v27 = vld [vmem:[%s1631_s0 + $0x50] sm:$0xff]  }
   0xf   :  { %v1071_v51 = vpack.c.bf16 %v417_v49, %v416_v44  ;;  %v158_v54 = vmul.f32 %v949_v46, %v1306_v1  ;;  %v953_v56 = vunpack.c.h.bf16 %v1222_v35  ;;  %v159_v57 = vmul.f32 %v952_v47, %v1306_v1 }
  0x10   :  { %v418_v55 = vsel %vm290_vm6, %v226_v42, %v354_v50  ;;  %v956_v58 = vunpack.c.l.bf16 %v1223_v48  ;;  %v419_v59 = vsel %vm291_vm7, %v227_v43, %v355_v52  ;;  %v228_v60 = vadd.f32 %v1320_v7, %v157_v53 }
  0x11   :  { %1250 = vst [vmem:[%s1634_s3 + $0x10] sm:$0xff] %v1071_v51   ;;  %v229_v61 = vadd.f32 %v1320_v7, %v158_v54  ;;  %v957_v62 = vunpack.c.h.bf16 %v1223_v48  ;;  %v1076_v63 = vpack.c.bf16 %v419_v59, %v418_v55  ;;  %v160_v0 = vmul.f32 %v953_v56, %v1306_v1  ;;  %v1228_v55 = vld [vmem:[%s1631_s0 + $0x58] sm:$0xff]  }
  0x12   :  { %v230_v2 = vadd.f32 %v1320_v7, %v159_v57  ;;  %v161_v3 = vmul.f32 %v956_v58, %v1306_v1  ;;  %vm292_vm8 = vcmp.ge.f32.partialorder %v228_v60, 0.0  ;;  %v356_v5 = vmul.f32 0.2, %v228_v60 }
  0x13   :  { %vm293_vm9 = vcmp.ge.f32.partialorder %v229_v61, 0.0  ;;  %v357_v6 = vmul.f32 0.2, %v229_v61  ;;  %1251 = vst [vmem:[%s1634_s3 + $0x18] sm:$0xff] %v1076_v63   ;;  %v231_v8 = vadd.f32 %v1320_v7, %v160_v0  ;;  %v162_v10 = vmul.f32 %v957_v62, %v1306_v1 }
  0x14   :  { %vm294_vm10 = vcmp.ge.f32.partialorder %v230_v2, 0.0  ;;  %v358_v9 = vmul.f32 0.2, %v230_v2  ;;  %v420_v11 = vsel %vm292_vm8, %v228_v60, %v356_v5  ;;  %v232_v13 = vadd.f32 %v1320_v7, %v161_v3  ;;  %v1229_v60 = vld [vmem:[%s1631_s0 + $0x60] sm:$0xff]  }
  0x15   :  { %v421_v12 = vsel %vm293_vm9, %v229_v61, %v357_v6  ;;  %v960_v14 = vunpack.c.l.bf16 %v1224_v4  ;;  %vm295_vm11 = vcmp.ge.f32.partialorder %v231_v8, 0.0  ;;  %v359_v17 = vmul.f32 0.2, %v231_v8 }
  0x16   :  { %v1081_v16 = vpack.c.bf16 %v421_v12, %v420_v11  ;;  %v422_v18 = vsel %vm294_vm10, %v230_v2, %v358_v9  ;;  %v233_v19 = vadd.f32 %v1320_v7, %v162_v10  ;;  %vm296_vm12 = vcmp.ge.f32.partialorder %v232_v13, 0.0  ;;  %v1230_v9 = vld [vmem:[%s1631_s0 + $0x68] sm:$0xff]  }
  0x17   :  { %v360_v20 = vmul.f32 0.2, %v232_v13  ;;  %v961_v21 = vunpack.c.h.bf16 %v1224_v4  ;;  %v423_v22 = vsel %vm295_vm11, %v231_v8, %v359_v17  ;;  %v163_v23 = vmul.f32 %v960_v14, %v1306_v1 }
  0x18   :  { %1252 = vst [vmem:[%s1634_s3 + $0x20] sm:$0xff] %v1081_v16   ;;  %v964_v24 = vunpack.c.l.bf16 %v1225_v15  ;;  %v965_v25 = vunpack.c.h.bf16 %v1225_v15  ;;  %v1086_v28 = vpack.c.bf16 %v423_v22, %v422_v18  ;;  %vm297_vm13 = vcmp.ge.f32.partialorder %v233_v19, 0.0 }
  0x19   :  { %v361_v29 = vmul.f32 0.2, %v233_v19  ;;  %v424_v30 = vsel %vm296_vm12, %v232_v13, %v360_v20  ;;  %v164_v31 = vmul.f32 %v961_v21, %v1306_v1  ;;  %v234_v32 = vadd.f32 %v1320_v7, %v163_v23 }
  0x1a   :  { %v165_v33 = vmul.f32 %v964_v24, %v1306_v1  ;;  %v166_v34 = vmul.f32 %v965_v25, %v1306_v1  ;;  %1253 = vst [vmem:[%s1634_s3 + $0x28] sm:$0xff] %v1086_v28   ;;  %v968_v36 = vunpack.c.l.bf16 %v1226_v26  ;;  %v969_v37 = vunpack.c.h.bf16 %v1226_v26  ;;  %v1231_v28 = vld [vmem:[%s1631_s0 + $0x70] sm:$0xff]  }
  0x1b   :  { %v425_v35 = vsel %vm297_vm13, %v233_v19, %v361_v29  ;;  %v972_v38 = vunpack.c.l.bf16 %v1227_v27  ;;  %v235_v40 = vadd.f32 %v1320_v7, %v164_v31  ;;  %vm298_vm14 = vcmp.ge.f32.partialorder %v234_v32, 0.0 }
  0x1c   :  { %v1091_v39 = vpack.c.bf16 %v425_v35, %v424_v30  ;;  %v362_v41 = vmul.f32 0.2, %v234_v32  ;;  %v236_v42 = vadd.f32 %v1320_v7, %v165_v33  ;;  %v237_v43 = vadd.f32 %v1320_v7, %v166_v34 }
  0x1d   :  { %v167_v44 = vmul.f32 %v968_v36, %v1306_v1  ;;  %v168_v45 = vmul.f32 %v969_v37, %v1306_v1  ;;  %vm299_vm15 = vcmp.ge.f32.partialorder %v235_v40, 0.0  ;;  %v363_v46 = vmul.f32 0.2, %v235_v40  ;;  %v1232_v37 = vld [vmem:[%s1631_s0 + $0x78] sm:$0xff]  }
  0x1e   :  { %1254 = vst [vmem:[%s1634_s3 + $0x30] sm:$0xff] %v1091_v39   ;;  %v426_v47 = vsel %vm298_vm14, %v234_v32, %v362_v41  ;;  %v973_v48 = vunpack.c.h.bf16 %v1227_v27  ;;  %vm300_vm0 = vcmp.ge.f32.partialorder %v236_v42, 0.0  ;;  %vm301_vm1 = vcmp.ge.f32.partialorder %v237_v43, 0.0 }
  0x1f   :  { %v364_v49 = vmul.f32 0.2, %v236_v42  ;;  %v365_v50 = vmul.f32 0.2, %v237_v43  ;;  %v427_v51 = vsel %vm299_vm15, %v235_v40, %v363_v46  ;;  %v238_v52 = vadd.f32 %v1320_v7, %v167_v44 }
  0x20   :  { %v239_v53 = vadd.f32 %v1320_v7, %v168_v45  ;;  %v169_v54 = vmul.f32 %v972_v38, %v1306_v1  ;;  %v1096_v56 = vpack.c.bf16 %v427_v51, %v426_v47  ;;  %v170_v59 = vmul.f32 %v973_v48, %v1306_v1 }
  0x21   :  { %v428_v57 = vsel %vm300_vm0, %v236_v42, %v364_v49  ;;  %v429_v58 = vsel %vm301_vm1, %v237_v43, %v365_v50  ;;  %vm302_vm2 = vcmp.ge.f32.partialorder %v238_v52, 0.0  ;;  %v366_v62 = vmul.f32 0.2, %v238_v52  ;;  %v1233_v42 = vld [vmem:[%s1631_s0 + $0x80] sm:$0xff]   ;;  %v1234_v50 = vld [vmem:[%s1631_s0 + $0x88] sm:$0xff]  }
  0x22   :  { %v1101_v61 = vpack.c.bf16 %v429_v58, %v428_v57  ;;  %vm303_vm3 = vcmp.ge.f32.partialorder %v239_v53, 0.0  ;;  %1255 = vst [vmem:[%s1634_s3 + $0x38] sm:$0xff] %v1096_v56   ;;  %v367_v63 = vmul.f32 0.2, %v239_v53  ;;  %v240_v0 = vadd.f32 %v1320_v7, %v169_v54 }
  0x23   :  { %v241_v2 = vadd.f32 %v1320_v7, %v170_v59  ;;  %v976_v3 = vunpack.c.l.bf16 %v1228_v55  ;;  %v430_v4 = vsel %vm302_vm2, %v238_v52, %v366_v62  ;;  %v977_v5 = vunpack.c.h.bf16 %v1228_v55 }
  0x24   :  { %1256 = vst [vmem:[%s1634_s3 + $0x40] sm:$0xff] %v1101_v61   ;;  %v980_v6 = vunpack.c.l.bf16 %v1229_v60  ;;  %v981_v8 = vunpack.c.h.bf16 %v1229_v60  ;;  %v431_v10 = vsel %vm303_vm3, %v239_v53, %v367_v63  ;;  %vm304_vm4 = vcmp.ge.f32.partialorder %v240_v0, 0.0 }
  0x25   :  { %vm305_vm5 = vcmp.ge.f32.partialorder %v241_v2, 0.0  ;;  %v368_v11 = vmul.f32 0.2, %v240_v0  ;;  %v1106_v12 = vpack.c.bf16 %v431_v10, %v430_v4  ;;  %v369_v13 = vmul.f32 0.2, %v241_v2 }
  0x26   :  { %v171_v14 = vmul.f32 %v976_v3, %v1306_v1  ;;  %v172_v15 = vmul.f32 %v977_v5, %v1306_v1  ;;  %v173_v17 = vmul.f32 %v980_v6, %v1306_v1  ;;  %v174_v18 = vmul.f32 %v981_v8, %v1306_v1 }
  0x27   :  { %v432_v16 = vsel %vm304_vm4, %v240_v0, %v368_v11  ;;  %v984_v19 = vunpack.c.l.bf16 %v1230_v9  ;;  %1257 = vst [vmem:[%s1634_s3 + $0x48] sm:$0xff] %v1106_v12   ;;  %v433_v20 = vsel %vm305_vm5, %v241_v2, %v369_v13  ;;  %v985_v23 = vunpack.c.h.bf16 %v1230_v9 }
  0x28   :  { %v242_v21 = vadd.f32 %v1320_v7, %v171_v14  ;;  %v243_v22 = vadd.f32 %v1320_v7, %v172_v15  ;;  %v1111_v24 = vpack.c.bf16 %v433_v20, %v432_v16  ;;  %v244_v25 = vadd.f32 %v1320_v7, %v173_v17  ;;  %v1235_v15 = vld [vmem:[%s1631_s0 + $0x90] sm:$0xff]   ;;  %v1236_v20 = vld [vmem:[%s1631_s0 + $0x98] sm:$0xff]  }
  0x29   :  { %v245_v26 = vadd.f32 %v1320_v7, %v174_v18  ;;  %v175_v27 = vmul.f32 %v984_v19, %v1306_v1  ;;  %v176_v35 = vmul.f32 %v985_v23, %v1306_v1  ;;  %v988_v41 = vunpack.c.l.bf16 %v1231_v28 }
  0x2a   :  { %vm306_vm6 = vcmp.ge.f32.partialorder %v242_v21, 0.0  ;;  %vm307_vm7 = vcmp.ge.f32.partialorder %v243_v22, 0.0  ;;  %v370_v29 = vmul.f32 0.2, %v242_v21  ;;  %v371_v30 = vmul.f32 0.2, %v243_v22 }
  0x2b   :  { %1258 = vst [vmem:[%s1634_s3 + $0x50] sm:$0xff] %v1111_v24   ;;  %vm308_vm8 = vcmp.ge.f32.partialorder %v244_v25, 0.0  ;;  %vm309_vm9 = vcmp.ge.f32.partialorder %v245_v26, 0.0  ;;  %v372_v31 = vmul.f32 0.2, %v244_v25  ;;  %v246_v36 = vadd.f32 %v1320_v7, %v175_v27 }
  0x2c   :  { %v373_v32 = vmul.f32 0.2, %v245_v26  ;;  %v434_v33 = vsel %vm306_vm6, %v242_v21, %v370_v29  ;;  %v435_v34 = vsel %vm307_vm7, %v243_v22, %v371_v30  ;;  %v247_v44 = vadd.f32 %v1320_v7, %v176_v35  ;;  %v1237_v21 = vld [vmem:[%s1631_s0 + $0xa0] sm:$0xff]  }
  0x2d   :  { %v1116_v38 = vpack.c.bf16 %v435_v34, %v434_v33  ;;  %v436_v39 = vsel %vm308_vm8, %v244_v25, %v372_v31  ;;  %vm310_vm10 = vcmp.ge.f32.partialorder %v246_v36, 0.0  ;;  %v374_v45 = vmul.f32 0.2, %v246_v36 }
  0x2e   :  { %v437_v40 = vsel %vm309_vm9, %v245_v26, %v373_v32  ;;  %v989_v46 = vunpack.c.h.bf16 %v1231_v28  ;;  %v177_v47 = vmul.f32 %v988_v41, %v1306_v1  ;;  %v992_v48 = vunpack.c.l.bf16 %v1232_v37 }
  0x2f   :  { %v1121_v43 = vpack.c.bf16 %v437_v40, %v436_v39  ;;  %1259 = vst [vmem:[%s1634_s3 + $0x58] sm:$0xff] %v1116_v38   ;;  %v993_v49 = vunpack.c.h.bf16 %v1232_v37  ;;  %vm311_vm11 = vcmp.ge.f32.partialorder %v247_v44, 0.0  ;;  %v375_v51 = vmul.f32 0.2, %v247_v44  ;;  %v1238_v40 = vld [vmem:[%s1631_s0 + $0xa8] sm:$0xff]  }
  0x30   :  { %v438_v52 = vsel %vm310_vm10, %v246_v36, %v374_v45  ;;  %v996_v53 = vunpack.c.l.bf16 %v1233_v42  ;;  %v178_v54 = vmul.f32 %v989_v46, %v1306_v1  ;;  %v248_v55 = vadd.f32 %v1320_v7, %v177_v47 }
  0x31   :  { %1260 = vst [vmem:[%s1634_s3 + $0x60] sm:$0xff] %v1121_v43   ;;  %v179_v56 = vmul.f32 %v992_v48, %v1306_v1  ;;  %v180_v57 = vmul.f32 %v993_v49, %v1306_v1  ;;  %v439_v58 = vsel %vm311_vm11, %v247_v44, %v375_v51  ;;  %v997_v59 = vunpack.c.h.bf16 %v1233_v42 }
  0x32   :  { %v181_v60 = vmul.f32 %v996_v53, %v1306_v1  ;;  %v1000_v61 = vunpack.c.l.bf16 %v1234_v50  ;;  %v1126_v62 = vpack.c.bf16 %v439_v58, %v438_v52  ;;  %v249_v63 = vadd.f32 %v1320_v7, %v178_v54 }
  0x33   :  { %vm312_vm12 = vcmp.ge.f32.partialorder %v248_v55, 0.0  ;;  %v376_v0 = vmul.f32 0.2, %v248_v55  ;;  %v250_v2 = vadd.f32 %v1320_v7, %v179_v56  ;;  %v251_v3 = vadd.f32 %v1320_v7, %v180_v57 }
  0x34   :  { %v182_v4 = vmul.f32 %v997_v59, %v1306_v1  ;;  %v252_v5 = vadd.f32 %v1320_v7, %v181_v60  ;;  %1261 = vst [vmem:[%s1634_s3 + $0x68] sm:$0xff] %v1126_v62   ;;  %vm313_vm13 = vcmp.ge.f32.partialorder %v249_v63, 0.0  ;;  %v377_v6 = vmul.f32 0.2, %v249_v63 }
  0x35   :  { %v440_v8 = vsel %vm312_vm12, %v248_v55, %v376_v0  ;;  %v1001_v9 = vunpack.c.h.bf16 %v1234_v50  ;;  %vm314_vm14 = vcmp.ge.f32.partialorder %v250_v2, 0.0  ;;  %vm315_vm15 = vcmp.ge.f32.partialorder %v251_v3, 0.0  ;;  %v1239_v0 = vld [vmem:[%s1631_s0 + $0xb0] sm:$0xff]  }
  0x36   :  { %v378_v10 = vmul.f32 0.2, %v250_v2  ;;  %v379_v11 = vmul.f32 0.2, %v251_v3  ;;  %v441_v12 = vsel %vm313_vm13, %v249_v63, %v377_v6  ;;  %v253_v13 = vadd.f32 %v1320_v7, %v182_v4 }
  0x37   :  { %vm316_vm0 = vcmp.ge.f32.partialorder %v252_v5, 0.0  ;;  %v380_v14 = vmul.f32 0.2, %v252_v5  ;;  %v1131_v16 = vpack.c.bf16 %v441_v12, %v440_v8  ;;  %v183_v19 = vmul.f32 %v1000_v61, %v1306_v1 }
  0x38   :  { %v442_v17 = vsel %vm314_vm14, %v250_v2, %v378_v10  ;;  %v443_v18 = vsel %vm315_vm15, %v251_v3, %v379_v11  ;;  %vm317_vm1 = vcmp.ge.f32.partialorder %v253_v13, 0.0  ;;  %v381_v23 = vmul.f32 0.2, %v253_v13  ;;  %v1240_v2 = vld [vmem:[%s1631_s0 + $0xb8] sm:$0xff]  }
  0x39   :  { %v1136_v22 = vpack.c.bf16 %v443_v18, %v442_v17  ;;  %v444_v24 = vsel %vm316_vm0, %v252_v5, %v380_v14  ;;  %1262 = vst [vmem:[%s1634_s3 + $0x70] sm:$0xff] %v1131_v16   ;;  %v184_v25 = vmul.f32 %v1001_v9, %v1306_v1  ;;  %v254_v26 = vadd.f32 %v1320_v7, %v183_v19  ;;  %v1241_v18 = vld [vmem:[%s1631_s0 + $0xc0] sm:$0xff]  }
  0x3a   :  { %v1004_v27 = vunpack.c.l.bf16 %v1235_v15  ;;  %v1005_v28 = vunpack.c.h.bf16 %v1235_v15  ;;  %v445_v29 = vsel %vm317_vm1, %v253_v13, %v381_v23  ;;  %v1008_v30 = vunpack.c.l.bf16 %v1236_v20 }
  0x3b   :  { %1263 = vst [vmem:[%s1634_s3 + $0x78] sm:$0xff] %v1136_v22   ;;  %v1009_v31 = vunpack.c.h.bf16 %v1236_v20  ;;  %v1012_v32 = vunpack.c.l.bf16 %v1237_v21  ;;  %v1141_v33 = vpack.c.bf16 %v445_v29, %v444_v24  ;;  %v255_v34 = vadd.f32 %v1320_v7, %v184_v25 }
  0x3c   :  { %vm318_vm2 = vcmp.ge.f32.partialorder %v254_v26, 0.0  ;;  %v382_v35 = vmul.f32 0.2, %v254_v26  ;;  %v185_v36 = vmul.f32 %v1004_v27, %v1306_v1  ;;  %v186_v37 = vmul.f32 %v1005_v28, %v1306_v1 }
  0x3d   :  { %v187_v38 = vmul.f32 %v1008_v30, %v1306_v1  ;;  %v188_v39 = vmul.f32 %v1009_v31, %v1306_v1  ;;  %1264 = vst [vmem:[%s1634_s3 + $0x80] sm:$0xff] %v1141_v33   ;;  %vm319_vm3 = vcmp.ge.f32.partialorder %v255_v34, 0.0  ;;  %v383_v41 = vmul.f32 0.2, %v255_v34 }
  0x3e   :  { %v446_v42 = vsel %vm318_vm2, %v254_v26, %v382_v35  ;;  %v1013_v43 = vunpack.c.h.bf16 %v1237_v21  ;;  %v256_v44 = vadd.f32 %v1320_v7, %v185_v36  ;;  %v257_v45 = vadd.f32 %v1320_v7, %v186_v37  ;;  %v1242_v36 = vld [vmem:[%s1631_s0 + $0xc8] sm:$0xff]  }
  0x3f   :  { %v258_v46 = vadd.f32 %v1320_v7, %v187_v38  ;;  %v259_v47 = vadd.f32 %v1320_v7, %v188_v39  ;;  %v447_v48 = vsel %vm319_vm3, %v255_v34, %v383_v41  ;;  %v189_v49 = vmul.f32 %v1012_v32, %v1306_v1 }
  0x40   :  { %v190_v50 = vmul.f32 %v1013_v43, %v1306_v1  ;;  %v1016_v51 = vunpack.c.l.bf16 %v1238_v40  ;;  %v1146_v52 = vpack.c.bf16 %v447_v48, %v446_v42  ;;  %vm320_vm4 = vcmp.ge.f32.partialorder %v256_v44, 0.0  ;;  %v1243_v42 = vld [vmem:[%s1631_s0 + $0xd0] sm:$0xff]  }
  0x41   :  { %vm321_vm5 = vcmp.ge.f32.partialorder %v257_v45, 0.0  ;;  %v384_v53 = vmul.f32 0.2, %v256_v44  ;;  %v385_v54 = vmul.f32 0.2, %v257_v45  ;;  %vm322_vm6 = vcmp.ge.f32.partialorder %v258_v46, 0.0 }
  0x42   :  { %vm323_vm7 = vcmp.ge.f32.partialorder %v259_v47, 0.0  ;;  %v386_v55 = vmul.f32 0.2, %v258_v46  ;;  %1265 = vst [vmem:[%s1634_s3 + $0x88] sm:$0xff] %v1146_v52   ;;  %v387_v57 = vmul.f32 0.2, %v259_v47  ;;  %v260_v58 = vadd.f32 %v1320_v7, %v189_v49 }
  0x43   :  { %v448_v56 = vsel %vm320_vm4, %v256_v44, %v384_v53  ;;  %v261_v59 = vadd.f32 %v1320_v7, %v190_v50  ;;  %v449_v60 = vsel %vm321_vm5, %v257_v45, %v385_v54  ;;  %v1017_v62 = vunpack.c.h.bf16 %v1238_v40 }
  0x44   :  { %v450_v61 = vsel %vm322_vm6, %v258_v46, %v386_v55  ;;  %v191_v63 = vmul.f32 %v1016_v51, %v1306_v1  ;;  %v1151_v3 = vpack.c.bf16 %v449_v60, %v448_v56  ;;  %v451_v4 = vsel %vm323_vm7, %v259_v47, %v387_v57  ;;  %v1244_v55 = vld [vmem:[%s1631_s0 + $0xd8] sm:$0xff]  }
  0x45   :  { %vm324_vm8 = vcmp.ge.f32.partialorder %v260_v58, 0.0  ;;  %vm325_vm9 = vcmp.ge.f32.partialorder %v261_v59, 0.0  ;;  %v1156_v5 = vpack.c.bf16 %v451_v4, %v450_v61  ;;  %v388_v6 = vmul.f32 0.2, %v260_v58 }
  0x46   :  { %v389_v8 = vmul.f32 0.2, %v261_v59  ;;  %v192_v9 = vmul.f32 %v1017_v62, %v1306_v1  ;;  %1266 = vst [vmem:[%s1634_s3 + $0x90] sm:$0xff] %v1151_v3   ;;  %v262_v10 = vadd.f32 %v1320_v7, %v191_v63  ;;  %v1020_v11 = vunpack.c.l.bf16 %v1239_v0 }
  0x47   :  { %v1021_v12 = vunpack.c.h.bf16 %v1239_v0  ;;  %v1024_v13 = vunpack.c.l.bf16 %v1240_v2  ;;  %1267 = vst [vmem:[%s1634_s3 + $0x98] sm:$0xff] %v1156_v5   ;;  %v452_v14 = vsel %vm324_vm8, %v260_v58, %v388_v6  ;;  %v1025_v17 = vunpack.c.h.bf16 %v1240_v2 }
  0x48   :  { %v453_v15 = vsel %vm325_vm9, %v261_v59, %v389_v8  ;;  %v263_v16 = vadd.f32 %v1320_v7, %v192_v9  ;;  %vm326_vm10 = vcmp.ge.f32.partialorder %v262_v10, 0.0  ;;  %v390_v20 = vmul.f32 0.2, %v262_v10 }
  0x49   :  { %v1161_v19 = vpack.c.bf16 %v453_v15, %v452_v14  ;;  %v193_v21 = vmul.f32 %v1020_v11, %v1306_v1  ;;  %v194_v23 = vmul.f32 %v1021_v12, %v1306_v1  ;;  %v195_v24 = vmul.f32 %v1024_v13, %v1306_v1  ;;  %v1246_v14 = vld [vmem:[%s1631_s0 + $0xe8] sm:$0xff]  }
  0x4a   :  { %vm327_vm11 = vcmp.ge.f32.partialorder %v263_v16, 0.0  ;;  %v391_v22 = vmul.f32 0.2, %v263_v16  ;;  %v454_v25 = vsel %vm326_vm10, %v262_v10, %v390_v20  ;;  %v196_v27 = vmul.f32 %v1025_v17, %v1306_v1  ;;  %v1245_v10 = vld [vmem:[%s1631_s0 + $0xe0] sm:$0xff]  }
  0x4b   :  { %1268 = vst [vmem:[%s1634_s3 + $0xa0] sm:$0xff] %v1161_v19   ;;  %v264_v26 = vadd.f32 %v1320_v7, %v193_v21  ;;  %v1028_v28 = vunpack.c.l.bf16 %v1241_v18  ;;  %v265_v30 = vadd.f32 %v1320_v7, %v194_v23  ;;  %v266_v31 = vadd.f32 %v1320_v7, %v195_v24 }
  0x4c   :  { %v455_v29 = vsel %vm327_vm11, %v263_v16, %v391_v22  ;;  %v1029_v32 = vunpack.c.h.bf16 %v1241_v18  ;;  %v267_v35 = vadd.f32 %v1320_v7, %v196_v27  ;;  %v1032_v46 = vunpack.c.l.bf16 %v1242_v36 }
  0x4d   :  { %v1166_v33 = vpack.c.bf16 %v455_v29, %v454_v25  ;;  %vm328_vm12 = vcmp.ge.f32.partialorder %v264_v26, 0.0  ;;  %v392_v34 = vmul.f32 0.2, %v264_v26  ;;  %vm329_vm13 = vcmp.ge.f32.partialorder %v265_v30, 0.0 }
  0x4e   :  { %v393_v37 = vmul.f32 0.2, %v265_v30  ;;  %vm330_vm14 = vcmp.ge.f32.partialorder %v266_v31, 0.0  ;;  %v394_v38 = vmul.f32 0.2, %v266_v31  ;;  %vm331_vm15 = vcmp.ge.f32.partialorder %v267_v35, 0.0 }
  0x4f   :  { %1269 = vst [vmem:[%s1634_s3 + $0xa8] sm:$0xff] %v1166_v33   ;;  %v456_v39 = vsel %vm328_vm12, %v264_v26, %v392_v34  ;;  %v395_v40 = vmul.f32 0.2, %v267_v35  ;;  %v197_v41 = vmul.f32 %v1028_v28, %v1306_v1  ;;  %v198_v45 = vmul.f32 %v1029_v32, %v1306_v1 }
  0x50   :  { %v457_v43 = vsel %vm329_vm13, %v265_v30, %v393_v37  ;;  %v458_v44 = vsel %vm330_vm14, %v266_v31, %v394_v38  ;;  %v1033_v50 = vunpack.c.h.bf16 %v1242_v36  ;;  %v199_v53 = vmul.f32 %v1032_v46, %v1306_v1  ;;  %v1247_v30 = vld [vmem:[%s1631_s0 + $0xf0] sm:$0xff]  }
  0x51   :  { %v1171_v47 = vpack.c.bf16 %v457_v43, %v456_v39  ;;  %v459_v48 = vsel %vm331_vm15, %v267_v35, %v395_v40  ;;  %v268_v49 = vadd.f32 %v1320_v7, %v197_v41  ;;  %v269_v52 = vadd.f32 %v1320_v7, %v198_v45 }
  0x52   :  { %v1176_v51 = vpack.c.bf16 %v459_v48, %v458_v44  ;;  %v1036_v54 = vunpack.c.l.bf16 %v1243_v42  ;;  %v200_v57 = vmul.f32 %v1033_v50, %v1306_v1  ;;  %v1037_v58 = vunpack.c.h.bf16 %v1243_v42  ;;  %v1248_v44 = vld [vmem:[%s1631_s0 + $0xf8] sm:$0xff]  }
  0x53   :  { %1270 = vst [vmem:[%s1634_s3 + $0xb0] sm:$0xff] %v1171_v47   ;;  %vm332_vm0 = vcmp.ge.f32.partialorder %v268_v49, 0.0  ;;  %v396_v56 = vmul.f32 0.2, %v268_v49  ;;  %vm333_vm1 = vcmp.ge.f32.partialorder %v269_v52, 0.0  ;;  %v270_v60 = vadd.f32 %v1320_v7, %v199_v53 }
  0x54   :  { %1271 = vst [vmem:[%s1634_s3 + $0xb8] sm:$0xff] %v1176_v51   ;;  %v397_v59 = vmul.f32 0.2, %v269_v52  ;;  %v201_v61 = vmul.f32 %v1036_v54, %v1306_v1  ;;  %v271_v63 = vadd.f32 %v1320_v7, %v200_v57  ;;  %v202_v0 = vmul.f32 %v1037_v58, %v1306_v1 }
  0x55   :  { %v460_v62 = vsel %vm332_vm0, %v268_v49, %v396_v56  ;;  %v1040_v2 = vunpack.c.l.bf16 %v1244_v55  ;;  %vm334_vm2 = vcmp.ge.f32.partialorder %v270_v60, 0.0  ;;  %v398_v4 = vmul.f32 0.2, %v270_v60 }
  0x56   :  { %v461_v3 = vsel %vm333_vm1, %v269_v52, %v397_v59  ;;  %v272_v5 = vadd.f32 %v1320_v7, %v201_v61  ;;  %vm335_vm3 = vcmp.ge.f32.partialorder %v271_v63, 0.0  ;;  %v399_v8 = vmul.f32 0.2, %v271_v63 }
  0x57   :  { %v1181_v6 = vpack.c.bf16 %v461_v3, %v460_v62  ;;  %v273_v9 = vadd.f32 %v1320_v7, %v202_v0  ;;  %v462_v11 = vsel %vm334_vm2, %v270_v60, %v398_v4  ;;  %v1041_v13 = vunpack.c.h.bf16 %v1244_v55 }
  0x58   :  { %vm336_vm4 = vcmp.ge.f32.partialorder %v272_v5, 0.0  ;;  %v400_v12 = vmul.f32 0.2, %v272_v5  ;;  %v463_v15 = vsel %vm335_vm3, %v271_v63, %v399_v8  ;;  %v203_v17 = vmul.f32 %v1040_v2, %v1306_v1 }
  0x59   :  { %1272 = vst [vmem:[%s1634_s3 + $0xc0] sm:$0xff] %v1181_v6   ;;  %vm337_vm5 = vcmp.ge.f32.partialorder %v273_v9, 0.0  ;;  %v401_v16 = vmul.f32 0.2, %v273_v9  ;;  %v1186_v18 = vpack.c.bf16 %v463_v15, %v462_v11  ;;  %v204_v20 = vmul.f32 %v1041_v13, %v1306_v1 }
  0x5a   :  { %v464_v19 = vsel %vm336_vm4, %v272_v5, %v400_v12  ;;  %v1044_v21 = vunpack.c.l.bf16 %v1245_v10  ;;  %v274_v23 = vadd.f32 %v1320_v7, %v203_v17  ;;  %v1045_v24 = vunpack.c.h.bf16 %v1245_v10 }
  0x5b   :  { %v465_v22 = vsel %vm337_vm5, %v273_v9, %v401_v16  ;;  %v1048_v25 = vunpack.c.l.bf16 %v1246_v14  ;;  %1273 = vst [vmem:[%s1634_s3 + $0xc8] sm:$0xff] %v1186_v18   ;;  %v275_v27 = vadd.f32 %v1320_v7, %v204_v20  ;;  %v1049_v29 = vunpack.c.h.bf16 %v1246_v14 }
  0x5c   :  { %v1191_v26 = vpack.c.bf16 %v465_v22, %v464_v19  ;;  %v205_v28 = vmul.f32 %v1044_v21, %v1306_v1  ;;  %vm338_vm6 = vcmp.ge.f32.partialorder %v274_v23, 0.0  ;;  %v402_v31 = vmul.f32 0.2, %v274_v23 }
  0x5d   :  { %v206_v32 = vmul.f32 %v1045_v24, %v1306_v1  ;;  %v207_v33 = vmul.f32 %v1048_v25, %v1306_v1  ;;  %vm339_vm7 = vcmp.ge.f32.partialorder %v275_v27, 0.0  ;;  %v403_v34 = vmul.f32 0.2, %v275_v27 }
  0x5e   :  { %1274 = vst [vmem:[%s1634_s3 + $0xd0] sm:$0xff] %v1191_v26   ;;  %v276_v35 = vadd.f32 %v1320_v7, %v205_v28  ;;  %v208_v36 = vmul.f32 %v1049_v29, %v1306_v1  ;;  %v466_v37 = vsel %vm338_vm6, %v274_v23, %v402_v31  ;;  %v1052_v40 = vunpack.c.l.bf16 %v1247_v30 }
  0x5f   :  { %v277_v38 = vadd.f32 %v1320_v7, %v206_v32  ;;  %v278_v39 = vadd.f32 %v1320_v7, %v207_v33  ;;  %v467_v41 = vsel %vm339_vm7, %v275_v27, %v403_v34  ;;  %v1053_v51 = vunpack.c.h.bf16 %v1247_v30 }
  0x60   :  { %vm340_vm8 = vcmp.ge.f32.partialorder %v276_v35, 0.0  ;;  %v404_v42 = vmul.f32 0.2, %v276_v35  ;;  %v279_v43 = vadd.f32 %v1320_v7, %v208_v36  ;;  %v1196_v45 = vpack.c.bf16 %v467_v41, %v466_v37 }
  0x61   :  { %vm341_vm9 = vcmp.ge.f32.partialorder %v277_v38, 0.0  ;;  %v405_v46 = vmul.f32 0.2, %v277_v38  ;;  %vm342_vm10 = vcmp.ge.f32.partialorder %v278_v39, 0.0  ;;  %v406_v48 = vmul.f32 0.2, %v278_v39 }
  0x62   :  { %v468_v47 = vsel %vm340_vm8, %v276_v35, %v404_v42  ;;  %vm343_vm11 = vcmp.ge.f32.partialorder %v279_v43, 0.0  ;;  %v407_v49 = vmul.f32 0.2, %v279_v43  ;;  %1275 = vst [vmem:[%s1634_s3 + $0xd8] sm:$0xff] %v1196_v45   ;;  %v209_v52 = vmul.f32 %v1052_v40, %v1306_v1 }
  0x63   :  { %v469_v50 = vsel %vm341_vm9, %v277_v38, %v405_v46  ;;  %v1056_v53 = vunpack.c.l.bf16 %v1248_v44  ;;  %v470_v55 = vsel %vm342_vm10, %v278_v39, %v406_v48  ;;  %v1057_v57 = vunpack.c.h.bf16 %v1248_v44 }
  0x64   :  { %v1201_v54 = vpack.c.bf16 %v469_v50, %v468_v47  ;;  %v471_v56 = vsel %vm343_vm11, %v279_v43, %v407_v49  ;;  %v210_v59 = vmul.f32 %v1053_v51, %v1306_v1  ;;  %v280_v60 = vadd.f32 %v1320_v7, %v209_v52 }
  0x65   :  { %v1206_v58 = vpack.c.bf16 %v471_v56, %v470_v55  ;;  %v211_v61 = vmul.f32 %v1056_v53, %v1306_v1  ;;  %v212_v62 = vmul.f32 %v1057_v57, %v1306_v1 }
  0x66   :  { %1276 = vst [vmem:[%s1634_s3 + $0xe0] sm:$0xff] %v1201_v54   ;;  %v281_v63 = vadd.f32 %v1320_v7, %v210_v59  ;;  %vm344_vm12 = vcmp.ge.f32.partialorder %v280_v60, 0.0  ;;  %v408_v0 = vmul.f32 0.2, %v280_v60 }
  0x67   :  { %1277 = vst [vmem:[%s1634_s3 + $0xe8] sm:$0xff] %v1206_v58   ;;  %v282_v2 = vadd.f32 %v1320_v7, %v211_v61  ;;  %v283_v3 = vadd.f32 %v1320_v7, %v212_v62 }
  0x68   :  { %vm345_vm13 = vcmp.ge.f32.partialorder %v281_v63, 0.0  ;;  %v409_v4 = vmul.f32 0.2, %v281_v63  ;;  %v472_v5 = vsel %vm344_vm12, %v280_v60, %v408_v0 }
  0x69   :  { %vm346_vm14 = vcmp.ge.f32.partialorder %v282_v2, 0.0  ;;  %vm347_vm15 = vcmp.ge.f32.partialorder %v283_v3, 0.0  ;;  %v410_v6 = vmul.f32 0.2, %v282_v2  ;;  %v411_v8 = vmul.f32 0.2, %v283_v3 }
  0x6a   :  { %v473_v1 = vsel %vm345_vm13, %v281_v63, %v409_v4 }
  0x6b   :  { %v1211_v9 = vpack.c.bf16 %v473_v1, %v472_v5  ;;  %v474_v10 = vsel %vm346_vm14, %v282_v2, %v410_v6  ;;  %v475_v11 = vsel %vm347_vm15, %v283_v3, %v411_v8 }
  0x6c   :  { %v1216_v12 = vpack.c.bf16 %v475_v11, %v474_v10 }
  0x6d   :  { %1278 = vst [vmem:[%s1634_s3 + $0xf0] sm:$0xff] %v1211_v9  }
  0x6e   :  { %1279 = vst [vmem:[%s1634_s3 + $0xf8] sm:$0xff] %v1216_v12  }

// kernel: discriminator_forward.10
= control target key start
LH: loop header
LB: loop body
LE: loop exit
PB: predicated region body
PF: predicated region fallthrough
CT: control target
= control target key end

     0   :  { %s4954_s18 = smov 0   ;;  %s6074_s0 = inlined_call_operand.vmem [shape: bf16[2,18,18,64], index: 0, kind: input, shape index: {}]   ;;  %s6075_s1 = inlined_call_operand.vmem [shape: bf16[9,64,128], index: 1, kind: input, shape index: {}]   ;;  %s6076_s2 = inlined_call_operand.vmem [shape: f32[1,128], index: 2, kind: input, shape index: {}]   ;;  %s6077_s3 = inlined_call_operand.vmem [shape: bf16[2,16,16,128], index: 3, kind: output, shape index: {0}]   ;;  %s6078_s4 = inlined_call_operand.vmem [shape: f32[16,128], index: 4, kind: output, shape index: {1}]   ;;  %s6079_s5 = inlined_call_operand.vmem [shape: f32[16,128], index: 5, kind: output, shape index: {2}]  }
   0x1 LB: > { %s3617_s19 = sadd.s32 4294967295, %s4922_s18   ;;  %p3621_p0 = scmp.ge.s32.totalorder %s4922_s18, 1  ;;  %s4922_s18 = sphi %s4954_s18, %s16_s18  }
   0x2   : > { %p192_p1 = scmp.lt.s32.totalorder %s4922_s18, 3 }
   0x4   : > { %p193_p2 = pnand %p3621_p0, %p192_p1 }
   0x6   : > { %196 = sbr.rel (%p193_p2) target bundleno = 557 (0x22d), region = 32 }
   0xd   : > { %v4855_v0 = vld [vmem:[%s6075_s1 + $0x20] sm:$0xff]   ;;  %p228_p3 = scmp.lt.s32.totalorder %s3617_s19, 1  ;;  %v4857_v2 = vld [vmem:[%s6075_s1 + $0x28] sm:$0xff]   ;;  %v4859_v4 = vld [vmem:[%s6075_s1 + $0x30] sm:$0xff]   ;;  %vm373_vm0 = vsmask.f32 3328 }
   0xe   : > { %v4856_v1 = vld [vmem:[%s6075_s1 + $0x80] sm:$0xff]   ;;  %4222 = vmatprep.subr.bf16.mxu1 %v4855_v0  ;;  %v4858_v3 = vld [vmem:[%s6075_s1 + $0x88] sm:$0xff]   ;;  %v4860_v5 = vld [vmem:[%s6075_s1 + $0x90] sm:$0xff]   ;;  %vm374_vm1 = vsmask.f32 7440  ;;  %vm832_vm2 = vcmask 523264  }
   0xf   : > { %s6155_s19 = smov (!%p228_p3, %s3617_s19), 1  ;;  %4382 = vmatprep.subr.bf16.mxu0 %v4856_v1  ;;  %4223 = vmatpush3.bf16.msra.mxu1 %v4855_v0  ;;  %v4861_v6 = vld [vmem:[%s6075_s1 + $0x38] sm:$0xff]   ;;  %v5008_v18 = vld [vmem:[%s6075_s1] sm:$0xff]   ;;  %vm5028_vm3 = vmor %vm373_vm0, %vm374_vm1  ;;  %vm1371_vm4 = vcmask 1042432   ;;  %vm1372_vm5 = vcmask 1046532  }
  0x10   : > { %4383 = vmatpush3.bf16.msra.mxu0 %v4856_v1  ;;  %4224 = vmatprep.subr.bf16.mxu1 %v4857_v2  ;;  %s4846_s30 = smul.u32 216, %s6155_s19  ;;  %v4862_v7 = vld [vmem:[%s6075_s1 + $0x98] sm:$0xff]   ;;  %v5016_v23 = vld [vmem:[%s6075_s1 + $0xa0] sm:$0xff]   ;;  %vm5235_vm6 = vmor %vm1371_vm4, %vm1372_vm5  ;;  %s3914_s14 = sshll.u32 %s6155_s19, 7 }
  0x11   : > { %4384 = vmatprep.subr.bf16.mxu0 %v4858_v3  ;;  %s6011_s17 = scalar_lea.vmem %s6077_s3, %s3914_s14  ;;  %s3625_s20 = sshll.u32 %s6155_s19, 3 }
  0x12   : > { %s4989_s12 = scalar_lea.vmem %s6074_s0, %s4846_s30  ;;  %s241_s23 = scalar_lea.vmem %s6078_s4, %s3625_s20 }
  0x13   : > { %4225 = vmatpush3.bf16.msra.mxu1 %v4857_v2  ;;  %v4995_v8 = vld [vmem:[%s4989_s12] sm:$0xf]  ;;  %v4998_v9 = vld [vmem:[%s4989_s12 + $0x4] sm:$0xf]  ;;  %v249_v10 = vld [vmem:[%s4989_s12 + $0x8] sm:$0x1]  ;;  %s245_s26 = scalar_lea.vmem %s6079_s5, %s3625_s20 }
  0x14   : > { %4385 = vmatpush3.bf16.msra.mxu0 %v4858_v3  ;;  %4226 = vmatprep.subr.bf16.mxu1 %v4859_v4  ;;  %v377_v11 = vshrl.u32 %v4995_v8, 16  ;;  %v380_v12 = vshll.u32 %v4995_v8, 16  ;;  %v386_v13 = vshll.u32 %v4998_v9, 16  ;;  %v390_v14 = vshrl.u32 %v4998_v9, 16  ;;  %v5011_v22 = vld [vmem:[%s4989_s12 + $0xc] sm:$0xf] }
  0x15   : > { %4386 = vmatprep.subr.bf16.mxu0 %v4860_v5  ;;  %v396_v15 = vshll.u32 %v249_v10, 16  ;;  %v5019_v25 = vld [vmem:[%s4989_s12 + $0x10] sm:$0xf]  ;;  %v5022_v26 = vld [vmem:[%s4989_s12 + $0x14] sm:$0x1]  ;;  %v401_v27 = vshrl.u32 %v5011_v22, 16 }
  0x16   : > { %v379_v16 = vrot.slane %v377_v11, 4  ;;  %v382_v17 = vrot.slane %v380_v12, 5  ;;  %v388_v19 = vrot.slane %v386_v13, 5  ;;  %v392_v20 = vrot.slane %v390_v14, 4  ;;  %v5041_v42 = vld [vmem:[%s4989_s12 + $0x18] sm:$0xf] }
  0x17   : > { %4227 = vmatpush3.bf16.msra.mxu1 %v4859_v4  ;;  %v398_v21 = vrot.slane %v396_v15, 5  ;;  %v404_v28 = vshll.u32 %v5011_v22, 16  ;;  %v410_v31 = vshll.u32 %v5019_v25, 16  ;;  %v414_v32 = vshrl.u32 %v5019_v25, 16  ;;  %v5048_v46 = vld [vmem:[%s4989_s12 + $0x1c] sm:$0xf] }
  0x18   : > { %4387 = vmatpush3.bf16.msra.mxu0 %v4860_v5  ;;  %4228 = vmatprep.subr.bf16.mxu1 %v4861_v6  ;;  %v383_v24 = vor.u32 %v382_v17, %v379_v16  ;;  %v393_v30 = vor.u32 %v392_v20, %v388_v19  ;;  %v420_v33 = vshll.u32 %v5022_v26, 16  ;;  %v403_v35 = vrot.slane %v401_v27, 4  ;;  %v5051_v47 = vld [vmem:[%s4989_s12 + $0x20] sm:$0x1]  ;;  %v5059_v53 = vld [vmem:[%s4989_s12 + $0x24] sm:$0xf] }
  0x19   : > { %4388 = vmatprep.subr.bf16.mxu0 %v4862_v7  ;;  %v406_v36 = vrot.slane %v404_v28, 5  ;;  %v5037_v37 = vcombine.low %v5011_v22, %v5019_v25  ;;  %v412_v39 = vrot.slane %v410_v31, 5  ;;  %v416_v40 = vrot.slane %v414_v32, 4  ;;  %v5062_v54 = vld [vmem:[%s4989_s12 + $0x28] sm:$0xf] }
  0x1a   : > { %v384_v34 = vrot.slane %v383_v24, 4  ;;  %v394_v38 = vrot.slane %v393_v30, 4  ;;  %v422_v41 = vrot.slane %v420_v33, 5  ;;  %v1386_v45 = vrot.slane %v5022_v26, 5  ;;  %v5066_v59 = vld [vmem:[%s4989_s12 + $0x2c] sm:$0x1] }
  0x1b   : > { %4229 = vmatpush3.bf16.msra.mxu1 %v4861_v6  ;;  %v407_v44 = vor.u32 %v406_v36, %v403_v35  ;;  %v425_v48 = vshrl.u32 %v5041_v42, 16  ;;  %v417_v50 = vor.u32 %v416_v40, %v412_v39  ;;  %v428_v51 = vshll.u32 %v5041_v42, 16  ;;  %v5078_v10 = vld [vmem:[%s4989_s12 + $0x30] sm:$0xf]  ;;  %v4867_v11 = vld [vmem:[%s6075_s1 + $0x8] sm:$0xff]  }
  0x1c   : > { %4389 = vmatpush3.bf16.msra.mxu0 %v4862_v7  ;;  %4262 = vmatprep.subr.bf16.mxu1 %v5008_v18  ;;  %v389_v43 = vsel %vm5028_vm3, %v384_v34, %v388_v19  ;;  %v399_v49 = vsel %vm5028_vm3, %v394_v38, %v398_v21  ;;  %v434_v52 = vshll.u32 %v5048_v46, 16  ;;  %v438_v58 = vshrl.u32 %v5048_v46, 16  ;;  %v5086_v16 = vld [vmem:[%s4989_s12 + $0x34] sm:$0xf]  ;;  %v5093_v30 = vld [vmem:[%s4989_s12 + $0x38] sm:$0x1] }
  0x1d   : > { %4422 = vmatprep.subr.bf16.mxu0 %v5016_v23  ;;  %v3627_v55 = vcombine.low %v389_v43, %v399_v49  ;;  %v408_v56 = vrot.slane %v407_v44, 4  ;;  %v427_v57 = vrot.slane %v425_v48, 4  ;;  %v418_v60 = vrot.slane %v417_v50, 4  ;;  %v5101_v36 = vld [vmem:[%s4989_s12 + $0x3c] sm:$0xf]  ;;  %v4866_v40 = vld [vmem:[%s6075_s1 + $0xa8] sm:$0xff]  }
  0x1e   : > { %v430_v61 = vrot.slane %v428_v51, 5  ;;  %v436_v62 = vrot.slane %v434_v52, 5  ;;  %v444_v63 = vshll.u32 %v5051_v47, 16  ;;  %v440_v1 = vrot.slane %v438_v58, 4  ;;  %v4870_v43 = vld [vmem:[%s6075_s1 + $0x10] sm:$0xff]  }
  0x1f   : > { %4230 = vmatprep.mubr.msk.bf16.mxu1 %vm832_vm2, %v3627_v55  ;;  %v413_v0 = vsel %vm5028_vm3, %v408_v56, %v412_v39  ;;  %v1390_v2 = vrot.slane %v5048_v46, 5  ;;  %v1393_v3 = vrot.slane %v5051_v47, 5  ;;  %v423_v4 = vsel %vm5028_vm3, %v418_v60, %v422_v41  ;;  %v5116_v51 = vld [vmem:[%s4989_s12 + $0x40] sm:$0xf] }
  0x20   : > { %v431_v5 = vor.u32 %v430_v61, %v427_v57  ;;  %v446_v6 = vrot.slane %v444_v63, 5  ;;  %v449_v7 = vshrl.u32 %v5059_v53, 16  ;;  %v3628_v12 = vcombine.low %v413_v0, %v423_v4 }
  0x21   : > { %v441_v13 = vor.u32 %v440_v1, %v436_v62  ;;  %v452_v14 = vshll.u32 %v5059_v53, 16  ;;  %v458_v15 = vshll.u32 %v5062_v54, 16  ;;  %v462_v20 = vshrl.u32 %v5062_v54, 16 }
  0x22   : > { %v432_v17 = vrot.slane %v431_v5, 4  ;;  %v451_v19 = vrot.slane %v449_v7, 4  ;;  %v468_v21 = vshll.u32 %v5066_v59, 16  ;;  %4390 = vmatprep.mubr.msk.bf16.mxu0 %vm832_vm2, %v3628_v12  ;;  %4231 = vmatmul.mubr.msk.bf16.vlgmr.msra.gmra.mrb[0].mxu1 %vm832_vm2, %v3628_v12  ;;  %v473_v31 = vshrl.u32 %v5078_v10, 16 }
  0x23   : > { %v442_v24 = vrot.slane %v441_v13, 4  ;;  %v454_v27 = vrot.slane %v452_v14, 5  ;;  %v460_v28 = vrot.slane %v458_v15, 5  ;;  %4263 = vmatpush3.bf16.msra.mxu1 %v5008_v18  ;;  %v464_v33 = vrot.slane %v462_v20, 4  ;;  %v5141_v15 = vld [vmem:[%s4989_s12 + $0x4c] sm:$0xf] }
  0x24   : > { %v437_v32 = vsel %vm5028_vm3, %v432_v17, %v436_v62  ;;  %v470_v34 = vrot.slane %v468_v21, 5  ;;  %v476_v35 = vshll.u32 %v5078_v10, 16  ;;  %v475_v41 = vrot.slane %v473_v31, 4  ;;  %4264 = vmatprep.subr.bf16.mxu1 %v4867_v11  ;;  %v5125_v62 = vld [vmem:[%s4989_s12 + $0x44] sm:$0x1]  ;;  %v4872_v21 = vld [vmem:[%s6075_s1 + $0x18] sm:$0xff]  }
  0x25   : > { %v447_v38 = vsel %vm5028_vm3, %v442_v24, %v446_v6  ;;  %v455_v39 = vor.u32 %v454_v27, %v451_v19  ;;  %v482_v18 = vshll.u32 %v5086_v16, 16  ;;  %v465_v48 = vor.u32 %v464_v33, %v460_v28  ;;  %v5133_v6 = vld [vmem:[%s4989_s12 + $0x48] sm:$0xf]  ;;  %v5153_v31 = vld [vmem:[%s4989_s12 + $0x50] sm:$0x1] }
  0x26   : > { %v5112_v44 = vcombine.low %v437_v32, %v447_v38  ;;  %v478_v49 = vrot.slane %v476_v35, 5  ;;  %v486_v50 = vshrl.u32 %v5086_v16, 16  ;;  %v492_v56 = vshll.u32 %v5093_v30, 16 }
  0x27   : > { %v456_v52 = vrot.slane %v455_v39, 4  ;;  %v484_v55 = vrot.slane %v482_v18, 5  ;;  %v497_v57 = vshrl.u32 %v5101_v36, 16  ;;  %v466_v58 = vrot.slane %v465_v48, 4  ;;  %4265 = vmatpush3.bf16.msra.mxu1 %v4867_v11  ;;  %v5163_v39 = vld [vmem:[%s4989_s12 + $0x54] sm:$0xf] }
  0x28   : > { %6112 = vst [vmem:[#allocation2_spill] sm:$0xff] %v5112_v44  ;;  %4391 = vmatmul.mubr.msk.bf16.vlgmr.msra.gmra.mrb[0].mxu0 %vm832_vm2, %v5112_v44  ;;  %4234 = vmatprep.mubr.msk.bf16.mxu1 %vm832_vm2, %v5112_v44  ;;  %v479_v60 = vor.u32 %v478_v49, %v475_v41  ;;  %v488_v61 = vrot.slane %v486_v50, 4  ;;  %v500_v63 = vshll.u32 %v5101_v36, 16  ;;  %v494_v1 = vrot.slane %v492_v56, 5  ;;  %6114 = vst [vmem:[#allocation4_spill] sm:$0xff] %v5163_v39  ;;  %v4869_v41 = vld [vmem:[%s6075_s1 + $0xb8] sm:$0xff]  }
  0x29   : > { %4423 = vmatpush3.bf16.msra.mxu0 %v5016_v23  ;;  %v461_v0 = vsel %vm5028_vm3, %v456_v52, %v460_v28  ;;  %v499_v4 = vrot.slane %v497_v57, 4  ;;  %v506_v5 = vshll.u32 %v5116_v51, 16  ;;  %v471_v7 = vsel %vm5028_vm3, %v466_v58, %v470_v34  ;;  %v4868_v23 = vld [vmem:[%s6075_s1 + $0xb0] sm:$0xff]   ;;  %4266 = vmatprep.subr.bf16.mxu1 %v4870_v43  ;;  %v5172_v52 = vld [vmem:[%s4989_s12 + $0x58] sm:$0xf] }
  0x2a   : > { %4424 = vmatprep.subr.bf16.mxu0 %v4866_v40  ;;  %v480_v12 = vrot.slane %v479_v60, 4  ;;  %v489_v13 = vor.u32 %v488_v61, %v484_v55  ;;  %v502_v14 = vrot.slane %v500_v63, 5  ;;  %v5143_v17 = vcombine.low %v461_v0, %v471_v7  ;;  %v5182_v61 = vld [vmem:[%s4989_s12 + $0x5c] sm:$0x1] }
  0x2b   : > { %v508_v11 = vrot.slane %v506_v5, 5  ;;  %v510_v19 = vshrl.u32 %v5116_v51, 16  ;;  %v516_v20 = vshll.u32 %v5125_v62, 16  ;;  %v521_v32 = vshrl.u32 %v5133_v6, 16  ;;  %4267 = vmatpush3.bf16.msra.mxu1 %v4870_v43 }
  0x2c   : > { %6113 = vst [vmem:[#allocation3_spill] sm:$0xff] %v5143_v17  ;;  %v485_v24 = vsel %vm5028_vm3, %v480_v12, %v484_v55  ;;  %v490_v27 = vrot.slane %v489_v13, 4  ;;  %v503_v28 = vor.u32 %v502_v14, %v499_v4  ;;  %4394 = vmatprep.mubr.msk.bf16.mxu0 %vm832_vm2, %v5143_v17  ;;  %4235 = vmatmul.mubr.msk.bf16.gmra.mrb[4].mxu1 %vm832_vm2, %v5143_v17  ;;  %v524_v35 = vshll.u32 %v5133_v6, 16  ;;  %v5177_v55 = vld [vmem:[%s6075_s1 + $0x40] sm:$0xff]  }
  0x2d   : > { %v512_v33 = vrot.slane %v510_v19, 4  ;;  %v518_v34 = vrot.slane %v516_v20, 5  ;;  %v530_v38 = vshll.u32 %v5141_v15, 16  ;;  %4425 = vmatpush3.bf16.msra.mxu0 %v4866_v40  ;;  %v523_v49 = vrot.slane %v521_v32, 4  ;;  %4268 = vmatprep.subr.bf16.mxu1 %v4872_v21  ;;  %v5196_v19 = vld [vmem:[%s4989_s12 + $0x60] sm:$0xf] }
  0x2e   : > { %v495_v18 = vsel %vm5028_vm3, %v490_v27, %v494_v1  ;;  %v504_v48 = vrot.slane %v503_v28, 4  ;;  %v534_v50 = vshrl.u32 %v5141_v15, 16  ;;  %4426 = vmatprep.subr.bf16.mxu0 %v4868_v23  ;;  %v526_v58 = vrot.slane %v524_v35, 5  ;;  %v5201_v32 = vld [vmem:[%s4989_s12 + $0x64] sm:$0xf] }
  0x2f   : > { %v5179_v56 = vcombine.low %v485_v24, %v495_v18  ;;  %v513_v57 = vor.u32 %v512_v33, %v508_v11  ;;  %v532_v60 = vrot.slane %v530_v38, 5  ;;  %v540_v43 = vshll.u32 %v5153_v31, 16  ;;  %4269 = vmatpush3.bf16.msra.mxu1 %v4872_v21  ;;  %v5210_v21 = vld [vmem:[%s6075_s1 + $0xc0] sm:$0xff]  }
  0x30   : > { %v509_v40 = vsel %vm5028_vm3, %v504_v48, %v508_v11  ;;  %v536_v63 = vrot.slane %v534_v50, 4  ;;  %v545_v0 = vshrl.u32 %v5163_v39, 16  ;;  %v527_v4 = vor.u32 %v526_v58, %v523_v49  ;;  %4302 = vmatprep.subr.bf16.mxu1 %v5177_v55  ;;  %v5215_v48 = vld [vmem:[%s4989_s12 + $0x68] sm:$0x1] }
  0x31   : > { %6115 = vst [vmem:[#allocation5_spill] sm:$0xff] %v5179_v56  ;;  %4395 = vmatmul.mubr.msk.bf16.gmra.mrb[4].mxu0 %vm832_vm2, %v5179_v56  ;;  %4238 = vmatprep.mubr.msk.bf16.mxu1 %vm832_vm2, %v5179_v56  ;;  %v514_v1 = vrot.slane %v513_v57, 4  ;;  %v548_v5 = vshll.u32 %v5163_v39, 16  ;;  %v554_v7 = vshll.u32 %v5172_v52, 16  ;;  %v542_v13 = vrot.slane %v540_v43, 5 }
  0x32   : > { %v537_v12 = vor.u32 %v536_v63, %v532_v60  ;;  %4427 = vmatpush3.bf16.msra.mxu0 %v4868_v23  ;;  %v547_v14 = vrot.slane %v545_v0, 4  ;;  %v558_v11 = vshrl.u32 %v5172_v52, 16  ;;  %v528_v24 = vrot.slane %v527_v4, 4  ;;  %v5229_v4 = vld [vmem:[%s4989_s12 + $0x6c] sm:$0xf] }
  0x33   : > { %v519_v20 = vsel %vm5028_vm3, %v514_v1, %v518_v34  ;;  %v550_v27 = vrot.slane %v548_v5, 5  ;;  %v556_v28 = vrot.slane %v554_v7, 5  ;;  %4428 = vmatprep.subr.bf16.mxu0 %v4869_v41  ;;  %v564_v38 = vshll.u32 %v5182_v61, 16 }
  0x34   : > { %v5204_v33 = vcombine.low %v509_v40, %v519_v20  ;;  %v538_v23 = vrot.slane %v537_v12, 4  ;;  %v560_v35 = vrot.slane %v558_v11, 4  ;;  %v533_v34 = vsel %vm5028_vm3, %v528_v24, %v532_v60 }
  0x35   : > { %v551_v18 = vor.u32 %v550_v27, %v547_v14  ;;  %v569_v49 = vshrl.u32 %v5196_v19, 16  ;;  %v572_v50 = vshll.u32 %v5196_v19, 16  ;;  %v566_v40 = vrot.slane %v564_v38, 5  ;;  %v5249_v27 = vld [vmem:[%s4989_s12 + $0x70] sm:$0xf] }
  0x36   : > { %6116 = vst [vmem:[#allocation6_spill] sm:$0xff] %v5204_v33  ;;  %4398 = vmatprep.mubr.msk.bf16.mxu0 %vm832_vm2, %v5204_v33  ;;  %4239 = vmatmul.mubr.msk.bf16.gmra.mrb[8].mxu1 %vm832_vm2, %v5204_v33  ;;  %v543_v57 = vsel %vm5028_vm3, %v538_v23, %v542_v13  ;;  %v561_v58 = vor.u32 %v560_v35, %v556_v28  ;;  %v578_v60 = vshll.u32 %v5201_v32, 16  ;;  %v582_v12 = vshrl.u32 %v5201_v32, 16 }
  0x37   : > { %v5226_v63 = vcombine.low %v533_v34, %v543_v57  ;;  %v552_v43 = vrot.slane %v551_v18, 4  ;;  %v571_v0 = vrot.slane %v569_v49, 4  ;;  %v574_v1 = vrot.slane %v572_v50, 5  ;;  %4429 = vmatpush3.bf16.msra.mxu0 %v4869_v41  ;;  %v5254_v34 = vld [vmem:[%s4989_s12 + $0x74] sm:$0x1] }
  0x38   : > { %v562_v5 = vrot.slane %v561_v58, 4  ;;  %v580_v7 = vrot.slane %v578_v60, 5  ;;  %v588_v13 = vshll.u32 %v5215_v48, 16  ;;  %4462 = vmatprep.subr.bf16.mxu0 %v5210_v21  ;;  %v3700_v20 = vrot.slane %v5011_v22, 9 }
  0x39   : > { %6117 = vst [vmem:[#allocation7_spill] sm:$0xff] %v5226_v63  ;;  %4399 = vmatmul.mubr.msk.bf16.gmra.mrb[8].mxu0 %vm832_vm2, %v5226_v63  ;;  %4242 = vmatprep.mubr.msk.bf16.mxu1 %vm832_vm2, %v5226_v63  ;;  %v557_v41 = vsel %vm5028_vm3, %v552_v43, %v556_v28  ;;  %v575_v11 = vor.u32 %v574_v1, %v571_v0  ;;  %v1383_v24 = vrot.slane %v5019_v25, 5  ;;  %v584_v35 = vrot.slane %v582_v12, 4 }
  0x3a   : > { %v567_v23 = vsel %vm5028_vm3, %v562_v5, %v566_v40  ;;  %v590_v38 = vrot.slane %v588_v13, 5  ;;  %v593_v18 = vshrl.u32 %v5229_v4, 16  ;;  %v596_v58 = vshll.u32 %v5229_v4, 16  ;;  %v5274_v5 = vld [vmem:[%s4989_s12 + $0x78] sm:$0xf] }
  0x3b   : > { %v5257_v49 = vcombine.low %v557_v41, %v567_v23  ;;  %v576_v28 = vrot.slane %v575_v11, 4  ;;  %v1384_v22 = vsel %vm5235_vm6, %v3700_v20, %v1383_v24  ;;  %v1385_v50 = vrot.slane %v1383_v24, 4 }
  0x3c   : > { %v585_v25 = vor.u32 %v584_v35, %v580_v7  ;;  %v595_v57 = vrot.slane %v593_v18, 4  ;;  %v602_v40 = vshll.u32 %v5249_v27, 16  ;;  %v606_v0 = vshrl.u32 %v5249_v27, 16  ;;  %v5286_v35 = vld [vmem:[%s4989_s12 + $0x7c] sm:$0xf] }
  0x3d   : > { %6120 = vst [vmem:[#allocation8_spill] sm:$0xff] %v5257_v49  ;;  %4402 = vmatprep.mubr.msk.bf16.mxu0 %vm832_vm2, %v5257_v49  ;;  %v581_v60 = vsel %vm5028_vm3, %v576_v28, %v580_v7  ;;  %v1387_v43 = vsel %vm5235_vm6, %v1385_v50, %v1386_v45  ;;  %v612_v1 = vshll.u32 %v5254_v34, 16  ;;  %v598_v7 = vrot.slane %v596_v58, 5  ;;  %v5289_v18 = vld [vmem:[%s4989_s12 + $0x80] sm:$0x1] }
  0x3e   : > { %4243 = vmatmul.mubr.msk.bf16.gmra.mrb[12].mxu1 %vm832_vm2, %v5257_v49  ;;  %v586_v12 = vrot.slane %v585_v25, 4  ;;  %v5278_v13 = vcombine.low %v1384_v22, %v1387_v43  ;;  %v604_v41 = vrot.slane %v602_v40, 5  ;;  %v608_v26 = vrot.slane %v606_v0, 4 }
  0x3f   : > { %v614_v11 = vrot.slane %v612_v1, 5  ;;  %v3701_v20 = vrot.slane %v5041_v42, 9  ;;  %v1392_v45 = vrot.slane %v1390_v2, 4  ;;  %v599_v23 = vor.u32 %v598_v7, %v595_v57  ;;  %v5306_v1 = vld [vmem:[%s4989_s12 + $0x84] sm:$0xf] }
  0x40   : > { %6121 = vst [vmem:[#allocation9_spill] sm:$0xff] %v5278_v13  ;;  %v591_v24 = vsel %vm5028_vm3, %v586_v12, %v590_v38  ;;  %v617_v28 = vshrl.u32 %v5274_v5, 16  ;;  %v620_v22 = vshll.u32 %v5274_v5, 16  ;;  %v609_v25 = vor.u32 %v608_v26, %v604_v41  ;;  %v5316_v12 = vld [vmem:[%s4989_s12 + $0x88] sm:$0xf] }
  0x41   : > { %v5293_v50 = vcombine.low %v581_v60, %v591_v24  ;;  %v1391_v58 = vsel %vm5235_vm6, %v3701_v20, %v1390_v2  ;;  %v1394_v38 = vsel %vm5235_vm6, %v1392_v45, %v1393_v3  ;;  %v600_v57 = vrot.slane %v599_v23, 4  ;;  %v5319_v7 = vld [vmem:[%s4989_s12 + $0x8c] sm:$0x1] }
  0x42   : > { %v5303_v40 = vcombine.low %v1391_v58, %v1394_v38  ;;  %v619_v43 = vrot.slane %v617_v28, 4  ;;  %v622_v0 = vrot.slane %v620_v22, 5  ;;  %v610_v60 = vrot.slane %v609_v25, 4 }
  0x43   : > { %6122 = vst [vmem:[#allocation10_spill] sm:$0xff] %v5293_v50  ;;  %4403 = vmatmul.mubr.msk.bf16.gmra.mrb[12].mxu0 %vm832_vm2, %v5293_v50  ;;  %4246 = vmatprep.mubr.msk.bf16.mxu1 %vm832_vm2, %v5293_v50  ;;  %v626_v2 = vshll.u32 %v5286_v35, 16  ;;  %v630_v47 = vshrl.u32 %v5286_v35, 16  ;;  %v636_v3 = vshll.u32 %v5289_v18, 16  ;;  %v605_v26 = vsel %vm5028_vm3, %v600_v57, %v604_v41 }
  0x44   : > { %6123 = vst [vmem:[#allocation11_spill] sm:$0xff] %v5303_v40  ;;  %4430 = vmatprep.mubr.msk.bf16.mxu0 %vm832_vm2, %v5278_v13  ;;  %v623_v20 = vor.u32 %v622_v0, %v619_v43  ;;  %v3702_v45 = vrot.slane %v5059_v53, 9  ;;  %v1397_v24 = vrot.slane %v5062_v54, 5  ;;  %v615_v23 = vsel %vm5028_vm3, %v610_v60, %v614_v11 }
  0x45   : > { %v628_v28 = vrot.slane %v626_v2, 5  ;;  %v632_v22 = vrot.slane %v630_v47, 4  ;;  %v638_v25 = vrot.slane %v636_v3, 5  ;;  %v5329_v58 = vcombine.low %v605_v26, %v615_v23 }
  0x46   : > { %v624_v38 = vrot.slane %v623_v20, 4  ;;  %v1398_v50 = vsel %vm5235_vm6, %v3702_v45, %v1397_v24  ;;  %v1399_v49 = vrot.slane %v1397_v24, 4  ;;  %v1400_v57 = vrot.slane %v5066_v59, 5  ;;  %v5346_v45 = vld [vmem:[%s4989_s12 + $0x90] sm:$0xf]  ;;  %v4873_v24 = vld [vmem:[%s6075_s1 + $0xc8] sm:$0xff]  }
  0x47   : > { %6124 = vst [vmem:[#allocation12_spill] sm:$0xff] %v5329_v58  ;;  %v633_v41 = vor.u32 %v632_v22, %v628_v28  ;;  %v641_v43 = vshrl.u32 %v5306_v1, 16  ;;  %v644_v0 = vshll.u32 %v5306_v1, 16  ;;  %4247 = vmatmul.mubr.msk.bf16.gmra.mrb[16].mxu1 %vm832_vm2, %v5329_v58  ;;  %v650_v60 = vshll.u32 %v5316_v12, 16  ;;  %v5354_v58 = vld [vmem:[%s4989_s12 + $0x94] sm:$0xf] }
  0x48   : > { %v629_v11 = vsel %vm5028_vm3, %v624_v38, %v628_v28  ;;  %v654_v2 = vshrl.u32 %v5316_v12, 16  ;;  %v660_v47 = vshll.u32 %v5319_v7, 16  ;;  %v1401_v59 = vsel %vm5235_vm6, %v1399_v49, %v1400_v57 }
  0x49   : > { %v634_v3 = vrot.slane %v633_v41, 4  ;;  %v643_v26 = vrot.slane %v641_v43, 4  ;;  %v646_v20 = vrot.slane %v644_v0, 5  ;;  %v5351_v23 = vcombine.low %v1398_v50, %v1401_v59  ;;  %v5363_v0 = vld [vmem:[%s4989_s12 + $0x98] sm:$0x1] }
  0x4a   : > { %v652_v28 = vrot.slane %v650_v60, 5  ;;  %v656_v22 = vrot.slane %v654_v2, 4  ;;  %v662_v38 = vrot.slane %v660_v47, 5  ;;  %v3703_v57 = vrot.slane %v5078_v10, 9 }
  0x4b   : > { %6125 = vst [vmem:[#allocation13_spill] sm:$0xff] %v5351_v23  ;;  %4431 = vmatmul.mubr.msk.bf16.vlgmr.msra.gmra.mrb[0].mxu0 %vm832_vm2, %v5303_v40  ;;  %v639_v49 = vsel %vm5028_vm3, %v634_v3, %v638_v25  ;;  %v647_v41 = vor.u32 %v646_v20, %v643_v26  ;;  %v1404_v43 = vrot.slane %v5086_v16, 5  ;;  %v1407_v2 = vrot.slane %v5093_v30, 5  ;;  %v5473_v40 = vld [vmem:[%s4989_s12 + $0xbc] sm:$0x1] }
  0x4c   : > { %4463 = vmatpush3.bf16.msra.mxu0 %v5210_v21  ;;  %v5366_v50 = vcombine.low %v629_v11, %v639_v49  ;;  %4434 = vmatprep.mubr.msk.bf16.mxu0 %vm832_vm2, %v5351_v23  ;;  %v657_v60 = vor.u32 %v656_v22, %v652_v28  ;;  %v665_v25 = vshrl.u32 %v5346_v45, 16  ;;  %v668_v26 = vshll.u32 %v5346_v45, 16  ;;  %v5376_v21 = vld [vmem:[%s4989_s12 + $0x9c] sm:$0xf]  ;;  %v4876_v11 = vld [vmem:[%s6075_s1 + $0xd0] sm:$0xff]  }
  0x4d   : > { %v648_v47 = vrot.slane %v647_v41, 4  ;;  %v1405_v3 = vsel %vm5235_vm6, %v3703_v57, %v1404_v43  ;;  %v1406_v59 = vrot.slane %v1404_v43, 4  ;;  %4464 = vmatprep.subr.bf16.mxu0 %v4873_v24  ;;  %v674_v22 = vshll.u32 %v5354_v58, 16  ;;  %v5386_v41 = vld [vmem:[%s4989_s12 + $0xa0] sm:$0xf] }
  0x4e   : > { %6126 = vst [vmem:[#allocation14_spill] sm:$0xff] %v5366_v50  ;;  %4250 = vmatprep.mubr.msk.bf16.mxu1 %vm832_vm2, %v5366_v50  ;;  %v658_v30 = vrot.slane %v657_v60, 4  ;;  %v667_v20 = vrot.slane %v665_v25, 4  ;;  %v678_v49 = vshrl.u32 %v5354_v58, 16  ;;  %v670_v63 = vrot.slane %v668_v26, 5  ;;  %v4881_v60 = vld [vmem:[%s6075_s1 + $0xd8] sm:$0xff]  }
  0x4f   : > { %v653_v57 = vsel %vm5028_vm3, %v648_v47, %v652_v28  ;;  %v1408_v43 = vsel %vm5235_vm6, %v1406_v59, %v1407_v2  ;;  %v684_v33 = vshll.u32 %v5363_v0, 16  ;;  %v676_v56 = vrot.slane %v674_v22, 5  ;;  %v5404_v59 = vld [vmem:[%s4989_s12 + $0xa4] sm:$0x1] }
  0x50   : > { %v663_v25 = vsel %vm5028_vm3, %v658_v30, %v662_v38  ;;  %v5398_v50 = vcombine.low %v1405_v3, %v1408_v43  ;;  %v680_v17 = vrot.slane %v678_v49, 4  ;;  %4465 = vmatpush3.bf16.msra.mxu0 %v4873_v24  ;;  %v671_v28 = vor.u32 %v670_v63, %v667_v20 }
  0x51   : > { %v5400_v44 = vcombine.low %v653_v57, %v663_v25  ;;  %v686_v2 = vrot.slane %v684_v33, 5  ;;  %v3704_v47 = vrot.slane %v5101_v36, 9  ;;  %4466 = vmatprep.subr.bf16.mxu0 %v4876_v11  ;;  %v1411_v23 = vrot.slane %v5116_v51, 5 }
  0x52   : > { %6127 = vst [vmem:[#allocation15_spill] sm:$0xff] %v5398_v50  ;;  %v681_v26 = vor.u32 %v680_v17, %v676_v56  ;;  %v1414_v38 = vrot.slane %v5125_v62, 5  ;;  %v689_v3 = vshrl.u32 %v5376_v21, 16  ;;  %v672_v63 = vrot.slane %v671_v28, 4  ;;  %v5417_v17 = vld [vmem:[%s4989_s12 + $0xa8] sm:$0xf] }
  0x53   : > { %6128 = vst [vmem:[#allocation16_spill] sm:$0xff] %v5400_v44  ;;  %4251 = vmatmul.mubr.msk.bf16.gmra.mrb[20].mxu1 %vm832_vm2, %v5400_v44  ;;  %4435 = vmatmul.mubr.msk.bf16.gmra.mrb[4].mxu0 %vm832_vm2, %v5398_v50  ;;  %v692_v33 = vshll.u32 %v5376_v21, 16  ;;  %v698_v24 = vshll.u32 %v5386_v41, 16  ;;  %v702_v30 = vshrl.u32 %v5386_v41, 16  ;;  %v1412_v62 = vsel %vm5235_vm6, %v3704_v47, %v1411_v23  ;;  %v5426_v44 = vld [vmem:[%s6075_s1 + $0xe0] sm:$0xff]  }
  0x54   : > { %v682_v20 = vrot.slane %v681_v26, 4  ;;  %v1413_v22 = vrot.slane %v1411_v23, 4  ;;  %v691_v49 = vrot.slane %v689_v3, 4  ;;  %4467 = vmatpush3.bf16.msra.mxu0 %v4876_v11  ;;  %v677_v57 = vsel %vm5028_vm3, %v672_v63, %v676_v56  ;;  %6129 = vst [vmem:[#allocation17_spill] sm:$0xff] %v5426_v44  ;;  %v5435_v56 = vld [vmem:[%s4989_s12 + $0xac] sm:$0xf] }
  0x55   : > { %v694_v43 = vrot.slane %v692_v33, 5  ;;  %v700_v25 = vrot.slane %v698_v24, 5  ;;  %v704_v28 = vrot.slane %v702_v30, 4  ;;  %4468 = vmatprep.subr.bf16.mxu0 %v4881_v60  ;;  %v708_v11 = vshll.u32 %v5404_v59, 16  ;;  %v5442_v30 = vld [vmem:[%s4989_s12 + $0xb0] sm:$0x1] }
  0x56   : > { %v687_v26 = vsel %vm5028_vm3, %v682_v20, %v686_v2  ;;  %v1415_v23 = vsel %vm5235_vm6, %v1413_v22, %v1414_v38  ;;  %v3705_v47 = vrot.slane %v5133_v6, 9  ;;  %v1418_v2 = vrot.slane %v5141_v15, 5 }
  0x57   : > { %v5437_v3 = vcombine.low %v677_v57, %v687_v26  ;;  %v5439_v63 = vcombine.low %v1412_v62, %v1415_v23  ;;  %v695_v33 = vor.u32 %v694_v43, %v691_v49  ;;  %v705_v24 = vor.u32 %v704_v28, %v700_v25  ;;  %v5454_v43 = vld [vmem:[%s4989_s12 + $0xb4] sm:$0xf] }
  0x58   : > { %v710_v50 = vrot.slane %v708_v11, 5  ;;  %v1421_v38 = vrot.slane %v5153_v31, 5  ;;  %v713_v20 = vshrl.u32 %v5417_v17, 16  ;;  %4469 = vmatpush3.bf16.msra.mxu0 %v4881_v60  ;;  %v716_v49 = vshll.u32 %v5417_v17, 16 }
  0x59   : > { %6130 = vst [vmem:[#allocation18_spill] sm:$0xff] %v5437_v3  ;;  %6131 = vst [vmem:[#allocation19_spill] sm:$0xff] %v5439_v63  ;;  %4254 = vmatprep.mubr.msk.bf16.mxu1 %vm832_vm2, %v5437_v3  ;;  %4438 = vmatprep.mubr.msk.bf16.mxu0 %vm832_vm2, %v5439_v63  ;;  %v696_v62 = vrot.slane %v695_v33, 4  ;;  %v706_v22 = vrot.slane %v705_v24, 4  ;;  %v722_v57 = vshll.u32 %v5435_v56, 16  ;;  %v1419_v31 = vsel %vm5235_vm6, %v3705_v47, %v1418_v2 }
  0x5a   : > { %v1420_v60 = vrot.slane %v1418_v2, 4  ;;  %v715_v28 = vrot.slane %v713_v20, 4  ;;  %v726_v26 = vshrl.u32 %v5435_v56, 16  ;;  %4502 = vmatprep.subr.bf16.mxu0 %v5426_v44  ;;  %v718_v33 = vrot.slane %v716_v49, 5  ;;  %v5465_v3 = vld [vmem:[%s4989_s12 + $0xb8] sm:$0xf] }
  0x5b   : > { %v701_v23 = vsel %vm5028_vm3, %v696_v62, %v700_v25  ;;  %v711_v11 = vsel %vm5028_vm3, %v706_v22, %v710_v50  ;;  %v724_v24 = vrot.slane %v722_v57, 5  ;;  %v732_v20 = vshll.u32 %v5442_v30, 16 }
  0x5c   : > { %v5467_v63 = vcombine.low %v701_v23, %v711_v11  ;;  %v1422_v47 = vsel %vm5235_vm6, %v1420_v60, %v1421_v38  ;;  %v728_v2 = vrot.slane %v726_v26, 4  ;;  %v719_v25 = vor.u32 %v718_v33, %v715_v28 }
  0x5d   : > { %v5475_v13 = vcombine.low %v1419_v31, %v1422_v47  ;;  %v3706_v62 = vrot.slane %v5163_v39, 9  ;;  %v1425_v50 = vrot.slane %v5172_v52, 5  ;;  %v734_v49 = vrot.slane %v732_v20, 5 }
  0x5e   : > { %6132 = vst [vmem:[#allocation20_spill] sm:$0xff] %v5467_v63  ;;  %4255 = vmatmul.mubr.msk.bf16.gmra.mrb[24].mxu1 %vm832_vm2, %v5467_v63  ;;  %v729_v22 = vor.u32 %v728_v2, %v724_v24  ;;  %v1428_v57 = vrot.slane %v5182_v61, 5  ;;  %v737_v38 = vshrl.u32 %v5454_v43, 16  ;;  %v720_v60 = vrot.slane %v719_v25, 4 }
  0x5f   : > { %6133 = vst [vmem:[#allocation21_spill] sm:$0xff] %v5475_v13  ;;  %4439 = vmatmul.mubr.msk.bf16.gmra.mrb[8].mxu0 %vm832_vm2, %v5475_v13  ;;  %v1426_v31 = vsel %vm5235_vm6, %v3706_v62, %v1425_v50  ;;  %v1427_v28 = vrot.slane %v1425_v50, 4  ;;  %v740_v26 = vshll.u32 %v5454_v43, 16  ;;  %v746_v33 = vshll.u32 %v5465_v3, 16 }
  0x60   : > { %v730_v23 = vrot.slane %v729_v22, 4  ;;  %v739_v11 = vrot.slane %v737_v38, 4  ;;  %v750_v47 = vshrl.u32 %v5465_v3, 16  ;;  %v725_v61 = vsel %vm5028_vm3, %v720_v60, %v724_v24 }
  0x61   : > { %v1429_v2 = vsel %vm5235_vm6, %v1427_v28, %v1428_v57  ;;  %v742_v20 = vrot.slane %v740_v26, 5  ;;  %v756_v25 = vshll.u32 %v5473_v40, 16  ;;  %v748_v22 = vrot.slane %v746_v33, 5 }
  0x62   : > { %v735_v62 = vsel %vm5028_vm3, %v730_v23, %v734_v49  ;;  %v5497_v50 = vcombine.low %v1426_v31, %v1429_v2  ;;  %v752_v38 = vrot.slane %v750_v47, 4  ;;  %v3707_v39 = vrot.slane %v5196_v19, 9 }
  0x63   : > { %v5499_v63 = vcombine.low %v725_v61, %v735_v62  ;;  %v743_v13 = vor.u32 %v742_v20, %v739_v11  ;;  %v758_v44 = vrot.slane %v756_v25, 5  ;;  %v1432_v57 = vrot.slane %v5201_v32, 5 }
  0x64   : > { %4442 = vmatprep.mubr.msk.bf16.mxu0 %vm832_vm2, %v5497_v50  ;;  %v753_v24 = vor.u32 %v752_v38, %v748_v22  ;;  %v1435_v60 = vrot.slane %v5215_v48, 5  ;;  %v3708_v49 = vrot.slane %v5229_v4, 9  ;;  %v3663_v28 = vcombine.low %v4995_v8, %v4998_v9 }
  0x65   : > { %4258 = vmatprep.mubr.msk.bf16.mxu1 %vm832_vm2, %v5499_v63  ;;  %v744_v31 = vrot.slane %v743_v13, 4  ;;  %v1439_v26 = vrot.slane %v5249_v27, 5  ;;  %v1442_v23 = vrot.slane %v5254_v34, 5  ;;  %v1433_v33 = vsel %vm5235_vm6, %v3707_v39, %v1432_v57 }
  0x66   : > { %v754_v11 = vrot.slane %v753_v24, 4  ;;  %v1434_v47 = vrot.slane %v1432_v57, 4  ;;  %v1446_v48 = vrot.slane %v5286_v35, 5  ;;  %v3709_v8 = vrot.slane %v5274_v5, 9 }
  0x67   : > { %v749_v61 = vsel %vm5028_vm3, %v744_v31, %v748_v22  ;;  %v1440_v13 = vsel %vm5235_vm6, %v3708_v49, %v1439_v26  ;;  %v1441_v2 = vrot.slane %v1439_v26, 4  ;;  %v1449_v39 = vrot.slane %v5289_v18, 5 }
  0x68   : > { %v759_v9 = vsel %vm5028_vm3, %v754_v11, %v758_v44  ;;  %v1436_v34 = vsel %vm5235_vm6, %v1434_v47, %v1435_v60  ;;  %v1448_v20 = vrot.slane %v1446_v48, 4  ;;  %v3710_v24 = vrot.slane %v5306_v1, 9 }
  0x69   : > { %v5526_v25 = vcombine.low %v749_v61, %v759_v9  ;;  %v5528_v62 = vcombine.low %v1433_v33, %v1436_v34  ;;  %v1443_v22 = vsel %vm5235_vm6, %v1441_v2, %v1442_v23  ;;  %v1453_v57 = vrot.slane %v5316_v12, 5  ;;  %v4880_v2 = vld [vmem:[%s6075_s1 + $0x48] sm:$0xff]  }
  0x6a   : > { %v5532_v38 = vcombine.low %v1440_v13, %v1443_v22  ;;  %v1456_v44 = vrot.slane %v5319_v7, 5  ;;  %v1447_v18 = vsel %vm5235_vm6, %v3709_v8, %v1446_v48  ;;  %v1450_v60 = vsel %vm5235_vm6, %v1448_v20, %v1449_v39 }
  0x6b   : > { %4259 = vmatmul.mubr.msk.bf16.gmra.mrb[28].mxu1 %vm832_vm2, %v5526_v25  ;;  %4443 = vmatmul.mubr.msk.bf16.gmra.mrb[12].mxu0 %vm832_vm2, %v5528_v62  ;;  %v1455_v49 = vrot.slane %v1453_v57, 4  ;;  %v1460_v31 = vrot.slane %v5354_v58, 5  ;;  %v1467_v26 = vrot.slane %v5386_v41, 5  ;;  %v1454_v23 = vsel %vm5235_vm6, %v3710_v24, %v1453_v57 }
  0x6c   : > { %4270 = vmatprep.mubr.msk.bf16.mxu1 %vm832_vm2, %v3663_v28  ;;  %4446 = vmatprep.mubr.msk.bf16.mxu0 %vm832_vm2, %v5532_v38  ;;  %v5554_v28 = vcombine.low %v1447_v18, %v1450_v60  ;;  %v3711_v11 = vrot.slane %v5346_v45, 9  ;;  %v1463_v47 = vrot.slane %v5363_v0, 5  ;;  %v5560_v48 = vcombine.low %v5041_v42, %v5048_v46 }
  0x6d   : > { %v1457_v7 = vsel %vm5235_vm6, %v1455_v49, %v1456_v44  ;;  %v1462_v33 = vrot.slane %v1460_v31, 4  ;;  %v3712_v61 = vrot.slane %v5376_v21, 9  ;;  %v1469_v8 = vrot.slane %v1467_v26, 4 }
  0x6e   : > { %v5563_v13 = vcombine.low %v1454_v23, %v1457_v7  ;;  %v1470_v9 = vrot.slane %v5404_v59, 5  ;;  %v1474_v34 = vrot.slane %v5435_v56, 5  ;;  %v1461_v42 = vsel %vm5235_vm6, %v3711_v11, %v1460_v31  ;;  %v5679_v31 = vld [vmem:[%s6075_s1 + $0x60] sm:$0xff]  }
  0x6f   : > { %v1464_v46 = vsel %vm5235_vm6, %v1462_v33, %v1463_v47  ;;  %v5583_v0 = vcombine.low %v5059_v53, %v5062_v54  ;;  %v1468_v59 = vsel %vm5235_vm6, %v3712_v61, %v1467_v26  ;;  %v5589_v20 = vcombine.low %v5196_v19, %v5201_v32  ;;  %v4886_v53 = vld [vmem:[%s6075_s1 + $0x50] sm:$0xff]  }
  0x70   : > { %v3713_v39 = vrot.slane %v5417_v17, 9  ;;  %v1481_v22 = vrot.slane %v5465_v3, 5  ;;  %v5602_v54 = vcombine.low %v5229_v4, %v5249_v27  ;;  %v5604_v19 = vcombine.low %v1461_v42, %v1464_v46 }
  0x71   : > { %v1476_v32 = vrot.slane %v1474_v34, 4  ;;  %v1477_v24 = vrot.slane %v5442_v30, 5  ;;  %v5609_v57 = vcombine.low %v5274_v5, %v5286_v35  ;;  %v5613_v44 = vcombine.low %v5306_v1, %v5316_v12  ;;  %v297_v30 = vld [vmem:[%s4989_s12 + $0xc8] sm:$0x1] }
  0x72   : > { %v5617_v18 = vcombine.low %v5346_v45, %v5354_v58  ;;  %v5621_v4 = vcombine.low %v5376_v21, %v5386_v41  ;;  %v5625_v27 = vcombine.low %v5417_v17, %v5435_v56  ;;  %v5629_v5 = vcombine.low %v5078_v10, %v5086_v16  ;;  %v5640_v21 = vld [vmem:[%s4989_s12 + $0xc4] sm:$0xf]  ;;  %v4892_v10 = vld [vmem:[%s6075_s1 + $0x58] sm:$0xff]  }
  0x73   : > { %4271 = vmatmul.mubr.msk.bf16.vlgmr.msra.gmra.mrb[0].mxu1 %vm832_vm2, %v5037_v37  ;;  %4447 = vmatmul.mubr.msk.bf16.gmra.mrb[16].mxu0 %vm832_vm2, %v5554_v28  ;;  %v5635_v1 = vcombine.low %v5454_v43, %v5465_v3  ;;  %v3714_v12 = vrot.slane %v5454_v43, 9  ;;  %v1483_v58 = vrot.slane %v1481_v22, 4  ;;  %v1484_v45 = vrot.slane %v5473_v40, 5  ;;  %v5663_v3 = vld [vmem:[%s4989_s12 + $0xc0] sm:$0xf] }
  0x74   : > { %4303 = vmatpush3.bf16.msra.mxu1 %v5177_v55  ;;  %4274 = vmatprep.mubr.msk.bf16.mxu1 %vm832_vm2, %v5560_v48  ;;  %v1471_v55 = vsel %vm5235_vm6, %v1469_v8, %v1470_v9  ;;  %v1475_v16 = vsel %vm5235_vm6, %v3713_v39, %v1474_v34  ;;  %v1478_v41 = vsel %vm5235_vm6, %v1476_v32, %v1477_v24  ;;  %v2274_v40 = vrot.slane %v5640_v21, 5 }
  0x75   : > { %4450 = vmatprep.mubr.msk.bf16.mxu0 %vm832_vm2, %v5563_v13  ;;  %4304 = vmatprep.subr.bf16.mxu1 %v4880_v2  ;;  %v5631_v35 = vcombine.low %v1468_v59, %v1471_v55  ;;  %v1482_v17 = vsel %vm5235_vm6, %v3714_v12, %v1481_v22  ;;  %v1485_v56 = vsel %vm5235_vm6, %v1483_v58, %v1484_v45  ;;  %v2025_v26 = vshrl.u32 %v5663_v3, 16  ;;  %v6134_v22 = vld [vmem:[#allocation4_spill] sm:$0xff]  ;;  %v6135_v45 = vld [vmem:[#allocation17_spill] sm:$0xff] }
  0x76   : > { %v5668_v43 = vcombine.low %v5101_v36, %v5116_v51  ;;  %v5670_v60 = vcombine.low %v1475_v16, %v1478_v41  ;;  %v5674_v49 = vcombine.low %v5133_v6, %v5141_v15  ;;  %v2028_v23 = vshll.u32 %v5663_v3, 16  ;;  %v4900_v16 = vld [vmem:[%s6075_s1 + $0xf8] sm:$0xff]   ;;  %v4909_v41 = vld [vmem:[%s4989_s12 + $0x4] sm:$0xf] }
  0x77   : > { %v2034_v7 = vshll.u32 %v5640_v21, 16  ;;  %v2038_v36 = vshrl.u32 %v5640_v21, 16  ;;  %v5685_v51 = vcombine.low %v1482_v17, %v1485_v56  ;;  %v3793_v11 = vrot.slane %v5663_v3, 9  ;;  %v4904_v17 = vld [vmem:[%s6075_s1 + $0x100] sm:$0xff]   ;;  %v4910_v56 = vld [vmem:[%s4989_s12 + $0x8] sm:$0x1] }
  0x78   : > { %4305 = vmatpush3.bf16.msra.mxu1 %v4880_v2  ;;  %v2276_v6 = vrot.slane %v2274_v40, 4  ;;  %v2277_v15 = vrot.slane %v297_v30, 5  ;;  %v2027_v33 = vrot.slane %v2025_v26, 4  ;;  %v2030_v47 = vrot.slane %v2028_v23, 5  ;;  %v4911_v26 = vld [vmem:[%s4989_s12] sm:$0xf] }
  0x79   : > { %4306 = vmatprep.subr.bf16.mxu1 %v4886_v53  ;;  %v2036_v61 = vrot.slane %v2034_v7, 5  ;;  %v2040_v2 = vrot.slane %v2038_v36, 4  ;;  %v2044_v34 = vshll.u32 %v297_v30, 16  ;;  %v2275_v42 = vsel %vm5235_vm6, %v3793_v11, %v2274_v40 }
  0x7a   : > { %v2031_v8 = vor.u32 %v2030_v47, %v2027_v33  ;;  %v2278_v46 = vsel %vm5235_vm6, %v2276_v6, %v2277_v15  ;;  %v1376_v40 = vrot.slane %v4909_v41, 5  ;;  %v1379_v30 = vrot.slane %v4910_v56, 5  ;;  %v4899_v15 = vld [vmem:[%s6075_s1 + $0x68] sm:$0xff]   ;;  %v6136_v33 = vld [vmem:[#allocation9_spill] sm:$0xff]  ;;  %v6148_v41 = vld [vmem:[#allocation10_spill] sm:$0xff] }
  0x7b   : > { %4275 = vmatmul.mubr.msk.bf16.gmra.mrb[4].mxu1 %vm832_vm2, %v5583_v0  ;;  %4451 = vmatmul.mubr.msk.bf16.gmra.mrb[20].mxu0 %vm832_vm2, %v5604_v19  ;;  %v2041_v9 = vor.u32 %v2040_v2, %v2036_v61  ;;  %v2046_v39 = vrot.slane %v2044_v34, 5  ;;  %v5705_v32 = vcombine.low %v2275_v42, %v2278_v46  ;;  %v3699_v23 = vrot.slane %v4911_v26, 9  ;;  %v6137_v47 = vld [vmem:[#allocation11_spill] sm:$0xff]  ;;  %v4905_v2 = vld [vmem:[%s6075_s1 + $0x78] sm:$0xff]   ;;  %v4912_v34 = vld [vmem:[%s6075_s1 + $0x80] sm:$0xff]  }
  0x7c   : > { %4278 = vmatprep.mubr.msk.bf16.mxu1 %vm832_vm2, %v5629_v5  ;;  %4454 = vmatprep.mubr.msk.bf16.mxu0 %vm832_vm2, %v5631_v35  ;;  %v2032_v59 = vrot.slane %v2031_v8, 4  ;;  %v1378_v7 = vrot.slane %v1376_v40, 4  ;;  %v6138_v8 = vld [vmem:[#allocation13_spill] sm:$0xff]  ;;  %v6140_v42 = vld [vmem:[#allocation19_spill] sm:$0xff]  ;;  %v6151_v56 = vld [vmem:[#allocation16_spill] sm:$0xff] }
  0x7d   : > { %4307 = vmatpush3.bf16.msra.mxu1 %v4886_v53  ;;  %v2042_v55 = vrot.slane %v2041_v9, 4  ;;  %v5703_v53 = vcombine.low %v6134_v22, %v5172_v52  ;;  %v4893_v52 = vld [vmem:[%s6075_s1 + $0xe8] sm:$0xff]   ;;  %v1377_v36 = vsel %vm5235_vm6, %v3699_v23, %v1376_v40  ;;  %v5800_v9 = vcombine.low %v5663_v3, %v5640_v21  ;;  %v6141_v46 = vld [vmem:[#allocation21_spill] sm:$0xff]  ;;  %v5817_v3 = vld [vmem:[%s4989_s12 + $0xd0] sm:$0xf] }
  0x7e   : > { %4308 = vmatprep.subr.bf16.mxu1 %v4892_v10  ;;  %v2037_v24 = vsel %vm5028_vm3, %v2032_v59, %v2036_v61  ;;  %v1380_v11 = vsel %vm5235_vm6, %v1378_v7, %v1379_v30  ;;  %v4903_v61 = vld [vmem:[%s6075_s1 + $0x70] sm:$0xff]   ;;  %v5814_v21 = vld [vmem:[%s4989_s12 + $0xcc] sm:$0xf]  ;;  %v2741_v23 = vshrl.u32 %v5817_v3, 16  ;;  %v6152_v7 = vld [vmem:[#allocation18_spill] sm:$0xff]  ;;  %v2977_v29 = vrot.slane %v5817_v3, 5 }
  0x7f   : > { %v2047_v12 = vsel %vm5028_vm3, %v2042_v55, %v2046_v39  ;;  %v3715_v6 = vcombine.low %v1377_v36, %v1380_v11  ;;  %v3815_v59 = vcombine.low %v5814_v21, %v5817_v3  ;;  %v6142_v55 = vld [vmem:[#allocation2_spill] sm:$0xff]  ;;  %v4906_v39 = vld [vmem:[%s6075_s1 + $0x108] sm:$0xff]   ;;  %v6149_v40 = vld [vmem:[#allocation12_spill] sm:$0xff]  ;;  %v2728_v30 = vshrl.u32 %v5814_v21, 16 }
  0x80   : > { %v5711_v58 = vcombine.low %v2037_v24, %v2047_v12  ;;  %v6143_v22 = vld [vmem:[#allocation3_spill] sm:$0xff]  ;;  %v6144_v24 = vld [vmem:[#allocation5_spill] sm:$0xff]  ;;  %v4907_v12 = vld [vmem:[%s6075_s1 + $0x110] sm:$0xff]   ;;  %v2731_v26 = vshll.u32 %v5814_v21, 16 }
  0x81   : > { %4309 = vmatpush3.bf16.msra.mxu1 %v4892_v10  ;;  %v4898_v10 = vld [vmem:[%s6075_s1 + $0xf0] sm:$0xff]   ;;  %v2730_v36 = vrot.slane %v2728_v30, 4 }
  0x82   : > { %4342 = vmatprep.subr.bf16.mxu1 %v5679_v31  ;;  %v2733_v11 = vrot.slane %v2731_v26, 5 }
  0x83   : > { %4279 = vmatmul.mubr.msk.bf16.gmra.mrb[8].mxu1 %vm832_vm2, %v5668_v43  ;;  %4455 = vmatmul.mubr.msk.bf16.gmra.mrb[24].mxu0 %vm832_vm2, %v5670_v60 }
  0x84   : > { %4282 = vmatprep.mubr.msk.bf16.mxu1 %vm832_vm2, %v5674_v49  ;;  %4458 = vmatprep.mubr.msk.bf16.mxu0 %vm832_vm2, %v5685_v51 }
  0x8b   : > { %4283 = vmatmul.mubr.msk.bf16.gmra.mrb[12].mxu1 %vm832_vm2, %v5703_v53  ;;  %4459 = vmatmul.mubr.msk.bf16.gmra.mrb[28].mxu0 %vm832_vm2, %v5705_v32 }
  0x8c   : > { %4286 = vmatprep.mubr.msk.bf16.mxu1 %vm832_vm2, %v5589_v20  ;;  %4470 = vmatprep.mubr.msk.bf16.mxu0 %vm832_vm2, %v5560_v48 }
  0x93   : > { %4287 = vmatmul.mubr.msk.bf16.gmra.mrb[16].mxu1 %vm832_vm2, %v5602_v54  ;;  %4471 = vmatmul.mubr.msk.bf16.vlgmr.msra.gmra.mrb[0].mxu0 %vm832_vm2, %v5583_v0 }
  0x94   : > { %4503 = vmatpush3.bf16.msra.mxu0 %v6135_v45  ;;  %4290 = vmatprep.mubr.msk.bf16.mxu1 %vm832_vm2, %v5609_v57  ;;  %v6145_v45 = vld [vmem:[#allocation6_spill] sm:$0xff] }
  0x95   : > { %4474 = vmatprep.mubr.msk.bf16.mxu0 %vm832_vm2, %v5629_v5  ;;  %4504 = vmatprep.subr.bf16.mxu0 %v4893_v52 }
  0x98   : > { %4505 = vmatpush3.bf16.msra.mxu0 %v4893_v52  ;;  %v4908_v52 = vld [vmem:[%s6075_s1 + $0x118] sm:$0xff]  }
  0x99   : > { %4506 = vmatprep.subr.bf16.mxu0 %v4898_v10 }
  0x9b   : > { %4291 = vmatmul.mubr.msk.bf16.gmra.mrb[20].mxu1 %vm832_vm2, %v5613_v44  ;;  %4475 = vmatmul.mubr.msk.bf16.gmra.mrb[4].mxu0 %vm832_vm2, %v5668_v43 }
  0x9c   : > { %4294 = vmatprep.mubr.msk.bf16.mxu1 %vm832_vm2, %v5617_v18  ;;  %4478 = vmatprep.mubr.msk.bf16.mxu0 %vm832_vm2, %v5674_v49 }
  0x9d   : > { %4507 = vmatpush3.bf16.msra.mxu0 %v4898_v10  ;;  %v6146_v10 = vld [vmem:[#allocation7_spill] sm:$0xff] }
  0x9e   : > { %4508 = vmatprep.subr.bf16.mxu0 %v4900_v16 }
  0xa1   : > { %4509 = vmatpush3.bf16.msra.mxu0 %v4900_v16  ;;  %v6147_v16 = vld [vmem:[#allocation8_spill] sm:$0xff] }
  0xa2   : > { %4542 = vmatprep.subr.bf16.mxu0 %v4904_v17 }
  0xa3   : > { %4295 = vmatmul.mubr.msk.bf16.gmra.mrb[24].mxu1 %vm832_vm2, %v5621_v4  ;;  %4479 = vmatmul.mubr.msk.bf16.gmra.mrb[8].mxu0 %vm832_vm2, %v5703_v53 }
  0xa4   : > { %4298 = vmatprep.mubr.msk.bf16.mxu1 %vm832_vm2, %v5625_v27  ;;  %4482 = vmatprep.mubr.msk.bf16.mxu0 %vm832_vm2, %v5589_v20 }
  0xab   : > { %4299 = vmatmul.mubr.msk.bf16.gmra.mrb[28].mxu1 %vm832_vm2, %v5635_v1  ;;  %4483 = vmatmul.mubr.msk.bf16.gmra.mrb[12].mxu0 %vm832_vm2, %v5602_v54 }
  0xac   : > { %4310 = vmatprep.mubr.msk.bf16.mxu1 %vm832_vm2, %v3715_v6  ;;  %4486 = vmatprep.mubr.msk.bf16.mxu0 %vm832_vm2, %v5609_v57 }
  0xb3   : > { %4311 = vmatmul.mubr.msk.bf16.vlgmr.msra.gmra.mrb[0].mxu1 %vm832_vm2, %v6136_v33  ;;  %4487 = vmatmul.mubr.msk.bf16.gmra.mrb[16].mxu0 %vm832_vm2, %v5613_v44  ;;  %v5885_v33 = vld [vmem:[%s4989_s12 + $0xd4] sm:$0x1] }
  0xb4   : > { %4343 = vmatpush3.bf16.msra.mxu1 %v5679_v31  ;;  %4314 = vmatprep.mubr.msk.bf16.mxu1 %vm832_vm2, %v6137_v47  ;;  %v6139_v31 = vld [vmem:[#allocation15_spill] sm:$0xff] }
  0xb5   : > { %4490 = vmatprep.mubr.msk.bf16.mxu0 %vm832_vm2, %v5617_v18  ;;  %4344 = vmatprep.subr.bf16.mxu1 %v4899_v15 }
  0xb8   : > { %4345 = vmatpush3.bf16.msra.mxu1 %v4899_v15  ;;  %v2743_v15 = vrot.slane %v2741_v23, 4 }
  0xb9   : > { %4346 = vmatprep.subr.bf16.mxu1 %v4903_v61 }
  0xbb   : > { %4315 = vmatmul.mubr.msk.bf16.gmra.mrb[4].mxu1 %vm832_vm2, %v6138_v8  ;;  %4491 = vmatmul.mubr.msk.bf16.gmra.mrb[20].mxu0 %vm832_vm2, %v5621_v4 }
  0xbc   : > { %4318 = vmatprep.mubr.msk.bf16.mxu1 %vm832_vm2, %v6139_v31  ;;  %4494 = vmatprep.mubr.msk.bf16.mxu0 %vm832_vm2, %v5625_v27 }
  0xbd   : > { %4347 = vmatpush3.bf16.msra.mxu1 %v4903_v61  ;;  %v6153_v61 = vld [vmem:[#allocation20_spill] sm:$0xff] }
  0xbe   : > { %4348 = vmatprep.subr.bf16.mxu1 %v4905_v2 }
  0xc1   : > { %4349 = vmatpush3.bf16.msra.mxu1 %v4905_v2  ;;  %v2734_v2 = vor.u32 %v2733_v11, %v2730_v36 }
  0xc2   : > { %4582 = vmatprep.subr.bf16.mxu1 %v4912_v34 }
  0xc3   : > { %4319 = vmatmul.mubr.msk.bf16.gmra.mrb[8].mxu1 %vm832_vm2, %v6140_v42  ;;  %4495 = vmatmul.mubr.msk.bf16.gmra.mrb[24].mxu0 %vm832_vm2, %v5635_v1 }
  0xc4   : > { %4322 = vmatprep.mubr.msk.bf16.mxu1 %vm832_vm2, %v6141_v46  ;;  %4498 = vmatprep.mubr.msk.bf16.mxu0 %vm832_vm2, %v5800_v9 }
  0xcb   : > { %4323 = vmatmul.mubr.msk.bf16.gmra.mrb[12].mxu1 %vm832_vm2, %v5497_v50  ;;  %4499 = vmatmul.mubr.msk.bf16.gmra.mrb[28].mxu0 %vm832_vm2, %v3815_v59  ;;  %v2747_v59 = vshll.u32 %v5885_v33, 16 }
  0xcc   : > { %4326 = vmatprep.mubr.msk.bf16.mxu1 %vm832_vm2, %v5528_v62  ;;  %4510 = vmatprep.mubr.msk.bf16.mxu0 %vm832_vm2, %v6142_v55  ;;  %v4915_v55 = vld [vmem:[%s6075_s1 + $0x98] sm:$0xff]  }
  0xd3   : > { %4327 = vmatmul.mubr.msk.bf16.gmra.mrb[16].mxu1 %vm832_vm2, %v5532_v38  ;;  %4511 = vmatmul.mubr.msk.bf16.vlgmr.msra.gmra.mrb[0].mxu0 %vm832_vm2, %v6143_v22  ;;  %v2749_v22 = vrot.slane %v2747_v59, 5 }
  0xd4   : > { %4543 = vmatpush3.bf16.msra.mxu0 %v4904_v17  ;;  %4330 = vmatprep.mubr.msk.bf16.mxu1 %vm832_vm2, %v5554_v28  ;;  %v6150_v17 = vld [vmem:[#allocation14_spill] sm:$0xff] }
  0xd5   : > { %4514 = vmatprep.mubr.msk.bf16.mxu0 %vm832_vm2, %v6144_v24  ;;  %4544 = vmatprep.subr.bf16.mxu0 %v4906_v39 }
  0xd8   : > { %4545 = vmatpush3.bf16.msra.mxu0 %v4906_v39 }
  0xd9   : > { %4546 = vmatprep.subr.bf16.mxu0 %v4907_v12 }
  0xdb   : > { %4331 = vmatmul.mubr.msk.bf16.gmra.mrb[20].mxu1 %vm832_vm2, %v5563_v13  ;;  %4515 = vmatmul.mubr.msk.bf16.gmra.mrb[4].mxu0 %vm832_vm2, %v6145_v45 }
  0xdc   : > { %4334 = vmatprep.mubr.msk.bf16.mxu1 %vm832_vm2, %v5604_v19  ;;  %4518 = vmatprep.mubr.msk.bf16.mxu0 %vm832_vm2, %v6146_v10 }
  0xdd   : > { %4547 = vmatpush3.bf16.msra.mxu0 %v4907_v12 }
  0xde   : > { %4548 = vmatprep.subr.bf16.mxu0 %v4908_v52 }
  0xe1   : > { %4549 = vmatpush3.bf16.msra.mxu0 %v4908_v52 }
  0xe3   : > { %4335 = vmatmul.mubr.msk.bf16.gmra.mrb[24].mxu1 %vm832_vm2, %v5631_v35  ;;  %4519 = vmatmul.mubr.msk.bf16.gmra.mrb[8].mxu0 %vm832_vm2, %v6147_v16 }
  0xe4   : > { %4338 = vmatprep.mubr.msk.bf16.mxu1 %vm832_vm2, %v5670_v60  ;;  %4522 = vmatprep.mubr.msk.bf16.mxu0 %vm832_vm2, %v6148_v41 }
  0xeb   : > { %4339 = vmatmul.mubr.msk.bf16.gmra.mrb[28].mxu1 %vm832_vm2, %v5685_v51  ;;  %4523 = vmatmul.mubr.msk.bf16.gmra.mrb[12].mxu0 %vm832_vm2, %v6149_v40 }
  0xec   : > { %4350 = vmatprep.mubr.msk.bf16.mxu1 %vm832_vm2, %v5037_v37  ;;  %4526 = vmatprep.mubr.msk.bf16.mxu0 %vm832_vm2, %v6150_v17  ;;  %v2737_v37 = vshll.u32 %v5817_v3, 16 }
  0xee   : > { %v2739_v6 = vrot.slane %v2737_v37, 5 }
  0xf3   : > { %4351 = vmatmul.mubr.msk.bf16.vlgmr.msra.gmra.mrb[0].mxu1 %vm832_vm2, %v5560_v48  ;;  %4527 = vmatmul.mubr.msk.bf16.gmra.mrb[16].mxu0 %vm832_vm2, %v6151_v56  ;;  %v4913_v48 = vld [vmem:[%s6075_s1 + $0x88] sm:$0xff]  }
  0xf4   : > { %4586 = vmatpush3.bf16.msra.mxu1 %v4912_v34  ;;  %4354 = vmatprep.mubr.msk.bf16.mxu1 %vm832_vm2, %v5583_v0  ;;  %v4914_v0 = vld [vmem:[%s6075_s1 + $0x90] sm:$0xff]   ;;  %v2744_v34 = vor.u32 %v2743_v15, %v2739_v6 }
  0xf5   : > { %4530 = vmatprep.mubr.msk.bf16.mxu0 %vm832_vm2, %v6152_v7  ;;  %4583 = vmatprep.subr.bf16.mxu1 %v4913_v48 }
  0xf6   : > { %v2745_v39 = vrot.slane %v2744_v34, 4 }
  0xf8   : > { %4587 = vmatpush3.bf16.msra.mxu1 %v4913_v48  ;;  %v2750_v24 = vsel %vm5028_vm3, %v2745_v39, %v2749_v22 }
  0xf9   : > { %4584 = vmatprep.subr.bf16.mxu1 %v4914_v0 }
  0xfb   : > { %4355 = vmatmul.mubr.msk.bf16.gmra.mrb[4].mxu1 %vm832_vm2, %v5629_v5  ;;  %4531 = vmatmul.mubr.msk.bf16.gmra.mrb[20].mxu0 %vm832_vm2, %v6153_v61  ;;  %v2735_v5 = vrot.slane %v2734_v2, 4 }
  0xfc   : > { %4358 = vmatprep.mubr.msk.bf16.mxu1 %vm832_vm2, %v5668_v43  ;;  %4534 = vmatprep.mubr.msk.bf16.mxu0 %vm832_vm2, %v5499_v63 }
  0xfd   : > { %4588 = vmatpush3.bf16.msra.mxu1 %v4914_v0  ;;  %v2740_v43 = vsel %vm5028_vm3, %v2735_v5, %v2739_v6 }
  0xfe   : > { %4585 = vmatprep.subr.bf16.mxu1 %v4915_v55  ;;  %v3836_v12 = vcombine.low %v2740_v43, %v2750_v24 }
 0x101   : > { %4589 = vmatpush3.bf16.msra.mxu1 %v4915_v55 }
 0x103   : > { %4359 = vmatmul.mubr.msk.bf16.gmra.mrb[8].mxu1 %vm832_vm2, %v5674_v49  ;;  %4535 = vmatmul.mubr.msk.bf16.gmra.mrb[24].mxu0 %vm832_vm2, %v5526_v25 }
 0x104   : > { %4362 = vmatprep.mubr.msk.bf16.mxu1 %vm832_vm2, %v5703_v53  ;;  %4538 = vmatprep.mubr.msk.bf16.mxu0 %vm832_vm2, %v5711_v58 }
 0x10b   : > { %4363 = vmatmul.mubr.msk.bf16.gmra.mrb[12].mxu1 %vm832_vm2, %v5589_v20  ;;  %4539 = vmatmul.mubr.msk.bf16.gmra.mrb[28].mxu0 %vm832_vm2, %v3836_v12 }
 0x10c   : > { %4366 = vmatprep.mubr.msk.bf16.mxu1 %vm832_vm2, %v5602_v54  ;;  %4550 = vmatprep.mubr.msk.bf16.mxu0 %vm832_vm2, %v6137_v47 }
 0x113   : > { %4367 = vmatmul.mubr.msk.bf16.gmra.mrb[16].mxu1 %vm832_vm2, %v5609_v57  ;;  %4551 = vmatmul.mubr.msk.bf16.vlgmr.msra.gmra.mrb[0].mxu0 %vm832_vm2, %v6138_v8  ;;  %v6002_v8 = vld [vmem:[%s6076_s2] ss:$0 sm:$0xff] }
 0x114   : > { %4370 = vmatprep.mubr.msk.bf16.mxu1 %vm832_vm2, %v5613_v44  ;;  %4554 = vmatprep.mubr.msk.bf16.mxu0 %vm832_vm2, %v6139_v31 }
 0x11b   : > { %4371 = vmatmul.mubr.msk.bf16.gmra.mrb[20].mxu1 %vm832_vm2, %v5617_v18  ;;  %4555 = vmatmul.mubr.msk.bf16.gmra.mrb[4].mxu0 %vm832_vm2, %v6140_v42 }
 0x11c   : > { %4374 = vmatprep.mubr.msk.bf16.mxu1 %vm832_vm2, %v5621_v4  ;;  %4558 = vmatprep.mubr.msk.bf16.mxu0 %vm832_vm2, %v6141_v46 }
 0x123   : > { %4375 = vmatmul.mubr.msk.bf16.gmra.mrb[24].mxu1 %vm832_vm2, %v5625_v27  ;;  %4559 = vmatmul.mubr.msk.bf16.gmra.mrb[8].mxu0 %vm832_vm2, %v5497_v50  ;;  %v3857_v50 = vrot.slane %v5814_v21, 9 }
 0x124   : > { %4378 = vmatprep.mubr.msk.bf16.mxu1 %vm832_vm2, %v5635_v1  ;;  %4562 = vmatprep.mubr.msk.bf16.mxu0 %vm832_vm2, %v5528_v62  ;;  %v2979_v62 = vrot.slane %v2977_v29, 4 }
 0x12b   : > { %4379 = vmatmul.mubr.msk.bf16.gmra.mrb[28].mxu1 %vm832_vm2, %v5800_v9  ;;  %4563 = vmatmul.mubr.msk.bf16.gmra.mrb[12].mxu0 %vm832_vm2, %v5532_v38  ;;  %v2980_v38 = vrot.slane %v5885_v33, 5 }
 0x12c   : > { %4406 = vmatprep.mubr.msk.bf16.mxu1 %vm832_vm2, %v6149_v40  ;;  %4566 = vmatprep.mubr.msk.bf16.mxu0 %vm832_vm2, %v5554_v28  ;;  %v2978_v28 = vsel %vm5235_vm6, %v3857_v50, %v2977_v29 }
 0x133   : > { %4407 = vmatmul.mubr.msk.bf16.vlgmr.msra.gmra.mrb[16].mxu1 %vm832_vm2, %v6150_v17  ;;  %4567 = vmatmul.mubr.msk.bf16.gmra.mrb[16].mxu0 %vm832_vm2, %v5563_v13  ;;  %v2981_v13 = vsel %vm5235_vm6, %v2979_v62, %v2980_v38 }
 0x134   : > { %4410 = vmatprep.mubr.msk.bf16.mxu1 %vm832_vm2, %v6151_v56  ;;  %4570 = vmatprep.mubr.msk.bf16.mxu0 %vm832_vm2, %v5604_v19  ;;  %v3858_v20 = vcombine.low %v2978_v28, %v2981_v13 }
 0x13b   : > { %4411 = vmatmul.mubr.msk.bf16.gmra.mrb[20].mxu1 %vm832_vm2, %v6152_v7  ;;  %4571 = vmatmul.mubr.msk.bf16.gmra.mrb[20].mxu0 %vm832_vm2, %v5631_v35 }
 0x13c   : > { %4414 = vmatprep.mubr.msk.bf16.mxu1 %vm832_vm2, %v6153_v61  ;;  %4574 = vmatprep.mubr.msk.bf16.mxu0 %vm832_vm2, %v5670_v60 }
 0x143   : > { %4415 = vmatmul.mubr.msk.bf16.gmra.mrb[24].mxu1 %vm832_vm2, %v5499_v63  ;;  %4575 = vmatmul.mubr.msk.bf16.gmra.mrb[24].mxu0 %vm832_vm2, %v5685_v51 }
 0x144   : > { %4418 = vmatprep.mubr.msk.bf16.mxu1 %vm832_vm2, %v5526_v25  ;;  %4578 = vmatprep.mubr.msk.bf16.mxu0 %vm832_vm2, %v5705_v32 }
 0x14b   : > { %4419 = vmatmul.mubr.msk.bf16.gmra.mrb[28].mxu1 %vm832_vm2, %v5711_v58  ;;  %4579 = vmatmul.mubr.msk.bf16.gmra.mrb[28].mxu0 %vm832_vm2, %v3858_v20 }
 0x1c6   : > { %v4352_v63 = vpop.f32.mrb[0].mxu1 }
 0x1c7   : > { %v1865_v54 = vpop.f32.mrb[1].mxu1 }
 0x1c8   : > { %v4353_v19 = vpop.f32.mrb[2].mxu1 }
 0x1c9   : > { %v1868_v57 = vpop.f32.mrb[3].mxu1 }
 0x1ce   : > { %v4356_v25 = vpop.f32.mrb[4].mxu1 }
 0x1cf   : > { %v1881_v44 = vpop.f32.mrb[5].mxu1 }
 0x1d0   : > { %v4357_v18 = vpop.f32.mrb[6].mxu1 }
 0x1d1   : > { %v1884_v4 = vpop.f32.mrb[7].mxu1 }
 0x1d6   : > { %v4360_v27 = vpop.f32.mrb[8].mxu1 }
 0x1d7   : > { %v1897_v35 = vpop.f32.mrb[9].mxu1 }
 0x1d8   : > { %v5987_v1 = vpop.f32.mrb[10].mxu1 }
 0x1d9   : > { %v5989_v14 = vpop.f32.mrb[11].mxu1 }
 0x1de   : > { %v5991_v60 = vpop.f32.mrb[12].mxu1 }
 0x1df   : > { %v5993_v49 = vpop.f32.mrb[13].mxu1 }
 0x1e0   : > { %v5995_v51 = vpop.f32.mrb[14].mxu1 }
 0x1e1   : > { %v5997_v53 = vpop.f32.mrb[15].mxu1 }
 0x1e6   : > { %v4552_v32 = vpop.f32.mrb[0].mxu0 }
 0x1e7   : > { %v4590_v58 = vadd.f32 %v4552_v32, %v4352_v63  ;;  %v3046_v47 = vpop.f32.mrb[1].mxu0 }
 0x1e8   : > { %v4591_v31 = vadd.f32 %v3046_v47, %v1865_v54  ;;  %v4553_v9 = vpop.f32.mrb[2].mxu0 }
 0x1e9   : > { %v4592_v42 = vadd.f32 %v4553_v9, %v4353_v19  ;;  %v3049_v46 = vpop.f32.mrb[3].mxu0  ;;  %v3310_v3 = vadd.f32 %v4590_v58, %v6002_v8  ;;  %v3239_v56 = vmul.f32 %v4590_v58, %v4590_v58 }
 0x1ea   : > { %v4593_v21 = vadd.f32 %v3049_v46, %v1868_v57  ;;  %v3237_v52 = vmul.f32 %v4591_v31, %v4591_v31  ;;  %v3308_v10 = vadd.f32 %v4591_v31, %v6002_v8 }
 0x1eb   : > { %v3311_v45 = vadd.f32 %v4592_v42, %v6002_v8  ;;  %v3240_v36 = vmul.f32 %v4592_v42, %v4592_v42 }
 0x1ec   : > { %v3205_v16 = vadd.f32 %v4593_v21, %v4591_v31  ;;  %v3238_v41 = vmul.f32 %v4593_v21, %v4593_v21  ;;  %v3309_v40 = vadd.f32 %v4593_v21, %v6002_v8 }
 0x1ed   : > { %v3955_v17 = vpack.c.bf16 %v3311_v45, %v3310_v3 }
 0x1ee   : > { %v3206_v30 = vadd.f32 %v4590_v58, %v3205_v16  ;;  %v3269_v26 = vadd.f32 %v3238_v41, %v3237_v52  ;;  %v3950_v23 = vpack.c.bf16 %v3309_v40, %v3308_v10  ;;  %v4556_v37 = vpop.f32.mrb[4].mxu0 }
 0x1ef   : > { %4027 = vst [vmem:[%s6011_s17 + $0x8] sm:$0xff] %v3955_v17   ;;  %v4594_v7 = vadd.f32 %v4556_v37, %v4356_v25  ;;  %v3062_v48 = vpop.f32.mrb[5].mxu0 }
 0x1f0   : > { %v3270_v11 = vadd.f32 %v3269_v26, %v3239_v56  ;;  %3951 = vst [vmem:[%s6011_s17] sm:$0xff] %v3950_v23   ;;  %v4595_v6 = vadd.f32 %v3062_v48, %v1881_v44  ;;  %v3207_v15 = vadd.f32 %v4592_v42, %v3206_v30  ;;  %v4557_v33 = vpop.f32.mrb[6].mxu0 }
 0x1f1   : > { %v4596_v0 = vadd.f32 %v4557_v33, %v4357_v18  ;;  %v3065_v61 = vpop.f32.mrb[7].mxu0  ;;  %v3314_v55 = vadd.f32 %v4594_v7, %v6002_v8  ;;  %v3243_v62 = vmul.f32 %v4594_v7, %v4594_v7 }
 0x1f2   : > { %v3208_v2 = vadd.f32 %v4595_v6, %v3207_v15  ;;  %v3241_v34 = vmul.f32 %v4595_v6, %v4595_v6  ;;  %v3271_v59 = vadd.f32 %v3270_v11, %v3240_v36  ;;  %v4597_v39 = vadd.f32 %v3065_v61, %v1884_v4 }
 0x1f3   : > { %v3315_v5 = vadd.f32 %v4596_v0, %v6002_v8  ;;  %v3312_v43 = vadd.f32 %v4595_v6, %v6002_v8  ;;  %v3244_v25 = vmul.f32 %v4596_v0, %v4596_v0 }
 0x1f4   : > { %v3272_v22 = vadd.f32 %v3271_v59, %v3241_v34  ;;  %v3209_v12 = vadd.f32 %v4597_v39, %v3208_v2  ;;  %v3242_v29 = vmul.f32 %v4597_v39, %v4597_v39  ;;  %v3313_v50 = vadd.f32 %v4597_v39, %v6002_v8 }
 0x1f5   : > { %v3965_v24 = vpack.c.bf16 %v3315_v5, %v3314_v55 }
 0x1f6   : > { %v4560_v38 = vpop.f32.mrb[8].mxu0  ;;  %v3210_v28 = vadd.f32 %v4594_v7, %v3209_v12  ;;  %v3273_v13 = vadd.f32 %v3272_v22, %v3242_v29  ;;  %v3960_v20 = vpack.c.bf16 %v3313_v50, %v3312_v43 }
 0x1f7   : > { %4029 = vst [vmem:[%s6011_s17 + $0x18] sm:$0xff] %v3965_v24   ;;  %v4598_v63 = vadd.f32 %v4560_v38, %v4360_v27  ;;  %v3078_v54 = vpop.f32.mrb[9].mxu0 }
 0x1f8   : > { %v4599_v19 = vadd.f32 %v3078_v54, %v1897_v35  ;;  %v4561_v57 = vpop.f32.mrb[10].mxu0  ;;  %v3274_v44 = vadd.f32 %v3273_v13, %v3243_v62  ;;  %4028 = vst [vmem:[%s6011_s17 + $0x10] sm:$0xff] %v3960_v20   ;;  %v3211_v18 = vadd.f32 %v4596_v0, %v3210_v28 }
 0x1f9   : > { %v3081_v4 = vpop.f32.mrb[11].mxu0  ;;  %v4600_v58 = vadd.f32 %v4561_v57, %v5987_v1  ;;  %v3318_v31 = vadd.f32 %v4598_v63, %v6002_v8  ;;  %v3247_v16 = vmul.f32 %v4598_v63, %v4598_v63 }
 0x1fa   : > { %v3245_v32 = vmul.f32 %v4599_v19, %v4599_v19  ;;  %v4601_v47 = vadd.f32 %v3081_v4, %v5989_v14  ;;  %v3212_v9 = vadd.f32 %v4599_v19, %v3211_v18  ;;  %v3275_v42 = vadd.f32 %v3274_v44, %v3244_v25 }
 0x1fb   : > { %v3316_v27 = vadd.f32 %v4599_v19, %v6002_v8  ;;  %v3319_v35 = vadd.f32 %v4600_v58, %v6002_v8  ;;  %v3248_v26 = vmul.f32 %v4600_v58, %v4600_v58 }
 0x1fc   : > { %v3246_v46 = vmul.f32 %v4601_v47, %v4601_v47  ;;  %v3317_v21 = vadd.f32 %v4601_v47, %v6002_v8  ;;  %v3276_v3 = vadd.f32 %v3275_v42, %v3245_v32  ;;  %v3213_v52 = vadd.f32 %v4601_v47, %v3212_v9 }
 0x1fd   : > { %v3975_v45 = vpack.c.bf16 %v3319_v35, %v3318_v31 }
 0x1fe   : > { %v3970_v10 = vpack.c.bf16 %v3317_v21, %v3316_v27  ;;  %v4564_v1 = vpop.f32.mrb[12].mxu0  ;;  %v3214_v14 = vadd.f32 %v4598_v63, %v3213_v52  ;;  %v3277_v41 = vadd.f32 %v3276_v3, %v3246_v46 }
 0x1ff   : > { %v4602_v40 = vadd.f32 %v4564_v1, %v5991_v60  ;;  %v3094_v17 = vpop.f32.mrb[13].mxu0  ;;  %4031 = vst [vmem:[%s6011_s17 + $0x28] sm:$0xff] %v3975_v45  }
 0x200   : > { %4030 = vst [vmem:[%s6011_s17 + $0x20] sm:$0xff] %v3970_v10   ;;  %v4603_v56 = vadd.f32 %v3094_v17, %v5993_v49  ;;  %v4565_v30 = vpop.f32.mrb[14].mxu0  ;;  %v3278_v23 = vadd.f32 %v3277_v41, %v3247_v16  ;;  %v3215_v37 = vadd.f32 %v4600_v58, %v3214_v14 }
 0x201   : > { %v3097_v7 = vpop.f32.mrb[15].mxu0  ;;  %v4604_v36 = vadd.f32 %v4565_v30, %v5995_v51  ;;  %v3322_v6 = vadd.f32 %v4602_v40, %v6002_v8 }
 0x202   : > { %v3249_v48 = vmul.f32 %v4603_v56, %v4603_v56  ;;  %v4605_v11 = vadd.f32 %v3097_v7, %v5997_v53  ;;  %v3216_v15 = vadd.f32 %v4603_v56, %v3215_v37  ;;  %v3279_v33 = vadd.f32 %v3278_v23, %v3248_v26 }
 0x203   : > { %v3320_v60 = vadd.f32 %v4603_v56, %v6002_v8  ;;  %v3323_v0 = vadd.f32 %v4604_v36, %v6002_v8  ;;  %v3251_v53 = vmul.f32 %v4602_v40, %v4602_v40  ;;  %v3252_v38 = vmul.f32 %v4604_v36, %v4604_v36 }
 0x204   : > { %v3250_v49 = vmul.f32 %v4605_v11, %v4605_v11  ;;  %v3321_v61 = vadd.f32 %v4605_v11, %v6002_v8  ;;  %v3280_v2 = vadd.f32 %v3279_v33, %v3249_v48  ;;  %v3217_v34 = vadd.f32 %v4605_v11, %v3216_v15 }
 0x205   : > { %v3985_v59 = vpack.c.bf16 %v3323_v0, %v3322_v6 }
 0x206   : > { %v3980_v55 = vpack.c.bf16 %v3321_v61, %v3320_v60  ;;  %v4408_v51 = vpop.f32.mrb[16].mxu1  ;;  %v4568_v5 = vpop.f32.mrb[16].mxu0  ;;  %v3218_v39 = vadd.f32 %v4602_v40, %v3217_v34  ;;  %v3281_v22 = vadd.f32 %v3280_v2, %v3250_v49 }
 0x207   : > { %v4606_v43 = vadd.f32 %v4568_v5, %v4408_v51  ;;  %v2176_v24 = vpop.f32.mrb[17].mxu1  ;;  %v3110_v12 = vpop.f32.mrb[17].mxu0  ;;  %4033 = vst [vmem:[%s6011_s17 + $0x38] sm:$0xff] %v3985_v59  }
 0x208   : > { %4032 = vst [vmem:[%s6011_s17 + $0x30] sm:$0xff] %v3980_v55   ;;  %v4607_v29 = vadd.f32 %v3110_v12, %v2176_v24  ;;  %v4409_v50 = vpop.f32.mrb[18].mxu1  ;;  %v4569_v62 = vpop.f32.mrb[18].mxu0  ;;  %v3282_v28 = vadd.f32 %v3281_v22, %v3251_v53  ;;  %v3219_v13 = vadd.f32 %v4604_v36, %v3218_v39 }
 0x209   : > { %v2179_v20 = vpop.f32.mrb[19].mxu1  ;;  %v3113_v63 = vpop.f32.mrb[19].mxu0  ;;  %v4608_v19 = vadd.f32 %v4569_v62, %v4409_v50  ;;  %v3326_v25 = vadd.f32 %v4606_v43, %v6002_v8  ;;  %v3255_v21 = vmul.f32 %v4606_v43, %v4606_v43 }
 0x20a   : > { %v3253_v54 = vmul.f32 %v4607_v29, %v4607_v29  ;;  %v4609_v57 = vadd.f32 %v3113_v63, %v2179_v20  ;;  %v3220_v44 = vadd.f32 %v4607_v29, %v3219_v13  ;;  %v3283_v18 = vadd.f32 %v3282_v28, %v3252_v38 }
 0x20b   : > { %v3324_v4 = vadd.f32 %v4607_v29, %v6002_v8  ;;  %v3327_v32 = vadd.f32 %v4608_v19, %v6002_v8  ;;  %v3256_v40 = vmul.f32 %v4608_v19, %v4608_v19 }
 0x20c   : > { %v3254_v58 = vmul.f32 %v4609_v57, %v4609_v57  ;;  %v3325_v47 = vadd.f32 %v4609_v57, %v6002_v8  ;;  %v3284_v31 = vadd.f32 %v3283_v18, %v3253_v54  ;;  %v3221_v9 = vadd.f32 %v4609_v57, %v3220_v44 }
 0x20d   : > { %v3995_v42 = vpack.c.bf16 %v3327_v32, %v3326_v25 }
 0x20e   : > { %v3990_v27 = vpack.c.bf16 %v3325_v47, %v3324_v4  ;;  %v4412_v35 = vpop.f32.mrb[20].mxu1  ;;  %v4572_v46 = vpop.f32.mrb[20].mxu0  ;;  %v3222_v3 = vadd.f32 %v4606_v43, %v3221_v9  ;;  %v3285_v52 = vadd.f32 %v3284_v31, %v3254_v58 }
 0x20f   : > { %v4610_v45 = vadd.f32 %v4572_v46, %v4412_v35  ;;  %v2192_v10 = vpop.f32.mrb[21].mxu1  ;;  %v3126_v1 = vpop.f32.mrb[21].mxu0  ;;  %4035 = vst [vmem:[%s6011_s17 + $0x48] sm:$0xff] %v3995_v42  }
 0x210   : > { %4034 = vst [vmem:[%s6011_s17 + $0x40] sm:$0xff] %v3990_v27   ;;  %v4611_v16 = vadd.f32 %v3126_v1, %v2192_v10  ;;  %v4413_v14 = vpop.f32.mrb[22].mxu1  ;;  %v4573_v41 = vpop.f32.mrb[22].mxu0  ;;  %v3286_v17 = vadd.f32 %v3285_v52, %v3255_v21  ;;  %v3223_v56 = vadd.f32 %v4608_v19, %v3222_v3 }
 0x211   : > { %v2195_v30 = vpop.f32.mrb[23].mxu1  ;;  %v3129_v26 = vpop.f32.mrb[23].mxu0  ;;  %v4612_v37 = vadd.f32 %v4573_v41, %v4413_v14  ;;  %v3330_v48 = vadd.f32 %v4610_v45, %v6002_v8  ;;  %v3259_v55 = vmul.f32 %v4610_v45, %v4610_v45 }
 0x212   : > { %v3257_v23 = vmul.f32 %v4611_v16, %v4611_v16  ;;  %v4613_v7 = vadd.f32 %v3129_v26, %v2195_v30  ;;  %v3224_v36 = vadd.f32 %v4611_v16, %v3223_v56  ;;  %v3287_v11 = vadd.f32 %v3286_v17, %v3256_v40 }
 0x213   : > { %v3328_v6 = vadd.f32 %v4611_v16, %v6002_v8  ;;  %v3331_v15 = vadd.f32 %v4612_v37, %v6002_v8  ;;  %v3260_v29 = vmul.f32 %v4612_v37, %v4612_v37 }
 0x214   : > { %v3258_v33 = vmul.f32 %v4613_v7, %v4613_v7  ;;  %v3329_v60 = vadd.f32 %v4613_v7, %v6002_v8  ;;  %v3288_v0 = vadd.f32 %v3287_v11, %v3257_v23  ;;  %v3225_v49 = vadd.f32 %v4613_v7, %v3224_v36 }
 0x215   : > { %v4005_v61 = vpack.c.bf16 %v3331_v15, %v3330_v48 }
 0x216   : > { %v4000_v2 = vpack.c.bf16 %v3329_v60, %v3328_v6  ;;  %v4416_v34 = vpop.f32.mrb[24].mxu1  ;;  %v4576_v59 = vpop.f32.mrb[24].mxu0  ;;  %v3226_v51 = vadd.f32 %v4610_v45, %v3225_v49  ;;  %v3289_v5 = vadd.f32 %v3288_v0, %v3258_v33 }
 0x217   : > { %v4614_v53 = vadd.f32 %v4576_v59, %v4416_v34  ;;  %v2208_v39 = vpop.f32.mrb[25].mxu1  ;;  %v3142_v22 = vpop.f32.mrb[25].mxu0  ;;  %4037 = vst [vmem:[%s6011_s17 + $0x58] sm:$0xff] %v4005_v61  }
 0x218   : > { %4036 = vst [vmem:[%s6011_s17 + $0x50] sm:$0xff] %v4000_v2   ;;  %v4615_v43 = vadd.f32 %v3142_v22, %v2208_v39  ;;  %v4417_v24 = vpop.f32.mrb[26].mxu1  ;;  %v4577_v12 = vpop.f32.mrb[26].mxu0  ;;  %v3290_v50 = vadd.f32 %v3289_v5, %v3259_v55  ;;  %v3227_v62 = vadd.f32 %v4612_v37, %v3226_v51 }
 0x219   : > { %v2211_v38 = vpop.f32.mrb[27].mxu1  ;;  %v3145_v28 = vpop.f32.mrb[27].mxu0  ;;  %v4616_v20 = vadd.f32 %v4577_v12, %v4417_v24  ;;  %v3334_v54 = vadd.f32 %v4614_v53, %v6002_v8  ;;  %v3263_v27 = vmul.f32 %v4614_v53, %v4614_v53 }
 0x21a   : > { %v3261_v13 = vmul.f32 %v4615_v43, %v4615_v43  ;;  %v4617_v63 = vadd.f32 %v3145_v28, %v2211_v38  ;;  %v3228_v19 = vadd.f32 %v4615_v43, %v3227_v62  ;;  %v3291_v57 = vadd.f32 %v3290_v50, %v3260_v29 }
 0x21b   : > { %v3332_v25 = vadd.f32 %v4615_v43, %v6002_v8  ;;  %v3335_v44 = vadd.f32 %v4616_v20, %v6002_v8  ;;  %v3264_v16 = vmul.f32 %v4616_v20, %v4616_v20 }
 0x21c   : > { %v3262_v18 = vmul.f32 %v4617_v63, %v4617_v63  ;;  %v3333_v4 = vadd.f32 %v4617_v63, %v6002_v8  ;;  %v3292_v32 = vadd.f32 %v3291_v57, %v3261_v13  ;;  %v3229_v58 = vadd.f32 %v4617_v63, %v3228_v19 }
 0x21d   : > { %v4015_v47 = vpack.c.bf16 %v3335_v44, %v3334_v54 }
 0x21e   : > { %v4010_v31 = vpack.c.bf16 %v3333_v4, %v3332_v25  ;;  %v4420_v9 = vpop.f32.mrb[28].mxu1  ;;  %v4580_v42 = vpop.f32.mrb[28].mxu0  ;;  %v3230_v35 = vadd.f32 %v4614_v53, %v3229_v58  ;;  %v3293_v46 = vadd.f32 %v3292_v32, %v3262_v18 }
 0x21f   : > { %v4618_v21 = vadd.f32 %v4580_v42, %v4420_v9  ;;  %v2224_v3 = vpop.f32.mrb[29].mxu1  ;;  %v3158_v52 = vpop.f32.mrb[29].mxu0  ;;  %4039 = vst [vmem:[%s6011_s17 + $0x68] sm:$0xff] %v4015_v47  }
 0x220   : > { %4038 = vst [vmem:[%s6011_s17 + $0x60] sm:$0xff] %v4010_v31   ;;  %v4619_v45 = vadd.f32 %v3158_v52, %v2224_v3  ;;  %v4421_v10 = vpop.f32.mrb[30].mxu1  ;;  %v4581_v1 = vpop.f32.mrb[30].mxu0  ;;  %v3294_v14 = vadd.f32 %v3293_v46, %v3263_v27  ;;  %v3231_v41 = vadd.f32 %v4616_v20, %v3230_v35 }
 0x221   : > { %v2227_v40 = vpop.f32.mrb[31].mxu1  ;;  %v3161_v17 = vpop.f32.mrb[31].mxu0  ;;  %v4620_v30 = vadd.f32 %v4581_v1, %v4421_v10  ;;  %v3338_v23 = vadd.f32 %v4618_v21, %v6002_v8  ;;  %v3267_v49 = vmul.f32 %v4618_v21, %v4618_v21 }
 0x222   : > { %v3265_v56 = vmul.f32 %v4619_v45, %v4619_v45  ;;  %v4621_v26 = vadd.f32 %v3161_v17, %v2227_v40  ;;  %v3232_v37 = vadd.f32 %v4619_v45, %v3231_v41  ;;  %v3295_v7 = vadd.f32 %v3294_v14, %v3264_v16 }
 0x223   : > { %v3336_v48 = vadd.f32 %v4619_v45, %v6002_v8  ;;  %v3339_v36 = vadd.f32 %v4620_v30, %v6002_v8  ;;  %v3268_v34 = vmul.f32 %v4620_v30, %v4620_v30 }
 0x224   : > { %v3266_v11 = vmul.f32 %v4621_v26, %v4621_v26  ;;  %v3337_v6 = vadd.f32 %v4621_v26, %v6002_v8  ;;  %v3296_v15 = vadd.f32 %v3295_v7, %v3265_v56  ;;  %v3233_v33 = vadd.f32 %v4621_v26, %v3232_v37 }
 0x225   : > { %v4025_v60 = vpack.c.bf16 %v3339_v36, %v3338_v23 }
 0x226   : > { %v4020_v0 = vpack.c.bf16 %v3337_v6, %v3336_v48  ;;  %v3234_v61 = vadd.f32 %v4618_v21, %v3233_v33  ;;  %v3297_v2 = vadd.f32 %v3296_v15, %v3266_v11 }
 0x227   : > { %4041 = vst [vmem:[%s6011_s17 + $0x78] sm:$0xff] %v4025_v60  }
 0x228   : > { %4040 = vst [vmem:[%s6011_s17 + $0x70] sm:$0xff] %v4020_v0   ;;  %v3235_v59 = vadd.f32 %v4620_v30, %v3234_v61  ;;  %v3298_v55 = vadd.f32 %v3297_v2, %v3267_v49 }
 0x22a   : > { %3236 = vst [vmem:[%s241_s23] sm:$0xff] %v3235_v59  ;;  %v3299_v8 = vadd.f32 %v3298_v55, %v3268_v34 }
 0x22c   : > { %3300 = vst [vmem:[%s245_s26] sm:$0xff] %v3299_v8 }
 0x22d PF: > { %s16_s18 = sadd.s32 1, %s4922_s18  }
 0x22e   : > { %p13_p4 = scmp.ge.s32.totalorder %s16_s18, 4  }
 0x230   :  { %15 = sbr.rel (!%p13_p4) target bundleno = 1 (0x1), region = 86 }

// kernel: discriminator_forward.13
= control target key start
LH: loop header
LB: loop body
LE: loop exit
PB: predicated region body
PF: predicated region fallthrough
CT: control target
= control target key end

     0   :  { %s455_s0 = inlined_call_operand.vmem [shape: bf16[128,128], index: 0, kind: input, shape index: {}]   ;;  %s456_s1 = inlined_call_operand.vmem [shape: f32[1,128], index: 1, kind: input, shape index: {}]   ;;  %s457_s2 = inlined_call_operand.vmem [shape: f32[1,128], index: 2, kind: input, shape index: {}]   ;;  %s458_s3 = inlined_call_operand.vmem [shape: bf16[128,128], index: 3, kind: output, shape index: {}]  }
   0x1   :  { %v259_v0 = vld [vmem:[%s455_s0] sm:$0xff]   ;;  %v330_v4 = vld [vmem:[%s455_s0 + $0x8] sm:$0xff]   ;;  %v331_v5 = vld [vmem:[%s455_s0 + $0x10] sm:$0xff]  }
   0x2   :  { %v370_v1 = vld [vmem:[%s456_s1] ss:$0 sm:$0xff]  ;;  %v260_v2 = vunpack.c.l.bf16 %v259_v0  ;;  %v261_v3 = vunpack.c.h.bf16 %v259_v0  ;;  %v332_v6 = vld [vmem:[%s455_s0 + $0x18] sm:$0xff]   ;;  %v264_v8 = vunpack.c.l.bf16 %v330_v4  ;;  %v265_v9 = vunpack.c.h.bf16 %v330_v4  ;;  %v334_v35 = vld [vmem:[%s455_s0 + $0x28] sm:$0xff]  }
   0x3   :  { %v384_v7 = vld [vmem:[%s457_s2] ss:$0 sm:$0xff]  ;;  %v268_v10 = vunpack.c.l.bf16 %v331_v5  ;;  %v269_v11 = vunpack.c.h.bf16 %v331_v5  ;;  %v272_v14 = vunpack.c.l.bf16 %v332_v6  ;;  %v273_v15 = vunpack.c.h.bf16 %v332_v6  ;;  %v335_v48 = vld [vmem:[%s455_s0 + $0x30] sm:$0xff]   ;;  %v336_v4 = vld [vmem:[%s455_s0 + $0x38] sm:$0xff]  }
   0x4   :  { %v53_v12 = vmul.f32 %v260_v2, %v370_v1  ;;  %v54_v13 = vmul.f32 %v261_v3, %v370_v1  ;;  %v55_v16 = vmul.f32 %v264_v8, %v370_v1  ;;  %v56_v17 = vmul.f32 %v265_v9, %v370_v1  ;;  %v333_v34 = vld [vmem:[%s455_s0 + $0x20] sm:$0xff]  }
   0x5   :  { %v57_v18 = vmul.f32 %v268_v10, %v370_v1  ;;  %v58_v19 = vmul.f32 %v269_v11, %v370_v1  ;;  %v59_v22 = vmul.f32 %v272_v14, %v370_v1  ;;  %v60_v23 = vmul.f32 %v273_v15, %v370_v1 }
   0x6   :  { %v76_v20 = vadd.f32 %v384_v7, %v53_v12  ;;  %v77_v21 = vadd.f32 %v384_v7, %v54_v13  ;;  %v78_v24 = vadd.f32 %v384_v7, %v55_v16  ;;  %v79_v25 = vadd.f32 %v384_v7, %v56_v17 }
   0x7   :  { %v80_v26 = vadd.f32 %v384_v7, %v57_v18  ;;  %v81_v27 = vadd.f32 %v384_v7, %v58_v19  ;;  %v82_v42 = vadd.f32 %v384_v7, %v59_v22  ;;  %v83_v43 = vadd.f32 %v384_v7, %v60_v23 }
   0x8   :  { %vm92_vm0 = vcmp.ge.f32.partialorder %v76_v20, 0.0  ;;  %vm93_vm1 = vcmp.ge.f32.partialorder %v77_v21, 0.0  ;;  %v108_v28 = vmul.f32 0.2, %v76_v20  ;;  %v109_v29 = vmul.f32 0.2, %v77_v21 }
   0x9   :  { %vm94_vm2 = vcmp.ge.f32.partialorder %v78_v24, 0.0  ;;  %vm95_vm3 = vcmp.ge.f32.partialorder %v79_v25, 0.0  ;;  %v110_v30 = vmul.f32 0.2, %v78_v24  ;;  %v111_v31 = vmul.f32 0.2, %v79_v25 }
   0xa   :  { %v124_v32 = vsel %vm92_vm0, %v76_v20, %v108_v28  ;;  %v125_v33 = vsel %vm93_vm1, %v77_v21, %v109_v29  ;;  %vm96_vm4 = vcmp.ge.f32.partialorder %v80_v26, 0.0  ;;  %vm97_vm5 = vcmp.ge.f32.partialorder %v81_v27, 0.0 }
   0xb   :  { %v293_v36 = vpack.c.bf16 %v125_v33, %v124_v32  ;;  %v126_v37 = vsel %vm94_vm2, %v78_v24, %v110_v30  ;;  %v127_v38 = vsel %vm95_vm3, %v79_v25, %v111_v31  ;;  %v112_v39 = vmul.f32 0.2, %v80_v26 }
   0xc   :  { %v298_v40 = vpack.c.bf16 %v127_v38, %v126_v37  ;;  %v113_v41 = vmul.f32 0.2, %v81_v27  ;;  %v276_v45 = vunpack.c.l.bf16 %v333_v34  ;;  %v277_v46 = vunpack.c.h.bf16 %v333_v34 }
   0xd   :  { %294 = vst [vmem:[%s458_s3] sm:$0xff] %v293_v36   ;;  %v128_v44 = vsel %vm96_vm4, %v80_v26, %v112_v39  ;;  %v280_v47 = vunpack.c.l.bf16 %v334_v35  ;;  %vm98_vm6 = vcmp.ge.f32.partialorder %v82_v42, 0.0  ;;  %vm99_vm7 = vcmp.ge.f32.partialorder %v83_v43, 0.0 }
   0xe   :  { %337 = vst [vmem:[%s458_s3 + $0x8] sm:$0xff] %v298_v40   ;;  %v129_v49 = vsel %vm97_vm5, %v81_v27, %v113_v41  ;;  %v114_v50 = vmul.f32 0.2, %v82_v42  ;;  %v115_v52 = vmul.f32 0.2, %v83_v43  ;;  %v61_v53 = vmul.f32 %v276_v45, %v370_v1 }
   0xf   :  { %v303_v51 = vpack.c.bf16 %v129_v49, %v128_v44  ;;  %v62_v54 = vmul.f32 %v277_v46, %v370_v1  ;;  %v281_v56 = vunpack.c.h.bf16 %v334_v35  ;;  %v63_v57 = vmul.f32 %v280_v47, %v370_v1 }
  0x10   :  { %v130_v55 = vsel %vm98_vm6, %v82_v42, %v114_v50  ;;  %v284_v58 = vunpack.c.l.bf16 %v335_v48  ;;  %v131_v59 = vsel %vm99_vm7, %v83_v43, %v115_v52  ;;  %v84_v60 = vadd.f32 %v384_v7, %v61_v53 }
  0x11   :  { %338 = vst [vmem:[%s458_s3 + $0x10] sm:$0xff] %v303_v51   ;;  %v85_v61 = vadd.f32 %v384_v7, %v62_v54  ;;  %v285_v62 = vunpack.c.h.bf16 %v335_v48  ;;  %v308_v63 = vpack.c.bf16 %v131_v59, %v130_v55  ;;  %v64_v0 = vmul.f32 %v281_v56, %v370_v1 }
  0x12   :  { %v86_v2 = vadd.f32 %v384_v7, %v63_v57  ;;  %v65_v3 = vmul.f32 %v284_v58, %v370_v1  ;;  %vm100_vm8 = vcmp.ge.f32.partialorder %v84_v60, 0.0  ;;  %v116_v5 = vmul.f32 0.2, %v84_v60 }
  0x13   :  { %vm101_vm9 = vcmp.ge.f32.partialorder %v85_v61, 0.0  ;;  %v117_v6 = vmul.f32 0.2, %v85_v61  ;;  %339 = vst [vmem:[%s458_s3 + $0x18] sm:$0xff] %v308_v63   ;;  %v87_v8 = vadd.f32 %v384_v7, %v64_v0  ;;  %v66_v10 = vmul.f32 %v285_v62, %v370_v1 }
  0x14   :  { %vm102_vm10 = vcmp.ge.f32.partialorder %v86_v2, 0.0  ;;  %v118_v9 = vmul.f32 0.2, %v86_v2  ;;  %v132_v11 = vsel %vm100_vm8, %v84_v60, %v116_v5  ;;  %v88_v13 = vadd.f32 %v384_v7, %v65_v3 }
  0x15   :  { %v133_v12 = vsel %vm101_vm9, %v85_v61, %v117_v6  ;;  %v288_v14 = vunpack.c.l.bf16 %v336_v4  ;;  %vm103_vm11 = vcmp.ge.f32.partialorder %v87_v8, 0.0  ;;  %v119_v16 = vmul.f32 0.2, %v87_v8 }
  0x16   :  { %v313_v15 = vpack.c.bf16 %v133_v12, %v132_v11  ;;  %v134_v17 = vsel %vm102_vm10, %v86_v2, %v118_v9  ;;  %v89_v18 = vadd.f32 %v384_v7, %v66_v10  ;;  %vm104_vm12 = vcmp.ge.f32.partialorder %v88_v13, 0.0 }
  0x17   :  { %v120_v19 = vmul.f32 0.2, %v88_v13  ;;  %v289_v20 = vunpack.c.h.bf16 %v336_v4  ;;  %v135_v21 = vsel %vm103_vm11, %v87_v8, %v119_v16  ;;  %v67_v22 = vmul.f32 %v288_v14, %v370_v1 }
  0x18   :  { %340 = vst [vmem:[%s458_s3 + $0x20] sm:$0xff] %v313_v15   ;;  %v318_v23 = vpack.c.bf16 %v135_v21, %v134_v17  ;;  %vm105_vm13 = vcmp.ge.f32.partialorder %v89_v18, 0.0  ;;  %v121_v24 = vmul.f32 0.2, %v89_v18 }
  0x19   :  { %v136_v25 = vsel %vm104_vm12, %v88_v13, %v120_v19  ;;  %v68_v26 = vmul.f32 %v289_v20, %v370_v1  ;;  %v90_v27 = vadd.f32 %v384_v7, %v67_v22 }
  0x1a   :  { %341 = vst [vmem:[%s458_s3 + $0x28] sm:$0xff] %v318_v23   ;;  %v137_v28 = vsel %vm105_vm13, %v89_v18, %v121_v24 }
  0x1b   :  { %v323_v29 = vpack.c.bf16 %v137_v28, %v136_v25  ;;  %v91_v30 = vadd.f32 %v384_v7, %v68_v26  ;;  %vm106_vm14 = vcmp.ge.f32.partialorder %v90_v27, 0.0  ;;  %v122_v31 = vmul.f32 0.2, %v90_v27 }
  0x1d   :  { %342 = vst [vmem:[%s458_s3 + $0x30] sm:$0xff] %v323_v29   ;;  %vm107_vm15 = vcmp.ge.f32.partialorder %v91_v30, 0.0  ;;  %v123_v32 = vmul.f32 0.2, %v91_v30  ;;  %v138_v33 = vsel %vm106_vm14, %v90_v27, %v122_v31 }
  0x1f   :  { %v139_v1 = vsel %vm107_vm15, %v91_v30, %v123_v32 }
  0x20   :  { %v328_v34 = vpack.c.bf16 %v139_v1, %v138_v33 }
  0x22   :  { %343 = vst [vmem:[%s458_s3 + $0x38] sm:$0xff] %v328_v34  }

// kernel: discriminator_forward.12
= control target key start
LH: loop header
LB: loop body
LE: loop exit
PB: predicated region body
PF: predicated region fallthrough
CT: control target
= control target key end

     0   :  { %s2777_s18 = smov 0   ;;  %s3297_s0 = inlined_call_operand.vmem [shape: bf16[2,36,9,128], index: 0, kind: input, shape index: {}]   ;;  %s3298_s1 = inlined_call_operand.vmem [shape: bf16[9,128,128], index: 1, kind: input, shape index: {}]   ;;  %s3299_s2 = inlined_call_operand.vmem [shape: f32[1,128], index: 2, kind: input, shape index: {}]   ;;  %s3300_s3 = inlined_call_operand.vmem [shape: bf16[2,8,8,128], index: 3, kind: output, shape index: {0}]   ;;  %s3301_s4 = inlined_call_operand.vmem [shape: f32[16,128], index: 4, kind: output, shape index: {1}]   ;;  %s3302_s5 = inlined_call_operand.vmem [shape: f32[16,128], index: 5, kind: output, shape index: {2}]  }
   0x1 LB: > { %s2085_s19 = sadd.s32 4294967295, %s2745_s18   ;;  %p2089_p0 = scmp.ge.s32.totalorder %s2745_s18, 1  ;;  %s2745_s18 = sphi %s2777_s18, %s16_s18  }
   0x2   : > { %p192_p1 = scmp.lt.s32.totalorder %s2745_s18, 3 }
   0x4   : > { %p193_p2 = pnand %p2089_p0, %p192_p1 }
   0x5   : > { %v2643_v0 = vld [vmem:[%s3298_s1 + $0x40] sm:$0xff] (!%p193_p2)   ;;  %p228_p3 = scmp.lt.s32.totalorder (!%p193_p2), %s2085_s19, 1  ;;  %v2645_v2 = vld [vmem:[%s3298_s1 + $0x48] sm:$0xff] (!%p193_p2)   ;;  %v2647_v4 = vld [vmem:[%s3298_s1 + $0x50] sm:$0xff] (!%p193_p2)   ;;  %vm716_vm0 = vsmask.f32 (!%p193_p2), 3328 }
   0x6   : > { %196 = sbr.rel (%p193_p2) target bundleno = 401 (0x191), region = 32  ;;  %v2644_v1 = vld [vmem:[%s3298_s1 + $0x100] sm:$0xff] (!%p193_p2)   ;;  %2338 = vmatprep.subr.bf16.mxu1 (!%p193_p2), %v2643_v0  ;;  %v2646_v3 = vld [vmem:[%s3298_s1 + $0x108] sm:$0xff] (!%p193_p2)   ;;  %v2648_v5 = vld [vmem:[%s3298_s1 + $0x110] sm:$0xff] (!%p193_p2)   ;;  %vm717_vm1 = vsmask.f32 (!%p193_p2), 7440 }
   0x7   : > { %2434 = vmatprep.subr.bf16.mxu0 (!%p193_p2), %v2644_v1  ;;  %2339 = vmatpush3.bf16.msra.mxu1 (!%p193_p2), %v2643_v0  ;;  %v2649_v6 = vld [vmem:[%s3298_s1 + $0x58] sm:$0xff] (!%p193_p2)   ;;  %v2651_v8 = vld [vmem:[%s3298_s1 + $0x60] sm:$0xff] (!%p193_p2)   ;;  %v2653_v10 = vld [vmem:[%s3298_s1 + $0x68] sm:$0xff] (!%p193_p2)  }
   0x8   : > { %2435 = vmatpush3.bf16.msra.mxu0 (!%p193_p2), %v2644_v1  ;;  %2340 = vmatprep.subr.bf16.mxu1 (!%p193_p2), %v2645_v2  ;;  %v2650_v7 = vld [vmem:[%s3298_s1 + $0x118] sm:$0xff] (!%p193_p2)   ;;  %v2652_v9 = vld [vmem:[%s3298_s1 + $0x120] sm:$0xff] (!%p193_p2)   ;;  %v2654_v14 = vld [vmem:[%s3298_s1 + $0x128] sm:$0xff] (!%p193_p2)  }
   0x9   : > { %2436 = vmatprep.subr.bf16.mxu0 (!%p193_p2), %v2646_v3  ;;  %v2655_v18 = vld [vmem:[%s3298_s1 + $0x70] sm:$0xff] (!%p193_p2)   ;;  %v2657_v20 = vld [vmem:[%s3298_s1 + $0x78] sm:$0xff] (!%p193_p2)   ;;  %v2661_v23 = vld [vmem:[%s3298_s1] sm:$0xff] (!%p193_p2)  }
   0xa   : > { %v2656_v19 = vld [vmem:[%s3298_s1 + $0x130] sm:$0xff] (!%p193_p2)   ;;  %v2658_v21 = vld [vmem:[%s3298_s1 + $0x138] sm:$0xff] (!%p193_p2)   ;;  %v2663_v24 = vld [vmem:[%s3298_s1 + $0x140] sm:$0xff] (!%p193_p2)  }
   0xb   : > { %2341 = vmatpush3.bf16.msra.mxu1 (!%p193_p2), %v2645_v2  ;;  %v2666_v29 = vld [vmem:[%s3298_s1 + $0x8] sm:$0xff] (!%p193_p2)   ;;  %v2668_v36 = vld [vmem:[%s3298_s1 + $0x10] sm:$0xff] (!%p193_p2)   ;;  %v2670_v43 = vld [vmem:[%s3298_s1 + $0x18] sm:$0xff] (!%p193_p2)  }
   0xc   : > { %2437 = vmatpush3.bf16.msra.mxu0 (!%p193_p2), %v2646_v3  ;;  %2342 = vmatprep.subr.bf16.mxu1 (!%p193_p2), %v2647_v4  ;;  %v2667_v31 = vld [vmem:[%s3298_s1 + $0x148] sm:$0xff] (!%p193_p2)   ;;  %v2669_v38 = vld [vmem:[%s3298_s1 + $0x150] sm:$0xff] (!%p193_p2)   ;;  %v2671_v44 = vld [vmem:[%s3298_s1 + $0x158] sm:$0xff] (!%p193_p2)  }
   0xd   : > { %s3306_s19 = smov (!%p228_p3, %s2085_s19), 1  ;;  %2438 = vmatprep.subr.bf16.mxu0 %v2648_v5  ;;  %v2672_v48 = vld [vmem:[%s3298_s1 + $0x20] sm:$0xff]   ;;  %v2674_v63 = vld [vmem:[%s3298_s1 + $0x28] sm:$0xff]   ;;  %vm2942_vm2 = vmor %vm716_vm0, %vm717_vm1 }
   0xe   : > { %s2634_s11 = smul.u32 288, %s3306_s19  ;;  %v2673_v51 = vld [vmem:[%s3298_s1 + $0x160] sm:$0xff]   ;;  %v2675_v0 = vld [vmem:[%s3298_s1 + $0x168] sm:$0xff]   ;;  %s2093_s15 = sshll.u32 %s3306_s19, 3 }
   0xf   : > { %2343 = vmatpush3.bf16.msra.mxu1 %v2647_v4  ;;  %s241_s21 = scalar_lea.vmem %s3301_s4, %s2093_s15  ;;  %s245_s24 = scalar_lea.vmem %s3302_s5, %s2093_s15 }
  0x10   : > { %2439 = vmatpush3.bf16.msra.mxu0 %v2648_v5  ;;  %2344 = vmatprep.subr.bf16.mxu1 %v2649_v6  ;;  %s2821_s20 = scalar_lea.vmem %s3297_s0, %s2634_s11  ;;  %s2206_s11 = sshll.u32 %s3306_s19, 5 }
  0x11   : > { %2440 = vmatprep.subr.bf16.mxu0 %v2650_v7  ;;  %v265_v11 = vld [vmem:[%s2821_s20 + $0x48] sm:$0xf]  ;;  %v2828_v12 = vld [vmem:[%s2821_s20 + $0x50] sm:$0xf]  ;;  %v2831_v13 = vld [vmem:[%s2821_s20 + $0x58] sm:$0xf]  ;;  %s237_s14 = scalar_lea.vmem %s3300_s3, %s2206_s11 }
  0x12   : > { %v2095_v15 = vcombine.low %v265_v11, %v2828_v12  ;;  %v2179_v16 = vcombine.low %v2828_v12, %v2831_v13  ;;  %v2662_v17 = vld [vmem:[%s2821_s20 + $0xd8] ss:$8 sps:$4 sm:$0xff]   ;;  %v2665_v26 = vld [vmem:[%s2821_s20 + $0xe8] ss:$8 sps:$4 sm:$0xff]   ;;  %v275_v47 = vld [vmem:[%s2821_s20 + $0x94] sm:$0x1] }
  0x13   : > { %2345 = vmatpush3.bf16.msra.mxu1 %v2649_v6  ;;  %2450 = vmatprep.mubr.bf16.mxu0 %v2662_v17  ;;  %v2853_v22 = vld [vmem:[%s2821_s20 + $0x60] sm:$0xf]  ;;  %v2865_v27 = vld [vmem:[%s2821_s20 + $0x68] sm:$0xf]  ;;  %v2868_v28 = vld [vmem:[%s2821_s20 + $0x70] sm:$0xf] }
  0x14   : > { %2441 = vmatpush3.bf16.msra.mxu0 %v2650_v7  ;;  %2346 = vmatprep.subr.bf16.mxu1 %v2651_v8  ;;  %v2096_v25 = vcombine.low %v2831_v13, %v2853_v22  ;;  %v2180_v30 = vcombine.low %v2853_v22, %v2865_v27  ;;  %v2097_v32 = vcombine.low %v2865_v27, %v2868_v28  ;;  %v2679_v33 = vld [vmem:[%s2821_s20 + $0xf8] ss:$8 sps:$4 sm:$0xff]   ;;  %v2682_v41 = vld [vmem:[%s2821_s20 + $0x108] ss:$8 sps:$4 sm:$0xff]   ;;  %v277_v50 = vld [vmem:[%s2821_s20 + $0x9c] sm:$0x1] }
  0x15   : > { %2442 = vmatprep.subr.bf16.mxu0 %v2652_v9  ;;  %2354 = vmatprep.mubr.bf16.mxu1 %v2095_v15  ;;  %v2882_v34 = vld [vmem:[%s2821_s20 + $0x78] sm:$0xf]  ;;  %v2885_v35 = vld [vmem:[%s2821_s20 + $0x80] sm:$0xf]  ;;  %v2902_v42 = vld [vmem:[%s2821_s20 + $0x8] sm:$0xf] }
  0x16   : > { %v2181_v37 = vcombine.low %v2868_v28, %v2882_v34  ;;  %v2098_v39 = vcombine.low %v2882_v34, %v2885_v35  ;;  %v2898_v40 = vld [vmem:[%s2821_s20] sm:$0xf]  ;;  %v2913_v46 = vld [vmem:[%s2821_s20 + $0x90] sm:$0xf]  ;;  %v2920_v49 = vld [vmem:[%s2821_s20 + $0x98] sm:$0xf] }
  0x17   : > { %2347 = vmatpush3.bf16.msra.mxu1 %v2651_v8  ;;  %v2107_v45 = vcombine.low %v2898_v40, %v2902_v42  ;;  %v1259_v52 = vshrl.u32 %v2913_v46, 16  ;;  %v1262_v53 = vshll.u32 %v2913_v46, 16  ;;  %v1268_v54 = vshll.u32 %v275_v47, 16  ;;  %v2938_v3 = vld [vmem:[%s2821_s20 + $0xa0] sm:$0xf]  ;;  %v2720_v12 = vld [vmem:[%s3298_s1 + $0xf0] sm:$0xff]  }
  0x18   : > { %2443 = vmatpush3.bf16.msra.mxu0 %v2652_v9  ;;  %2348 = vmatprep.subr.bf16.mxu1 %v2653_v10  ;;  %v720_v55 = vshrl.u32 %v2898_v40, 16  ;;  %v1273_v56 = vshrl.u32 %v2920_v49, 16  ;;  %v1276_v57 = vshll.u32 %v2920_v49, 16  ;;  %v1282_v58 = vshll.u32 %v277_v50, 16  ;;  %v279_v8 = vld [vmem:[%s2821_s20 + $0xa4] sm:$0x1] }
  0x19   : > { %2444 = vmatprep.subr.bf16.mxu0 %v2654_v14  ;;  %v1261_v59 = vrot.slane %v1259_v52, 4  ;;  %v1264_v60 = vrot.slane %v1262_v53, 5  ;;  %v1270_v2 = vrot.slane %v1268_v54, 5  ;;  %v723_v4 = vshll.u32 %v2898_v40, 16  ;;  %v2948_v9 = vld [vmem:[%s2821_s20 + $0xa8] sm:$0xf] }
  0x1a   : > { %v1275_v61 = vrot.slane %v1273_v56, 4  ;;  %v1278_v62 = vrot.slane %v1276_v57, 5  ;;  %v1284_v7 = vrot.slane %v1282_v58, 5  ;;  %v1287_v15 = vshrl.u32 %v2938_v3, 16  ;;  %v2978_v52 = vld [vmem:[%s2821_s20 + $0x10] sm:$0xf] }
  0x1b   : > { %2349 = vmatpush3.bf16.msra.mxu1 %v2653_v10  ;;  %v1265_v1 = vor.u32 %v1264_v60, %v1261_v59  ;;  %v2950_v10 = vrot.slane %v720_v55, 4  ;;  %v1290_v17 = vshll.u32 %v2938_v3, 16  ;;  %v2981_v53 = vld [vmem:[%s2821_s20 + $0x18] sm:$0xf]  ;;  %v734_v54 = vshrl.u32 %v2902_v42, 16  ;;  %v2686_v56 = vld [vmem:[%s3298_s1 + $0x80] sm:$0xff]  }
  0x1c   : > { %2445 = vmatpush3.bf16.msra.mxu0 %v2654_v14  ;;  %2350 = vmatprep.subr.bf16.mxu1 %v2655_v18  ;;  %v1279_v6 = vor.u32 %v1278_v62, %v1275_v61  ;;  %v281_v14 = vld [vmem:[%s2821_s20 + $0xac] sm:$0x1]  ;;  %v737_v55 = vshll.u32 %v2902_v42, 16  ;;  %v2687_v57 = vld [vmem:[%s3298_s1 + $0x180] sm:$0xff]   ;;  %v748_v60 = vshrl.u32 %v2978_v52, 16  ;;  %v751_v61 = vshll.u32 %v2978_v52, 16 }
  0x1d   : > { %2446 = vmatprep.subr.bf16.mxu0 %v2656_v19  ;;  %v1266_v11 = vrot.slane %v1265_v1, 4  ;;  %v2998_v62 = vld [vmem:[%s2821_s20 + $0x20] sm:$0xf]  ;;  %v3006_v1 = vld [vmem:[%s2821_s20 + $0x28] sm:$0xf]  ;;  %v2722_v13 = vld [vmem:[%s3298_s1 + $0x1f0] sm:$0xff]  }
  0x1e   : > { %v2734_v27 = vld [vmem:[%s3298_s1 + $0x218] sm:$0xff]  }
  0x1f   : > { %2351 = vmatpush3.bf16.msra.mxu1 %v2655_v18  ;;  %v1280_v18 = vrot.slane %v1279_v6, 4 }
  0x20   : > { %2447 = vmatpush3.bf16.msra.mxu0 %v2656_v19  ;;  %2352 = vmatprep.subr.bf16.mxu1 %v2657_v20  ;;  %v1296_v19 = vshll.u32 %v279_v8, 16  ;;  %v3016_v8 = vld [vmem:[%s2821_s20 + $0xb8] sm:$0xf] }
  0x21   : > { %2448 = vmatprep.subr.bf16.mxu0 %v2658_v21 }
  0x22   : > { %v1298_v47 = vrot.slane %v1296_v19, 5  ;;  %v1329_v19 = vshrl.u32 %v3016_v8, 16 }
  0x23   : > { %2353 = vmatpush3.bf16.msra.mxu1 %v2657_v20  ;;  %v1301_v20 = vshrl.u32 %v2948_v9, 16 }
  0x24   : > { %2449 = vmatpush3.bf16.msra.mxu0 %v2658_v21  ;;  %2362 = vmatprep.subr.bf16.mxu1 %v2661_v23  ;;  %v1304_v21 = vshll.u32 %v2948_v9, 16 }
  0x25   : > { %2458 = vmatprep.subr.bf16.mxu0 %v2663_v24 }
  0x26   : > { %2355 = vmatmul.mubr.bf16.vlgmr.msra.gmra.mrb[0].mxu1 %v2096_v25  ;;  %v1289_v25 = vrot.slane %v1287_v15, 4 }
  0x27   : > { %2363 = vmatpush3.bf16.msra.mxu1 %v2661_v23  ;;  %2451 = vmatmul.mubr.bf16.vlgmr.msra.gmra.mrb[0].mxu0 %v2665_v26  ;;  %v2678_v23 = vld [vmem:[%s3298_s1 + $0x30] sm:$0xff]   ;;  %v1292_v26 = vrot.slane %v1290_v17, 5 }
  0x28   : > { %2459 = vmatpush3.bf16.msra.mxu0 %v2663_v24  ;;  %2364 = vmatprep.subr.bf16.mxu1 %v2666_v29  ;;  %v1271_v24 = vsel %vm2942_vm2, %v1266_v11, %v1270_v2  ;;  %v3009_v2 = vld [vmem:[%s2821_s20 + $0xb0] sm:$0xf]  ;;  %v285_v11 = vld [vmem:[%s2821_s20 + $0xbc] sm:$0x1] }
  0x29   : > { %2460 = vmatprep.subr.bf16.mxu0 %v2667_v31  ;;  %2358 = vmatprep.mubr.bf16.mxu1 %v2097_v32  ;;  %v2965_v32 = vrot.slane %v723_v4, 5  ;;  %v1293_v40 = vor.u32 %v1292_v26, %v1289_v25  ;;  %v283_v4 = vld [vmem:[%s2821_s20 + $0xb4] sm:$0x1]  ;;  %v1318_v15 = vshll.u32 %v3009_v2, 16  ;;  %v3028_v26 = vld [vmem:[%s2821_s20 + $0x30] sm:$0xf] }
  0x2a   : > { %2454 = vmatprep.mubr.bf16.mxu0 %v2679_v33  ;;  %v1285_v33 = vsel %vm2942_vm2, %v1280_v18, %v1284_v7  ;;  %v2690_v7 = vld [vmem:[%s3298_s1 + $0x188] sm:$0xff]   ;;  %v1324_v18 = vshll.u32 %v283_v4, 16 }
  0x2b   : > { %2365 = vmatpush3.bf16.msra.mxu1 %v2666_v29  ;;  %v1310_v29 = vshll.u32 %v281_v14, 16  ;;  %v1294_v50 = vrot.slane %v1293_v40, 4  ;;  %v1315_v14 = vshrl.u32 %v3009_v2, 16  ;;  %v726_v17 = vor.u32 %v2965_v32, %v2950_v10  ;;  %v2691_v32 = vld [vmem:[%s3298_s1 + $0x90] sm:$0xff]  }
  0x2c   : > { %2461 = vmatpush3.bf16.msra.mxu0 %v2667_v31  ;;  %2366 = vmatprep.subr.bf16.mxu1 %v2668_v36  ;;  %v2680_v31 = vld [vmem:[%s3298_s1 + $0x170] sm:$0xff]   ;;  %v1320_v25 = vrot.slane %v1318_v15, 5  ;;  %v2133_v10 = vcombine.low %v3009_v2, %v3016_v8  ;;  %v2736_v2 = vld [vmem:[%s3298_s1 + $0x228] sm:$0xff]  }
  0x2d   : > { %2462 = vmatprep.subr.bf16.mxu0 %v2669_v38  ;;  %v1299_v58 = vsel %vm2942_vm2, %v1294_v50, %v1298_v47  ;;  %v3047_v47 = vrot.slane %v726_v17, 4 }
  0x2e   : > { %2359 = vmatmul.mubr.bf16.gmra.mrb[4].mxu1 %v2098_v39  ;;  %v2155_v39 = vcombine.low %v1271_v24, %v1285_v33  ;;  %v1317_v24 = vrot.slane %v1315_v14, 4  ;;  %v1331_v33 = vrot.slane %v1329_v19, 4 }
  0x2f   : > { %2367 = vmatpush3.bf16.msra.mxu1 %v2668_v36  ;;  %2455 = vmatmul.mubr.bf16.gmra.mrb[4].mxu0 %v2682_v41  ;;  %v1303_v36 = vrot.slane %v1301_v20, 4  ;;  %v2132_v41 = vcombine.low %v2938_v3, %v2948_v9  ;;  %v1332_v20 = vshll.u32 %v3016_v8, 16 }
  0x30   : > { %2463 = vmatpush3.bf16.msra.mxu0 %v2669_v38  ;;  %2368 = vmatprep.subr.bf16.mxu1 %v2670_v43  ;;  %v1306_v38 = vrot.slane %v1304_v21, 5  ;;  %v1338_v21 = vshll.u32 %v285_v11, 16  ;;  %v1321_v40 = vor.u32 %v1320_v25, %v1317_v24 }
  0x31   : > { %2464 = vmatprep.subr.bf16.mxu0 %v2671_v44  ;;  %2378 = vmatprep.mubr.bf16.mxu1 %v2107_v45  ;;  %v2684_v45 = vld [vmem:[%s3298_s1 + $0x178] sm:$0xff]  }
  0x32   : > { %2474 = vmatprep.mubr.bf16.mxu0 %v2155_v39  ;;  %v2692_v39 = vld [vmem:[%s3298_s1 + $0x190] sm:$0xff]   ;;  %v1340_v50 = vrot.slane %v1338_v21, 5  ;;  %v2693_v21 = vld [vmem:[%s3298_s1 + $0x98] sm:$0xff]  }
  0x33   : > { %2369 = vmatpush3.bf16.msra.mxu1 %v2670_v43  ;;  %v2683_v43 = vld [vmem:[%s3298_s1 + $0x38] sm:$0xff]  }
  0x34   : > { %2465 = vmatpush3.bf16.msra.mxu0 %v2671_v44  ;;  %2370 = vmatprep.subr.bf16.mxu1 %v2672_v48  ;;  %v1307_v44 = vor.u32 %v1306_v38, %v1303_v36  ;;  %v1334_v36 = vrot.slane %v1332_v20, 5  ;;  %v3038_v38 = vld [vmem:[%s2821_s20 + $0x38] sm:$0xf] }
  0x35   : > { %2466 = vmatprep.subr.bf16.mxu0 %v2673_v51 }
  0x37   : > { %2371 = vmatpush3.bf16.msra.mxu1 %v2672_v48  ;;  %v1312_v48 = vrot.slane %v1310_v29, 5  ;;  %v762_v29 = vshrl.u32 %v2981_v53, 16 }
  0x38   : > { %2467 = vmatpush3.bf16.msra.mxu0 %v2673_v51  ;;  %2372 = vmatprep.subr.bf16.mxu1 %v2674_v63  ;;  %v1308_v51 = vrot.slane %v1307_v44, 4  ;;  %v3044_v44 = vld [vmem:[%s2821_s20 + $0xc0] sm:$0xf] }
  0x39   : > { %2468 = vmatprep.subr.bf16.mxu0 %v2675_v0  ;;  %v1343_v4 = vshrl.u32 %v3044_v44, 16 }
  0x3a   : > { %v1313_v59 = vsel %vm2942_vm2, %v1308_v51, %v1312_v48  ;;  %v1335_v48 = vor.u32 %v1334_v36, %v1331_v33  ;;  %v2110_v51 = vcombine.low %v3028_v26, %v3038_v38  ;;  %v2694_v33 = vld [vmem:[%s3298_s1 + $0x198] sm:$0xff]  }
  0x3b   : > { %2373 = vmatpush3.bf16.msra.mxu1 %v2674_v63  ;;  %v2108_v63 = vcombine.low %v2978_v52, %v2981_v53  ;;  %v2156_v6 = vcombine.low %v1299_v58, %v1313_v59  ;;  %v289_v58 = vld [vmem:[%s2821_s20 + $0xcc] sm:$0x1]  ;;  %v736_v59 = vrot.slane %v734_v54, 4  ;;  %v1345_v54 = vrot.slane %v1343_v4, 4  ;;  %v2695_v4 = vld [vmem:[%s3298_s1 + $0xa0] sm:$0xff]  }
  0x3c   : > { %2469 = vmatpush3.bf16.msra.mxu0 %v2675_v0  ;;  %2374 = vmatprep.subr.bf16.mxu1 %v2678_v23  ;;  %v2689_v0 = vld [vmem:[%s3298_s1 + $0x88] sm:$0xff]   ;;  %v1336_v14 = vrot.slane %v1335_v48, 4  ;;  %v1366_v17 = vshll.u32 %v289_v58, 16 }
  0x3d   : > { %2470 = vmatprep.subr.bf16.mxu0 %v2680_v31 }
  0x3f   : > { %2375 = vmatpush3.bf16.msra.mxu1 %v2678_v23  ;;  %v2109_v23 = vcombine.low %v2998_v62, %v3006_v1 }
  0x40   : > { %2471 = vmatpush3.bf16.msra.mxu0 %v2680_v31  ;;  %2376 = vmatprep.subr.bf16.mxu1 %v2683_v43  ;;  %v765_v31 = vshll.u32 %v2981_v53, 16 }
  0x41   : > { %2472 = vmatprep.subr.bf16.mxu0 %v2684_v45 }
  0x43   : > { %2377 = vmatpush3.bf16.msra.mxu1 %v2683_v43  ;;  %v1326_v43 = vrot.slane %v1324_v18, 5 }
  0x44   : > { %2473 = vmatpush3.bf16.msra.mxu0 %v2684_v45  ;;  %2386 = vmatprep.subr.bf16.mxu1 %v2686_v56  ;;  %v287_v45 = vld [vmem:[%s2821_s20 + $0xc4] sm:$0x1] }
  0x45   : > { %2482 = vmatprep.subr.bf16.mxu0 %v2687_v57  ;;  %v1352_v11 = vshll.u32 %v287_v45, 16  ;;  %v739_v45 = vrot.slane %v737_v55, 5  ;;  %v2167_v55 = vcombine.low %v2902_v42, %v2978_v52  ;;  %v2698_v52 = vld [vmem:[%s3298_s1 + $0x1a8] sm:$0xff]  }
  0x46   : > { %2379 = vmatmul.mubr.bf16.vlgmr.msra.gmra.mrb[0].mxu1 %v2108_v63  ;;  %v1322_v63 = vrot.slane %v1321_v40, 4 }
  0x47   : > { %2387 = vmatpush3.bf16.msra.mxu1 %v2686_v56  ;;  %2475 = vmatmul.mubr.bf16.vlgmr.msra.gmra.mrb[0].mxu0 %v2156_v6  ;;  %v3052_v56 = vld [vmem:[%s2821_s20 + $0xc8] sm:$0xf]  ;;  %v1346_v6 = vshll.u32 %v3044_v44, 16  ;;  %v1354_v20 = vrot.slane %v1352_v11, 5  ;;  %v740_v11 = vor.u32 %v739_v45, %v736_v59  ;;  %v2700_v45 = vld [vmem:[%s3298_s1 + $0xb0] sm:$0xff]  }
  0x48   : > { %2483 = vmatpush3.bf16.msra.mxu0 %v2687_v57  ;;  %2388 = vmatprep.subr.bf16.mxu1 %v2689_v0  ;;  %v1357_v57 = vshrl.u32 %v3052_v56, 16  ;;  %v1360_v15 = vshll.u32 %v3052_v56, 16  ;;  %v1327_v18 = vsel %vm2942_vm2, %v1322_v63, %v1326_v43  ;;  %v248_v43 = vld [vmem:[%s2821_s20 + $0x4] sm:$0x1]  ;;  %v2134_v48 = vcombine.low %v3044_v44, %v3052_v56  ;;  %v2737_v44 = vld [vmem:[%s3298_s1 + $0x230] sm:$0xff]  }
  0x49   : > { %2484 = vmatprep.subr.bf16.mxu0 %v2690_v7  ;;  %2382 = vmatprep.mubr.bf16.mxu1 %v2109_v23  ;;  %v1348_v19 = vrot.slane %v1346_v6, 5  ;;  %v1341_v23 = vsel %vm2942_vm2, %v1336_v14, %v1340_v50  ;;  %v729_v58 = vshll.u32 %v248_v43, 16  ;;  %v741_v42 = vrot.slane %v740_v11, 4 }
  0x4a   : > { %v1359_v24 = vrot.slane %v1357_v57, 4  ;;  %v1362_v25 = vrot.slane %v1360_v15, 5  ;;  %v2157_v36 = vcombine.low %v1327_v18, %v1341_v23  ;;  %v252_v15 = vld [vmem:[%s2821_s20 + $0x14] sm:$0x1]  ;;  %v776_v18 = vshrl.u32 %v2998_v62, 16 }
  0x4b   : > { %2389 = vmatpush3.bf16.msra.mxu1 %v2689_v0  ;;  %v1368_v0 = vrot.slane %v1366_v17, 5  ;;  %v1349_v40 = vor.u32 %v1348_v19, %v1345_v54  ;;  %v731_v57 = vrot.slane %v729_v58, 5  ;;  %v2696_v17 = vld [vmem:[%s3298_s1 + $0x1a0] sm:$0xff]   ;;  %v753_v54 = vrot.slane %v751_v61, 5  ;;  %v2697_v19 = vld [vmem:[%s3298_s1 + $0xa8] sm:$0xff]   ;;  %v2701_v58 = vld [vmem:[%s3298_s1 + $0x1b0] sm:$0xff]  }
  0x4c   : > { %2485 = vmatpush3.bf16.msra.mxu0 %v2690_v7  ;;  %2390 = vmatprep.subr.bf16.mxu1 %v2691_v32  ;;  %v250_v7 = vld [vmem:[%s2821_s20 + $0xc] sm:$0x1]  ;;  %v1363_v50 = vor.u32 %v1362_v25, %v1359_v24  ;;  %v764_v24 = vrot.slane %v762_v29, 4  ;;  %v779_v61 = vshll.u32 %v2998_v62, 16  ;;  %v790_v29 = vshrl.u32 %v3006_v1, 16 }
  0x4d   : > { %2486 = vmatprep.subr.bf16.mxu0 %v2692_v39  ;;  %v743_v63 = vshll.u32 %v250_v7, 16  ;;  %2478 = vmatprep.mubr.bf16.mxu0 %v2157_v36  ;;  %v1350_v6 = vrot.slane %v1349_v40, 4  ;;  %v732_v23 = vsel %vm2942_vm2, %v3047_v47, %v731_v57  ;;  %v757_v36 = vshll.u32 %v252_v15, 16 }
  0x4e   : > { %2383 = vmatmul.mubr.bf16.gmra.mrb[4].mxu1 %v2110_v51  ;;  %v1364_v14 = vrot.slane %v1363_v50, 4  ;;  %v793_v47 = vshll.u32 %v3006_v1, 16  ;;  %v804_v40 = vshrl.u32 %v3028_v26, 16  ;;  %v807_v43 = vshll.u32 %v3028_v26, 16 }
  0x4f   : > { %2391 = vmatpush3.bf16.msra.mxu1 %v2691_v32  ;;  %v745_v51 = vrot.slane %v743_v63, 5  ;;  %v750_v32 = vrot.slane %v748_v60, 4  ;;  %v1355_v59 = vsel %vm2942_vm2, %v1350_v6, %v1354_v20  ;;  %v767_v20 = vrot.slane %v765_v31, 5 }
  0x50   : > { %2487 = vmatpush3.bf16.msra.mxu0 %v2692_v39  ;;  %2392 = vmatprep.subr.bf16.mxu1 %v2693_v21  ;;  %v254_v39 = vld [vmem:[%s2821_s20 + $0x1c] sm:$0x1]  ;;  %v1369_v60 = vsel %vm2942_vm2, %v1364_v14, %v1368_v0  ;;  %v759_v63 = vrot.slane %v757_v36, 5  ;;  %v778_v6 = vrot.slane %v776_v18, 4  ;;  %v781_v14 = vrot.slane %v779_v61, 5 }
  0x51   : > { %2488 = vmatprep.subr.bf16.mxu0 %v2694_v33  ;;  %v2158_v25 = vcombine.low %v1355_v59, %v1369_v60  ;;  %v3110_v0 = vsel %vm2942_vm2, %v741_v42, %v745_v51  ;;  %v768_v7 = vor.u32 %v767_v20, %v764_v24  ;;  %v771_v50 = vshll.u32 %v254_v39, 16  ;;  %v2704_v18 = vld [vmem:[%s3298_s1 + $0x1b8] sm:$0xff]   ;;  %v256_v59 = vld [vmem:[%s2821_s20 + $0x24] sm:$0x1]  ;;  %v258_v42 = vld [vmem:[%s2821_s20 + $0x2c] sm:$0x1] }
  0x52   : > { %v2119_v31 = vcombine.low %v732_v23, %v3110_v0  ;;  %v792_v51 = vrot.slane %v790_v29, 4  ;;  %v785_v60 = vshll.u32 %v256_v59, 16  ;;  %v799_v23 = vshll.u32 %v258_v42, 16  ;;  %v260_v24 = vld [vmem:[%s2821_s20 + $0x34] sm:$0x1] }
  0x53   : > { %2393 = vmatpush3.bf16.msra.mxu1 %v2693_v21  ;;  %v754_v21 = vor.u32 %v753_v54, %v750_v32  ;;  %2479 = vmatmul.mubr.bf16.gmra.mrb[4].mxu0 %v2158_v25  ;;  %v769_v57 = vrot.slane %v768_v7, 4  ;;  %v773_v15 = vrot.slane %v771_v50, 5  ;;  %v782_v32 = vor.u32 %v781_v14, %v778_v6  ;;  %v262_v20 = vld [vmem:[%s2821_s20 + $0x3c] sm:$0x1]  ;;  %v2707_v6 = vld [vmem:[%s3298_s1 + $0x1c0] sm:$0xff]  }
  0x54   : > { %2489 = vmatpush3.bf16.msra.mxu0 %v2694_v33  ;;  %2394 = vmatprep.subr.bf16.mxu1 %v2695_v4  ;;  %v818_v33 = vshrl.u32 %v3038_v38, 16  ;;  %v806_v54 = vrot.slane %v804_v40, 4  ;;  %v809_v36 = vrot.slane %v807_v43, 5  ;;  %v787_v29 = vrot.slane %v785_v60, 5  ;;  %v2705_v40 = vld [vmem:[%s3298_s1 + $0xc0] sm:$0xff]  }
  0x55   : > { %2490 = vmatprep.subr.bf16.mxu0 %v2696_v17  ;;  %2402 = vmatprep.mubr.bf16.mxu1 %v2119_v31  ;;  %v755_v11 = vrot.slane %v754_v21, 4  ;;  %v783_v61 = vrot.slane %v782_v32, 4  ;;  %v813_v31 = vshll.u32 %v260_v24, 16  ;;  %v3183_v59 = vld [vmem:[%s2821_s20 + $0x40] sm:$0xf]  ;;  %v2131_v60 = vcombine.low %v2913_v46, %v2920_v49  ;;  %v2717_v46 = vld [vmem:[%s3298_s1 + $0xe8] sm:$0xff]  }
  0x56   : > { %2498 = vmatprep.mubr.bf16.mxu0 %v2167_v55  ;;  %v795_v55 = vrot.slane %v793_v47, 5  ;;  %v801_v47 = vrot.slane %v799_v23, 5  ;;  %v820_v21 = vrot.slane %v818_v33, 4  ;;  %v810_v7 = vor.u32 %v809_v36, %v806_v54  ;;  %v2714_v54 = vld [vmem:[%s3298_s1 + $0x1d8] sm:$0xff]   ;;  %v2716_v23 = vld [vmem:[%s3298_s1 + $0x1e0] sm:$0xff]   ;;  %v2718_v49 = vld [vmem:[%s3298_s1 + $0x1e8] sm:$0xff]  }
  0x57   : > { %2395 = vmatpush3.bf16.msra.mxu1 %v2695_v4  ;;  %v821_v4 = vshll.u32 %v3038_v38, 16  ;;  %v2170_v42 = vcombine.low %v3038_v38, %v3183_v59  ;;  %v2715_v38 = vld [vmem:[%s3298_s1 + $0xe0] sm:$0xff]   ;;  %v2724_v24 = vld [vmem:[%s3298_s1 + $0x1f8] sm:$0xff]   ;;  %v2733_v36 = vld [vmem:[%s3298_s1 + $0x210] sm:$0xff]   ;;  %v1770_v34 = vshrl.u32 %v3183_v59, 16 }
  0x58   : > { %2491 = vmatpush3.bf16.msra.mxu0 %v2696_v17  ;;  %2396 = vmatprep.subr.bf16.mxu1 %v2697_v19  ;;  %v2703_v17 = vld [vmem:[%s3298_s1 + $0xb8] sm:$0xff]   ;;  %v796_v39 = vor.u32 %v795_v55, %v792_v51  ;;  %v811_v14 = vrot.slane %v810_v7, 4  ;;  %v2710_v55 = vld [vmem:[%s3298_s1 + $0x1c8] sm:$0xff]  }
  0x59   : > { %2492 = vmatprep.subr.bf16.mxu0 %v2698_v52  ;;  %v823_v50 = vrot.slane %v821_v4, 5  ;;  %v1772_v3 = vrot.slane %v1770_v34, 4 }
  0x5a   : > { %v797_v25 = vrot.slane %v796_v39, 4  ;;  %v2713_v39 = vld [vmem:[%s3298_s1 + $0xd8] sm:$0xff]  }
  0x5b   : > { %2397 = vmatpush3.bf16.msra.mxu1 %v2697_v19  ;;  %v3135_v19 = vsel %vm2942_vm2, %v755_v11, %v759_v63  ;;  %v827_v63 = vshll.u32 %v262_v20, 16  ;;  %v2168_v11 = vcombine.low %v2981_v53, %v2998_v62  ;;  %v2169_v53 = vcombine.low %v3006_v1, %v3028_v26  ;;  %v2711_v62 = vld [vmem:[%s3298_s1 + $0xd0] sm:$0xff]   ;;  %v2727_v20 = vld [vmem:[%s3298_s1 + $0x200] sm:$0xff]  }
  0x5c   : > { %2493 = vmatpush3.bf16.msra.mxu0 %v2698_v52  ;;  %2398 = vmatprep.subr.bf16.mxu1 %v2700_v45  ;;  %v3141_v52 = vsel %vm2942_vm2, %v769_v57, %v773_v15  ;;  %v3157_v33 = vsel %vm2942_vm2, %v797_v25, %v801_v47  ;;  %v815_v57 = vrot.slane %v813_v31, 5  ;;  %v2709_v15 = vld [vmem:[%s3298_s1 + $0xc8] sm:$0xff]   ;;  %v2712_v1 = vld [vmem:[%s3298_s1 + $0x1d0] sm:$0xff]  }
  0x5d   : > { %2494 = vmatprep.subr.bf16.mxu0 %v2701_v58  ;;  %v2120_v43 = vcombine.low %v3135_v19, %v3141_v52  ;;  %v829_v51 = vrot.slane %v827_v63, 5  ;;  %v273_v25 = vld [vmem:[%s2821_s20 + $0x88] sm:$0xf] }
  0x5e   : > { %v2182_v22 = vcombine.low %v2885_v35, %v273_v25  ;;  %v1773_v35 = vshll.u32 %v3183_v59, 16 }
  0x5f   : > { %2399 = vmatpush3.bf16.msra.mxu1 %v2700_v45  ;;  %v3153_v45 = vsel %vm2942_vm2, %v783_v61, %v787_v29  ;;  %v2728_v61 = vld [vmem:[%s3298_s1 + $0x208] sm:$0xff]  }
  0x60   : > { %2495 = vmatpush3.bf16.msra.mxu0 %v2701_v58  ;;  %2400 = vmatprep.subr.bf16.mxu1 %v2703_v17  ;;  %v824_v58 = vor.u32 %v823_v50, %v820_v21  ;;  %v2121_v4 = vcombine.low %v3153_v45, %v3157_v33  ;;  %v1775_v9 = vrot.slane %v1773_v35, 5  ;;  %v2192_v47 = vcombine.low %v3141_v52, %v3153_v45 }
  0x61   : > { %2496 = vmatprep.subr.bf16.mxu0 %v2704_v18 }
  0x62   : > { %v825_v32 = vrot.slane %v824_v58, 4  ;;  %v1776_v8 = vor.u32 %v1775_v9, %v1772_v3 }
  0x63   : > { %2401 = vmatpush3.bf16.msra.mxu1 %v2703_v17  ;;  %v3176_v17 = vsel %vm2942_vm2, %v811_v14, %v815_v57 }
  0x64   : > { %2497 = vmatpush3.bf16.msra.mxu0 %v2704_v18  ;;  %2410 = vmatprep.subr.bf16.mxu1 %v2705_v40  ;;  %v3180_v18 = vsel %vm2942_vm2, %v825_v32, %v829_v51  ;;  %v2193_v28 = vcombine.low %v3157_v33, %v3176_v17  ;;  %v1777_v56 = vrot.slane %v1776_v8, 4 }
  0x65   : > { %2506 = vmatprep.subr.bf16.mxu0 %v2707_v6  ;;  %v2122_v26 = vcombine.low %v3176_v17, %v3180_v18 }
  0x66   : > { %2403 = vmatmul.mubr.bf16.vlgmr.msra.gmra.mrb[0].mxu1 %v2120_v43 }
  0x67   : > { %2411 = vmatpush3.bf16.msra.mxu1 %v2705_v40  ;;  %2499 = vmatmul.mubr.bf16.vlgmr.msra.gmra.mrb[0].mxu0 %v2168_v11 }
  0x68   : > { %2507 = vmatpush3.bf16.msra.mxu0 %v2707_v6  ;;  %2412 = vmatprep.subr.bf16.mxu1 %v2709_v15 }
  0x69   : > { %2508 = vmatprep.subr.bf16.mxu0 %v2710_v55  ;;  %2406 = vmatprep.mubr.bf16.mxu1 %v2121_v4 }
  0x6a   : > { %2502 = vmatprep.mubr.bf16.mxu0 %v2169_v53 }
  0x6b   : > { %2413 = vmatpush3.bf16.msra.mxu1 %v2709_v15 }
  0x6c   : > { %2509 = vmatpush3.bf16.msra.mxu0 %v2710_v55  ;;  %2414 = vmatprep.subr.bf16.mxu1 %v2711_v62 }
  0x6d   : > { %2510 = vmatprep.subr.bf16.mxu0 %v2712_v1 }
  0x6e   : > { %2407 = vmatmul.mubr.bf16.gmra.mrb[4].mxu1 %v2122_v26 }
  0x6f   : > { %2415 = vmatpush3.bf16.msra.mxu1 %v2711_v62  ;;  %2503 = vmatmul.mubr.bf16.gmra.mrb[4].mxu0 %v2170_v42 }
  0x70   : > { %2511 = vmatpush3.bf16.msra.mxu0 %v2712_v1  ;;  %2416 = vmatprep.subr.bf16.mxu1 %v2713_v39 }
  0x71   : > { %2512 = vmatprep.subr.bf16.mxu0 %v2714_v54  ;;  %2426 = vmatprep.mubr.bf16.mxu1 %v2131_v60 }
  0x72   : > { %2522 = vmatprep.mubr.bf16.mxu0 %v2179_v16  ;;  %v2723_v16 = vld [vmem:[%s3298_s1 + $0xf8] sm:$0xff]  }
  0x73   : > { %2417 = vmatpush3.bf16.msra.mxu1 %v2713_v39 }
  0x74   : > { %2513 = vmatpush3.bf16.msra.mxu0 %v2714_v54  ;;  %2418 = vmatprep.subr.bf16.mxu1 %v2715_v38 }
  0x75   : > { %2514 = vmatprep.subr.bf16.mxu0 %v2716_v23 }
  0x77   : > { %2419 = vmatpush3.bf16.msra.mxu1 %v2715_v38 }
  0x78   : > { %2515 = vmatpush3.bf16.msra.mxu0 %v2716_v23  ;;  %2420 = vmatprep.subr.bf16.mxu1 %v2717_v46 }
  0x79   : > { %2516 = vmatprep.subr.bf16.mxu0 %v2718_v49 }
  0x7b   : > { %2421 = vmatpush3.bf16.msra.mxu1 %v2717_v46 }
  0x7c   : > { %2517 = vmatpush3.bf16.msra.mxu0 %v2718_v49  ;;  %2422 = vmatprep.subr.bf16.mxu1 %v2720_v12 }
  0x7d   : > { %2518 = vmatprep.subr.bf16.mxu0 %v2722_v13 }
  0x7f   : > { %2423 = vmatpush3.bf16.msra.mxu1 %v2720_v12 }
  0x80   : > { %2519 = vmatpush3.bf16.msra.mxu0 %v2722_v13  ;;  %2424 = vmatprep.subr.bf16.mxu1 %v2723_v16 }
  0x81   : > { %2520 = vmatprep.subr.bf16.mxu0 %v2724_v24 }
  0x83   : > { %2425 = vmatpush3.bf16.msra.mxu1 %v2723_v16 }
  0x84   : > { %2521 = vmatpush3.bf16.msra.mxu0 %v2724_v24  ;;  %2554 = vmatprep.subr.bf16.mxu1 %v2727_v20 }
  0x85   : > { %2530 = vmatprep.subr.bf16.mxu0 %v2727_v20 }
  0x86   : > { %2427 = vmatmul.mubr.bf16.vlgmr.msra.gmra.mrb[0].mxu1 %v2132_v41  ;;  %v264_v41 = vld [vmem:[%s2821_s20 + $0x44] sm:$0x1] }
  0x87   : > { %2523 = vmatmul.mubr.bf16.vlgmr.msra.gmra.mrb[0].mxu0 %v2180_v30  ;;  %2562 = vmatpush3.bf16.msra.mxu1 %v2727_v20  ;;  %v2191_v30 = vcombine.low %v3110_v0, %v3135_v19  ;;  %v2738_v0 = vld [vmem:[%s3298_s1 + $0x238] sm:$0xff]  }
  0x88   : > { %2531 = vmatpush3.bf16.msra.mxu0 %v2727_v20  ;;  %2555 = vmatprep.subr.bf16.mxu1 %v2728_v61 }
  0x89   : > { %2532 = vmatprep.subr.bf16.mxu0 %v2728_v61  ;;  %2430 = vmatprep.mubr.bf16.mxu1 %v2133_v10  ;;  %v1779_v10 = vshll.u32 %v264_v41, 16 }
  0x8a   : > { %2526 = vmatprep.mubr.bf16.mxu0 %v2181_v37  ;;  %v2735_v37 = vld [vmem:[%s3298_s1 + $0x220] sm:$0xff]  }
  0x8b   : > { %2563 = vmatpush3.bf16.msra.mxu1 %v2728_v61 }
  0x8c   : > { %2533 = vmatpush3.bf16.msra.mxu0 %v2728_v61  ;;  %2556 = vmatprep.subr.bf16.mxu1 %v2733_v36 }
  0x8d   : > { %2534 = vmatprep.subr.bf16.mxu0 %v2733_v36 }
  0x8e   : > { %2431 = vmatmul.mubr.bf16.gmra.mrb[4].mxu1 %v2134_v48  ;;  %v1781_v48 = vrot.slane %v1779_v10, 5 }
  0x8f   : > { %2527 = vmatmul.mubr.bf16.gmra.mrb[4].mxu0 %v2182_v22  ;;  %2564 = vmatpush3.bf16.msra.mxu1 %v2733_v36 }
  0x90   : > { %2535 = vmatpush3.bf16.msra.mxu0 %v2733_v36  ;;  %2557 = vmatprep.subr.bf16.mxu1 %v2734_v27  ;;  %v1782_v19 = vsel %vm2942_vm2, %v1777_v56, %v1781_v48 }
  0x91   : > { %2536 = vmatprep.subr.bf16.mxu0 %v2734_v27  ;;  %2546 = vmatprep.mubr.bf16.mxu0 %v2191_v30  ;;  %v2194_v29 = vcombine.low %v3180_v18, %v1782_v19  ;;  %v2203_v18 = vld [vmem:[%s3299_s2] ss:$0 sm:$0xff] }
  0x92   : > { %2550 = vmatprep.mubr.bf16.mxu1 %v2193_v28 }
  0x93   : > { %2565 = vmatpush3.bf16.msra.mxu1 %v2734_v27 }
  0x94   : > { %2537 = vmatpush3.bf16.msra.mxu0 %v2734_v27  ;;  %2558 = vmatprep.subr.bf16.mxu1 %v2735_v37 }
  0x95   : > { %2538 = vmatprep.subr.bf16.mxu0 %v2735_v37 }
  0x97   : > { %2566 = vmatpush3.bf16.msra.mxu1 %v2735_v37 }
  0x98   : > { %2539 = vmatpush3.bf16.msra.mxu0 %v2735_v37  ;;  %2559 = vmatprep.subr.bf16.mxu1 %v2736_v2 }
  0x99   : > { %2540 = vmatprep.subr.bf16.mxu0 %v2736_v2 }
  0x9b   : > { %2567 = vmatpush3.bf16.msra.mxu1 %v2736_v2 }
  0x9c   : > { %2541 = vmatpush3.bf16.msra.mxu0 %v2736_v2  ;;  %2560 = vmatprep.subr.bf16.mxu1 %v2737_v44 }
  0x9d   : > { %2542 = vmatprep.subr.bf16.mxu0 %v2737_v44 }
  0x9f   : > { %2568 = vmatpush3.bf16.msra.mxu1 %v2737_v44 }
  0xa0   : > { %2543 = vmatpush3.bf16.msra.mxu0 %v2737_v44  ;;  %2561 = vmatprep.subr.bf16.mxu1 %v2738_v0 }
  0xa1   : > { %2544 = vmatprep.subr.bf16.mxu0 %v2738_v0 }
  0xa3   : > { %2569 = vmatpush3.bf16.msra.mxu1 %v2738_v0 }
  0xa4   : > { %2545 = vmatpush3.bf16.msra.mxu0 %v2738_v0 }
  0xa6   : > { %2551 = vmatmul.mubr.bf16.vlgmr.msra.gmra.mrb[8].mxu1 %v2194_v29 }
  0xa7   : > { %2547 = vmatmul.mubr.bf16.vlgmr.msra.gmra.mrb[0].mxu0 %v2192_v47 }
 0x159   : > { %v2428_v31 = vpop.f32.mrb[0].mxu1 }
 0x15a   : > { %v1074_v21 = vpop.f32.mrb[1].mxu1 }
 0x15b   : > { %v2429_v40 = vpop.f32.mrb[2].mxu1 }
 0x15c   : > { %v1077_v7 = vpop.f32.mrb[3].mxu1 }
 0x161   : > { %v2432_v50 = vpop.f32.mrb[4].mxu1 }
 0x162   : > { %v2528_v5 = vpop.f32.mrb[4].mxu0  ;;  %v1090_v63 = vpop.f32.mrb[5].mxu1 }
 0x163   : > { %v2574_v6 = vadd.f32 %v2528_v5, %v2432_v50  ;;  %v1746_v43 = vpop.f32.mrb[5].mxu0  ;;  %v2433_v33 = vpop.f32.mrb[6].mxu1 }
 0x164   : > { %v2576_v58 = vadd.f32 %v1746_v43, %v1090_v63  ;;  %v2529_v11 = vpop.f32.mrb[6].mxu0  ;;  %v1093_v14 = vpop.f32.mrb[7].mxu1 }
 0x165   : > { %v2578_v57 = vadd.f32 %v2529_v11, %v2433_v33  ;;  %v1749_v52 = vpop.f32.mrb[7].mxu0 }
 0x166   : > { %v2580_v45 = vadd.f32 %v1749_v52, %v1093_v14 }
 0x179   : > { %v2552_v51 = vpop.f32.mrb[8].mxu1 }
 0x17a   : > { %v2548_v15 = vpop.f32.mrb[0].mxu0  ;;  %v2575_v32 = vadd.f32 %v2574_v6, %v2552_v51  ;;  %v1890_v55 = vpop.f32.mrb[9].mxu1 }
 0x17b   : > { %v2570_v4 = vadd.f32 %v2548_v15, %v2428_v31  ;;  %v1874_v53 = vpop.f32.mrb[1].mxu0  ;;  %v2577_v62 = vadd.f32 %v2576_v58, %v1890_v55  ;;  %v2553_v17 = vpop.f32.mrb[10].mxu1 }
 0x17c   : > { %v2571_v59 = vadd.f32 %v1874_v53, %v1074_v21  ;;  %v2549_v1 = vpop.f32.mrb[2].mxu0  ;;  %v2579_v26 = vadd.f32 %v2578_v57, %v2553_v17  ;;  %v1893_v42 = vpop.f32.mrb[11].mxu1  ;;  %v1950_v60 = vadd.f32 %v2575_v32, %v2203_v18  ;;  %v1927_v0 = vmul.f32 %v2575_v32, %v2575_v32 }
 0x17d   : > { %v1877_v39 = vpop.f32.mrb[3].mxu0  ;;  %v2572_v54 = vadd.f32 %v2549_v1, %v2429_v40  ;;  %v2581_v46 = vadd.f32 %v2580_v45, %v1893_v42  ;;  %v1946_v49 = vadd.f32 %v2570_v4, %v2203_v18  ;;  %v1948_v36 = vadd.f32 %v2577_v62, %v2203_v18 }
 0x17e   : > { %v1951_v38 = vadd.f32 %v2579_v26, %v2203_v18  ;;  %v2573_v23 = vadd.f32 %v1877_v39, %v1077_v7  ;;  %v1921_v12 = vmul.f32 %v2571_v59, %v2571_v59  ;;  %v1944_v13 = vadd.f32 %v2571_v59, %v2203_v18 }
 0x17f   : > { %v1947_v16 = vadd.f32 %v2572_v54, %v2203_v18  ;;  %v1949_v27 = vadd.f32 %v2581_v46, %v2203_v18  ;;  %v1923_v30 = vmul.f32 %v2570_v4, %v2570_v4  ;;  %v1924_v3 = vmul.f32 %v2572_v54, %v2572_v54 }
 0x180   : > { %v2225_v24 = vpack.c.bf16 %v1951_v38, %v1950_v60  ;;  %v1913_v20 = vadd.f32 %v2573_v23, %v2571_v59  ;;  %v1922_v61 = vmul.f32 %v2573_v23, %v2573_v23  ;;  %v1945_v25 = vadd.f32 %v2573_v23, %v2203_v18 }
 0x181   : > { %v2215_v22 = vpack.c.bf16 %v1947_v16, %v1946_v49  ;;  %v2220_v37 = vpack.c.bf16 %v1949_v27, %v1948_v36  ;;  %v1925_v2 = vmul.f32 %v2577_v62, %v2577_v62  ;;  %v1926_v56 = vmul.f32 %v2581_v46, %v2581_v46 }
 0x182   : > { %2229 = vst [vmem:[%s237_s14 + $0x18] sm:$0xff] %v2225_v24   ;;  %v1914_v28 = vadd.f32 %v2570_v4, %v1913_v20  ;;  %v1929_v34 = vadd.f32 %v1922_v61, %v1921_v12  ;;  %v2210_v35 = vpack.c.bf16 %v1945_v25, %v1944_v13  ;;  %v1928_v47 = vmul.f32 %v2579_v26, %v2579_v26 }
 0x183   : > { %2227 = vst [vmem:[%s237_s14 + $0x8] sm:$0xff] %v2215_v22   ;;  %2228 = vst [vmem:[%s237_s14 + $0x10] sm:$0xff] %v2220_v37  }
 0x184   : > { %v1930_v9 = vadd.f32 %v1929_v34, %v1923_v30  ;;  %2211 = vst [vmem:[%s237_s14] sm:$0xff] %v2210_v35   ;;  %v1915_v41 = vadd.f32 %v2572_v54, %v1914_v28 }
 0x186   : > { %v1916_v8 = vadd.f32 %v2577_v62, %v1915_v41  ;;  %v1931_v10 = vadd.f32 %v1930_v9, %v1924_v3 }
 0x188   : > { %v1917_v44 = vadd.f32 %v2581_v46, %v1916_v8  ;;  %v1932_v48 = vadd.f32 %v1931_v10, %v1925_v2 }
 0x18a   : > { %v1918_v19 = vadd.f32 %v2575_v32, %v1917_v44  ;;  %v1933_v29 = vadd.f32 %v1932_v48, %v1926_v56 }
 0x18c   : > { %v1919_v31 = vadd.f32 %v2579_v26, %v1918_v19  ;;  %v1934_v21 = vadd.f32 %v1933_v29, %v1927_v0 }
 0x18e   : > { %1920 = vst [vmem:[%s241_s21] sm:$0xff] %v1919_v31  ;;  %v1935_v40 = vadd.f32 %v1934_v21, %v1928_v47 }
 0x190   : > { %1936 = vst [vmem:[%s245_s24] sm:$0xff] %v1935_v40 }
 0x191 PF: > { %s16_s18 = sadd.s32 1, %s2745_s18  }
 0x192   : > { %p13_p4 = scmp.ge.s32.totalorder %s16_s18, 4  }
 0x194   :  { %15 = sbr.rel (!%p13_p4) target bundleno = 1 (0x1), region = 86 }

// kernel: discriminator_forward.15
= control target key start
LH: loop header
LB: loop body
LE: loop exit
PB: predicated region body
PF: predicated region fallthrough
CT: control target
= control target key end

     0   :  { %v64_v0 = vlaneseq  ;;  %s608_s0 = inlined_call_operand.vmem [shape: bf16[128,256], index: 0, kind: input, shape index: {}]   ;;  %s609_s1 = inlined_call_operand.vmem [shape: f32[1,256], index: 1, kind: input, shape index: {}]   ;;  %s610_s2 = inlined_call_operand.vmem [shape: f32[1,256], index: 2, kind: input, shape index: {}]   ;;  %s611_s3 = inlined_call_operand.vmem [shape: bf16[128,256], index: 3, kind: output, shape index: {}]  }
   0x1   :  { %v14_v1 = vld [vmem:[%s608_s0] sm:$0xff]  ;;  %v15_v6 = vld [vmem:[%s608_s0 + $0x8] sm:$0xff]  ;;  %v16_v7 = vld [vmem:[%s608_s0 + $0x10] sm:$0xff] }
   0x2   :  { %v62_v2 = vld [vmem:[%s609_s1] sm:$0x3]  ;;  %v30_v3 = vunpack.c.l.bf16 %v14_v1  ;;  %v31_v4 = vunpack.c.h.bf16 %v14_v1  ;;  %v65_v5 = vshrl.u32 %v64_v0, 7  ;;  %v17_v8 = vld [vmem:[%s608_s0 + $0x18] sm:$0xff]  ;;  %v32_v10 = vunpack.c.l.bf16 %v15_v6  ;;  %v440_v15 = vld [vmem:[%s608_s0 + $0x28] sm:$0xff] }
   0x3   :  { %v106_v9 = vld [vmem:[%s610_s2] sm:$0x3]  ;;  %v33_v11 = vunpack.c.h.bf16 %v15_v6  ;;  %v34_v12 = vunpack.c.l.bf16 %v16_v7  ;;  %v35_v13 = vunpack.c.h.bf16 %v16_v7  ;;  %v36_v18 = vunpack.c.l.bf16 %v17_v8  ;;  %v445_v20 = vld [vmem:[%s608_s0 + $0x30] sm:$0xff]  ;;  %v450_v21 = vld [vmem:[%s608_s0 + $0x38] sm:$0xff] }
   0x4   :  { %v435_v14 = vld [vmem:[%s608_s0 + $0x20] sm:$0xff]  ;;  %v66_v16 = vsub.s32 0, %v65_v5  ;;  %v70_v17 = vsub.s32 1, %v65_v5  ;;  %v37_v19 = vunpack.c.h.bf16 %v17_v8  ;;  %v40_v24 = vunpack.c.l.bf16 %v440_v15 }
   0x5   :  { %v38_v22 = vunpack.c.l.bf16 %v435_v14  ;;  %v39_v23 = vunpack.c.h.bf16 %v435_v14  ;;  %v41_v25 = vunpack.c.h.bf16 %v440_v15  ;;  %v42_v30 = vunpack.c.l.bf16 %v445_v20 }
   0x6   :  { %v456_v26 = vrot.slane %v62_v2, %v66_v16  ;;  %v458_v27 = vrot.slane %v62_v2, %v70_v17  ;;  %v460_v28 = vrot.slane %v106_v9, %v66_v16  ;;  %v462_v29 = vrot.slane %v106_v9, %v70_v17 }
   0x7   :  { %v43_v31 = vunpack.c.h.bf16 %v445_v20  ;;  %v44_v32 = vunpack.c.l.bf16 %v450_v21  ;;  %v45_v33 = vunpack.c.h.bf16 %v450_v21 }
   0x8   :  { %v74_v34 = vmul.f32 %v456_v26, %v30_v3  ;;  %v75_v35 = vmul.f32 %v458_v27, %v31_v4  ;;  %v76_v36 = vmul.f32 %v456_v26, %v32_v10  ;;  %v77_v37 = vmul.f32 %v458_v27, %v33_v11 }
   0x9   :  { %v78_v38 = vmul.f32 %v456_v26, %v34_v12  ;;  %v79_v39 = vmul.f32 %v458_v27, %v35_v13  ;;  %v80_v40 = vmul.f32 %v456_v26, %v36_v18  ;;  %v81_v41 = vmul.f32 %v458_v27, %v37_v19 }
   0xa   :  { %v118_v42 = vadd.f32 %v460_v28, %v74_v34  ;;  %v119_v43 = vadd.f32 %v462_v29, %v75_v35  ;;  %v120_v44 = vadd.f32 %v460_v28, %v76_v36  ;;  %v121_v45 = vadd.f32 %v462_v29, %v77_v37  ;;  %v23_v37 = vld [vmem:[%s608_s0 + $0x48] sm:$0xff] }
   0xb   :  { %v122_v46 = vadd.f32 %v460_v28, %v78_v38  ;;  %v123_v47 = vadd.f32 %v462_v29, %v79_v39  ;;  %v124_v48 = vadd.f32 %v460_v28, %v80_v40  ;;  %v125_v49 = vadd.f32 %v462_v29, %v81_v41 }
   0xc   :  { %vm150_vm0 = vcmp.ge.f32.partialorder %v118_v42, 0.0  ;;  %vm151_vm1 = vcmp.ge.f32.partialorder %v119_v43, 0.0  ;;  %v182_v50 = vmul.f32 0.2, %v118_v42  ;;  %v183_v51 = vmul.f32 0.2, %v119_v43 }
   0xd   :  { %vm152_vm2 = vcmp.ge.f32.partialorder %v120_v44, 0.0  ;;  %vm153_vm3 = vcmp.ge.f32.partialorder %v121_v45, 0.0  ;;  %v184_v52 = vmul.f32 0.2, %v120_v44  ;;  %v185_v53 = vmul.f32 0.2, %v121_v45 }
   0xe   :  { %v214_v54 = vsel %vm150_vm0, %v118_v42, %v182_v50  ;;  %v215_v55 = vsel %vm151_vm1, %v119_v43, %v183_v51  ;;  %vm154_vm4 = vcmp.ge.f32.partialorder %v122_v46, 0.0  ;;  %vm155_vm5 = vcmp.ge.f32.partialorder %v123_v47, 0.0 }
   0xf   :  { %v378_v56 = vpack.c.bf16 %v215_v55, %v214_v54  ;;  %v216_v57 = vsel %vm152_vm2, %v120_v44, %v184_v52  ;;  %v217_v58 = vsel %vm153_vm3, %v121_v45, %v185_v53  ;;  %v186_v59 = vmul.f32 0.2, %v122_v46 }
  0x10   :  { %v379_v60 = vpack.c.bf16 %v217_v58, %v216_v57  ;;  %v187_v61 = vmul.f32 0.2, %v123_v47  ;;  %vm156_vm6 = vcmp.ge.f32.partialorder %v124_v48, 0.0  ;;  %vm157_vm7 = vcmp.ge.f32.partialorder %v125_v49, 0.0 }
  0x11   :  { %342 = vst [vmem:[%s611_s3] sm:$0xff] %v378_v56  ;;  %v218_v62 = vsel %vm154_vm4, %v122_v46, %v186_v59  ;;  %v188_v63 = vmul.f32 0.2, %v124_v48  ;;  %v189_v0 = vmul.f32 0.2, %v125_v49  ;;  %v82_v1 = vmul.f32 %v456_v26, %v38_v22  ;;  %v24_v46 = vld [vmem:[%s608_s0 + $0x50] sm:$0xff] }
  0x12   :  { %343 = vst [vmem:[%s611_s3 + $0x8] sm:$0xff] %v379_v60  ;;  %v219_v2 = vsel %vm155_vm5, %v123_v47, %v187_v61  ;;  %v83_v3 = vmul.f32 %v458_v27, %v39_v23  ;;  %v84_v4 = vmul.f32 %v456_v26, %v40_v24  ;;  %v85_v5 = vmul.f32 %v458_v27, %v41_v25 }
  0x13   :  { %v380_v6 = vpack.c.bf16 %v219_v2, %v218_v62  ;;  %v220_v7 = vsel %vm156_vm6, %v124_v48, %v188_v63  ;;  %v221_v8 = vsel %vm157_vm7, %v125_v49, %v189_v0  ;;  %v126_v9 = vadd.f32 %v460_v28, %v82_v1  ;;  %v25_v1 = vld [vmem:[%s608_s0 + $0x58] sm:$0xff] }
  0x14   :  { %v381_v10 = vpack.c.bf16 %v221_v8, %v220_v7  ;;  %v127_v11 = vadd.f32 %v462_v29, %v83_v3  ;;  %v128_v12 = vadd.f32 %v460_v28, %v84_v4  ;;  %v129_v13 = vadd.f32 %v462_v29, %v85_v5 }
  0x15   :  { %344 = vst [vmem:[%s611_s3 + $0x10] sm:$0xff] %v380_v6  ;;  %vm158_vm8 = vcmp.ge.f32.partialorder %v126_v9, 0.0  ;;  %v190_v14 = vmul.f32 0.2, %v126_v9  ;;  %v86_v15 = vmul.f32 %v456_v26, %v42_v30  ;;  %v87_v16 = vmul.f32 %v458_v27, %v43_v31  ;;  %v22_v31 = vld [vmem:[%s608_s0 + $0x40] sm:$0xff] }
  0x16   :  { %345 = vst [vmem:[%s611_s3 + $0x18] sm:$0xff] %v381_v10  ;;  %vm159_vm9 = vcmp.ge.f32.partialorder %v127_v11, 0.0  ;;  %v191_v17 = vmul.f32 0.2, %v127_v11  ;;  %vm160_vm10 = vcmp.ge.f32.partialorder %v128_v12, 0.0  ;;  %vm161_vm11 = vcmp.ge.f32.partialorder %v129_v13, 0.0 }
  0x17   :  { %v222_v18 = vsel %vm158_vm8, %v126_v9, %v190_v14  ;;  %v192_v19 = vmul.f32 0.2, %v128_v12  ;;  %v193_v20 = vmul.f32 0.2, %v129_v13  ;;  %v130_v22 = vadd.f32 %v460_v28, %v86_v15  ;;  %v26_v10 = vld [vmem:[%s608_s0 + $0x60] sm:$0xff]  ;;  %v27_v15 = vld [vmem:[%s608_s0 + $0x68] sm:$0xff] }
  0x18   :  { %v223_v23 = vsel %vm159_vm9, %v127_v11, %v191_v17  ;;  %v131_v24 = vadd.f32 %v462_v29, %v87_v16  ;;  %v88_v25 = vmul.f32 %v456_v26, %v44_v32  ;;  %v89_v30 = vmul.f32 %v458_v27, %v45_v33 }
  0x19   :  { %v382_v34 = vpack.c.bf16 %v223_v23, %v222_v18  ;;  %v224_v35 = vsel %vm160_vm10, %v128_v12, %v192_v19  ;;  %v225_v36 = vsel %vm161_vm11, %v129_v13, %v193_v20  ;;  %vm162_vm12 = vcmp.ge.f32.partialorder %v130_v22, 0.0 }
  0x1a   :  { %v383_v38 = vpack.c.bf16 %v225_v36, %v224_v35  ;;  %vm163_vm13 = vcmp.ge.f32.partialorder %v131_v24, 0.0  ;;  %v194_v39 = vmul.f32 0.2, %v130_v22  ;;  %v195_v32 = vmul.f32 0.2, %v131_v24 }
  0x1b   :  { %346 = vst [vmem:[%s611_s3 + $0x20] sm:$0xff] %v382_v34  ;;  %v132_v21 = vadd.f32 %v460_v28, %v88_v25  ;;  %v133_v33 = vadd.f32 %v462_v29, %v89_v30  ;;  %v46_v40 = vunpack.c.l.bf16 %v22_v31  ;;  %v47_v41 = vunpack.c.h.bf16 %v22_v31 }
  0x1c   :  { %347 = vst [vmem:[%s611_s3 + $0x28] sm:$0xff] %v383_v38  ;;  %v226_v42 = vsel %vm162_vm12, %v130_v22, %v194_v39  ;;  %v227_v43 = vsel %vm163_vm13, %v131_v24, %v195_v32  ;;  %v48_v44 = vunpack.c.l.bf16 %v23_v37  ;;  %v49_v45 = vunpack.c.h.bf16 %v23_v37  ;;  %v28_v37 = vld [vmem:[%s608_s0 + $0x70] sm:$0xff] }
  0x1d   :  { %v384_v47 = vpack.c.bf16 %v227_v43, %v226_v42  ;;  %vm164_vm14 = vcmp.ge.f32.partialorder %v132_v21, 0.0  ;;  %vm165_vm15 = vcmp.ge.f32.partialorder %v133_v33, 0.0  ;;  %v196_v48 = vmul.f32 0.2, %v132_v21 }
  0x1e   :  { %v197_v49 = vmul.f32 0.2, %v133_v33  ;;  %v90_v50 = vmul.f32 %v456_v26, %v46_v40  ;;  %v91_v51 = vmul.f32 %v458_v27, %v47_v41  ;;  %v92_v52 = vmul.f32 %v456_v26, %v48_v44 }
  0x1f   :  { %348 = vst [vmem:[%s611_s3 + $0x30] sm:$0xff] %v384_v47  ;;  %v228_v53 = vsel %vm164_vm14, %v132_v21, %v196_v48  ;;  %v93_v54 = vmul.f32 %v458_v27, %v49_v45  ;;  %v50_v55 = vunpack.c.l.bf16 %v24_v46  ;;  %v51_v56 = vunpack.c.h.bf16 %v24_v46 }
  0x20   :  { %v229_v57 = vsel %vm165_vm15, %v133_v33, %v197_v49  ;;  %v134_v58 = vadd.f32 %v460_v28, %v90_v50  ;;  %v135_v59 = vadd.f32 %v462_v29, %v91_v51  ;;  %v136_v60 = vadd.f32 %v460_v28, %v92_v52 }
  0x21   :  { %v385_v61 = vpack.c.bf16 %v229_v57, %v228_v53  ;;  %v137_v62 = vadd.f32 %v462_v29, %v93_v54  ;;  %v94_v63 = vmul.f32 %v456_v26, %v50_v55  ;;  %v95_v0 = vmul.f32 %v458_v27, %v51_v56  ;;  %v29_v53 = vld [vmem:[%s608_s0 + $0x78] sm:$0xff] }
  0x22   :  { %vm166_vm0 = vcmp.ge.f32.partialorder %v134_v58, 0.0  ;;  %vm167_vm1 = vcmp.ge.f32.partialorder %v135_v59, 0.0  ;;  %v198_v2 = vmul.f32 0.2, %v134_v58  ;;  %v199_v3 = vmul.f32 0.2, %v135_v59 }
  0x23   :  { %349 = vst [vmem:[%s611_s3 + $0x38] sm:$0xff] %v385_v61  ;;  %vm168_vm2 = vcmp.ge.f32.partialorder %v136_v60, 0.0  ;;  %vm169_vm3 = vcmp.ge.f32.partialorder %v137_v62, 0.0  ;;  %v200_v4 = vmul.f32 0.2, %v136_v60  ;;  %v138_v8 = vadd.f32 %v460_v28, %v94_v63 }
  0x24   :  { %v201_v5 = vmul.f32 0.2, %v137_v62  ;;  %v230_v6 = vsel %vm166_vm0, %v134_v58, %v198_v2  ;;  %v231_v7 = vsel %vm167_vm1, %v135_v59, %v199_v3  ;;  %v139_v9 = vadd.f32 %v462_v29, %v95_v0 }
  0x25   :  { %v386_v11 = vpack.c.bf16 %v231_v7, %v230_v6  ;;  %v232_v12 = vsel %vm168_vm2, %v136_v60, %v200_v4  ;;  %v52_v14 = vunpack.c.l.bf16 %v25_v1  ;;  %vm170_vm4 = vcmp.ge.f32.partialorder %v138_v8, 0.0 }
  0x26   :  { %v233_v13 = vsel %vm169_vm3, %v137_v62, %v201_v5  ;;  %vm171_vm5 = vcmp.ge.f32.partialorder %v139_v9, 0.0  ;;  %v202_v17 = vmul.f32 0.2, %v138_v8  ;;  %v203_v18 = vmul.f32 0.2, %v139_v9 }
  0x27   :  { %v387_v16 = vpack.c.bf16 %v233_v13, %v232_v12  ;;  %350 = vst [vmem:[%s611_s3 + $0x40] sm:$0xff] %v386_v11  ;;  %v53_v19 = vunpack.c.h.bf16 %v25_v1  ;;  %v96_v20 = vmul.f32 %v456_v26, %v52_v14  ;;  %v54_v22 = vunpack.c.l.bf16 %v26_v10 }
  0x28   :  { %v234_v23 = vsel %vm170_vm4, %v138_v8, %v202_v17  ;;  %v55_v24 = vunpack.c.h.bf16 %v26_v10  ;;  %v56_v25 = vunpack.c.l.bf16 %v27_v15  ;;  %v57_v30 = vunpack.c.h.bf16 %v27_v15 }
  0x29   :  { %351 = vst [vmem:[%s611_s3 + $0x48] sm:$0xff] %v387_v16  ;;  %v235_v31 = vsel %vm171_vm5, %v139_v9, %v203_v18  ;;  %v97_v34 = vmul.f32 %v458_v27, %v53_v19  ;;  %v140_v35 = vadd.f32 %v460_v28, %v96_v20  ;;  %v98_v36 = vmul.f32 %v456_v26, %v54_v22 }
  0x2a   :  { %v388_v38 = vpack.c.bf16 %v235_v31, %v234_v23  ;;  %v99_v39 = vmul.f32 %v458_v27, %v55_v24  ;;  %v100_v32 = vmul.f32 %v456_v26, %v56_v25  ;;  %v101_v21 = vmul.f32 %v458_v27, %v57_v30 }
  0x2b   :  { %v141_v33 = vadd.f32 %v462_v29, %v97_v34  ;;  %vm172_vm6 = vcmp.ge.f32.partialorder %v140_v35, 0.0  ;;  %v204_v40 = vmul.f32 0.2, %v140_v35  ;;  %v142_v41 = vadd.f32 %v460_v28, %v98_v36 }
  0x2c   :  { %352 = vst [vmem:[%s611_s3 + $0x50] sm:$0xff] %v388_v38  ;;  %v143_v42 = vadd.f32 %v462_v29, %v99_v39  ;;  %v144_v43 = vadd.f32 %v460_v28, %v100_v32  ;;  %v145_v44 = vadd.f32 %v462_v29, %v101_v21  ;;  %v58_v45 = vunpack.c.l.bf16 %v28_v37 }
  0x2d   :  { %vm173_vm7 = vcmp.ge.f32.partialorder %v141_v33, 0.0  ;;  %v205_v46 = vmul.f32 0.2, %v141_v33  ;;  %v236_v47 = vsel %vm172_vm6, %v140_v35, %v204_v40  ;;  %vm174_vm8 = vcmp.ge.f32.partialorder %v142_v41, 0.0 }
  0x2e   :  { %vm175_vm9 = vcmp.ge.f32.partialorder %v143_v42, 0.0  ;;  %v206_v48 = vmul.f32 0.2, %v142_v41  ;;  %v207_v49 = vmul.f32 0.2, %v143_v42  ;;  %vm176_vm10 = vcmp.ge.f32.partialorder %v144_v43, 0.0 }
  0x2f   :  { %v237_v50 = vsel %vm173_vm7, %v141_v33, %v205_v46  ;;  %vm177_vm11 = vcmp.ge.f32.partialorder %v145_v44, 0.0  ;;  %v208_v51 = vmul.f32 0.2, %v144_v43  ;;  %v209_v52 = vmul.f32 0.2, %v145_v44 }
  0x30   :  { %v389_v54 = vpack.c.bf16 %v237_v50, %v236_v47  ;;  %v238_v55 = vsel %vm174_vm8, %v142_v41, %v206_v48  ;;  %v239_v56 = vsel %vm175_vm9, %v143_v42, %v207_v49  ;;  %v59_v57 = vunpack.c.h.bf16 %v28_v37 }
  0x31   :  { %v390_v58 = vpack.c.bf16 %v239_v56, %v238_v55  ;;  %v240_v59 = vsel %vm176_vm10, %v144_v43, %v208_v51  ;;  %v241_v60 = vsel %vm177_vm11, %v145_v44, %v209_v52  ;;  %v102_v61 = vmul.f32 %v456_v26, %v58_v45 }
  0x32   :  { %353 = vst [vmem:[%s611_s3 + $0x58] sm:$0xff] %v389_v54  ;;  %v391_v62 = vpack.c.bf16 %v241_v60, %v240_v59  ;;  %v103_v63 = vmul.f32 %v458_v27, %v59_v57  ;;  %v60_v0 = vunpack.c.l.bf16 %v29_v53  ;;  %v61_v1 = vunpack.c.h.bf16 %v29_v53 }
  0x33   :  { %354 = vst [vmem:[%s611_s3 + $0x60] sm:$0xff] %v390_v58  ;;  %v146_v2 = vadd.f32 %v460_v28, %v102_v61 }
  0x34   :  { %355 = vst [vmem:[%s611_s3 + $0x68] sm:$0xff] %v391_v62  ;;  %v147_v3 = vadd.f32 %v462_v29, %v103_v63  ;;  %v104_v4 = vmul.f32 %v456_v26, %v60_v0  ;;  %v105_v5 = vmul.f32 %v458_v27, %v61_v1 }
  0x35   :  { %vm178_vm12 = vcmp.ge.f32.partialorder %v146_v2, 0.0  ;;  %v210_v6 = vmul.f32 0.2, %v146_v2 }
  0x36   :  { %vm179_vm13 = vcmp.ge.f32.partialorder %v147_v3, 0.0  ;;  %v211_v7 = vmul.f32 0.2, %v147_v3  ;;  %v148_v8 = vadd.f32 %v460_v28, %v104_v4  ;;  %v149_v9 = vadd.f32 %v462_v29, %v105_v5 }
  0x37   :  { %v242_v10 = vsel %vm178_vm12, %v146_v2, %v210_v6 }
  0x38   :  { %v243_v11 = vsel %vm179_vm13, %v147_v3, %v211_v7  ;;  %vm180_vm14 = vcmp.ge.f32.partialorder %v148_v8, 0.0  ;;  %vm181_vm15 = vcmp.ge.f32.partialorder %v149_v9, 0.0  ;;  %v212_v12 = vmul.f32 0.2, %v148_v8 }
  0x39   :  { %v392_v13 = vpack.c.bf16 %v243_v11, %v242_v10  ;;  %v213_v14 = vmul.f32 0.2, %v149_v9 }
  0x3a   :  { %v244_v15 = vsel %vm180_vm14, %v148_v8, %v212_v12 }
  0x3b   :  { %356 = vst [vmem:[%s611_s3 + $0x70] sm:$0xff] %v392_v13  ;;  %v245_v26 = vsel %vm181_vm15, %v149_v9, %v213_v14 }
  0x3c   :  { %v393_v27 = vpack.c.bf16 %v245_v26, %v244_v15 }
  0x3e   :  { %357 = vst [vmem:[%s611_s3 + $0x78] sm:$0xff] %v393_v27 }

// kernel: discriminator_forward.14
= control target key start
LH: loop header
LB: loop body
LE: loop exit
PB: predicated region body
PF: predicated region fallthrough
CT: control target
= control target key end

     0   :  { %s3095_s18 = smov 0   ;;  %s3938_s0 = inlined_call_operand.vmem [shape: bf16[2,10,10,128], index: 0, kind: input, shape index: {}]   ;;  %s3939_s1 = inlined_call_operand.vmem [shape: bf16[9,128,256], index: 1, kind: input, shape index: {}]   ;;  %s3940_s2 = inlined_call_operand.vmem [shape: f32[1,256], index: 2, kind: input, shape index: {}]   ;;  %s3941_s3 = inlined_call_operand.vmem [shape: bf16[2,8,8,256], index: 3, kind: output, shape index: {0}]   ;;  %s3942_s4 = inlined_call_operand.vmem [shape: f32[16,256], index: 4, kind: output, shape index: {1}]   ;;  %s3943_s5 = inlined_call_operand.vmem [shape: f32[16,256], index: 5, kind: output, shape index: {2}]  }
   0x1 LB: > { %s2463_s19 = sadd.s32 4294967295, %s3062_s18   ;;  %p2467_p0 = scmp.ge.s32.totalorder %s3062_s18, 1  ;;  %s3062_s18 = sphi %s3095_s18, %s16_s18  }
   0x2   : > { %p192_p1 = scmp.lt.s32.totalorder %s3062_s18, 3 }
   0x4   : > { %p193_p2 = pnand %p2467_p0, %p192_p1 }
   0x5   : > { %v2831_v0 = vld [vmem:[%s3939_s1 + $0x84] ss:$8 sps:$4 sm:$0xff] (!%p193_p2)   ;;  %v3064_v2 = vmov (!%p193_p2), 0   ;;  %v2835_v3 = vld [vmem:[%s3939_s1 + $0x80] ss:$8 sps:$4 sm:$0xff] (!%p193_p2)   ;;  %p230_p3 = scmp.lt.s32.totalorder (!%p193_p2), %s2463_s19, 1 }
   0x6   : > { %196 = sbr.rel (%p193_p2) target bundleno = 409 (0x199), region = 32  ;;  %v2833_v1 = vld [vmem:[%s3939_s1 + $0x204] ss:$8 sps:$4 sm:$0xff] (!%p193_p2)   ;;  %658 = vmatprep.mubr.bf16.mxu1 (!%p193_p2), %v3064_v2  ;;  %1418 = vmatprep.mubr.bf16.mxu0 (!%p193_p2), %v3064_v2  ;;  %v2836_v4 = vld [vmem:[%s3939_s1 + $0x200] ss:$8 sps:$4 sm:$0xff] (!%p193_p2)   ;;  %vm884_vm3 = vcmask (!%p193_p2), 1042432  }
   0x7   : > { %626 = vmatprep.subr.bf16.mxu1 (!%p193_p2), %v2831_v0  ;;  %1386 = vmatprep.subr.bf16.mxu0 (!%p193_p2), %v2833_v1  ;;  %v2837_v5 = vld [vmem:[%s3939_s1 + $0x94] ss:$8 sps:$4 sm:$0xff] (!%p193_p2)   ;;  %v2841_v7 = vld [vmem:[%s3939_s1 + $0x90] ss:$8 sps:$4 sm:$0xff] (!%p193_p2)   ;;  %v2843_v9 = vld [vmem:[%s3939_s1 + $0xa4] ss:$8 sps:$4 sm:$0xff] (!%p193_p2)  }
   0x8   : > { %627 = vmatpush1.bf16.msra.mxu1 (!%p193_p2), %v2835_v3  ;;  %1387 = vmatpush1.bf16.msra.mxu0 (!%p193_p2), %v2836_v4  ;;  %v2839_v6 = vld [vmem:[%s3939_s1 + $0x214] ss:$8 sps:$4 sm:$0xff] (!%p193_p2)   ;;  %v2842_v8 = vld [vmem:[%s3939_s1 + $0x210] ss:$8 sps:$4 sm:$0xff] (!%p193_p2)   ;;  %v2845_v10 = vld [vmem:[%s3939_s1 + $0x224] ss:$8 sps:$4 sm:$0xff] (!%p193_p2)  }
   0x9   : > { %628 = vmatprep.subr.bf16.mxu1 (!%p193_p2), %v2837_v5  ;;  %1388 = vmatprep.subr.bf16.mxu0 (!%p193_p2), %v2839_v6  ;;  %v2847_v11 = vld [vmem:[%s3939_s1 + $0xa0] ss:$8 sps:$4 sm:$0xff] (!%p193_p2)   ;;  %v2849_v13 = vld [vmem:[%s3939_s1 + $0xb4] ss:$8 sps:$4 sm:$0xff] (!%p193_p2)   ;;  %v2853_v15 = vld [vmem:[%s3939_s1 + $0xb0] ss:$8 sps:$4 sm:$0xff] (!%p193_p2)  }
   0xa   : > { %v2848_v12 = vld [vmem:[%s3939_s1 + $0x220] ss:$8 sps:$4 sm:$0xff] (!%p193_p2)   ;;  %v2851_v14 = vld [vmem:[%s3939_s1 + $0x234] ss:$8 sps:$4 sm:$0xff] (!%p193_p2)   ;;  %v2854_v16 = vld [vmem:[%s3939_s1 + $0x230] ss:$8 sps:$4 sm:$0xff] (!%p193_p2)  }
   0xb   : > { %v2855_v17 = vld [vmem:[%s3939_s1 + $0xc4] ss:$8 sps:$4 sm:$0xff] (!%p193_p2)   ;;  %v2859_v19 = vld [vmem:[%s3939_s1 + $0xc0] ss:$8 sps:$4 sm:$0xff] (!%p193_p2)   ;;  %v2861_v21 = vld [vmem:[%s3939_s1 + $0xd4] ss:$8 sps:$4 sm:$0xff] (!%p193_p2)  }
   0xc   : > { %629 = vmatpush1.bf16.msra.mxu1 (!%p193_p2), %v2841_v7  ;;  %1389 = vmatpush1.bf16.msra.mxu0 (!%p193_p2), %v2842_v8  ;;  %v2857_v18 = vld [vmem:[%s3939_s1 + $0x244] ss:$8 sps:$4 sm:$0xff] (!%p193_p2)   ;;  %v2860_v20 = vld [vmem:[%s3939_s1 + $0x240] ss:$8 sps:$4 sm:$0xff] (!%p193_p2)   ;;  %v2863_v22 = vld [vmem:[%s3939_s1 + $0x254] ss:$8 sps:$4 sm:$0xff] (!%p193_p2)  }
   0xd   : > { %630 = vmatprep.subr.bf16.mxu1 %v2843_v9  ;;  %1390 = vmatprep.subr.bf16.mxu0 %v2845_v10  ;;  %s3949_s19 = smov (!%p230_p3, %s2463_s19), 1  ;;  %vm415_vm0 = vsmask.f32 3328  ;;  %v2865_v23 = vld [vmem:[%s3939_s1 + $0xd0] ss:$8 sps:$4 sm:$0xff]   ;;  %vm885_vm4 = vcmask 1046532  }
   0xe   : > { %s2821_s8 = smul.u32 80, %s3949_s19  ;;  %vm416_vm1 = vsmask.f32 7440  ;;  %v2866_v24 = vld [vmem:[%s3939_s1 + $0x250] ss:$8 sps:$4 sm:$0xff]   ;;  %vm3280_vm5 = vmor %vm884_vm3, %vm885_vm4  ;;  %s2666_s25 = sshll.u32 %s3949_s19, 6 }
   0xf   : > { %v2867_v25 = vld [vmem:[%s3939_s1 + $0xe4] ss:$8 sps:$4 sm:$0xff]   ;;  %v2871_v29 = vld [vmem:[%s3939_s1 + $0xe0] ss:$8 sps:$4 sm:$0xff]   ;;  %v2873_v39 = vld [vmem:[%s3939_s1 + $0xf4] ss:$8 sps:$4 sm:$0xff]   ;;  %s3879_s28 = scalar_lea.vmem %s3941_s3, %s2666_s25 }
  0x10   : > { %631 = vmatpush1.bf16.msra.mxu1 %v2847_v11  ;;  %1391 = vmatpush1.bf16.msra.mxu0 %v2848_v12  ;;  %s3181_s21 = scalar_lea.vmem %s3938_s0, %s2821_s8  ;;  %v2869_v26 = vld [vmem:[%s3939_s1 + $0x264] ss:$8 sps:$4 sm:$0xff]   ;;  %v2872_v38 = vld [vmem:[%s3939_s1 + $0x260] ss:$8 sps:$4 sm:$0xff]   ;;  %v2875_v42 = vld [vmem:[%s3939_s1 + $0x274] ss:$8 sps:$4 sm:$0xff]  }
  0x11   : > { %632 = vmatprep.subr.bf16.mxu1 %v2849_v13  ;;  %1392 = vmatprep.subr.bf16.mxu0 %v2851_v14  ;;  %v3196_v27 = vld [vmem:[%s3181_s21] sm:$0xf]  ;;  %v3199_v28 = vld [vmem:[%s3181_s21 + $0x4] sm:$0x1]  ;;  %v3205_v30 = vld [vmem:[%s3181_s21 + $0x8] sm:$0xf] }
  0x12   : > { %v3208_v31 = vld [vmem:[%s3181_s21 + $0xc] sm:$0x1]  ;;  %v419_v32 = vshrl.u32 %v3196_v27, 16  ;;  %v422_v33 = vshll.u32 %v3196_v27, 16  ;;  %v428_v34 = vshll.u32 %v3199_v28, 16  ;;  %v433_v35 = vshrl.u32 %v3205_v30, 16  ;;  %vm3239_vm2 = vmor %vm415_vm0, %vm416_vm1 }
  0x13   : > { %v436_v36 = vshll.u32 %v3205_v30, 16  ;;  %v442_v37 = vshll.u32 %v3208_v31, 16  ;;  %v2877_v46 = vld [vmem:[%s3939_s1 + $0xf0] ss:$8 sps:$4 sm:$0xff]   ;;  %v3232_v50 = vld [vmem:[%s3181_s21 + $0x14] sm:$0x1] }
  0x14   : > { %633 = vmatpush1.bf16.msra.mxu1 %v2853_v15  ;;  %1393 = vmatpush1.bf16.msra.mxu0 %v2854_v16  ;;  %v421_v40 = vrot.slane %v419_v32, 4  ;;  %v424_v41 = vrot.slane %v422_v33, 5  ;;  %v430_v43 = vrot.slane %v428_v34, 5  ;;  %v435_v44 = vrot.slane %v433_v35, 4  ;;  %v3229_v49 = vld [vmem:[%s3181_s21 + $0x10] sm:$0xf] }
  0x15   : > { %634 = vmatprep.subr.bf16.mxu1 %v2855_v17  ;;  %1394 = vmatprep.subr.bf16.mxu0 %v2857_v18  ;;  %v438_v45 = vrot.slane %v436_v36, 5  ;;  %v444_v48 = vrot.slane %v442_v37, 5  ;;  %v2878_v51 = vld [vmem:[%s3939_s1 + $0x270] ss:$8 sps:$4 sm:$0xff]   ;;  %v447_v54 = vshrl.u32 %v3229_v49, 16  ;;  %v450_v55 = vshll.u32 %v3229_v49, 16 }
  0x16   : > { %v425_v47 = vor.u32 %v424_v41, %v421_v40  ;;  %v456_v56 = vshll.u32 %v3232_v50, 16  ;;  %v2881_v58 = vld [vmem:[%s3939_s1 + $0x4] ss:$8 sps:$4 sm:$0xff]   ;;  %v2543_v59 = vcombine.low %v3205_v30, %v3229_v49  ;;  %v889_v1 = vrot.slane %v3199_v28, 5  ;;  %v2879_v5 = vld [vmem:[%s3939_s1] ss:$8 sps:$4 sm:$0xff]  }
  0x17   : > { %v439_v53 = vor.u32 %v438_v45, %v435_v44  ;;  %v449_v61 = vrot.slane %v447_v54, 4  ;;  %v452_v62 = vrot.slane %v450_v55, 5  ;;  %v2884_v63 = vld [vmem:[%s3939_s1 + $0x284] ss:$8 sps:$4 sm:$0xff]   ;;  %v2515_v3 = vrot.slane %v3196_v27, 9  ;;  %s2667_s29 = sshll.u32 %s3949_s19, 4 }
  0x18   : > { %635 = vmatpush1.bf16.msra.mxu1 %v2859_v19  ;;  %1395 = vmatpush1.bf16.msra.mxu0 %v2860_v20  ;;  %v426_v57 = vrot.slane %v425_v47, 4  ;;  %v458_v7 = vrot.slane %v456_v56, 5  ;;  %v3264_v8 = vld [vmem:[%s3181_s21 + $0x18] sm:$0xf]  ;;  %v3267_v10 = vld [vmem:[%s3181_s21 + $0x1c] sm:$0x1]  ;;  %s244_s6 = scalar_lea.vmem %s3942_s4, %s2667_s29 }
  0x19   : > { %636 = vmatprep.subr.bf16.mxu1 %v2861_v21  ;;  %1396 = vmatprep.subr.bf16.mxu0 %v2863_v22  ;;  %v440_v60 = vrot.slane %v439_v53, 4  ;;  %v453_v6 = vor.u32 %v452_v62, %v449_v61  ;;  %v461_v11 = vshrl.u32 %v3264_v8, 16  ;;  %v464_v12 = vshll.u32 %v3264_v8, 16  ;;  %v2882_v14 = vld [vmem:[%s3939_s1 + $0x280] ss:$8 sps:$4 sm:$0xff]  }
  0x1a   : > { %v431_v0 = vsel %vm3239_vm2, %v426_v57, %v430_v43  ;;  %v2887_v15 = vld [vmem:[%s3939_s1 + $0x14] ss:$8 sps:$4 sm:$0xff]   ;;  %v470_v16 = vshll.u32 %v3267_v10, 16  ;;  %v2885_v18 = vld [vmem:[%s3939_s1 + $0x10] ss:$8 sps:$4 sm:$0xff]  }
  0x1b   : > { %v445_v4 = vsel %vm3239_vm2, %v440_v60, %v444_v48  ;;  %v454_v13 = vrot.slane %v453_v6, 4  ;;  %v463_v19 = vrot.slane %v461_v11, 4  ;;  %v466_v20 = vrot.slane %v464_v12, 5  ;;  %v3288_v21 = vld [vmem:[%s3181_s21 + $0x20] sm:$0xf] }
  0x1c   : > { %637 = vmatpush1.bf16.msra.mxu1 %v2865_v23  ;;  %1397 = vmatpush1.bf16.msra.mxu0 %v2866_v24  ;;  %v2475_v9 = vcombine.low %v431_v0, %v445_v4  ;;  %v3291_v22 = vld [vmem:[%s3181_s21 + $0x24] sm:$0x1]  ;;  %v3295_v23 = vsel %vm3280_vm5, %v2515_v3, %v889_v1  ;;  %v472_v33 = vrot.slane %v470_v16, 5  ;;  %v2888_v35 = vld [vmem:[%s3939_s1 + $0x290] ss:$8 sps:$4 sm:$0xff]  }
  0x1d   : > { %638 = vmatprep.subr.bf16.mxu1 %v2867_v25  ;;  %1398 = vmatprep.subr.bf16.mxu0 %v2869_v26  ;;  %v459_v24 = vsel %vm3239_vm2, %v454_v13, %v458_v7  ;;  %v475_v25 = vshrl.u32 %v3288_v21, 16  ;;  %v478_v26 = vshll.u32 %v3288_v21, 16  ;;  %v467_v32 = vor.u32 %v466_v20, %v463_v19  ;;  %v2893_v36 = vld [vmem:[%s3939_s1 + $0x24] ss:$8 sps:$4 sm:$0xff]   ;;  %v2891_v41 = vld [vmem:[%s3939_s1 + $0x20] ss:$8 sps:$4 sm:$0xff]  }
  0x1e   : > { %v2563_v28 = vcombine.low %v445_v4, %v459_v24  ;;  %v484_v34 = vshll.u32 %v3291_v22, 16  ;;  %v3322_v45 = vld [vmem:[%s3181_s21 + $0x28] sm:$0xf]  ;;  %v2899_v57 = vld [vmem:[%s3939_s1 + $0x34] ss:$8 sps:$4 sm:$0xff]  }
  0x1f   : > { %v477_v37 = vrot.slane %v475_v25, 4  ;;  %v468_v40 = vrot.slane %v467_v32, 4  ;;  %v489_v48 = vshrl.u32 %v3322_v45, 16  ;;  %v2894_v56 = vld [vmem:[%s3939_s1 + $0x2a0] ss:$8 sps:$4 sm:$0xff]  }
  0x20   : > { %639 = vmatpush1.bf16.msra.mxu1 %v2871_v29  ;;  %1399 = vmatpush1.bf16.msra.mxu0 %v2872_v38  ;;  %v2890_v29 = vld [vmem:[%s3939_s1 + $0x294] ss:$8 sps:$4 sm:$0xff]   ;;  %v480_v38 = vrot.slane %v478_v26, 5  ;;  %v486_v44 = vrot.slane %v484_v34, 5  ;;  %v3341_v61 = vld [vmem:[%s3181_s21 + $0x30] sm:$0xf] }
  0x21   : > { %640 = vmatprep.subr.bf16.mxu1 %v2873_v39  ;;  %1400 = vmatprep.subr.bf16.mxu0 %v2875_v42  ;;  %v2544_v39 = vcombine.low %v3264_v8, %v3288_v21  ;;  %v2896_v42 = vld [vmem:[%s3939_s1 + $0x2a4] ss:$8 sps:$4 sm:$0xff]   ;;  %v473_v47 = vsel %vm3239_vm2, %v468_v40, %v472_v33  ;;  %v3350_v0 = vld [vmem:[%s3181_s21 + $0x34] sm:$0x1]  ;;  %v503_v1 = vshrl.u32 %v3341_v61, 16  ;;  %v506_v3 = vshll.u32 %v3341_v61, 16 }
  0x22   : > { %v481_v43 = vor.u32 %v480_v38, %v477_v37  ;;  %v3332_v54 = vcombine.low %v459_v24, %v473_v47  ;;  %v2545_v4 = vcombine.low %v3322_v45, %v3341_v61  ;;  %v2902_v6 = vld [vmem:[%s3939_s1 + $0x2b4] ss:$8 sps:$4 sm:$0xff]   ;;  %v512_v11 = vshll.u32 %v3350_v0, 16  ;;  %v2905_v12 = vld [vmem:[%s3939_s1 + $0x44] ss:$8 sps:$4 sm:$0xff]  }
  0x23   : > { %v505_v13 = vrot.slane %v503_v1, 4  ;;  %v3372_v24 = vld [vmem:[%s3181_s21 + $0x38] sm:$0xf]  ;;  %v3375_v25 = vld [vmem:[%s3181_s21 + $0x3c] sm:$0x1] }
  0x24   : > { %641 = vmatpush1.bf16.msra.mxu1 %v2877_v46  ;;  %1401 = vmatpush1.bf16.msra.mxu0 %v2878_v51  ;;  %v3325_v46 = vld [vmem:[%s3181_s21 + $0x2c] sm:$0x1]  ;;  %v492_v51 = vshll.u32 %v3322_v45, 16  ;;  %v482_v55 = vrot.slane %v481_v43, 4  ;;  %v514_v20 = vrot.slane %v512_v11, 5  ;;  %v520_v32 = vshll.u32 %v3372_v24, 16 }
  0x25   : > { %803 = vmatprep.subr.bf16.mxu1 %v2881_v58  ;;  %1569 = vmatprep.subr.bf16.mxu0 %v2884_v63  ;;  %v498_v53 = vshll.u32 %v3325_v46, 16  ;;  %v491_v58 = vrot.slane %v489_v48, 4  ;;  %v2897_v63 = vld [vmem:[%s3939_s1 + $0x30] ss:$8 sps:$4 sm:$0xff]   ;;  %v526_v33 = vshll.u32 %v3375_v25, 16 }
  0x26   : > { %v494_v60 = vrot.slane %v492_v51, 5  ;;  %v487_v62 = vsel %vm3239_vm2, %v482_v55, %v486_v44  ;;  %v2911_v37 = vld [vmem:[%s3939_s1 + $0x54] ss:$8 sps:$4 sm:$0xff]   ;;  %v3394_v38 = vld [vmem:[%s3181_s21 + $0x40] sm:$0xf] }
  0x27   : > { %659 = vmatmul.mubr.bf16.vlgmr.msra.gmra.mrb[0].mxu1 %v2475_v9  ;;  %1419 = vmatmul.mubr.bf16.vlgmr.msra.gmra.mrb[0].mxu0 %v2563_v28  ;;  %v500_v9 = vrot.slane %v498_v53, 5  ;;  %v2908_v28 = vld [vmem:[%s3939_s1 + $0x2c4] ss:$8 sps:$4 sm:$0xff]   ;;  %v1284_v43 = vshrl.u32 %v3394_v38, 16  ;;  %v1287_v48 = vshll.u32 %v3394_v38, 16  ;;  %v2546_v53 = vcombine.low %v3372_v24, %v3394_v38 }
  0x28   : > { %804 = vmatpush1.bf16.msra.mxu1 %v2879_v5  ;;  %668 = vmatprep.mubr.bf16.mxu1 %v3064_v2  ;;  %v2564_v5 = vcombine.low %v473_v47, %v487_v62  ;;  %v495_v7 = vor.u32 %v494_v60, %v491_v58  ;;  %v2909_v47 = vld [vmem:[%s3939_s1 + $0x50] ss:$8 sps:$4 sm:$0xff]   ;;  %v528_v58 = vrot.slane %v526_v33, 5  ;;  %v2920_v11 = vld [vmem:[%s3939_s1 + $0x2e4] ss:$8 sps:$4 sm:$0xff]   ;;  %v2495_v33 = vcombine.low %v3196_v27, %v3205_v30 }
  0x29   : > { %805 = vmatprep.subr.bf16.mxu1 %v2887_v15  ;;  %1570 = vmatpush1.bf16.msra.mxu0 %v2882_v14  ;;  %v508_v14 = vrot.slane %v506_v3, 5  ;;  %v2900_v15 = vld [vmem:[%s3939_s1 + $0x2b0] ss:$8 sps:$4 sm:$0xff]   ;;  %v1286_v60 = vrot.slane %v1284_v43, 4  ;;  %v2936_v27 = vld [vmem:[%s3939_s1 + $0x114] ss:$8 sps:$4 sm:$0xff]  }
  0x2a   : > { %1428 = vmatprep.mubr.bf16.mxu0 %v3064_v2  ;;  %1571 = vmatprep.subr.bf16.mxu0 %v2890_v29  ;;  %v496_v16 = vrot.slane %v495_v7, 4  ;;  %v517_v29 = vshrl.u32 %v3372_v24, 16  ;;  %v2912_v3 = vld [vmem:[%s3939_s1 + $0x2d0] ss:$8 sps:$4 sm:$0xff]   ;;  %v2931_v43 = vld [vmem:[%s3939_s1 + $0x300] ss:$8 sps:$4 sm:$0xff]  }
  0x2b   : > { %v509_v19 = vor.u32 %v508_v14, %v505_v13  ;;  %v2923_v14 = vld [vmem:[%s3939_s1 + $0x74] ss:$8 sps:$4 sm:$0xff]   ;;  %v3053_v52 = vld [vmem:[%s3939_s1 + $0x470] ss:$8 sps:$4 sm:$0xff]  }
  0x2c   : > { %806 = vmatpush1.bf16.msra.mxu1 %v2885_v18  ;;  %v2903_v18 = vld [vmem:[%s3939_s1 + $0x40] ss:$8 sps:$4 sm:$0xff]   ;;  %v501_v26 = vsel %vm3239_vm2, %v496_v16, %v500_v9  ;;  %v519_v40 = vrot.slane %v517_v29, 4  ;;  %v897_v16 = vrot.slane %v3232_v50, 5  ;;  %v2930_v29 = vld [vmem:[%s3939_s1 + $0x104] ss:$8 sps:$4 sm:$0xff]  }
  0x2d   : > { %807 = vmatprep.subr.bf16.mxu1 %v2893_v36  ;;  %1572 = vmatpush1.bf16.msra.mxu0 %v2888_v35  ;;  %v3385_v34 = vcombine.low %v487_v62, %v501_v26  ;;  %v510_v35 = vrot.slane %v509_v19, 4  ;;  %v2906_v36 = vld [vmem:[%s3939_s1 + $0x2c0] ss:$8 sps:$4 sm:$0xff]   ;;  %v2917_v62 = vld [vmem:[%s3939_s1 + $0x64] ss:$8 sps:$4 sm:$0xff]  }
  0x2e   : > { %1573 = vmatprep.subr.bf16.mxu0 %v2896_v42  ;;  %v3397_v42 = vld [vmem:[%s3181_s21 + $0x44] sm:$0x1] }
  0x2f   : > { %669 = vmatmul.mubr.bf16.gmra.mrb[4].mxu1 %v3332_v54  ;;  %1429 = vmatmul.mubr.bf16.gmra.mrb[4].mxu0 %v2564_v5  ;;  %v515_v44 = vsel %vm3239_vm2, %v510_v35, %v514_v20  ;;  %v1293_v51 = vshll.u32 %v3397_v42, 16  ;;  %v2915_v5 = vld [vmem:[%s3939_s1 + $0x60] ss:$8 sps:$4 sm:$0xff]  }
  0x30   : > { %808 = vmatpush1.bf16.msra.mxu1 %v2891_v41  ;;  %678 = vmatprep.mubr.bf16.mxu1 %v3064_v2  ;;  %v522_v41 = vrot.slane %v520_v32, 5  ;;  %v2565_v55 = vcombine.low %v501_v26, %v515_v44  ;;  %v2918_v20 = vld [vmem:[%s3939_s1 + $0x2e0] ss:$8 sps:$4 sm:$0xff]   ;;  %v2921_v26 = vld [vmem:[%s3939_s1 + $0x70] ss:$8 sps:$4 sm:$0xff]  }
  0x31   : > { %809 = vmatprep.subr.bf16.mxu1 %v2899_v57  ;;  %1574 = vmatpush1.bf16.msra.mxu0 %v2894_v56  ;;  %v2914_v56 = vld [vmem:[%s3939_s1 + $0x2d4] ss:$8 sps:$4 sm:$0xff]   ;;  %v1295_v7 = vrot.slane %v1293_v51, 5  ;;  %v2924_v32 = vld [vmem:[%s3939_s1 + $0x2f0] ss:$8 sps:$4 sm:$0xff]   ;;  %v2519_v51 = vrot.slane %v3288_v21, 9 }
  0x32   : > { %1438 = vmatprep.mubr.bf16.mxu0 %v3064_v2  ;;  %1575 = vmatprep.subr.bf16.mxu0 %v2902_v6  ;;  %v523_v57 = vor.u32 %v522_v41, %v519_v40  ;;  %v2928_v35 = vld [vmem:[%s3939_s1 + $0x100] ss:$8 sps:$4 sm:$0xff]   ;;  %v2933_v40 = vld [vmem:[%s3939_s1 + $0x304] ss:$8 sps:$4 sm:$0xff]  }
  0x34   : > { %810 = vmatpush1.bf16.msra.mxu1 %v2897_v63  ;;  %v1289_v63 = vrot.slane %v1287_v48, 5  ;;  %v524_v1 = vrot.slane %v523_v57, 4  ;;  %v901_v48 = vrot.slane %v3267_v10, 5  ;;  %v2943_v57 = vld [vmem:[%s3939_s1 + $0x124] ss:$8 sps:$4 sm:$0xff]  }
  0x35   : > { %811 = vmatprep.subr.bf16.mxu1 %v2905_v12  ;;  %1576 = vmatpush1.bf16.msra.mxu0 %v2900_v15  ;;  %v893_v15 = vrot.slane %v3208_v31, 5  ;;  %v2517_v31 = vrot.slane %v3229_v49, 9  ;;  %v2937_v10 = vld [vmem:[%s3939_s1 + $0x310] ss:$8 sps:$4 sm:$0xff]  }
  0x36   : > { %1577 = vmatprep.subr.bf16.mxu0 %v2908_v28  ;;  %v1290_v6 = vor.u32 %v1289_v63, %v1286_v60  ;;  %v529_v9 = vsel %vm3239_vm2, %v524_v1, %v528_v58  ;;  %v2926_v28 = vld [vmem:[%s3939_s1 + $0x2f4] ss:$8 sps:$4 sm:$0xff]   ;;  %v2941_v58 = vld [vmem:[%s3939_s1 + $0x120] ss:$8 sps:$4 sm:$0xff]   ;;  %v2946_v63 = vld [vmem:[%s3939_s1 + $0x324] ss:$8 sps:$4 sm:$0xff]  }
  0x37   : > { %679 = vmatmul.mubr.bf16.gmra.mrb[8].mxu1 %v3385_v34  ;;  %1439 = vmatmul.mubr.bf16.gmra.mrb[8].mxu0 %v2565_v55  ;;  %v3429_v12 = vcombine.low %v515_v44, %v529_v9  ;;  %v2518_v44 = vrot.slane %v3264_v8, 9  ;;  %v905_v55 = vrot.slane %v3291_v22, 5  ;;  %v3505_v22 = vcombine.low %v3229_v49, %v3264_v8  ;;  %v2949_v1 = vld [vmem:[%s3939_s1 + $0x134] ss:$8 sps:$4 sm:$0xff]   ;;  %v3036_v49 = vld [vmem:[%s3939_s1 + $0x420] ss:$8 sps:$4 sm:$0xff]  }
  0x38   : > { %812 = vmatpush1.bf16.msra.mxu1 %v2903_v18  ;;  %688 = vmatprep.mubr.bf16.mxu1 %v3064_v2  ;;  %v1291_v13 = vrot.slane %v1290_v6, 4  ;;  %v2516_v18 = vrot.slane %v3205_v30, 9  ;;  %v909_v6 = vrot.slane %v3325_v46, 5  ;;  %v2952_v46 = vld [vmem:[%s3939_s1 + $0x334] ss:$8 sps:$4 sm:$0xff]  }
  0x39   : > { %813 = vmatprep.subr.bf16.mxu1 %v2911_v37  ;;  %1578 = vmatpush1.bf16.msra.mxu0 %v2906_v36  ;;  %v3472_v37 = vsel %vm3280_vm5, %v2517_v31, %v897_v16  ;;  %v3512_v60 = vsel %vm3280_vm5, %v2518_v44, %v901_v48  ;;  %v2954_v16 = vld [vmem:[%s3939_s1 + $0x140] ss:$8 sps:$4 sm:$0xff]   ;;  %v2962_v31 = vld [vmem:[%s3939_s1 + $0x154] ss:$8 sps:$4 sm:$0xff]   ;;  %v2972_v48 = vld [vmem:[%s3939_s1 + $0x364] ss:$8 sps:$4 sm:$0xff]  }
  0x3a   : > { %1448 = vmatprep.mubr.bf16.mxu0 %v3064_v2  ;;  %1579 = vmatprep.subr.bf16.mxu0 %v2914_v56  ;;  %v3440_v19 = vsel %vm3239_vm2, %v1291_v13, %v1295_v7  ;;  %v3468_v36 = vsel %vm3280_vm5, %v2516_v18, %v893_v15  ;;  %v2939_v56 = vld [vmem:[%s3939_s1 + $0x314] ss:$8 sps:$4 sm:$0xff]   ;;  %v2521_v7 = vrot.slane %v3341_v61, 9  ;;  %v913_v13 = vrot.slane %v3350_v0, 5  ;;  %v2950_v15 = vld [vmem:[%s3939_s1 + $0x330] ss:$8 sps:$4 sm:$0xff]  }
  0x3b   : > { %v2566_v50 = vcombine.low %v529_v9, %v3440_v19  ;;  %v2584_v41 = vcombine.low %v3468_v36, %v3472_v37  ;;  %v2944_v9 = vld [vmem:[%s3939_s1 + $0x320] ss:$8 sps:$4 sm:$0xff]   ;;  %v3550_v0 = vcombine.low %v3288_v21, %v3322_v45 }
  0x3c   : > { %814 = vmatpush1.bf16.msra.mxu1 %v2909_v47  ;;  %v2934_v47 = vld [vmem:[%s3939_s1 + $0x110] ss:$8 sps:$4 sm:$0xff]  }
  0x3d   : > { %815 = vmatprep.subr.bf16.mxu1 %v2917_v62  ;;  %1580 = vmatpush1.bf16.msra.mxu0 %v2912_v3  ;;  %v3516_v62 = vsel %vm3280_vm5, %v2519_v51, %v905_v55  ;;  %v2975_v51 = vld [vmem:[%s3939_s1 + $0x174] ss:$8 sps:$4 sm:$0xff]  }
  0x3e   : > { %1581 = vmatprep.subr.bf16.mxu0 %v2920_v11  ;;  %v2585_v3 = vcombine.low %v3512_v60, %v3516_v62  ;;  %v2947_v11 = vld [vmem:[%s3939_s1 + $0x130] ss:$8 sps:$4 sm:$0xff]  }
  0x3f   : > { %689 = vmatmul.mubr.bf16.gmra.mrb[12].mxu1 %v3429_v12  ;;  %1449 = vmatmul.mubr.bf16.gmra.mrb[12].mxu0 %v2566_v50 }
  0x40   : > { %816 = vmatpush1.bf16.msra.mxu1 %v2915_v5  ;;  %835 = vmatprep.mubr.bf16.mxu1 %v3064_v2  ;;  %v2520_v5 = vrot.slane %v3322_v45, 9 }
  0x41   : > { %817 = vmatprep.subr.bf16.mxu1 %v2923_v14  ;;  %1582 = vmatpush1.bf16.msra.mxu0 %v2918_v20  ;;  %v2956_v14 = vld [vmem:[%s3939_s1 + $0x144] ss:$8 sps:$4 sm:$0xff]   ;;  %v3561_v20 = vsel %vm3280_vm5, %v2521_v7, %v913_v13  ;;  %v2982_v7 = vld [vmem:[%s3939_s1 + $0x380] ss:$8 sps:$4 sm:$0xff]   ;;  %v3665_v13 = vcombine.low %v3472_v37, %v3512_v60  ;;  %v2997_v60 = vld [vmem:[%s3939_s1 + $0x1b0] ss:$8 sps:$4 sm:$0xff]  }
  0x42   : > { %1601 = vmatprep.mubr.bf16.mxu0 %v3064_v2  ;;  %1583 = vmatprep.subr.bf16.mxu0 %v2926_v28  ;;  %v3557_v18 = vsel %vm3280_vm5, %v2520_v5, %v909_v6  ;;  %v2522_v28 = vrot.slane %v3372_v24, 9  ;;  %v2984_v5 = vld [vmem:[%s3939_s1 + $0x384] ss:$8 sps:$4 sm:$0xff]   ;;  %v2987_v6 = vld [vmem:[%s3939_s1 + $0x194] ss:$8 sps:$4 sm:$0xff]  }
  0x43   : > { %v2586_v50 = vcombine.low %v3557_v18, %v3561_v20  ;;  %v2994_v37 = vld [vmem:[%s3939_s1 + $0x3a0] ss:$8 sps:$4 sm:$0xff]  }
  0x44   : > { %818 = vmatpush1.bf16.msra.mxu1 %v2921_v26  ;;  %v2959_v26 = vld [vmem:[%s3939_s1 + $0x344] ss:$8 sps:$4 sm:$0xff]  }
  0x45   : > { %1015 = vmatprep.subr.bf16.mxu1 %v2930_v29  ;;  %1584 = vmatpush1.bf16.msra.mxu0 %v2924_v32  ;;  %v917_v29 = vrot.slane %v3375_v25, 5  ;;  %v2583_v32 = vrot.slane %v3394_v38, 9  ;;  %v2965_v25 = vld [vmem:[%s3939_s1 + $0x354] ss:$8 sps:$4 sm:$0xff]  }
  0x46   : > { %1742 = vmatprep.subr.bf16.mxu0 %v2933_v40  ;;  %v1478_v40 = vrot.slane %v3397_v42, 5  ;;  %v3595_v42 = vcombine.low %v3341_v61, %v3372_v24  ;;  %v3050_v61 = vld [vmem:[%s3939_s1 + $0x460] ss:$8 sps:$4 sm:$0xff]  }
  0x47   : > { %836 = vmatmul.mubr.bf16.vlgmr.msra.gmra.mrb[0].mxu1 %v2495_v33  ;;  %v2957_v33 = vld [vmem:[%s3939_s1 + $0x340] ss:$8 sps:$4 sm:$0xff]   ;;  %v3602_v44 = vsel %vm3280_vm5, %v2522_v28, %v917_v29  ;;  %v3011_v28 = vld [vmem:[%s3939_s1 + $0x1d4] ss:$8 sps:$4 sm:$0xff]  }
  0x48   : > { %1016 = vmatpush1.bf16.msra.mxu1 %v2928_v35  ;;  %845 = vmatprep.mubr.bf16.mxu1 %v3064_v2  ;;  %v2960_v35 = vld [vmem:[%s3939_s1 + $0x150] ss:$8 sps:$4 sm:$0xff]   ;;  %v3014_v29 = vld [vmem:[%s3939_s1 + $0x3d4] ss:$8 sps:$4 sm:$0xff]  }
  0x49   : > { %1017 = vmatprep.subr.bf16.mxu1 %v2936_v27  ;;  %1602 = vmatmul.mubr.bf16.vlgmr.msra.gmra.mrb[0].mxu0 %v2584_v41  ;;  %v2969_v27 = vld [vmem:[%s3939_s1 + $0x164] ss:$8 sps:$4 sm:$0xff]   ;;  %v2963_v41 = vld [vmem:[%s3939_s1 + $0x350] ss:$8 sps:$4 sm:$0xff]  }
  0x4a   : > { %1743 = vmatpush1.bf16.msra.mxu0 %v2931_v43  ;;  %1611 = vmatprep.mubr.bf16.mxu0 %v3064_v2  ;;  %v2967_v43 = vld [vmem:[%s3939_s1 + $0x160] ss:$8 sps:$4 sm:$0xff]  }
  0x4b   : > { %1744 = vmatprep.subr.bf16.mxu0 %v2939_v56  ;;  %v2970_v56 = vld [vmem:[%s3939_s1 + $0x360] ss:$8 sps:$4 sm:$0xff]  }
  0x4c   : > { %1018 = vmatpush1.bf16.msra.mxu1 %v2934_v47  ;;  %v3606_v47 = vsel %vm3280_vm5, %v2583_v32, %v1478_v40  ;;  %v3017_v32 = vld [vmem:[%s3939_s1 + $0x1e4] ss:$8 sps:$4 sm:$0xff]   ;;  %v3732_v40 = vld [vmem:[%s3181_s21 + $0x48] sm:$0xf] }
  0x4d   : > { %1019 = vmatprep.subr.bf16.mxu1 %v2943_v57  ;;  %v2587_v55 = vcombine.low %v3602_v44, %v3606_v47  ;;  %v2973_v57 = vld [vmem:[%s3939_s1 + $0x170] ss:$8 sps:$4 sm:$0xff]   ;;  %v1835_v30 = vshll.u32 %v3732_v40, 16 }
  0x4e   : > { %1745 = vmatpush1.bf16.msra.mxu0 %v2937_v10  ;;  %v2978_v10 = vld [vmem:[%s3939_s1 + $0x374] ss:$8 sps:$4 sm:$0xff]  }
  0x4f   : > { %846 = vmatmul.mubr.bf16.gmra.mrb[4].mxu1 %v3505_v22  ;;  %1746 = vmatprep.subr.bf16.mxu0 %v2946_v63  ;;  %v2976_v63 = vld [vmem:[%s3939_s1 + $0x370] ss:$8 sps:$4 sm:$0xff]  }
  0x50   : > { %1020 = vmatpush1.bf16.msra.mxu1 %v2941_v58  ;;  %855 = vmatprep.mubr.bf16.mxu1 %v3064_v2  ;;  %v2981_v58 = vld [vmem:[%s3939_s1 + $0x184] ss:$8 sps:$4 sm:$0xff]  }
  0x51   : > { %1021 = vmatprep.subr.bf16.mxu1 %v2949_v1  ;;  %1612 = vmatmul.mubr.bf16.gmra.mrb[4].mxu0 %v2585_v3  ;;  %v2523_v1 = vcombine.low %v3295_v23, %v3468_v36  ;;  %v2979_v3 = vld [vmem:[%s3939_s1 + $0x180] ss:$8 sps:$4 sm:$0xff]   ;;  %v2985_v23 = vld [vmem:[%s3939_s1 + $0x190] ss:$8 sps:$4 sm:$0xff]   ;;  %v2990_v36 = vld [vmem:[%s3939_s1 + $0x394] ss:$8 sps:$4 sm:$0xff]  }
  0x52   : > { %1747 = vmatpush1.bf16.msra.mxu0 %v2944_v9  ;;  %1621 = vmatprep.mubr.bf16.mxu0 %v3064_v2  ;;  %v2993_v9 = vld [vmem:[%s3939_s1 + $0x1a4] ss:$8 sps:$4 sm:$0xff]  }
  0x53   : > { %1748 = vmatprep.subr.bf16.mxu0 %v2952_v46  ;;  %v2991_v46 = vld [vmem:[%s3939_s1 + $0x1a0] ss:$8 sps:$4 sm:$0xff]  }
  0x54   : > { %1022 = vmatpush1.bf16.msra.mxu1 %v2947_v11  ;;  %v2988_v11 = vld [vmem:[%s3939_s1 + $0x390] ss:$8 sps:$4 sm:$0xff]  }
  0x55   : > { %1023 = vmatprep.subr.bf16.mxu1 %v2956_v14  ;;  %v2999_v14 = vld [vmem:[%s3939_s1 + $0x1b4] ss:$8 sps:$4 sm:$0xff]  }
  0x56   : > { %1749 = vmatpush1.bf16.msra.mxu0 %v2950_v15  ;;  %v3002_v15 = vld [vmem:[%s3939_s1 + $0x3b4] ss:$8 sps:$4 sm:$0xff]  }
  0x57   : > { %856 = vmatmul.mubr.bf16.gmra.mrb[8].mxu1 %v3550_v0  ;;  %1750 = vmatprep.subr.bf16.mxu0 %v2959_v26  ;;  %v3000_v26 = vld [vmem:[%s3939_s1 + $0x3b0] ss:$8 sps:$4 sm:$0xff]  }
  0x58   : > { %1024 = vmatpush1.bf16.msra.mxu1 %v2954_v16  ;;  %865 = vmatprep.mubr.bf16.mxu1 %v3064_v2  ;;  %v3005_v16 = vld [vmem:[%s3939_s1 + $0x1c4] ss:$8 sps:$4 sm:$0xff]  }
  0x59   : > { %1025 = vmatprep.subr.bf16.mxu1 %v2962_v31  ;;  %1622 = vmatmul.mubr.bf16.gmra.mrb[8].mxu0 %v2586_v50  ;;  %v3697_v31 = vcombine.low %v3516_v62, %v3557_v18  ;;  %v3003_v50 = vld [vmem:[%s3939_s1 + $0x1c0] ss:$8 sps:$4 sm:$0xff]   ;;  %v3009_v18 = vld [vmem:[%s3939_s1 + $0x1d0] ss:$8 sps:$4 sm:$0xff]  }
  0x5a   : > { %1751 = vmatpush1.bf16.msra.mxu0 %v2957_v33  ;;  %1631 = vmatprep.mubr.bf16.mxu0 %v3064_v2  ;;  %v3006_v62 = vld [vmem:[%s3939_s1 + $0x3c0] ss:$8 sps:$4 sm:$0xff]   ;;  %v3012_v33 = vld [vmem:[%s3939_s1 + $0x3d0] ss:$8 sps:$4 sm:$0xff]  }
  0x5b   : > { %1752 = vmatprep.subr.bf16.mxu0 %v2965_v25  ;;  %v3015_v25 = vld [vmem:[%s3939_s1 + $0x1e0] ss:$8 sps:$4 sm:$0xff]  }
  0x5c   : > { %1026 = vmatpush1.bf16.msra.mxu1 %v2960_v35  ;;  %v3729_v35 = vcombine.low %v3561_v20, %v3602_v44  ;;  %v2604_v20 = vcombine.low %v3394_v38, %v3732_v40  ;;  %v3027_v44 = vld [vmem:[%s3939_s1 + $0x3f4] ss:$8 sps:$4 sm:$0xff]  }
  0x5d   : > { %1027 = vmatprep.subr.bf16.mxu1 %v2969_v27  ;;  %v3021_v27 = vld [vmem:[%s3939_s1 + $0x3e4] ss:$8 sps:$4 sm:$0xff]  }
  0x5e   : > { %1753 = vmatpush1.bf16.msra.mxu0 %v2963_v41  ;;  %v3024_v41 = vld [vmem:[%s3939_s1 + $0x1f4] ss:$8 sps:$4 sm:$0xff]  }
  0x5f   : > { %866 = vmatmul.mubr.bf16.gmra.mrb[12].mxu1 %v3595_v42  ;;  %1754 = vmatprep.subr.bf16.mxu0 %v2972_v48  ;;  %v3031_v48 = vld [vmem:[%s3939_s1 + $0x404] ss:$8 sps:$4 sm:$0xff]  }
  0x60   : > { %1028 = vmatpush1.bf16.msra.mxu1 %v2967_v43  ;;  %1047 = vmatprep.mubr.bf16.mxu1 %v3064_v2  ;;  %v3022_v43 = vld [vmem:[%s3939_s1 + $0x1f0] ss:$8 sps:$4 sm:$0xff]  }
  0x61   : > { %1029 = vmatprep.subr.bf16.mxu1 %v2975_v51  ;;  %1632 = vmatmul.mubr.bf16.gmra.mrb[12].mxu0 %v2587_v55  ;;  %v3025_v51 = vld [vmem:[%s3939_s1 + $0x3f0] ss:$8 sps:$4 sm:$0xff]   ;;  %v3029_v55 = vld [vmem:[%s3939_s1 + $0x400] ss:$8 sps:$4 sm:$0xff]  }
  0x62   : > { %1755 = vmatpush1.bf16.msra.mxu0 %v2970_v56  ;;  %1774 = vmatprep.mubr.bf16.mxu0 %v3064_v2  ;;  %v3034_v56 = vld [vmem:[%s3939_s1 + $0x414] ss:$8 sps:$4 sm:$0xff]  }
  0x63   : > { %1756 = vmatprep.subr.bf16.mxu0 %v2978_v10  ;;  %v3038_v10 = vld [vmem:[%s3939_s1 + $0x424] ss:$8 sps:$4 sm:$0xff]  }
  0x64   : > { %1030 = vmatpush1.bf16.msra.mxu1 %v2973_v57  ;;  %v3032_v57 = vld [vmem:[%s3939_s1 + $0x410] ss:$8 sps:$4 sm:$0xff]  }
  0x65   : > { %1194 = vmatprep.subr.bf16.mxu1 %v2981_v58  ;;  %v1832_v58 = vshrl.u32 %v3732_v40, 16 }
  0x66   : > { %1757 = vmatpush1.bf16.msra.mxu0 %v2976_v63  ;;  %v1837_v63 = vrot.slane %v1835_v30, 5 }
  0x67   : > { %1048 = vmatmul.mubr.bf16.vlgmr.msra.gmra.mrb[0].mxu1 %v2523_v1  ;;  %1928 = vmatprep.subr.bf16.mxu0 %v2984_v5  ;;  %v3039_v1 = vld [vmem:[%s3939_s1 + $0x430] ss:$8 sps:$4 sm:$0xff]   ;;  %v3045_v5 = vld [vmem:[%s3939_s1 + $0x444] ss:$8 sps:$4 sm:$0xff]  }
  0x68   : > { %1195 = vmatpush1.bf16.msra.mxu1 %v2979_v3  ;;  %1057 = vmatprep.mubr.bf16.mxu1 %v3064_v2  ;;  %v270_v3 = vld [vmem:[%s3181_s21 + $0x4c] sm:$0x1]  ;;  %s249_s21 = scalar_lea.vmem %s3943_s5, %s2667_s29 }
  0x69   : > { %1196 = vmatprep.subr.bf16.mxu1 %v2987_v6  ;;  %1775 = vmatmul.mubr.bf16.vlgmr.msra.gmra.mrb[0].mxu0 %v3505_v22  ;;  %v2996_v22 = vld [vmem:[%s3939_s1 + $0x3a4] ss:$8 sps:$4 sm:$0xff]   ;;  %v1841_v21 = vshll.u32 %v270_v3, 16  ;;  %v3048_v6 = vld [vmem:[%s3939_s1 + $0x454] ss:$8 sps:$4 sm:$0xff]  }
  0x6a   : > { %1929 = vmatpush1.bf16.msra.mxu0 %v2982_v7  ;;  %1784 = vmatprep.mubr.bf16.mxu0 %v3064_v2 }
  0x6b   : > { %1930 = vmatprep.subr.bf16.mxu0 %v2990_v36  ;;  %v1843_v7 = vrot.slane %v1841_v21, 5  ;;  %v3052_v36 = vld [vmem:[%s3939_s1 + $0x464] ss:$8 sps:$4 sm:$0xff]  }
  0x6c   : > { %1197 = vmatpush1.bf16.msra.mxu1 %v2985_v23  ;;  %v3046_v23 = vld [vmem:[%s3939_s1 + $0x450] ss:$8 sps:$4 sm:$0xff]  }
  0x6d   : > { %1198 = vmatprep.subr.bf16.mxu1 %v2993_v9 }
  0x6e   : > { %1931 = vmatpush1.bf16.msra.mxu0 %v2988_v11 }
  0x6f   : > { %1058 = vmatmul.mubr.bf16.gmra.mrb[4].mxu1 %v3665_v13  ;;  %1932 = vmatprep.subr.bf16.mxu0 %v2996_v22 }
  0x70   : > { %1199 = vmatpush1.bf16.msra.mxu1 %v2991_v46  ;;  %1067 = vmatprep.mubr.bf16.mxu1 %v3064_v2 }
  0x71   : > { %1200 = vmatprep.subr.bf16.mxu1 %v2999_v14  ;;  %1785 = vmatmul.mubr.bf16.gmra.mrb[4].mxu0 %v3550_v0  ;;  %v3008_v0 = vld [vmem:[%s3939_s1 + $0x3c4] ss:$8 sps:$4 sm:$0xff]  }
  0x72   : > { %1933 = vmatpush1.bf16.msra.mxu0 %v2994_v37  ;;  %1794 = vmatprep.mubr.bf16.mxu0 %v3064_v2 }
  0x73   : > { %1934 = vmatprep.subr.bf16.mxu0 %v3002_v15 }
  0x74   : > { %1201 = vmatpush1.bf16.msra.mxu1 %v2997_v60 }
  0x75   : > { %1202 = vmatprep.subr.bf16.mxu1 %v3005_v16 }
  0x76   : > { %1935 = vmatpush1.bf16.msra.mxu0 %v3000_v26  ;;  %v2244_v26 = vlaneseq }
  0x77   : > { %1068 = vmatmul.mubr.bf16.gmra.mrb[8].mxu1 %v3697_v31  ;;  %1936 = vmatprep.subr.bf16.mxu0 %v3008_v0 }
  0x78   : > { %1203 = vmatpush1.bf16.msra.mxu1 %v3003_v50  ;;  %1077 = vmatprep.mubr.bf16.mxu1 %v3064_v2 }
  0x79   : > { %1204 = vmatprep.subr.bf16.mxu1 %v3011_v28  ;;  %1795 = vmatmul.mubr.bf16.gmra.mrb[8].mxu0 %v3595_v42  ;;  %v3019_v42 = vld [vmem:[%s3939_s1 + $0x3e0] ss:$8 sps:$4 sm:$0xff]  }
  0x7a   : > { %1937 = vmatpush1.bf16.msra.mxu0 %v3006_v62  ;;  %1804 = vmatprep.mubr.bf16.mxu0 %v3064_v2 }
  0x7b   : > { %1938 = vmatprep.subr.bf16.mxu0 %v3014_v29 }
  0x7c   : > { %1205 = vmatpush1.bf16.msra.mxu1 %v3009_v18 }
  0x7d   : > { %1206 = vmatprep.subr.bf16.mxu1 %v3017_v32  ;;  %v2245_v32 = vshrl.u32 %v2244_v26, 7 }
  0x7e   : > { %1939 = vmatpush1.bf16.msra.mxu0 %v3012_v33 }
  0x7f   : > { %1078 = vmatmul.mubr.bf16.gmra.mrb[12].mxu1 %v3729_v35  ;;  %1940 = vmatprep.subr.bf16.mxu0 %v3021_v27 }
  0x80   : > { %1207 = vmatpush1.bf16.msra.mxu1 %v3015_v25  ;;  %1226 = vmatprep.mubr.bf16.mxu1 %v3064_v2 }
  0x81   : > { %1208 = vmatprep.subr.bf16.mxu1 %v3024_v41  ;;  %1805 = vmatmul.mubr.bf16.gmra.mrb[12].mxu0 %v2604_v20  ;;  %v2246_v41 = vsub.s32 0, %v2245_v32 }
  0x82   : > { %1941 = vmatpush1.bf16.msra.mxu0 %v3019_v42  ;;  %1960 = vmatprep.mubr.bf16.mxu0 %v3064_v2 }
  0x83   : > { %1942 = vmatprep.subr.bf16.mxu0 %v3027_v44  ;;  %v2250_v44 = vsub.s32 1, %v2245_v32 }
  0x84   : > { %1209 = vmatpush1.bf16.msra.mxu1 %v3022_v43  ;;  %v2242_v43 = vld [vmem:[%s3940_s2] sm:$0x3] }
  0x85   : > { %2677 = vmatprep.subr.bf16.mxu1 %v3031_v48  ;;  %v3861_v30 = vrot.slane %v2242_v43, %v2250_v44 }
  0x86   : > { %1943 = vmatpush1.bf16.msra.mxu0 %v3025_v51 }
  0x87   : > { %1227 = vmatmul.mubr.bf16.vlgmr.msra.gmra.mrb[0].mxu1 %v2543_v59  ;;  %2105 = vmatprep.subr.bf16.mxu0 %v3031_v48  ;;  %v3041_v59 = vld [vmem:[%s3939_s1 + $0x434] ss:$8 sps:$4 sm:$0xff]  }
  0x88   : > { %2685 = vmatpush1.bf16.msra.mxu1 %v3029_v55  ;;  %1236 = vmatprep.mubr.bf16.mxu1 %v3064_v2 }
  0x89   : > { %2678 = vmatprep.subr.bf16.mxu1 %v3034_v56  ;;  %1961 = vmatmul.mubr.bf16.vlgmr.msra.gmra.mrb[0].mxu0 %v3332_v54  ;;  %v1834_v54 = vrot.slane %v1832_v58, 4 }
  0x8a   : > { %2106 = vmatpush1.bf16.msra.mxu0 %v3029_v55  ;;  %1970 = vmatprep.mubr.bf16.mxu0 %v3064_v2 }
  0x8b   : > { %2107 = vmatprep.subr.bf16.mxu0 %v3034_v56  ;;  %v1838_v8 = vor.u32 %v1837_v63, %v1834_v54 }
  0x8c   : > { %2686 = vmatpush1.bf16.msra.mxu1 %v3032_v57 }
  0x8d   : > { %2679 = vmatprep.subr.bf16.mxu1 %v3038_v10 }
  0x8e   : > { %2108 = vmatpush1.bf16.msra.mxu0 %v3032_v57 }
  0x8f   : > { %1237 = vmatmul.mubr.bf16.gmra.mrb[4].mxu1 %v2544_v39  ;;  %2109 = vmatprep.subr.bf16.mxu0 %v3038_v10  ;;  %v3043_v39 = vld [vmem:[%s3939_s1 + $0x440] ss:$8 sps:$4 sm:$0xff]   ;;  %v3859_v10 = vrot.slane %v2242_v43, %v2246_v41 }
  0x90   : > { %2687 = vmatpush1.bf16.msra.mxu1 %v3036_v49  ;;  %1246 = vmatprep.mubr.bf16.mxu1 %v3064_v2 }
  0x91   : > { %2680 = vmatprep.subr.bf16.mxu1 %v3041_v59  ;;  %1971 = vmatmul.mubr.bf16.gmra.mrb[4].mxu0 %v3385_v34  ;;  %v1839_v34 = vrot.slane %v1838_v8, 4 }
  0x92   : > { %2110 = vmatpush1.bf16.msra.mxu0 %v3036_v49  ;;  %1980 = vmatprep.mubr.bf16.mxu0 %v3064_v2 }
  0x93   : > { %2111 = vmatprep.subr.bf16.mxu0 %v3041_v59  ;;  %v1844_v45 = vsel %vm3239_vm2, %v1839_v34, %v1843_v7 }
  0x94   : > { %2688 = vmatpush1.bf16.msra.mxu1 %v3039_v1  ;;  %v2621_v9 = vcombine.low %v3440_v19, %v1844_v45  ;;  %v2020_v19 = vrot.slane %v270_v3, 5 }
  0x95   : > { %2681 = vmatprep.subr.bf16.mxu1 %v3045_v5 }
  0x96   : > { %2112 = vmatpush1.bf16.msra.mxu0 %v3039_v1 }
  0x97   : > { %1247 = vmatmul.mubr.bf16.gmra.mrb[8].mxu1 %v2545_v4  ;;  %2113 = vmatprep.subr.bf16.mxu0 %v3045_v5  ;;  %v3055_v4 = vld [vmem:[%s3939_s1 + $0x474] ss:$8 sps:$4 sm:$0xff]  }
  0x98   : > { %2689 = vmatpush1.bf16.msra.mxu1 %v3043_v39  ;;  %1256 = vmatprep.mubr.bf16.mxu1 %v3064_v2 }
  0x99   : > { %2682 = vmatprep.subr.bf16.mxu1 %v3048_v6  ;;  %1981 = vmatmul.mubr.bf16.gmra.mrb[8].mxu0 %v3429_v12  ;;  %v2638_v12 = vrot.slane %v3732_v40, 9 }
  0x9a   : > { %2114 = vmatpush1.bf16.msra.mxu0 %v3043_v39  ;;  %1990 = vmatprep.mubr.bf16.mxu0 %v3064_v2 }
  0x9b   : > { %2115 = vmatprep.subr.bf16.mxu0 %v3048_v6  ;;  %v2021_v24 = vsel %vm3280_vm5, %v2638_v12, %v2020_v19 }
  0x9c   : > { %2690 = vmatpush1.bf16.msra.mxu1 %v3046_v23  ;;  %v2639_v38 = vcombine.low %v3606_v47, %v2021_v24 }
  0x9d   : > { %2683 = vmatprep.subr.bf16.mxu1 %v3052_v36 }
  0x9e   : > { %2116 = vmatpush1.bf16.msra.mxu0 %v3046_v23 }
  0x9f   : > { %1257 = vmatmul.mubr.bf16.gmra.mrb[12].mxu1 %v2546_v53  ;;  %2117 = vmatprep.subr.bf16.mxu0 %v3052_v36 }
  0xa0   : > { %2691 = vmatpush1.bf16.msra.mxu1 %v3050_v61  ;;  %2157 = vmatprep.mubr.bf16.mxu1 %v3064_v2 }
  0xa1   : > { %2684 = vmatprep.subr.bf16.mxu1 %v3055_v4  ;;  %1991 = vmatmul.mubr.bf16.gmra.mrb[12].mxu0 %v2621_v9 }
  0xa2   : > { %2118 = vmatpush1.bf16.msra.mxu0 %v3050_v61  ;;  %2137 = vmatprep.mubr.bf16.mxu0 %v3064_v2 }
  0xa3   : > { %2119 = vmatprep.subr.bf16.mxu0 %v3055_v4 }
  0xa4   : > { %2692 = vmatpush1.bf16.msra.mxu1 %v3053_v52 }
  0xa6   : > { %2120 = vmatpush1.bf16.msra.mxu0 %v3053_v52 }
  0xa7   : > { %2158 = vmatmul.mubr.bf16.vlgmr.msra.gmra.mrb[16].mxu1 %v3729_v35 }
  0xa8   : > { %2167 = vmatprep.mubr.bf16.mxu1 %v3064_v2 }
  0xa9   : > { %2138 = vmatmul.mubr.bf16.vlgmr.msra.gmra.mrb[0].mxu0 %v3665_v13 }
  0xaa   : > { %2147 = vmatprep.mubr.bf16.mxu0 %v3064_v2 }
  0xaf   : > { %2168 = vmatmul.mubr.bf16.gmra.mrb[20].mxu1 %v2639_v38 }
  0xb1   : > { %2148 = vmatmul.mubr.bf16.gmra.mrb[4].mxu0 %v3697_v31 }
 0x15a   : > { %v1228_v53 = vpop.f32.mrb[0].mxu1 }
 0x15b   : > { %v1230_v11 = vpop.f32.mrb[1].mxu1 }
 0x15c   : > { %v1232_v46 = vpop.f32.mrb[2].mxu1 }
 0x15d   : > { %v1234_v22 = vpop.f32.mrb[3].mxu1 }
 0x162   : > { %v3846_v14 = vpop.f32.mrb[4].mxu1 }
 0x163   : > { %v3848_v37 = vpop.f32.mrb[5].mxu1 }
 0x164   : > { %v3850_v60 = vpop.f32.mrb[6].mxu1 }
 0x165   : > { %v3852_v17 = vpop.f32.mrb[7].mxu1 }
 0x16a   : > { %v1248_v13 = vpop.f32.mrb[8].mxu1 }
 0x16b   : > { %v1250_v15 = vpop.f32.mrb[9].mxu1 }
 0x16c   : > { %v1252_v2 = vpop.f32.mrb[10].mxu1  ;;  %v1982_v16 = vpop.f32.mrb[8].mxu0 }
 0x16d   : > { %v1254_v47 = vpop.f32.mrb[11].mxu1  ;;  %v2701_v50 = vadd.f32 %v1982_v16, %v1248_v13  ;;  %v1984_v31 = vpop.f32.mrb[9].mxu0 }
 0x16e   : > { %v2703_v0 = vadd.f32 %v1984_v31, %v1250_v15  ;;  %v1986_v28 = vpop.f32.mrb[10].mxu0 }
 0x16f   : > { %v2705_v62 = vadd.f32 %v1986_v28, %v1252_v2  ;;  %v1988_v18 = vpop.f32.mrb[11].mxu0 }
 0x170   : > { %v2707_v29 = vadd.f32 %v1988_v18, %v1254_v47 }
 0x172   : > { %v1258_v33 = vpop.f32.mrb[12].mxu1 }
 0x173   : > { %v1260_v35 = vpop.f32.mrb[13].mxu1 }
 0x174   : > { %v1262_v40 = vpop.f32.mrb[14].mxu1  ;;  %v1992_v25 = vpop.f32.mrb[12].mxu0 }
 0x175   : > { %v1264_v27 = vpop.f32.mrb[15].mxu1  ;;  %v2709_v20 = vadd.f32 %v1992_v25, %v1258_v33  ;;  %v1994_v42 = vpop.f32.mrb[13].mxu0 }
 0x176   : > { %v2711_v48 = vadd.f32 %v1994_v42, %v1260_v35  ;;  %v1996_v51 = vpop.f32.mrb[14].mxu0 }
 0x177   : > { %v2713_v55 = vadd.f32 %v1996_v51, %v1262_v40  ;;  %v1998_v56 = vpop.f32.mrb[15].mxu0 }
 0x178   : > { %v3857_v57 = vadd.f32 %v1998_v56, %v1264_v27 }
 0x17a   : > { %v2159_v58 = vpop.f32.mrb[16].mxu1 }
 0x17b   : > { %v3863_v49 = vadd.f32 %v2701_v50, %v2159_v58  ;;  %v2161_v59 = vpop.f32.mrb[17].mxu1 }
 0x17c   : > { %v3866_v54 = vadd.f32 %v2703_v0, %v2161_v59  ;;  %v2163_v63 = vpop.f32.mrb[18].mxu1  ;;  %v2139_v1 = vpop.f32.mrb[0].mxu0 }
 0x17d   : > { %v2262_v3 = vadd.f32 %v3863_v49, %v3859_v10  ;;  %v3870_v5 = vadd.f32 %v2705_v62, %v2163_v63  ;;  %v2165_v8 = vpop.f32.mrb[19].mxu1  ;;  %v2693_v21 = vadd.f32 %v2139_v1, %v1228_v53  ;;  %v2141_v39 = vpop.f32.mrb[1].mxu0 }
 0x17e   : > { %v2263_v6 = vadd.f32 %v3866_v54, %v3861_v30  ;;  %v3874_v34 = vadd.f32 %v2707_v29, %v2165_v8  ;;  %v2694_v7 = vadd.f32 %v2141_v39, %v1230_v11  ;;  %v2143_v23 = vpop.f32.mrb[2].mxu0  ;;  %v2218_v39 = vmul.f32 %v3863_v49, %v3863_v49 }
 0x17f   : > { %v2254_v36 = vadd.f32 %v2693_v21, %v3859_v10  ;;  %v2695_v61 = vadd.f32 %v2143_v23, %v1232_v46  ;;  %v2264_v4 = vadd.f32 %v3870_v5, %v3859_v10  ;;  %v2145_v9 = vpop.f32.mrb[3].mxu0  ;;  %v2210_v52 = vmul.f32 %v2693_v21, %v2693_v21 }
 0x180   : > { %v2673_v45 = vpack.c.bf16 %v2263_v6, %v2262_v3  ;;  %v2211_v12 = vmul.f32 %v2694_v7, %v2694_v7  ;;  %v2255_v19 = vadd.f32 %v2694_v7, %v3861_v30  ;;  %v2696_v24 = vadd.f32 %v2145_v9, %v1234_v22 }
 0x181   : > { %v2194_v38 = vadd.f32 %v2695_v61, %v2693_v21  ;;  %v2212_v53 = vmul.f32 %v2695_v61, %v2695_v61  ;;  %v2256_v11 = vadd.f32 %v2695_v61, %v3859_v10  ;;  %v2265_v13 = vadd.f32 %v3874_v34, %v3861_v30 }
 0x182   : > { %2338 = vst [vmem:[%s3879_s28 + $0x20] sm:$0xff] %v2673_v45  ;;  %v2169_v15 = vpop.f32.mrb[20].mxu1  ;;  %v2669_v46 = vpack.c.bf16 %v2255_v19, %v2254_v36  ;;  %v2201_v2 = vadd.f32 %v2696_v24, %v2694_v7  ;;  %v2213_v16 = vmul.f32 %v2696_v24, %v2696_v24  ;;  %v2257_v47 = vadd.f32 %v2696_v24, %v3861_v30 }
 0x183   : > { %v2171_v26 = vpop.f32.mrb[21].mxu1  ;;  %v2226_v50 = vadd.f32 %v2212_v53, %v2210_v52  ;;  %v2674_v22 = vpack.c.bf16 %v2265_v13, %v2264_v4  ;;  %v2710_v31 = vadd.f32 %v2709_v20, %v2169_v15  ;;  %v2220_v4 = vmul.f32 %v3870_v5, %v3870_v5 }
 0x184   : > { %v3890_v0 = vadd.f32 %v2711_v48, %v2171_v26  ;;  %v2173_v28 = vpop.f32.mrb[22].mxu1  ;;  %2334 = vst [vmem:[%s3879_s28] sm:$0xff] %v2669_v46  ;;  %v2233_v62 = vadd.f32 %v2213_v16, %v2211_v12  ;;  %v2670_v18 = vpack.c.bf16 %v2257_v47, %v2256_v11  ;;  %v2149_v29 = vpop.f32.mrb[4].mxu0  ;;  %v2221_v11 = vmul.f32 %v3874_v34, %v3874_v34 }
 0x185   : > { %v2714_v32 = vadd.f32 %v2713_v55, %v2173_v28  ;;  %v2175_v33 = vpop.f32.mrb[23].mxu1  ;;  %2339 = vst [vmem:[%s3879_s28 + $0x28] sm:$0xff] %v2674_v22  ;;  %v2697_v35 = vadd.f32 %v2149_v29, %v3846_v14  ;;  %v2266_v40 = vadd.f32 %v2710_v31, %v3859_v10  ;;  %v2151_v25 = vpop.f32.mrb[5].mxu0  ;;  %v2222_v19 = vmul.f32 %v2710_v31, %v2710_v31 }
 0x186   : > { %2335 = vst [vmem:[%s3879_s28 + $0x8] sm:$0xff] %v2670_v18  ;;  %v2698_v27 = vadd.f32 %v2151_v25, %v3848_v37  ;;  %v2267_v41 = vadd.f32 %v3890_v0, %v3861_v30  ;;  %v2153_v20 = vpop.f32.mrb[6].mxu0  ;;  %v2223_v46 = vmul.f32 %v3890_v0, %v3890_v0 }
 0x187   : > { %v2195_v42 = vadd.f32 %v2697_v35, %v2194_v38  ;;  %v2214_v43 = vmul.f32 %v2697_v35, %v2697_v35  ;;  %v2258_v44 = vadd.f32 %v2697_v35, %v3859_v10  ;;  %v2699_v48 = vadd.f32 %v2153_v20, %v3850_v60  ;;  %v2155_v51 = vpop.f32.mrb[7].mxu0 }
 0x188   : > { %v2202_v55 = vadd.f32 %v2698_v27, %v2201_v2  ;;  %v2215_v14 = vmul.f32 %v2698_v27, %v2698_v27  ;;  %v2259_v56 = vadd.f32 %v2698_v27, %v3861_v30  ;;  %v2675_v58 = vpack.c.bf16 %v2267_v41, %v2266_v40 }
 0x189   : > { %v2227_v59 = vadd.f32 %v2226_v50, %v2214_v43  ;;  %v2196_v37 = vadd.f32 %v2699_v48, %v2195_v42  ;;  %v2216_v63 = vmul.f32 %v2699_v48, %v2699_v48  ;;  %v2260_v1 = vadd.f32 %v2699_v48, %v3859_v10 }
 0x18a   : > { %v2234_v3 = vadd.f32 %v2233_v62, %v2215_v14  ;;  %v2671_v8 = vpack.c.bf16 %v2259_v56, %v2258_v44  ;;  %2340 = vst [vmem:[%s3879_s28 + $0x30] sm:$0xff] %v2675_v58  ;;  %v2700_v21 = vadd.f32 %v2155_v51, %v3852_v17  ;;  %v2716_v60 = vadd.f32 %v3857_v57, %v2175_v33 }
 0x18b   : > { %v2197_v6 = vadd.f32 %v3863_v49, %v2196_v37  ;;  %v2228_v7 = vadd.f32 %v2227_v59, %v2216_v63  ;;  %v2268_v23 = vadd.f32 %v2714_v32, %v3859_v10  ;;  %v2219_v49 = vmul.f32 %v3866_v54, %v3866_v54 }
 0x18c   : > { %2336 = vst [vmem:[%s3879_s28 + $0x10] sm:$0xff] %v2671_v8  ;;  %v2203_v36 = vadd.f32 %v2700_v21, %v2202_v55  ;;  %v2217_v45 = vmul.f32 %v2700_v21, %v2700_v21  ;;  %v2261_v61 = vadd.f32 %v2700_v21, %v3861_v30  ;;  %v2269_v9 = vadd.f32 %v2716_v60, %v3861_v30 }
 0x18d   : > { %v2229_v17 = vadd.f32 %v2228_v7, %v2218_v39  ;;  %v2198_v57 = vadd.f32 %v3870_v5, %v2197_v6  ;;  %v2224_v15 = vmul.f32 %v2714_v32, %v2714_v32  ;;  %v2225_v50 = vmul.f32 %v2716_v60, %v2716_v60 }
 0x18e   : > { %v2204_v10 = vadd.f32 %v3866_v54, %v2203_v36  ;;  %v2235_v52 = vadd.f32 %v2234_v3, %v2217_v45  ;;  %v2672_v12 = vpack.c.bf16 %v2261_v61, %v2260_v1  ;;  %v2676_v53 = vpack.c.bf16 %v2269_v9, %v2268_v23 }
 0x18f   : > { %v2199_v24 = vadd.f32 %v2710_v31, %v2198_v57  ;;  %v2230_v38 = vadd.f32 %v2229_v17, %v2220_v4 }
 0x190   : > { %v2236_v30 = vadd.f32 %v2235_v52, %v2219_v49  ;;  %2337 = vst [vmem:[%s3879_s28 + $0x18] sm:$0xff] %v2672_v12  ;;  %v2205_v5 = vadd.f32 %v3874_v34, %v2204_v10  ;;  %2341 = vst [vmem:[%s3879_s28 + $0x38] sm:$0xff] %v2676_v53 }
 0x191   : > { %v2200_v13 = vadd.f32 %v2714_v32, %v2199_v24  ;;  %v2231_v54 = vadd.f32 %v2230_v38, %v2222_v19 }
 0x192   : > { %v2206_v2 = vadd.f32 %v3890_v0, %v2205_v5  ;;  %v2237_v16 = vadd.f32 %v2236_v30, %v2221_v11 }
 0x193   : > { %2208 = vst [vmem:[%s244_s6] sm:$0xff] %v2200_v13  ;;  %v2232_v47 = vadd.f32 %v2231_v54, %v2224_v15 }
 0x194   : > { %v2207_v26 = vadd.f32 %v2716_v60, %v2206_v2  ;;  %v2238_v22 = vadd.f32 %v2237_v16, %v2223_v46 }
 0x195   : > { %2240 = vst [vmem:[%s249_s21] sm:$0xff] %v2232_v47 }
 0x196   : > { %2209 = vst [vmem:[%s244_s6 + $0x8] sm:$0xff] %v2207_v26  ;;  %v2239_v34 = vadd.f32 %v2238_v22, %v2225_v50 }
 0x198   : > { %2241 = vst [vmem:[%s249_s21 + $0x8] sm:$0xff] %v2239_v34 }
 0x199 PF: > { %s16_s18 = sadd.s32 1, %s3062_s18  }
 0x19a   : > { %p13_p4 = scmp.ge.s32.totalorder %s16_s18, 4  }
 0x19c   :  { %15 = sbr.rel (!%p13_p4) target bundleno = 1 (0x1), region = 86 }

// kernel: reverse
= control target key start
LH: loop header
LB: loop body
LE: loop exit
PB: predicated region body
PF: predicated region fallthrough
CT: control target
= control target key end

     0   :  { %v395_v10 = vmov 0.0   ;;  %s658_s0 = inlined_call_operand.vmem [shape: bf16[3,3,512,1], index: 0, kind: input, shape index: {}]   ;;  %s659_s1 = inlined_call_operand.vmem [shape: bf16[3,3,512,1], index: 1, kind: output, shape index: {}]  }
   0x1   :  { %v324_v0 = vld [vmem:[%s658_s0 + $0x20] ss:$0 sm:$0x3]  ;;  %v325_v1 = vld [vmem:[%s658_s0 + $0x14] ss:$0 sm:$0x3] }
   0x2   :  { %v4_v2 = vunpack.i.l.bf16 %v324_v0  ;;  %v12_v3 = vunpack.i.l.bf16 %v325_v1  ;;  %v327_v4 = vld [vmem:[%s658_s0 + $0x8] ss:$0 sm:$0x3]  ;;  %v329_v5 = vld [vmem:[%s658_s0 + $0x1c] ss:$0 sm:$0x3] }
   0x3   :  { %v21_v6 = vunpack.i.l.bf16 %v327_v4  ;;  %v30_v7 = vunpack.i.l.bf16 %v329_v5  ;;  %v331_v8 = vld [vmem:[%s658_s0 + $0x10] ss:$0 sm:$0x3]  ;;  %v333_v9 = vld [vmem:[%s658_s0 + $0x4] ss:$0 sm:$0x3] }
   0x4   :  { %v8_v11 = vpack.c.bf16 %v395_v10, %v4_v2  ;;  %v17_v12 = vpack.c.bf16 %v395_v10, %v12_v3  ;;  %v39_v13 = vunpack.i.l.bf16 %v331_v8  ;;  %v48_v14 = vunpack.i.l.bf16 %v333_v9  ;;  %v335_v15 = vld [vmem:[%s658_s0 + $0x18] ss:$0 sm:$0x3]  ;;  %v337_v16 = vld [vmem:[%s658_s0 + $0xc] ss:$0 sm:$0x3] }
   0x5   :  { %v26_v17 = vpack.c.bf16 %v395_v10, %v21_v6  ;;  %v35_v18 = vpack.c.bf16 %v395_v10, %v30_v7  ;;  %v57_v19 = vunpack.i.l.bf16 %v335_v15  ;;  %v66_v20 = vunpack.i.l.bf16 %v337_v16  ;;  %v73_v21 = vld [vmem:[%s658_s0] ss:$0 sm:$0x3]  ;;  %v340_v22 = vld [vmem:[%s658_s0 + $0x21] ss:$0 sm:$0x3] }
   0x6   :  { %9 = vst [vmem:[%s659_s1] sm:$0x1] %v8_v11  ;;  %326 = vst [vmem:[%s659_s1 + $0xc] sm:$0x1] %v17_v12  ;;  %v44_v23 = vpack.c.bf16 %v395_v10, %v39_v13  ;;  %v53_v24 = vpack.c.bf16 %v395_v10, %v48_v14  ;;  %v74_v25 = vunpack.i.l.bf16 %v73_v21  ;;  %v83_v26 = vunpack.i.l.bf16 %v340_v22  ;;  %v342_v27 = vld [vmem:[%s658_s0 + $0x15] ss:$0 sm:$0x3] }
   0x7   :  { %v344_v28 = vld [vmem:[%s658_s0 + $0x9] ss:$0 sm:$0x3]  ;;  %328 = vst [vmem:[%s659_s1 + $0x18] sm:$0x1] %v26_v17  ;;  %v62_v29 = vpack.c.bf16 %v395_v10, %v57_v19  ;;  %v71_v30 = vpack.c.bf16 %v395_v10, %v66_v20  ;;  %v92_v31 = vunpack.i.l.bf16 %v342_v27 }
   0x8   :  { %330 = vst [vmem:[%s659_s1 + $0x4] sm:$0x1] %v35_v18  ;;  %v101_v32 = vunpack.i.l.bf16 %v344_v28  ;;  %v346_v33 = vld [vmem:[%s658_s0 + $0x1d] ss:$0 sm:$0x3]  ;;  %v79_v35 = vpack.c.bf16 %v395_v10, %v74_v25  ;;  %v88_v36 = vpack.c.bf16 %v395_v10, %v83_v26 }
   0x9   :  { %v348_v34 = vld [vmem:[%s658_s0 + $0x11] ss:$0 sm:$0x3]  ;;  %332 = vst [vmem:[%s659_s1 + $0x10] sm:$0x1] %v44_v23  ;;  %v110_v37 = vunpack.i.l.bf16 %v346_v33  ;;  %v97_v41 = vpack.c.bf16 %v395_v10, %v92_v31 }
   0xa   :  { %334 = vst [vmem:[%s659_s1 + $0x1c] sm:$0x1] %v53_v24  ;;  %v119_v38 = vunpack.i.l.bf16 %v348_v34  ;;  %v350_v39 = vld [vmem:[%s658_s0 + $0x5] ss:$0 sm:$0x3]  ;;  %v106_v42 = vpack.c.bf16 %v395_v10, %v101_v32 }
   0xb   :  { %v352_v40 = vld [vmem:[%s658_s0 + $0x19] ss:$0 sm:$0x3]  ;;  %336 = vst [vmem:[%s659_s1 + $0x8] sm:$0x1] %v62_v29  ;;  %v128_v43 = vunpack.i.l.bf16 %v350_v39  ;;  %v115_v47 = vpack.c.bf16 %v395_v10, %v110_v37 }
   0xc   :  { %338 = vst [vmem:[%s659_s1 + $0x14] sm:$0x1] %v71_v30  ;;  %v137_v44 = vunpack.i.l.bf16 %v352_v40  ;;  %v354_v45 = vld [vmem:[%s658_s0 + $0xd] ss:$0 sm:$0x3]  ;;  %v124_v48 = vpack.c.bf16 %v395_v10, %v119_v38 }
   0xd   :  { %v356_v46 = vld [vmem:[%s658_s0 + $0x1] ss:$0 sm:$0x3]  ;;  %339 = vst [vmem:[%s659_s1 + $0x20] sm:$0x1] %v79_v35  ;;  %v146_v49 = vunpack.i.l.bf16 %v354_v45  ;;  %v133_v53 = vpack.c.bf16 %v395_v10, %v128_v43 }
   0xe   :  { %341 = vst [vmem:[%s659_s1 + $0x1] sm:$0x1] %v88_v36  ;;  %v155_v50 = vunpack.i.l.bf16 %v356_v46  ;;  %v358_v51 = vld [vmem:[%s658_s0 + $0x22] ss:$0 sm:$0x3]  ;;  %v142_v54 = vpack.c.bf16 %v395_v10, %v137_v44 }
   0xf   :  { %v360_v52 = vld [vmem:[%s658_s0 + $0x16] ss:$0 sm:$0x3]  ;;  %343 = vst [vmem:[%s659_s1 + $0xd] sm:$0x1] %v97_v41  ;;  %v164_v55 = vunpack.i.l.bf16 %v358_v51  ;;  %v151_v59 = vpack.c.bf16 %v395_v10, %v146_v49 }
  0x10   :  { %345 = vst [vmem:[%s659_s1 + $0x19] sm:$0x1] %v106_v42  ;;  %v173_v56 = vunpack.i.l.bf16 %v360_v52  ;;  %v362_v57 = vld [vmem:[%s658_s0 + $0xa] ss:$0 sm:$0x3]  ;;  %v160_v60 = vpack.c.bf16 %v395_v10, %v155_v50 }
  0x11   :  { %v364_v58 = vld [vmem:[%s658_s0 + $0x1e] ss:$0 sm:$0x3]  ;;  %347 = vst [vmem:[%s659_s1 + $0x5] sm:$0x1] %v115_v47  ;;  %v182_v61 = vunpack.i.l.bf16 %v362_v57  ;;  %v169_v1 = vpack.c.bf16 %v395_v10, %v164_v55 }
  0x12   :  { %349 = vst [vmem:[%s659_s1 + $0x11] sm:$0x1] %v124_v48  ;;  %v191_v62 = vunpack.i.l.bf16 %v364_v58  ;;  %v366_v63 = vld [vmem:[%s658_s0 + $0x12] ss:$0 sm:$0x3]  ;;  %v178_v2 = vpack.c.bf16 %v395_v10, %v173_v56 }
  0x13   :  { %v368_v0 = vld [vmem:[%s658_s0 + $0x6] ss:$0 sm:$0x3]  ;;  %351 = vst [vmem:[%s659_s1 + $0x1d] sm:$0x1] %v133_v53  ;;  %v200_v3 = vunpack.i.l.bf16 %v366_v63  ;;  %v187_v7 = vpack.c.bf16 %v395_v10, %v182_v61 }
  0x14   :  { %353 = vst [vmem:[%s659_s1 + $0x9] sm:$0x1] %v142_v54  ;;  %v209_v4 = vunpack.i.l.bf16 %v368_v0  ;;  %v370_v5 = vld [vmem:[%s658_s0 + $0x1a] ss:$0 sm:$0x3]  ;;  %v196_v8 = vpack.c.bf16 %v395_v10, %v191_v62 }
  0x15   :  { %v372_v6 = vld [vmem:[%s658_s0 + $0xe] ss:$0 sm:$0x3]  ;;  %355 = vst [vmem:[%s659_s1 + $0x15] sm:$0x1] %v151_v59  ;;  %v218_v9 = vunpack.i.l.bf16 %v370_v5  ;;  %v205_v14 = vpack.c.bf16 %v395_v10, %v200_v3 }
  0x16   :  { %357 = vst [vmem:[%s659_s1 + $0x21] sm:$0x1] %v160_v60  ;;  %v227_v11 = vunpack.i.l.bf16 %v372_v6  ;;  %v374_v12 = vld [vmem:[%s658_s0 + $0x2] ss:$0 sm:$0x3]  ;;  %v214_v15 = vpack.c.bf16 %v395_v10, %v209_v4 }
  0x17   :  { %v376_v13 = vld [vmem:[%s658_s0 + $0x23] ss:$0 sm:$0x3]  ;;  %359 = vst [vmem:[%s659_s1 + $0x2] sm:$0x1] %v169_v1  ;;  %v236_v16 = vunpack.i.l.bf16 %v374_v12  ;;  %v223_v20 = vpack.c.bf16 %v395_v10, %v218_v9 }
  0x18   :  { %361 = vst [vmem:[%s659_s1 + $0xe] sm:$0x1] %v178_v2  ;;  %v245_v17 = vunpack.i.l.bf16 %v376_v13  ;;  %v378_v18 = vld [vmem:[%s658_s0 + $0x17] ss:$0 sm:$0x3]  ;;  %v232_v21 = vpack.c.bf16 %v395_v10, %v227_v11 }
  0x19   :  { %v380_v19 = vld [vmem:[%s658_s0 + $0xb] ss:$0 sm:$0x3]  ;;  %363 = vst [vmem:[%s659_s1 + $0x1a] sm:$0x1] %v187_v7  ;;  %v254_v22 = vunpack.i.l.bf16 %v378_v18  ;;  %v241_v26 = vpack.c.bf16 %v395_v10, %v236_v16 }
  0x1a   :  { %365 = vst [vmem:[%s659_s1 + $0x6] sm:$0x1] %v196_v8  ;;  %v263_v23 = vunpack.i.l.bf16 %v380_v19  ;;  %v382_v24 = vld [vmem:[%s658_s0 + $0x1f] ss:$0 sm:$0x3]  ;;  %v250_v27 = vpack.c.bf16 %v395_v10, %v245_v17 }
  0x1b   :  { %v384_v25 = vld [vmem:[%s658_s0 + $0x13] ss:$0 sm:$0x3]  ;;  %367 = vst [vmem:[%s659_s1 + $0x12] sm:$0x1] %v205_v14  ;;  %v272_v28 = vunpack.i.l.bf16 %v382_v24  ;;  %v259_v32 = vpack.c.bf16 %v395_v10, %v254_v22 }
  0x1c   :  { %369 = vst [vmem:[%s659_s1 + $0x1e] sm:$0x1] %v214_v15  ;;  %v281_v29 = vunpack.i.l.bf16 %v384_v25  ;;  %v386_v30 = vld [vmem:[%s658_s0 + $0x7] ss:$0 sm:$0x3]  ;;  %v268_v33 = vpack.c.bf16 %v395_v10, %v263_v23 }
  0x1d   :  { %v388_v31 = vld [vmem:[%s658_s0 + $0x1b] ss:$0 sm:$0x3]  ;;  %371 = vst [vmem:[%s659_s1 + $0xa] sm:$0x1] %v223_v20  ;;  %v290_v34 = vunpack.i.l.bf16 %v386_v30  ;;  %v277_v38 = vpack.c.bf16 %v395_v10, %v272_v28 }
  0x1e   :  { %373 = vst [vmem:[%s659_s1 + $0x16] sm:$0x1] %v232_v21  ;;  %v299_v35 = vunpack.i.l.bf16 %v388_v31  ;;  %v390_v36 = vld [vmem:[%s658_s0 + $0xf] ss:$0 sm:$0x3]  ;;  %v286_v39 = vpack.c.bf16 %v395_v10, %v281_v29 }
  0x1f   :  { %v392_v37 = vld [vmem:[%s658_s0 + $0x3] ss:$0 sm:$0x3]  ;;  %375 = vst [vmem:[%s659_s1 + $0x22] sm:$0x1] %v241_v26  ;;  %v308_v40 = vunpack.i.l.bf16 %v390_v36  ;;  %v295_v42 = vpack.c.bf16 %v395_v10, %v290_v34 }
  0x20   :  { %377 = vst [vmem:[%s659_s1 + $0x3] sm:$0x1] %v250_v27  ;;  %v317_v41 = vunpack.i.l.bf16 %v392_v37  ;;  %379 = vst [vmem:[%s659_s1 + $0xf] sm:$0x1] %v259_v32  ;;  %v304_v43 = vpack.c.bf16 %v395_v10, %v299_v35 }
  0x21   :  { %381 = vst [vmem:[%s659_s1 + $0x1b] sm:$0x1] %v268_v33  ;;  %383 = vst [vmem:[%s659_s1 + $0x7] sm:$0x1] %v277_v38  ;;  %v313_v44 = vpack.c.bf16 %v395_v10, %v308_v40 }
  0x22   :  { %385 = vst [vmem:[%s659_s1 + $0x13] sm:$0x1] %v286_v39  ;;  %v322_v10 = vpack.c.bf16 %v395_v10, %v317_v41  ;;  %387 = vst [vmem:[%s659_s1 + $0x1f] sm:$0x1] %v295_v42 }
  0x23   :  { %389 = vst [vmem:[%s659_s1 + $0xb] sm:$0x1] %v304_v43  ;;  %391 = vst [vmem:[%s659_s1 + $0x17] sm:$0x1] %v313_v44 }
  0x24   :  { %393 = vst [vmem:[%s659_s1 + $0x23] sm:$0x1] %v322_v10 }

</bundles_post_ra>
